<compile_context>
chip_gen: v5e
topology: v5e:2x2
jax: 0.10.0
libtpu: 0.0.40
codegen_flags: <defaults>
</compile_context>

<pallas_src>
import functools

import jax
import jax.numpy as jnp
from jax.experimental import pallas as pl
from jax.experimental.pallas import tpu as pltpu

EPS = 1e-5


# ------------------------------------------------------------------
# Pallas kernels (channel-first: out[N, M], M = flattened spatial on lanes)
# ------------------------------------------------------------------

def _mm_affine_kernel(relu_rows, w_ref, x_ref, b_ref, s_ref, t_ref, o_ref):
    """o = maybe_relu(w @ x + b) * s + t ; ReLU applied to the first relu_rows rows."""
    acc = jnp.dot(w_ref[...], x_ref[...], preferred_element_type=jnp.float32)
    z = acc + b_ref[...]
    n = z.shape[0]
    if relu_rows >= n:
        z = jnp.maximum(z, 0.0)
    elif relu_rows > 0:
        rid = jax.lax.broadcasted_iota(jnp.int32, z.shape, 0)
        z = jnp.where(rid < relu_rows, jnp.maximum(z, 0.0), z)
    o_ref[...] = z * s_ref[...] + t_ref[...]


def _mm_skip_relu_kernel(w_ref, x_ref, b_ref, r_ref, o_ref):
    """ResBlock conv2: o = relu(relu(w @ x + b) + residual), skip-add fused."""
    acc = jnp.dot(w_ref[...], x_ref[...], preferred_element_type=jnp.float32)
    y = jnp.maximum(acc + b_ref[...], 0.0)
    o_ref[...] = jnp.maximum(y + r_ref[...], 0.0)


def _mm_gate_kernel(w_ref, x_ref, b_ref, hg_ref, f_ref, p_ref, g_ref):
    """preds = relu(w @ x + b); gate = relu((preds + feature) * hg * sigmoid(preds))."""
    acc = jnp.dot(w_ref[...], x_ref[...], preferred_element_type=jnp.float32)
    preds = jnp.maximum(acc + b_ref[...], 0.0)
    p_ref[...] = preds
    g_ref[...] = jnp.maximum(
        (preds + f_ref[...]) * hg_ref[...] * jax.nn.sigmoid(preds), 0.0)


def _final_kernel(w_ref, x_ref, b_ref, o_ref):
    """Per-batch-item 1x1 conv; the item's weight is selected by the grid index."""
    acc = jnp.dot(w_ref[0], x_ref[0], preferred_element_type=jnp.float32)
    o_ref[0] = acc + b_ref[0]


def _edge_kernel(h, w, x_ref, o_ref):
    """2x2 stride-1 max-pool minus 2x2 stride-1 min-pool of a left/top padded map."""
    a = x_ref[:, 0:h, 0:w]
    b = x_ref[:, 0:h, 1:w + 1]
    c = x_ref[:, 1:h + 1, 0:w]
    d = x_ref[:, 1:h + 1, 1:w + 1]
    mx = jnp.maximum(jnp.maximum(a, b), jnp.maximum(c, d))
    mn = jnp.minimum(jnp.minimum(a, b), jnp.minimum(c, d))
    o_ref[...] = mx - mn


# ------------------------------------------------------------------
# Pallas wrappers
# ------------------------------------------------------------------

def _pick_tile(m):
    """Largest lane tile (multiple of 128) dividing m, preferring >=2 grid steps."""
    if m % 128 != 0:
        return m
    if m % 256 == 0 and m // 256 >= 2:
        return 256
    if m // 128 >= 2:
        return 128
    return m


def _vec(v, n):
    return jnp.asarray(v, jnp.float32).reshape(n, 1)


def matmul_affine(w, x, bias, relu_rows, scale=None, shift=None):
    """(N,K)@(K,M) + bias, partial-row ReLU, optional post BN-affine. bf16 MXU."""
    n, k = w.shape
    m = x.shape[1]
    tn = _pick_tile(m)
    scale = jnp.ones((n,), jnp.float32) if scale is None else scale
    shift = jnp.zeros((n,), jnp.float32) if shift is None else shift
    return pl.pallas_call(
        functools.partial(_mm_affine_kernel, relu_rows),
        out_shape=jax.ShapeDtypeStruct((n, m), jnp.float32),
        grid=(m // tn,),
        in_specs=[
            pl.BlockSpec((n, k), lambda j: (0, 0)),      # weights stay resident
            pl.BlockSpec((k, tn), lambda j: (0, j)),
            pl.BlockSpec((n, 1), lambda j: (0, 0)),
            pl.BlockSpec((n, 1), lambda j: (0, 0)),
            pl.BlockSpec((n, 1), lambda j: (0, 0)),
        ],
        out_specs=pl.BlockSpec((n, tn), lambda j: (0, j)),
        compiler_params=pltpu.CompilerParams(dimension_semantics=("parallel",)),
    )(w.astype(jnp.bfloat16), x.astype(jnp.bfloat16),
      _vec(bias, n), _vec(scale, n), _vec(shift, n))


def matmul_skip_relu(w, x, bias, residual):
    n, k = w.shape
    m = x.shape[1]
    tn = _pick_tile(m)
    return pl.pallas_call(
        _mm_skip_relu_kernel,
        out_shape=jax.ShapeDtypeStruct((n, m), jnp.float32),
        grid=(m // tn,),
        in_specs=[
            pl.BlockSpec((n, k), lambda j: (0, 0)),
            pl.BlockSpec((k, tn), lambda j: (0, j)),
            pl.BlockSpec((n, 1), lambda j: (0, 0)),
            pl.BlockSpec((n, tn), lambda j: (0, j)),
        ],
        out_specs=pl.BlockSpec((n, tn), lambda j: (0, j)),
        compiler_params=pltpu.CompilerParams(dimension_semantics=("parallel",)),
    )(w.astype(jnp.bfloat16), x.astype(jnp.bfloat16), _vec(bias, n), residual)


def matmul_gate(w, x, bias, hg, feat):
    n, k = w.shape
    m = x.shape[1]
    tn = _pick_tile(m)
    return pl.pallas_call(
        _mm_gate_kernel,
        out_shape=(jax.ShapeDtypeStruct((n, m), jnp.float32),
                   jax.ShapeDtypeStruct((n, m), jnp.float32)),
        grid=(m // tn,),
        in_specs=[
            pl.BlockSpec((n, k), lambda j: (0, 0)),
            pl.BlockSpec((k, tn), lambda j: (0, j)),
            pl.BlockSpec((n, 1), lambda j: (0, 0)),
            pl.BlockSpec((n, tn), lambda j: (0, j)),
            pl.BlockSpec((n, tn), lambda j: (0, j)),
        ],
        out_specs=[pl.BlockSpec((n, tn), lambda j: (0, j)),
                   pl.BlockSpec((n, tn), lambda j: (0, j))],
        compiler_params=pltpu.CompilerParams(dimension_semantics=("parallel",)),
    )(w.astype(jnp.bfloat16), x.astype(jnp.bfloat16), _vec(bias, n), hg, feat)


def final_conv_batched(x_b, w_b, b_b):
    """All per-batch-item 1x1 convs in ONE pallas_call: grid over (B, M tiles)."""
    bsz, cin, m = x_b.shape
    oc = w_b.shape[1]
    tn = _pick_tile(m)
    return pl.pallas_call(
        _final_kernel,
        out_shape=jax.ShapeDtypeStruct((bsz, oc, m), jnp.float32),
        grid=(bsz, m // tn),
        in_specs=[
            pl.BlockSpec((1, oc, cin), lambda b, j: (b, 0, 0)),
            pl.BlockSpec((1, cin, tn), lambda b, j: (b, 0, j)),
            pl.BlockSpec((1, oc, 1), lambda b, j: (b, 0, 0)),
        ],
        out_specs=pl.BlockSpec((1, oc, tn), lambda b, j: (b, 0, j)),
        compiler_params=pltpu.CompilerParams(
            dimension_semantics=("parallel", "parallel")),
    )(w_b.astype(jnp.bfloat16), x_b.astype(jnp.bfloat16), b_b.astype(jnp.float32))


def morph_gradient(xp):
    """xp: (B*C, H+1, W+1) left/top padded -> dilate - erode, single Pallas call."""
    bc, hp, wp = xp.shape
    h, w = hp - 1, wp - 1
    return pl.pallas_call(
        functools.partial(_edge_kernel, h, w),
        out_shape=jax.ShapeDtypeStruct((bc, h, w), jnp.float32),
        grid=(1,),
        in_specs=[pl.BlockSpec((bc, hp, wp), lambda i: (0, 0, 0))],
        out_specs=pl.BlockSpec((bc, h, w), lambda i: (0, 0, 0)),
    )(xp)


# ------------------------------------------------------------------
# Convolution glue (channel-first im2col feeding the Pallas matmuls)
# ------------------------------------------------------------------

def im2col3x3_cf(x):
    """x: (C, P, h, w) -> (9C, P*h*w), zero pad=1, channel-first tap-major order.
    TODO(synk): im2col stays as XLA glue; an in-kernel 9-tap accumulation would
    remove the 9x HBM read amplification at large image sizes."""
    c, p, h, w = x.shape
    xp = jnp.pad(x, ((0, 0), (0, 0), (1, 1), (1, 1)))
    cols = [xp[:, :, dy:dy + h, dx:dx + w] for dy in range(3) for dx in range(3)]
    return jnp.concatenate(cols, axis=0).reshape(9 * c, p * h * w)


def conv3x3_mat(w_oihw):
    """(O,C,3,3) -> (O, 9C) matching im2col3x3_cf's (tap, channel) row order."""
    o, c = w_oihw.shape[0], w_oihw.shape[1]
    return jnp.transpose(w_oihw, (0, 2, 3, 1)).reshape(o, 9 * c)


def fold_conv_bn(conv, bn):
    """Conv -> BN(eval): fold BN scale into weights, shift into bias (exact)."""
    s = bn["gamma"] / jnp.sqrt(bn["var"] + EPS)
    w = conv["w"] * s[:, None, None, None]
    b0 = conv["b"] if conv["b"] is not None else jnp.zeros_like(s)
    return w, (b0 - bn["mean"]) * s + bn["beta"]


# ------------------------------------------------------------------
# Module apply functions
# ------------------------------------------------------------------

def res_apply(x_cf, p):
    """ResBlock2D: conv1(+BN1+ReLU) and the identity conv share one matmul (N=2C);
    conv2(+BN2) fuses the skip-add and final ReLU in its epilogue."""
    c, pp, h, w = x_cf.shape
    cout = p["c1"]["w"].shape[0]
    patches = im2col3x3_cf(x_cf)
    w1, b1 = fold_conv_bn(p["c1"], p["bn1"])
    w_stack = jnp.concatenate([conv3x3_mat(w1), conv3x3_mat(p["id"]["w"])], axis=0)
    b_stack = jnp.concatenate([b1, p["id"]["b"]], axis=0)
    y = matmul_affine(w_stack, patches, b_stack, relu_rows=cout)  # ReLU only on conv1 rows
    h1, residual = y[:cout], y[cout:]
    w2, b2 = fold_conv_bn(p["c2"], p["bn2"])
    out = matmul_skip_relu(conv3x3_mat(w2),
                           im2col3x3_cf(h1.reshape(cout, pp, h, w)), b2, residual)
    return out.reshape(cout, pp, h, w)


def dshot_stage1(x_cf, dshots):
    """Fused conv_r/conv_l (+BN +ReLU) of one or more DShot blocks sharing the same
    input; each block's following BN(2*cout) affine is fused into the epilogue so
    the stored tensor is the true BN output (correct zero-padding downstream)."""
    c, pp, h, w = x_cf.shape
    patches = im2col3x3_cf(x_cf)
    ws, bs, ss, ts = [], [], [], []
    for p in dshots:
        for branch in ("conv_r", "conv_l"):
            wf, bf = fold_conv_bn(p[branch]["conv"], p[branch]["bn"])
            ws.append(conv3x3_mat(wf))
            bs.append(bf)
        bn2 = p["conv"]["bn"]
        s2 = bn2["gamma"] / jnp.sqrt(bn2["var"] + EPS)
        ss.append(s2)
        ts.append(bn2["beta"] - bn2["mean"] * s2)
    w_stack = jnp.concatenate(ws, axis=0)
    y = matmul_affine(w_stack, patches, jnp.concatenate(bs, axis=0),
                      relu_rows=w_stack.shape[0],
                      scale=jnp.concatenate(ss, axis=0),
                      shift=jnp.concatenate(ts, axis=0))
    outs, row = [], 0
    for p in dshots:
        n2 = 2 * p["conv_r"]["conv"]["w"].shape[0]
        outs.append(y[row:row + n2].reshape(n2, pp, h, w))
        row += n2
    return outs


def dshot_stage2(y_bn, p):
    """Final 3x3 conv (+bias +ReLU) of a DShot block; input is already BN'd."""
    n2, pp, h, w = y_bn.shape
    cout = p["conv"]["conv"]["w"].shape[0]
    out = matmul_affine(conv3x3_mat(p["conv"]["conv"]["w"]), im2col3x3_cf(y_bn),
                        p["conv"]["conv"]["b"], relu_rows=cout)
    return out.reshape(cout, pp, h, w)


def dshot_stage2_gate(y_bn, p, hg_flat, feat_flat):
    """dshot_stage2 with the sigmoid gate fused into the epilogue (two outputs)."""
    n2, pp, h, w = y_bn.shape
    preds, gate = matmul_gate(conv3x3_mat(p["conv"]["conv"]["w"]), im2col3x3_cf(y_bn),
                              p["conv"]["conv"]["b"], hg_flat, feat_flat)
    cout = preds.shape[0]
    return preds.reshape(cout, pp, h, w), gate


def dshot_apply(x_cf, p):
    return dshot_stage2(dshot_stage1(x_cf, [p])[0], p)


# ------------------------------------------------------------------
# crop / cat (TODO(synk): crop_tensor / cat_tensor / MinPool sources not
# provided; assumed row-major H-by-nh, W-by-nw split and 2x2 stride-1 min-pool)
# ------------------------------------------------------------------

def crop_cf(x, nh, nw):  # (C, B, H, W) -> (C, B, nh*nw, H/nh, W/nw)
    c, b, hh, ww = x.shape
    h, w = hh // nh, ww // nw
    x = x.reshape(c, b, nh, h, nw, w).transpose(0, 1, 2, 4, 3, 5)
    return x.reshape(c, b, nh * nw, h, w)


def cat_nchw(x, nh, nw):  # (B, oc, nh*nw, h, w) -> (B, oc, nh*h, nw*w)
    b, oc, p, h, w = x.shape
    x = x.reshape(b, oc, nh, nw, h, w).transpose(0, 1, 2, 4, 3, 5)
    return x.reshape(b, oc, nh * h, nw * w)


# ------------------------------------------------------------------
# FL2D forward
# ------------------------------------------------------------------

def fl2d_forward(params, x_nchw, *, embed_shape=(2, 4), nstack=2):
    x = x_nchw.astype(jnp.float32)
    bsz, cin, hh, ww = x.shape

    # downsample: AvgPool2d(2) then 1x1 conv (single Pallas matmul over the batch)
    xp = x.reshape(bsz, cin, hh // 2, 2, ww // 2, 2).mean(axis=(3, 5))
    h2, w2 = hh // 2, ww // 2
    x_flat = jnp.transpose(xp, (1, 0, 2, 3)).reshape(cin, bsz * h2 * w2)
    cmid = params["down_conv"]["w"].shape[0]
    y = matmul_affine(params["down_conv"]["w"][:, :, 0, 0], x_flat,
                      params["down_conv"]["b"], relu_rows=0)
    x_cf = y.reshape(cmid, bsz, h2, w2)

    eh, ew = embed_shape
    x_embed = crop_cf(x_cf, eh, ew)          # (C, B, P, h, w)
    _, _, np_, ph, pw = x_embed.shape
    m = np_ * ph * pw

    batch_xc, final_w, final_b = [], [], []
    for bi in range(bsz):
        # The reference reads x_embed AFTER the merge updates of previous batch
        # items (the merge broadcasts over the batch axis), so this loop stays
        # sequential to preserve that data dependency.
        item = x_embed[:, bi]                # (C, P, h, w) — fixed across stacks
        combined = []
        for i in range(nstack):
            hg = item  # TODO(synk): Generator (hourglass) source not provided; identity stand-in.
            feature = res_apply(hg, params["features"][i]["res"])
            feature = dshot_apply(feature, params["features"][i]["dshot"])
            feat_flat = feature.reshape(cmid, m)
            hg_flat = hg.reshape(cmid, m)
            if i < nstack - 1:
                # outs[i] and merge_features[i] share feature's im2col: their four
                # 3x3 first-stage convs run as one stacked N=128 matmul.
                o_bn, mf_bn = dshot_stage1(
                    feature, [params["outs"][i], params["merge_features"][i]])
                preds, gate = dshot_stage2_gate(o_bn, params["outs"][i],
                                                hg_flat, feat_flat)
                mf_out = dshot_stage2(mf_bn, params["merge_features"][i])
                mp_out = dshot_apply(preds, params["merge_preds"][i])
                delta = (mp_out + mf_out).reshape(cmid, np_, ph, pw)
                # broadcast over the batch axis — matches the reference semantics
                x_embed = x_embed + delta[:, None]
            else:
                (o_bn,) = dshot_stage1(feature, [params["outs"][i]])
                _, gate = dshot_stage2_gate(o_bn, params["outs"][i],
                                            hg_flat, feat_flat)
            combined.append(gate)                         # (C, M)
        batch_xc.append(jnp.concatenate(combined, axis=0))  # (nstack*C, M)
        final_w.append(params["final"][bi]["w"][:, :, 0, 0])
        final_b.append(params["final"][bi]["b"])

    xc = jnp.stack(batch_xc, axis=0)                      # (B, nstack*C, M)
    wf = jnp.stack(final_w, axis=0)                       # (B, oc, nstack*C)
    bf = jnp.stack(final_b, axis=0)[..., None]            # (B, oc, 1)
    out = final_conv_batched(xc, wf, bf)                  # (B, oc, M)
    oc = wf.shape[1]
    out = out.reshape(bsz, oc, np_, ph, pw)
    outp = cat_nchw(out, eh, ew)                          # (B, oc, H/2, W/2)
    outp = jnp.repeat(jnp.repeat(outp, 2, axis=2), 2, axis=3)  # nearest x2

    # edge = MaxPool2d(2,1)(pad(outp,(1,0,1,0))) - MinPool(2,2,1)(pad(...))
    padded = jnp.pad(outp, ((0, 0), (0, 0), (1, 0), (1, 0)))
    edge = morph_gradient(padded.reshape(bsz * oc, hh + 1, ww + 1))
    edge = edge.reshape(bsz, oc, hh, ww)
    return outp, edge


# ------------------------------------------------------------------
# Parameter initialization (deterministic, synthetic; BN in eval mode)
# ------------------------------------------------------------------

class KeyGen:
    def __init__(self, key):
        self.key = key

    def __call__(self):
        self.key, sub = jax.random.split(self.key)
        return sub


def conv_init(key, cin, cout, k, bias=True):
    kw, kb = jax.random.split(key)
    fan_in = cin * k * k
    w = jax.random.normal(kw, (cout, cin, k, k), jnp.float32) / jnp.sqrt(float(fan_in))
    b = (jax.random.normal(kb, (cout,), jnp.float32) * 0.05) if bias else None
    return {"w": w, "b": b}


def bn_init(key, c):
    kg, kb = jax.random.split(key)
    return {
        "gamma": 1.0 + 0.1 * jax.random.normal(kg, (c,), jnp.float32),
        "beta": 0.1 * jax.random.normal(kb, (c,), jnp.float32),
        "mean": jnp.zeros((c,), jnp.float32),
        "var": jnp.ones((c,), jnp.float32),
    }


def dshot_init(kg, cin, cout):
    return {
        "conv_r": {"conv": conv_init(kg(), cin, cout, 3), "bn": bn_init(kg(), cout)},
        "conv_l": {"conv": conv_init(kg(), cin, cout, 3), "bn": bn_init(kg(), cout)},
        "conv": {"bn": bn_init(kg(), 2 * cout), "conv": conv_init(kg(), 2 * cout, cout, 3)},
    }


def res_init(kg, cin, cout):
    return {
        "c1": conv_init(kg(), cin, cout, 3, bias=False), "bn1": bn_init(kg(), cout),
        "c2": conv_init(kg(), cout, cout, 3, bias=False), "bn2": bn_init(kg(), cout),
        "id": conv_init(kg(), cin, cout, 3, bias=True),
    }


def fl2d_init(key, in_channel=1, out_channel=1, middle_channel=32, nstack=2, batch_size=2):
    kg = KeyGen(key)
    return {
        "down_conv": conv_init(kg(), in_channel, middle_channel, 1),
        "features": [{"res": res_init(kg, middle_channel, middle_channel),
                      "dshot": dshot_init(kg, middle_channel, middle_channel)}
                     for _ in range(nstack)],
        "outs": [dshot_init(kg, middle_channel, middle_channel) for _ in range(nstack)],
        "merge_features": [dshot_init(kg, middle_channel, middle_channel) for _ in range(nstack - 1)],
        "merge_preds": [dshot_init(kg, middle_channel, middle_channel) for _ in range(nstack - 1)],
        "final": [conv_init(kg(), nstack * middle_channel, out_channel, 1) for _ in range(batch_size)],
    }


# ------------------------------------------------------------------

if __name__ == "__main__":
    key = jax.random.PRNGKey(0)
    kp, kx = jax.random.split(key)

    B, Cin, H, W = 2, 1, 32, 64
    middle_channel, out_channel, nstack = 32, 1, 2

    params = fl2d_init(kp, in_channel=Cin, out_channel=out_channel,
                       middle_channel=middle_channel, nstack=nstack, batch_size=B)
    x = jax.random.normal(kx, (B, Cin, H, W), jnp.float32)

    fwd = jax.jit(functools.partial(fl2d_forward, embed_shape=(2, 4), nstack=nstack))
    outp, edge = fwd(params, x)
    jax.block_until_ready((outp, edge))

    assert outp.shape == (B, out_channel, H, W), outp.shape
    assert edge.shape == (B, out_channel, H, W), edge.shape
    print("KERNEL_OK")
</pallas_src>

<mosaic_0001>
module attributes {stable_mosaic.version = 11 : i64} {
  func.func @_mm_affine_kernel(%arg0: i32, %arg1: memref<32x1xbf16, #tpu.memory_space<vmem>>, %arg2: memref<1x256xbf16, #tpu.memory_space<vmem>>, %arg3: memref<32x1xf32, #tpu.memory_space<vmem>>, %arg4: memref<32x1xf32, #tpu.memory_space<vmem>>, %arg5: memref<32x1xf32, #tpu.memory_space<vmem>>, %arg6: memref<32x256xf32, #tpu.memory_space<vmem>>) attributes {dimension_semantics = [#tpu.dimension_semantics<parallel>], iteration_bounds = array<i64: 4>, scalar_prefetch = 0 : i64, scratch_operands = 0 : i64, tpu.core_type = #tpu.core_type<tc>, window_params = [{pipeline_mode = #tpu.pipeline_mode<synchronous>, transform_indices = @transform_0, window_bounds = array<i64: 32, 1>}, {transform_indices = @transform_1, window_bounds = array<i64: 1, 256>}, {pipeline_mode = #tpu.pipeline_mode<synchronous>, transform_indices = @transform_2, window_bounds = array<i64: 32, 1>}, {pipeline_mode = #tpu.pipeline_mode<synchronous>, transform_indices = @transform_3, window_bounds = array<i64: 32, 1>}, {pipeline_mode = #tpu.pipeline_mode<synchronous>, transform_indices = @transform_4, window_bounds = array<i64: 32, 1>}, {transform_indices = @transform_5, window_bounds = array<i64: 32, 256>}]} {
    %c0 = arith.constant 0 : index
    %c0_0 = arith.constant 0 : index
    %0 = vector.load %arg1[%c0, %c0_0] : memref<32x1xbf16, #tpu.memory_space<vmem>>, vector<32x1xbf16>
    %c0_1 = arith.constant 0 : index
    %c0_2 = arith.constant 0 : index
    %1 = vector.load %arg2[%c0_1, %c0_2] : memref<1x256xbf16, #tpu.memory_space<vmem>>, vector<1x256xbf16>
    %cst = arith.constant dense<0.000000e+00> : vector<32x256xf32>
    %2 = tpu.matmul %0, %1, %cst {dimension_numbers = #tpu.dot_dimension_numbers<[1], [0], [0], [1], [0, 0, 1, 1], [], []>} : vector<32x1xbf16>, vector<1x256xbf16>, vector<32x256xf32> -> vector<32x256xf32>
    %c0_3 = arith.constant 0 : index
    %c0_4 = arith.constant 0 : index
    %3 = vector.load %arg3[%c0_3, %c0_4] : memref<32x1xf32, #tpu.memory_space<vmem>>, vector<32x1xf32>
    %4 = vector.broadcast %3 : vector<32x1xf32> to vector<32x256xf32>
    %5 = arith.addf %2, %4 : vector<32x256xf32>
    %c0_5 = arith.constant 0 : index
    %c0_6 = arith.constant 0 : index
    %6 = vector.load %arg4[%c0_5, %c0_6] : memref<32x1xf32, #tpu.memory_space<vmem>>, vector<32x1xf32>
    %7 = vector.broadcast %6 : vector<32x1xf32> to vector<32x256xf32>
    %8 = arith.mulf %5, %7 : vector<32x256xf32>
    %c0_7 = arith.constant 0 : index
    %c0_8 = arith.constant 0 : index
    %9 = vector.load %arg5[%c0_7, %c0_8] : memref<32x1xf32, #tpu.memory_space<vmem>>, vector<32x1xf32>
    %10 = vector.broadcast %9 : vector<32x1xf32> to vector<32x256xf32>
    %11 = arith.addf %8, %10 : vector<32x256xf32>
    %c0_9 = arith.constant 0 : index
    %c0_10 = arith.constant 0 : index
    %12 = vector.load %arg6[%c0_9, %c0_10] : memref<32x256xf32, #tpu.memory_space<vmem>>, vector<32x256xf32>
    tpu.vector_store %arg6[%c0_9, %c0_10], %11 {strides = array<i32>} : memref<32x256xf32, #tpu.memory_space<vmem>>, vector<32x256xf32>,
    return
  }
  func.func @transform_0(%arg0: i32) -> (i32, i32) {
    %c0_i32 = arith.constant 0 : i32
    %c0_i32_0 = arith.constant 0 : i32
    %c0_i32_1 = arith.constant 0 : i32
    return %c0_i32, %c0_i32_0 : i32, i32
  }
  func.func @transform_1(%arg0: i32) -> (i32, i32) {
    %c0_i32 = arith.constant 0 : i32
    %c0_i32_0 = arith.constant 0 : i32
    return %c0_i32, %arg0 : i32, i32
  }
  func.func @transform_2(%arg0: i32) -> (i32, i32) {
    %c0_i32 = arith.constant 0 : i32
    %c0_i32_0 = arith.constant 0 : i32
    %c0_i32_1 = arith.constant 0 : i32
    return %c0_i32, %c0_i32_0 : i32, i32
  }
  func.func @transform_3(%arg0: i32) -> (i32, i32) {
    %c0_i32 = arith.constant 0 : i32
    %c0_i32_0 = arith.constant 0 : i32
    %c0_i32_1 = arith.constant 0 : i32
    return %c0_i32, %c0_i32_0 : i32, i32
  }
  func.func @transform_4(%arg0: i32) -> (i32, i32) {
    %c0_i32 = arith.constant 0 : i32
    %c0_i32_0 = arith.constant 0 : i32
    %c0_i32_1 = arith.constant 0 : i32
    return %c0_i32, %c0_i32_0 : i32, i32
  }
  func.func @transform_5(%arg0: i32) -> (i32, i32) {
    %c0_i32 = arith.constant 0 : i32
    %c0_i32_0 = arith.constant 0 : i32
    return %c0_i32, %arg0 : i32, i32
  }
}

module attributes {stable_mosaic.version = 11 : i64} {
  func.func @_mm_affine_kernel(%arg0: i32, %arg1: memref<64x288xbf16, #tpu.memory_space<vmem>>, %arg2: memref<288x256xbf16, #tpu.memory_space<vmem>>, %arg3: memref<64x1xf32, #tpu.memory_space<vmem>>, %arg4: memref<64x1xf32, #tpu.memory_space<vmem>>, %arg5: memref<64x1xf32, #tpu.memory_space<vmem>>, %arg6: memref<64x256xf32, #tpu.memory_space<vmem>>) attributes {dimension_semantics = [#tpu.dimension_semantics<parallel>], iteration_bounds = array<i64: 2>, scalar_prefetch = 0 : i64, scratch_operands = 0 : i64, tpu.core_type = #tpu.core_type<tc>, window_params = [{pipeline_mode = #tpu.pipeline_mode<synchronous>, transform_indices = @transform_0, window_bounds = array<i64: 64, 288>}, {transform_indices = @transform_1, window_bounds = array<i64: 288, 256>}, {pipeline_mode = #tpu.pipeline_mode<synchronous>, transform_indices = @transform_2, window_bounds = array<i64: 64, 1>}, {pipeline_mode = #tpu.pipeline_mode<synchronous>, transform_indices = @transform_3, window_bounds = array<i64: 64, 1>}, {pipeline_mode = #tpu.pipeline_mode<synchronous>, transform_indices = @transform_4, window_bounds = array<i64: 64, 1>}, {transform_indices = @transform_5, window_bounds = array<i64: 64, 256>}]} {
    %c0 = arith.constant 0 : index
    %c0_0 = arith.constant 0 : index
    %0 = vector.load %arg1[%c0, %c0_0] : memref<64x288xbf16, #tpu.memory_space<vmem>>, vector<64x288xbf16>
    %c0_1 = arith.constant 0 : index
    %c0_2 = arith.constant 0 : index
    %1 = vector.load %arg2[%c0_1, %c0_2] : memref<288x256xbf16, #tpu.memory_space<vmem>>, vector<288x256xbf16>
    %cst = arith.constant dense<0.000000e+00> : vector<64x256xf32>
    %2 = tpu.matmul %0, %1, %cst {dimension_numbers = #tpu.dot_dimension_numbers<[1], [0], [0], [1], [0, 0, 1, 1], [], []>} : vector<64x288xbf16>, vector<288x256xbf16>, vector<64x256xf32> -> vector<64x256xf32>
    %c0_3 = arith.constant 0 : index
    %c0_4 = arith.constant 0 : index
    %3 = vector.load %arg3[%c0_3, %c0_4] : memref<64x1xf32, #tpu.memory_space<vmem>>, vector<64x1xf32>
    %4 = vector.broadcast %3 : vector<64x1xf32> to vector<64x256xf32>
    %5 = arith.addf %2, %4 : vector<64x256xf32>
    %6 = tpu.iota {dimensions = array<i32: 0>} : vector<64x256xi32>
    %c32_i32 = arith.constant 32 : i32
    %7 = vector.broadcast %c32_i32 : i32 to vector<64x256xi32>
    %8 = arith.cmpi slt, %6, %7 : vector<64x256xi32>
    %cst_5 = arith.constant 0.000000e+00 : f32
    %9 = vector.broadcast %cst_5 : f32 to vector<64x256xf32>
    %10 = arith.maximumf %5, %9 : vector<64x256xf32>
    %11 = arith.select %8, %10, %5 : vector<64x256xi1>, vector<64x256xf32>
    %c0_6 = arith.constant 0 : index
    %c0_7 = arith.constant 0 : index
    %12 = vector.load %arg4[%c0_6, %c0_7] : memref<64x1xf32, #tpu.memory_space<vmem>>, vector<64x1xf32>
    %13 = vector.broadcast %12 : vector<64x1xf32> to vector<64x256xf32>
    %14 = arith.mulf %11, %13 : vector<64x256xf32>
    %c0_8 = arith.constant 0 : index
    %c0_9 = arith.constant 0 : index
    %15 = vector.load %arg5[%c0_8, %c0_9] : memref<64x1xf32, #tpu.memory_space<vmem>>, vector<64x1xf32>
    %16 = vector.broadcast %15 : vector<64x1xf32> to vector<64x256xf32>
    %17 = arith.addf %14, %16 : vector<64x256xf32>
    %c0_10 = arith.constant 0 : index
    %c0_11 = arith.constant 0 : index
    %18 = vector.load %arg6[%c0_10, %c0_11] : memref<64x256xf32, #tpu.memory_space<vmem>>, vector<64x256xf32>
    tpu.vector_store %arg6[%c0_10, %c0_11], %17 {strides = array<i32>} : memref<64x256xf32, #tpu.memory_space<vmem>>, vector<64x256xf32>,
    return
  }
  func.func @transform_0(%arg0: i32) -> (i32, i32) {
    %c0_i32 = arith.constant 0 : i32
    %c0_i32_0 = arith.constant 0 : i32
    %c0_i32_1 = arith.constant 0 : i32
    return %c0_i32, %c0_i32_0 : i32, i32
  }
  func.func @transform_1(%arg0: i32) -> (i32, i32) {
    %c0_i32 = arith.constant 0 : i32
    %c0_i32_0 = arith.constant 0 : i32
    return %c0_i32, %arg0 : i32, i32
  }
  func.func @transform_2(%arg0: i32) -> (i32, i32) {
    %c0_i32 = arith.constant 0 : i32
    %c0_i32_0 = arith.constant 0 : i32
    %c0_i32_1 = arith.constant 0 : i32
    return %c0_i32, %c0_i32_0 : i32, i32
  }
  func.func @transform_3(%arg0: i32) -> (i32, i32) {
    %c0_i32 = arith.constant 0 : i32
    %c0_i32_0 = arith.constant 0 : i32
    %c0_i32_1 = arith.constant 0 : i32
    return %c0_i32, %c0_i32_0 : i32, i32
  }
  func.func @transform_4(%arg0: i32) -> (i32, i32) {
    %c0_i32 = arith.constant 0 : i32
    %c0_i32_0 = arith.constant 0 : i32
    %c0_i32_1 = arith.constant 0 : i32
    return %c0_i32, %c0_i32_0 : i32, i32
  }
  func.func @transform_5(%arg0: i32) -> (i32, i32) {
    %c0_i32 = arith.constant 0 : i32
    %c0_i32_0 = arith.constant 0 : i32
    return %c0_i32, %arg0 : i32, i32
  }
}

module attributes {stable_mosaic.version = 11 : i64} {
  func.func @_mm_skip_relu_kernel(%arg0: i32, %arg1: memref<32x288xbf16, #tpu.memory_space<vmem>>, %arg2: memref<288x256xbf16, #tpu.memory_space<vmem>>, %arg3: memref<32x1xf32, #tpu.memory_space<vmem>>, %arg4: memref<32x256xf32, #tpu.memory_space<vmem>>, %arg5: memref<32x256xf32, #tpu.memory_space<vmem>>) attributes {dimension_semantics = [#tpu.dimension_semantics<parallel>], iteration_bounds = array<i64: 2>, scalar_prefetch = 0 : i64, scratch_operands = 0 : i64, tpu.core_type = #tpu.core_type<tc>, window_params = [{pipeline_mode = #tpu.pipeline_mode<synchronous>, transform_indices = @transform_0, window_bounds = array<i64: 32, 288>}, {transform_indices = @transform_1, window_bounds = array<i64: 288, 256>}, {pipeline_mode = #tpu.pipeline_mode<synchronous>, transform_indices = @transform_2, window_bounds = array<i64: 32, 1>}, {transform_indices = @transform_3, window_bounds = array<i64: 32, 256>}, {transform_indices = @transform_4, window_bounds = array<i64: 32, 256>}]} {
    %c0 = arith.constant 0 : index
    %c0_0 = arith.constant 0 : index
    %0 = vector.load %arg1[%c0, %c0_0] : memref<32x288xbf16, #tpu.memory_space<vmem>>, vector<32x288xbf16>
    %c0_1 = arith.constant 0 : index
    %c0_2 = arith.constant 0 : index
    %1 = vector.load %arg2[%c0_1, %c0_2] : memref<288x256xbf16, #tpu.memory_space<vmem>>, vector<288x256xbf16>
    %cst = arith.constant dense<0.000000e+00> : vector<32x256xf32>
    %2 = tpu.matmul %0, %1, %cst {dimension_numbers = #tpu.dot_dimension_numbers<[1], [0], [0], [1], [0, 0, 1, 1], [], []>} : vector<32x288xbf16>, vector<288x256xbf16>, vector<32x256xf32> -> vector<32x256xf32>
    %c0_3 = arith.constant 0 : index
    %c0_4 = arith.constant 0 : index
    %3 = vector.load %arg3[%c0_3, %c0_4] : memref<32x1xf32, #tpu.memory_space<vmem>>, vector<32x1xf32>
    %4 = vector.broadcast %3 : vector<32x1xf32> to vector<32x256xf32>
    %5 = arith.addf %2, %4 : vector<32x256xf32>
    %cst_5 = arith.constant 0.000000e+00 : f32
    %6 = vector.broadcast %cst_5 : f32 to vector<32x256xf32>
    %7 = arith.maximumf %5, %6 : vector<32x256xf32>
    %c0_6 = arith.constant 0 : index
    %c0_7 = arith.constant 0 : index
    %8 = vector.load %arg4[%c0_6, %c0_7] : memref<32x256xf32, #tpu.memory_space<vmem>>, vector<32x256xf32>
    %9 = arith.addf %7, %8 : vector<32x256xf32>
    %cst_8 = arith.constant 0.000000e+00 : f32
    %10 = vector.broadcast %cst_8 : f32 to vector<32x256xf32>
    %11 = arith.maximumf %9, %10 : vector<32x256xf32>
    %c0_9 = arith.constant 0 : index
    %c0_10 = arith.constant 0 : index
    %12 = vector.load %arg5[%c0_9, %c0_10] : memref<32x256xf32, #tpu.memory_space<vmem>>, vector<32x256xf32>
    tpu.vector_store %arg5[%c0_9, %c0_10], %11 {strides = array<i32>} : memref<32x256xf32, #tpu.memory_space<vmem>>, vector<32x256xf32>,
    return
  }
  func.func @transform_0(%arg0: i32) -> (i32, i32) {
    %c0_i32 = arith.constant 0 : i32
    %c0_i32_0 = arith.constant 0 : i32
    %c0_i32_1 = arith.constant 0 : i32
    return %c0_i32, %c0_i32_0 : i32, i32
  }
  func.func @transform_1(%arg0: i32) -> (i32, i32) {
    %c0_i32 = arith.constant 0 : i32
    %c0_i32_0 = arith.constant 0 : i32
    return %c0_i32, %arg0 : i32, i32
  }
  func.func @transform_2(%arg0: i32) -> (i32, i32) {
    %c0_i32 = arith.constant 0 : i32
    %c0_i32_0 = arith.constant 0 : i32
    %c0_i32_1 = arith.constant 0 : i32
    return %c0_i32, %c0_i32_0 : i32, i32
  }
  func.func @transform_3(%arg0: i32) -> (i32, i32) {
    %c0_i32 = arith.constant 0 : i32
    %c0_i32_0 = arith.constant 0 : i32
    return %c0_i32, %arg0 : i32, i32
  }
  func.func @transform_4(%arg0: i32) -> (i32, i32) {
    %c0_i32 = arith.constant 0 : i32
    %c0_i32_0 = arith.constant 0 : i32
    return %c0_i32, %arg0 : i32, i32
  }
}

module attributes {stable_mosaic.version = 11 : i64} {
  func.func @_mm_affine_kernel(%arg0: i32, %arg1: memref<64x288xbf16, #tpu.memory_space<vmem>>, %arg2: memref<288x256xbf16, #tpu.memory_space<vmem>>, %arg3: memref<64x1xf32, #tpu.memory_space<vmem>>, %arg4: memref<64x1xf32, #tpu.memory_space<vmem>>, %arg5: memref<64x1xf32, #tpu.memory_space<vmem>>, %arg6: memref<64x256xf32, #tpu.memory_space<vmem>>) attributes {dimension_semantics = [#tpu.dimension_semantics<parallel>], iteration_bounds = array<i64: 2>, scalar_prefetch = 0 : i64, scratch_operands = 0 : i64, tpu.core_type = #tpu.core_type<tc>, window_params = [{pipeline_mode = #tpu.pipeline_mode<synchronous>, transform_indices = @transform_0, window_bounds = array<i64: 64, 288>}, {transform_indices = @transform_1, window_bounds = array<i64: 288, 256>}, {pipeline_mode = #tpu.pipeline_mode<synchronous>, transform_indices = @transform_2, window_bounds = array<i64: 64, 1>}, {pipeline_mode = #tpu.pipeline_mode<synchronous>, transform_indices = @transform_3, window_bounds = array<i64: 64, 1>}, {pipeline_mode = #tpu.pipeline_mode<synchronous>, transform_indices = @transform_4, window_bounds = array<i64: 64, 1>}, {transform_indices = @transform_5, window_bounds = array<i64: 64, 256>}]} {
    %c0 = arith.constant 0 : index
    %c0_0 = arith.constant 0 : index
    %0 = vector.load %arg1[%c0, %c0_0] : memref<64x288xbf16, #tpu.memory_space<vmem>>, vector<64x288xbf16>
    %c0_1 = arith.constant 0 : index
    %c0_2 = arith.constant 0 : index
    %1 = vector.load %arg2[%c0_1, %c0_2] : memref<288x256xbf16, #tpu.memory_space<vmem>>, vector<288x256xbf16>
    %cst = arith.constant dense<0.000000e+00> : vector<64x256xf32>
    %2 = tpu.matmul %0, %1, %cst {dimension_numbers = #tpu.dot_dimension_numbers<[1], [0], [0], [1], [0, 0, 1, 1], [], []>} : vector<64x288xbf16>, vector<288x256xbf16>, vector<64x256xf32> -> vector<64x256xf32>
    %c0_3 = arith.constant 0 : index
    %c0_4 = arith.constant 0 : index
    %3 = vector.load %arg3[%c0_3, %c0_4] : memref<64x1xf32, #tpu.memory_space<vmem>>, vector<64x1xf32>
    %4 = vector.broadcast %3 : vector<64x1xf32> to vector<64x256xf32>
    %5 = arith.addf %2, %4 : vector<64x256xf32>
    %cst_5 = arith.constant 0.000000e+00 : f32
    %6 = vector.broadcast %cst_5 : f32 to vector<64x256xf32>
    %7 = arith.maximumf %5, %6 : vector<64x256xf32>
    %c0_6 = arith.constant 0 : index
    %c0_7 = arith.constant 0 : index
    %8 = vector.load %arg4[%c0_6, %c0_7] : memref<64x1xf32, #tpu.memory_space<vmem>>, vector<64x1xf32>
    %9 = vector.broadcast %8 : vector<64x1xf32> to vector<64x256xf32>
    %10 = arith.mulf %7, %9 : vector<64x256xf32>
    %c0_8 = arith.constant 0 : index
    %c0_9 = arith.constant 0 : index
    %11 = vector.load %arg5[%c0_8, %c0_9] : memref<64x1xf32, #tpu.memory_space<vmem>>, vector<64x1xf32>
    %12 = vector.broadcast %11 : vector<64x1xf32> to vector<64x256xf32>
    %13 = arith.addf %10, %12 : vector<64x256xf32>
    %c0_10 = arith.constant 0 : index
    %c0_11 = arith.constant 0 : index
    %14 = vector.load %arg6[%c0_10, %c0_11] : memref<64x256xf32, #tpu.memory_space<vmem>>, vector<64x256xf32>
    tpu.vector_store %arg6[%c0_10, %c0_11], %13 {strides = array<i32>} : memref<64x256xf32, #tpu.memory_space<vmem>>, vector<64x256xf32>,
    return
  }
  func.func @transform_0(%arg0: i32) -> (i32, i32) {
    %c0_i32 = arith.constant 0 : i32
    %c0_i32_0 = arith.constant 0 : i32
    %c0_i32_1 = arith.constant 0 : i32
    return %c0_i32, %c0_i32_0 : i32, i32
  }
  func.func @transform_1(%arg0: i32) -> (i32, i32) {
    %c0_i32 = arith.constant 0 : i32
    %c0_i32_0 = arith.constant 0 : i32
    return %c0_i32, %arg0 : i32, i32
  }
  func.func @transform_2(%arg0: i32) -> (i32, i32) {
    %c0_i32 = arith.constant 0 : i32
    %c0_i32_0 = arith.constant 0 : i32
    %c0_i32_1 = arith.constant 0 : i32
    return %c0_i32, %c0_i32_0 : i32, i32
  }
  func.func @transform_3(%arg0: i32) -> (i32, i32) {
    %c0_i32 = arith.constant 0 : i32
    %c0_i32_0 = arith.constant 0 : i32
    %c0_i32_1 = arith.constant 0 : i32
    return %c0_i32, %c0_i32_0 : i32, i32
  }
  func.func @transform_4(%arg0: i32) -> (i32, i32) {
    %c0_i32 = arith.constant 0 : i32
    %c0_i32_0 = arith.constant 0 : i32
    %c0_i32_1 = arith.constant 0 : i32
    return %c0_i32, %c0_i32_0 : i32, i32
  }
  func.func @transform_5(%arg0: i32) -> (i32, i32) {
    %c0_i32 = arith.constant 0 : i32
    %c0_i32_0 = arith.constant 0 : i32
    return %c0_i32, %arg0 : i32, i32
  }
}

module attributes {stable_mosaic.version = 11 : i64} {
  func.func @_mm_affine_kernel(%arg0: i32, %arg1: memref<32x576xbf16, #tpu.memory_space<vmem>>, %arg2: memref<576x256xbf16, #tpu.memory_space<vmem>>, %arg3: memref<32x1xf32, #tpu.memory_space<vmem>>, %arg4: memref<32x1xf32, #tpu.memory_space<vmem>>, %arg5: memref<32x1xf32, #tpu.memory_space<vmem>>, %arg6: memref<32x256xf32, #tpu.memory_space<vmem>>) attributes {dimension_semantics = [#tpu.dimension_semantics<parallel>], iteration_bounds = array<i64: 2>, scalar_prefetch = 0 : i64, scratch_operands = 0 : i64, tpu.core_type = #tpu.core_type<tc>, window_params = [{pipeline_mode = #tpu.pipeline_mode<synchronous>, transform_indices = @transform_0, window_bounds = array<i64: 32, 576>}, {transform_indices = @transform_1, window_bounds = array<i64: 576, 256>}, {pipeline_mode = #tpu.pipeline_mode<synchronous>, transform_indices = @transform_2, window_bounds = array<i64: 32, 1>}, {pipeline_mode = #tpu.pipeline_mode<synchronous>, transform_indices = @transform_3, window_bounds = array<i64: 32, 1>}, {pipeline_mode = #tpu.pipeline_mode<synchronous>, transform_indices = @transform_4, window_bounds = array<i64: 32, 1>}, {transform_indices = @transform_5, window_bounds = array<i64: 32, 256>}]} {
    %c0 = arith.constant 0 : index
    %c0_0 = arith.constant 0 : index
    %0 = vector.load %arg1[%c0, %c0_0] : memref<32x576xbf16, #tpu.memory_space<vmem>>, vector<32x576xbf16>
    %c0_1 = arith.constant 0 : index
    %c0_2 = arith.constant 0 : index
    %1 = vector.load %arg2[%c0_1, %c0_2] : memref<576x256xbf16, #tpu.memory_space<vmem>>, vector<576x256xbf16>
    %cst = arith.constant dense<0.000000e+00> : vector<32x256xf32>
    %2 = tpu.matmul %0, %1, %cst {dimension_numbers = #tpu.dot_dimension_numbers<[1], [0], [0], [1], [0, 0, 1, 1], [], []>} : vector<32x576xbf16>, vector<576x256xbf16>, vector<32x256xf32> -> vector<32x256xf32>
    %c0_3 = arith.constant 0 : index
    %c0_4 = arith.constant 0 : index
    %3 = vector.load %arg3[%c0_3, %c0_4] : memref<32x1xf32, #tpu.memory_space<vmem>>, vector<32x1xf32>
    %4 = vector.broadcast %3 : vector<32x1xf32> to vector<32x256xf32>
    %5 = arith.addf %2, %4 : vector<32x256xf32>
    %cst_5 = arith.constant 0.000000e+00 : f32
    %6 = vector.broadcast %cst_5 : f32 to vector<32x256xf32>
    %7 = arith.maximumf %5, %6 : vector<32x256xf32>
    %c0_6 = arith.constant 0 : index
    %c0_7 = arith.constant 0 : index
    %8 = vector.load %arg4[%c0_6, %c0_7] : memref<32x1xf32, #tpu.memory_space<vmem>>, vector<32x1xf32>
    %9 = vector.broadcast %8 : vector<32x1xf32> to vector<32x256xf32>
    %10 = arith.mulf %7, %9 : vector<32x256xf32>
    %c0_8 = arith.constant 0 : index
    %c0_9 = arith.constant 0 : index
    %11 = vector.load %arg5[%c0_8, %c0_9] : memref<32x1xf32, #tpu.memory_space<vmem>>, vector<32x1xf32>
    %12 = vector.broadcast %11 : vector<32x1xf32> to vector<32x256xf32>
    %13 = arith.addf %10, %12 : vector<32x256xf32>
    %c0_10 = arith.constant 0 : index
    %c0_11 = arith.constant 0 : index
    %14 = vector.load %arg6[%c0_10, %c0_11] : memref<32x256xf32, #tpu.memory_space<vmem>>, vector<32x256xf32>
    tpu.vector_store %arg6[%c0_10, %c0_11], %13 {strides = array<i32>} : memref<32x256xf32, #tpu.memory_space<vmem>>, vector<32x256xf32>,
    return
  }
  func.func @transform_0(%arg0: i32) -> (i32, i32) {
    %c0_i32 = arith.constant 0 : i32
    %c0_i32_0 = arith.constant 0 : i32
    %c0_i32_1 = arith.constant 0 : i32
    return %c0_i32, %c0_i32_0 : i32, i32
  }
  func.func @transform_1(%arg0: i32) -> (i32, i32) {
    %c0_i32 = arith.constant 0 : i32
    %c0_i32_0 = arith.constant 0 : i32
    return %c0_i32, %arg0 : i32, i32
  }
  func.func @transform_2(%arg0: i32) -> (i32, i32) {
    %c0_i32 = arith.constant 0 : i32
    %c0_i32_0 = arith.constant 0 : i32
    %c0_i32_1 = arith.constant 0 : i32
    return %c0_i32, %c0_i32_0 : i32, i32
  }
  func.func @transform_3(%arg0: i32) -> (i32, i32) {
    %c0_i32 = arith.constant 0 : i32
    %c0_i32_0 = arith.constant 0 : i32
    %c0_i32_1 = arith.constant 0 : i32
    return %c0_i32, %c0_i32_0 : i32, i32
  }
  func.func @transform_4(%arg0: i32) -> (i32, i32) {
    %c0_i32 = arith.constant 0 : i32
    %c0_i32_0 = arith.constant 0 : i32
    %c0_i32_1 = arith.constant 0 : i32
    return %c0_i32, %c0_i32_0 : i32, i32
  }
  func.func @transform_5(%arg0: i32) -> (i32, i32) {
    %c0_i32 = arith.constant 0 : i32
    %c0_i32_0 = arith.constant 0 : i32
    return %c0_i32, %arg0 : i32, i32
  }
}

module attributes {stable_mosaic.version = 11 : i64} {
  func.func @_mm_affine_kernel(%arg0: i32, %arg1: memref<128x288xbf16, #tpu.memory_space<vmem>>, %arg2: memref<288x256xbf16, #tpu.memory_space<vmem>>, %arg3: memref<128x1xf32, #tpu.memory_space<vmem>>, %arg4: memref<128x1xf32, #tpu.memory_space<vmem>>, %arg5: memref<128x1xf32, #tpu.memory_space<vmem>>, %arg6: memref<128x256xf32, #tpu.memory_space<vmem>>) attributes {dimension_semantics = [#tpu.dimension_semantics<parallel>], iteration_bounds = array<i64: 2>, scalar_prefetch = 0 : i64, scratch_operands = 0 : i64, tpu.core_type = #tpu.core_type<tc>, window_params = [{pipeline_mode = #tpu.pipeline_mode<synchronous>, transform_indices = @transform_0, window_bounds = array<i64: 128, 288>}, {transform_indices = @transform_1, window_bounds = array<i64: 288, 256>}, {pipeline_mode = #tpu.pipeline_mode<synchronous>, transform_indices = @transform_2, window_bounds = array<i64: 128, 1>}, {pipeline_mode = #tpu.pipeline_mode<synchronous>, transform_indices = @transform_3, window_bounds = array<i64: 128, 1>}, {pipeline_mode = #tpu.pipeline_mode<synchronous>, transform_indices = @transform_4, window_bounds = array<i64: 128, 1>}, {transform_indices = @transform_5, window_bounds = array<i64: 128, 256>}]} {
    %c0 = arith.constant 0 : index
    %c0_0 = arith.constant 0 : index
    %0 = vector.load %arg1[%c0, %c0_0] : memref<128x288xbf16, #tpu.memory_space<vmem>>, vector<128x288xbf16>
    %c0_1 = arith.constant 0 : index
    %c0_2 = arith.constant 0 : index
    %1 = vector.load %arg2[%c0_1, %c0_2] : memref<288x256xbf16, #tpu.memory_space<vmem>>, vector<288x256xbf16>
    %cst = arith.constant dense<0.000000e+00> : vector<128x256xf32>
    %2 = tpu.matmul %0, %1, %cst {dimension_numbers = #tpu.dot_dimension_numbers<[1], [0], [0], [1], [0, 0, 1, 1], [], []>} : vector<128x288xbf16>, vector<288x256xbf16>, vector<128x256xf32> -> vector<128x256xf32>
    %c0_3 = arith.constant 0 : index
    %c0_4 = arith.constant 0 : index
    %3 = vector.load %arg3[%c0_3, %c0_4] : memref<128x1xf32, #tpu.memory_space<vmem>>, vector<128x1xf32>
    %4 = vector.broadcast %3 : vector<128x1xf32> to vector<128x256xf32>
    %5 = arith.addf %2, %4 : vector<128x256xf32>
    %cst_5 = arith.constant 0.000000e+00 : f32
    %6 = vector.broadcast %cst_5 : f32 to vector<128x256xf32>
    %7 = arith.maximumf %5, %6 : vector<128x256xf32>
    %c0_6 = arith.constant 0 : index
    %c0_7 = arith.constant 0 : index
    %8 = vector.load %arg4[%c0_6, %c0_7] : memref<128x1xf32, #tpu.memory_space<vmem>>, vector<128x1xf32>
    %9 = vector.broadcast %8 : vector<128x1xf32> to vector<128x256xf32>
    %10 = arith.mulf %7, %9 : vector<128x256xf32>
    %c0_8 = arith.constant 0 : index
    %c0_9 = arith.constant 0 : index
    %11 = vector.load %arg5[%c0_8, %c0_9] : memref<128x1xf32, #tpu.memory_space<vmem>>, vector<128x1xf32>
    %12 = vector.broadcast %11 : vector<128x1xf32> to vector<128x256xf32>
    %13 = arith.addf %10, %12 : vector<128x256xf32>
    %c0_10 = arith.constant 0 : index
    %c0_11 = arith.constant 0 : index
    %14 = vector.load %arg6[%c0_10, %c0_11] : memref<128x256xf32, #tpu.memory_space<vmem>>, vector<128x256xf32>
    tpu.vector_store %arg6[%c0_10, %c0_11], %13 {strides = array<i32>} : memref<128x256xf32, #tpu.memory_space<vmem>>, vector<128x256xf32>,
    return
  }
  func.func @transform_0(%arg0: i32) -> (i32, i32) {
    %c0_i32 = arith.constant 0 : i32
    %c0_i32_0 = arith.constant 0 : i32
    %c0_i32_1 = arith.constant 0 : i32
    return %c0_i32, %c0_i32_0 : i32, i32
  }
  func.func @transform_1(%arg0: i32) -> (i32, i32) {
    %c0_i32 = arith.constant 0 : i32
    %c0_i32_0 = arith.constant 0 : i32
    return %c0_i32, %arg0 : i32, i32
  }
  func.func @transform_2(%arg0: i32) -> (i32, i32) {
    %c0_i32 = arith.constant 0 : i32
    %c0_i32_0 = arith.constant 0 : i32
    %c0_i32_1 = arith.constant 0 : i32
    return %c0_i32, %c0_i32_0 : i32, i32
  }
  func.func @transform_3(%arg0: i32) -> (i32, i32) {
    %c0_i32 = arith.constant 0 : i32
    %c0_i32_0 = arith.constant 0 : i32
    %c0_i32_1 = arith.constant 0 : i32
    return %c0_i32, %c0_i32_0 : i32, i32
  }
  func.func @transform_4(%arg0: i32) -> (i32, i32) {
    %c0_i32 = arith.constant 0 : i32
    %c0_i32_0 = arith.constant 0 : i32
    %c0_i32_1 = arith.constant 0 : i32
    return %c0_i32, %c0_i32_0 : i32, i32
  }
  func.func @transform_5(%arg0: i32) -> (i32, i32) {
    %c0_i32 = arith.constant 0 : i32
    %c0_i32_0 = arith.constant 0 : i32
    return %c0_i32, %arg0 : i32, i32
  }
}

module attributes {stable_mosaic.version = 11 : i64} {
  func.func @_mm_gate_kernel(%arg0: i32, %arg1: memref<32x576xbf16, #tpu.memory_space<vmem>>, %arg2: memref<576x256xbf16, #tpu.memory_space<vmem>>, %arg3: memref<32x1xf32, #tpu.memory_space<vmem>>, %arg4: memref<32x256xf32, #tpu.memory_space<vmem>>, %arg5: memref<32x256xf32, #tpu.memory_space<vmem>>, %arg6: memref<32x256xf32, #tpu.memory_space<vmem>>, %arg7: memref<32x256xf32, #tpu.memory_space<vmem>>) attributes {dimension_semantics = [#tpu.dimension_semantics<parallel>], iteration_bounds = array<i64: 2>, scalar_prefetch = 0 : i64, scratch_operands = 0 : i64, tpu.core_type = #tpu.core_type<tc>, window_params = [{pipeline_mode = #tpu.pipeline_mode<synchronous>, transform_indices = @transform_0, window_bounds = array<i64: 32, 576>}, {transform_indices = @transform_1, window_bounds = array<i64: 576, 256>}, {pipeline_mode = #tpu.pipeline_mode<synchronous>, transform_indices = @transform_2, window_bounds = array<i64: 32, 1>}, {transform_indices = @transform_3, window_bounds = array<i64: 32, 256>}, {transform_indices = @transform_4, window_bounds = array<i64: 32, 256>}, {transform_indices = @transform_5, window_bounds = array<i64: 32, 256>}, {transform_indices = @transform_6, window_bounds = array<i64: 32, 256>}]} {
    %c0 = arith.constant 0 : index
    %c0_0 = arith.constant 0 : index
    %0 = vector.load %arg1[%c0, %c0_0] : memref<32x576xbf16, #tpu.memory_space<vmem>>, vector<32x576xbf16>
    %c0_1 = arith.constant 0 : index
    %c0_2 = arith.constant 0 : index
    %1 = vector.load %arg2[%c0_1, %c0_2] : memref<576x256xbf16, #tpu.memory_space<vmem>>, vector<576x256xbf16>
    %cst = arith.constant dense<0.000000e+00> : vector<32x256xf32>
    %2 = tpu.matmul %0, %1, %cst {dimension_numbers = #tpu.dot_dimension_numbers<[1], [0], [0], [1], [0, 0, 1, 1], [], []>} : vector<32x576xbf16>, vector<576x256xbf16>, vector<32x256xf32> -> vector<32x256xf32>
    %c0_3 = arith.constant 0 : index
    %c0_4 = arith.constant 0 : index
    %3 = vector.load %arg3[%c0_3, %c0_4] : memref<32x1xf32, #tpu.memory_space<vmem>>, vector<32x1xf32>
    %4 = vector.broadcast %3 : vector<32x1xf32> to vector<32x256xf32>
    %5 = arith.addf %2, %4 : vector<32x256xf32>
    %cst_5 = arith.constant 0.000000e+00 : f32
    %6 = vector.broadcast %cst_5 : f32 to vector<32x256xf32>
    %7 = arith.maximumf %5, %6 : vector<32x256xf32>
    %c0_6 = arith.constant 0 : index
    %c0_7 = arith.constant 0 : index
    %8 = vector.load %arg6[%c0_6, %c0_7] : memref<32x256xf32, #tpu.memory_space<vmem>>, vector<32x256xf32>
    tpu.vector_store %arg6[%c0_6, %c0_7], %7 {strides = array<i32>} : memref<32x256xf32, #tpu.memory_space<vmem>>, vector<32x256xf32>,
    %c0_8 = arith.constant 0 : index
    %c0_9 = arith.constant 0 : index
    %9 = vector.load %arg5[%c0_8, %c0_9] : memref<32x256xf32, #tpu.memory_space<vmem>>, vector<32x256xf32>
    %10 = arith.addf %7, %9 : vector<32x256xf32>
    %c0_10 = arith.constant 0 : index
    %c0_11 = arith.constant 0 : index
    %11 = vector.load %arg4[%c0_10, %c0_11] : memref<32x256xf32, #tpu.memory_space<vmem>>, vector<32x256xf32>
    %12 = arith.mulf %10, %11 : vector<32x256xf32>
    %13 = arith.negf %7 : vector<32x256xf32>
    %14 = math.exp %13 : vector<32x256xf32>
    %cst_12 = arith.constant 1.000000e+00 : f32
    %15 = vector.broadcast %cst_12 : f32 to vector<32x256xf32>
    %16 = arith.addf %15, %14 : vector<32x256xf32>
    %17 = arith.divf %15, %16 : vector<32x256xf32>
    %18 = arith.mulf %12, %17 : vector<32x256xf32>
    %cst_13 = arith.constant 0.000000e+00 : f32
    %19 = vector.broadcast %cst_13 : f32 to vector<32x256xf32>
    %20 = arith.maximumf %18, %19 : vector<32x256xf32>
    %c0_14 = arith.constant 0 : index
    %c0_15 = arith.constant 0 : index
    %21 = vector.load %arg7[%c0_14, %c0_15] : memref<32x256xf32, #tpu.memory_space<vmem>>, vector<32x256xf32>
    tpu.vector_store %arg7[%c0_14, %c0_15], %20 {strides = array<i32>} : memref<32x256xf32, #tpu.memory_space<vmem>>, vector<32x256xf32>,
    return
  }
  func.func @transform_0(%arg0: i32) -> (i32, i32) {
    %c0_i32 = arith.constant 0 : i32
    %c0_i32_0 = arith.constant 0 : i32
    %c0_i32_1 = arith.constant 0 : i32
    return %c0_i32, %c0_i32_0 : i32, i32
  }
  func.func @transform_1(%arg0: i32) -> (i32, i32) {
    %c0_i32 = arith.constant 0 : i32
    %c0_i32_0 = arith.constant 0 : i32
    return %c0_i32, %arg0 : i32, i32
  }
  func.func @transform_2(%arg0: i32) -> (i32, i32) {
    %c0_i32 = arith.constant 0 : i32
    %c0_i32_0 = arith.constant 0 : i32
    %c0_i32_1 = arith.constant 0 : i32
    return %c0_i32, %c0_i32_0 : i32, i32
  }
  func.func @transform_3(%arg0: i32) -> (i32, i32) {
    %c0_i32 = arith.constant 0 : i32
    %c0_i32_0 = arith.constant 0 : i32
    return %c0_i32, %arg0 : i32, i32
  }
  func.func @transform_4(%arg0: i32) -> (i32, i32) {
    %c0_i32 = arith.constant 0 : i32
    %c0_i32_0 = arith.constant 0 : i32
    return %c0_i32, %arg0 : i32, i32
  }
  func.func @transform_5(%arg0: i32) -> (i32, i32) {
    %c0_i32 = arith.constant 0 : i32
    %c0_i32_0 = arith.constant 0 : i32
    return %c0_i32, %arg0 : i32, i32
  }
  func.func @transform_6(%arg0: i32) -> (i32, i32) {
    %c0_i32 = arith.constant 0 : i32
    %c0_i32_0 = arith.constant 0 : i32
    return %c0_i32, %arg0 : i32, i32
  }
}

module attributes {stable_mosaic.version = 11 : i64} {
  func.func @_mm_gate_kernel(%arg0: i32, %arg1: memref<32x576xbf16, #tpu.memory_space<vmem>>, %arg2: memref<576x256xbf16, #tpu.memory_space<vmem>>, %arg3: memref<32x1xf32, #tpu.memory_space<vmem>>, %arg4: memref<32x256xf32, #tpu.memory_space<vmem>>, %arg5: memref<32x256xf32, #tpu.memory_space<vmem>>, %arg6: memref<32x256xf32, #tpu.memory_space<vmem>>, %arg7: memref<32x256xf32, #tpu.memory_space<vmem>>) attributes {dimension_semantics = [#tpu.dimension_semantics<parallel>], iteration_bounds = array<i64: 2>, scalar_prefetch = 0 : i64, scratch_operands = 0 : i64, tpu.core_type = #tpu.core_type<tc>, window_params = [{pipeline_mode = #tpu.pipeline_mode<synchronous>, transform_indices = @transform_0, window_bounds = array<i64: 32, 576>}, {transform_indices = @transform_1, window_bounds = array<i64: 576, 256>}, {pipeline_mode = #tpu.pipeline_mode<synchronous>, transform_indices = @transform_2, window_bounds = array<i64: 32, 1>}, {transform_indices = @transform_3, window_bounds = array<i64: 32, 256>}, {transform_indices = @transform_4, window_bounds = array<i64: 32, 256>}, {transform_indices = @transform_5, window_bounds = array<i64: 32, 256>}, {transform_indices = @transform_6, window_bounds = array<i64: 32, 256>}]} {
    %c0 = arith.constant 0 : index
    %c0_0 = arith.constant 0 : index
    %0 = vector.load %arg1[%c0, %c0_0] : memref<32x576xbf16, #tpu.memory_space<vmem>>, vector<32x576xbf16>
    %c0_1 = arith.constant 0 : index
    %c0_2 = arith.constant 0 : index
    %1 = vector.load %arg2[%c0_1, %c0_2] : memref<576x256xbf16, #tpu.memory_space<vmem>>, vector<576x256xbf16>
    %cst = arith.constant dense<0.000000e+00> : vector<32x256xf32>
    %2 = tpu.matmul %0, %1, %cst {dimension_numbers = #tpu.dot_dimension_numbers<[1], [0], [0], [1], [0, 0, 1, 1], [], []>} : vector<32x576xbf16>, vector<576x256xbf16>, vector<32x256xf32> -> vector<32x256xf32>
    %c0_3 = arith.constant 0 : index
    %c0_4 = arith.constant 0 : index
    %3 = vector.load %arg3[%c0_3, %c0_4] : memref<32x1xf32, #tpu.memory_space<vmem>>, vector<32x1xf32>
    %4 = vector.broadcast %3 : vector<32x1xf32> to vector<32x256xf32>
    %5 = arith.addf %2, %4 : vector<32x256xf32>
    %cst_5 = arith.constant 0.000000e+00 : f32
    %6 = vector.broadcast %cst_5 : f32 to vector<32x256xf32>
    %7 = arith.maximumf %5, %6 : vector<32x256xf32>
    %c0_6 = arith.constant 0 : index
    %c0_7 = arith.constant 0 : index
    %8 = vector.load %arg6[%c0_6, %c0_7] : memref<32x256xf32, #tpu.memory_space<vmem>>, vector<32x256xf32>
    tpu.vector_store %arg6[%c0_6, %c0_7], %7 {strides = array<i32>} : memref<32x256xf32, #tpu.memory_space<vmem>>, vector<32x256xf32>,
    %c0_8 = arith.constant 0 : index
    %c0_9 = arith.constant 0 : index
    %9 = vector.load %arg5[%c0_8, %c0_9] : memref<32x256xf32, #tpu.memory_space<vmem>>, vector<32x256xf32>
    %10 = arith.addf %7, %9 : vector<32x256xf32>
    %c0_10 = arith.constant 0 : index
    %c0_11 = arith.constant 0 : index
    %11 = vector.load %arg4[%c0_10, %c0_11] : memref<32x256xf32, #tpu.memory_space<vmem>>, vector<32x256xf32>
    %12 = arith.mulf %10, %11 : vector<32x256xf32>
    %13 = arith.negf %7 : vector<32x256xf32>
    %14 = math.exp %13 : vector<32x256xf32>
    %cst_12 = arith.constant 1.000000e+00 : f32
    %15 = vector.broadcast %cst_12 : f32 to vector<32x256xf32>
    %16 = arith.addf %15, %14 : vector<32x256xf32>
    %17 = arith.divf %15, %16 : vector<32x256xf32>
    %18 = arith.mulf %12, %17 : vector<32x256xf32>
    %cst_13 = arith.constant 0.000000e+00 : f32
    %19 = vector.broadcast %cst_13 : f32 to vector<32x256xf32>
    %20 = arith.maximumf %18, %19 : vector<32x256xf32>
    %c0_14 = arith.constant 0 : index
    %c0_15 = arith.constant 0 : index
    %21 = vector.load %arg7[%c0_14, %c0_15] : memref<32x256xf32, #tpu.memory_space<vmem>>, vector<32x256xf32>
    tpu.vector_store %arg7[%c0_14, %c0_15], %20 {strides = array<i32>} : memref<32x256xf32, #tpu.memory_space<vmem>>, vector<32x256xf32>,
    return
  }
  func.func @transform_0(%arg0: i32) -> (i32, i32) {
    %c0_i32 = arith.constant 0 : i32
    %c0_i32_0 = arith.constant 0 : i32
    %c0_i32_1 = arith.constant 0 : i32
    return %c0_i32, %c0_i32_0 : i32, i32
  }
  func.func @transform_1(%arg0: i32) -> (i32, i32) {
    %c0_i32 = arith.constant 0 : i32
    %c0_i32_0 = arith.constant 0 : i32
    return %c0_i32, %arg0 : i32, i32
  }
  func.func @transform_2(%arg0: i32) -> (i32, i32) {
    %c0_i32 = arith.constant 0 : i32
    %c0_i32_0 = arith.constant 0 : i32
    %c0_i32_1 = arith.constant 0 : i32
    return %c0_i32, %c0_i32_0 : i32, i32
  }
  func.func @transform_3(%arg0: i32) -> (i32, i32) {
    %c0_i32 = arith.constant 0 : i32
    %c0_i32_0 = arith.constant 0 : i32
    return %c0_i32, %arg0 : i32, i32
  }
  func.func @transform_4(%arg0: i32) -> (i32, i32) {
    %c0_i32 = arith.constant 0 : i32
    %c0_i32_0 = arith.constant 0 : i32
    return %c0_i32, %arg0 : i32, i32
  }
  func.func @transform_5(%arg0: i32) -> (i32, i32) {
    %c0_i32 = arith.constant 0 : i32
    %c0_i32_0 = arith.constant 0 : i32
    return %c0_i32, %arg0 : i32, i32
  }
  func.func @transform_6(%arg0: i32) -> (i32, i32) {
    %c0_i32 = arith.constant 0 : i32
    %c0_i32_0 = arith.constant 0 : i32
    return %c0_i32, %arg0 : i32, i32
  }
}

module attributes {stable_mosaic.version = 11 : i64} {
  func.func @_final_kernel(%arg0: i32, %arg1: i32, %arg2: memref<1x1x64xbf16, #tpu.memory_space<vmem>>, %arg3: memref<1x64x256xbf16, #tpu.memory_space<vmem>>, %arg4: memref<1x1x1xf32, #tpu.memory_space<vmem>>, %arg5: memref<1x1x256xf32, #tpu.memory_space<vmem>>) attributes {dimension_semantics = [#tpu.dimension_semantics<parallel>, #tpu.dimension_semantics<parallel>], iteration_bounds = array<i64: 2, 2>, scalar_prefetch = 0 : i64, scratch_operands = 0 : i64, tpu.core_type = #tpu.core_type<tc>, window_params = [{transform_indices = @transform_0, window_bounds = array<i64: 1, 1, 64>}, {transform_indices = @transform_1, window_bounds = array<i64: 1, 64, 256>}, {transform_indices = @transform_2, window_bounds = array<i64: 1, 1, 1>}, {transform_indices = @transform_3, window_bounds = array<i64: 1, 1, 256>}]} {
    %c0 = arith.constant 0 : index
    %c0_0 = arith.constant 0 : index
    %c0_1 = arith.constant 0 : index
    %0 = vector.load %arg2[%c0, %c0_0, %c0_1] : memref<1x1x64xbf16, #tpu.memory_space<vmem>>, vector<1x1x64xbf16>
    %1 = vector.shape_cast %0 : vector<1x1x64xbf16> to vector<1x64xbf16>
    %c0_2 = arith.constant 0 : index
    %c0_3 = arith.constant 0 : index
    %c0_4 = arith.constant 0 : index
    %2 = vector.load %arg3[%c0_2, %c0_3, %c0_4] : memref<1x64x256xbf16, #tpu.memory_space<vmem>>, vector<1x64x256xbf16>
    %3 = vector.shape_cast %2 : vector<1x64x256xbf16> to vector<64x256xbf16>
    %cst = arith.constant dense<0.000000e+00> : vector<1x256xf32>
    %4 = tpu.matmul %1, %3, %cst {dimension_numbers = #tpu.dot_dimension_numbers<[1], [0], [0], [1], [0, 0, 1, 1], [], []>} : vector<1x64xbf16>, vector<64x256xbf16>, vector<1x256xf32> -> vector<1x256xf32>
    %c0_5 = arith.constant 0 : index
    %c0_6 = arith.constant 0 : index
    %c0_7 = arith.constant 0 : index
    %5 = vector.load %arg4[%c0_5, %c0_6, %c0_7] : memref<1x1x1xf32, #tpu.memory_space<vmem>>, vector<1x1x1xf32>
    %6 = vector.shape_cast %5 : vector<1x1x1xf32> to vector<1x1xf32>
    %7 = vector.broadcast %6 : vector<1x1xf32> to vector<1x256xf32>
    %8 = arith.addf %4, %7 : vector<1x256xf32>
    %c0_8 = arith.constant 0 : index
    %c0_9 = arith.constant 0 : index
    %c0_10 = arith.constant 0 : index
    %9 = vector.load %arg5[%c0_8, %c0_9, %c0_10] : memref<1x1x256xf32, #tpu.memory_space<vmem>>, vector<1x1x256xf32>
    %10 = vector.shape_cast %9 : vector<1x1x256xf32> to vector<1x256xf32>
    %11 = vector.shape_cast %8 : vector<1x256xf32> to vector<1x1x256xf32>
    tpu.vector_store %arg5[%c0_8, %c0_9, %c0_10], %11 {strides = array<i32>} : memref<1x1x256xf32, #tpu.memory_space<vmem>>, vector<1x1x256xf32>,
    return
  }
  func.func @transform_0(%arg0: i32, %arg1: i32) -> (i32, i32, i32) {
    %c0_i32 = arith.constant 0 : i32
    %c0_i32_0 = arith.constant 0 : i32
    %c0_i32_1 = arith.constant 0 : i32
    return %arg0, %c0_i32, %c0_i32_0 : i32, i32, i32
  }
  func.func @transform_1(%arg0: i32, %arg1: i32) -> (i32, i32, i32) {
    %c0_i32 = arith.constant 0 : i32
    %c0_i32_0 = arith.constant 0 : i32
    return %arg0, %c0_i32, %arg1 : i32, i32, i32
  }
  func.func @transform_2(%arg0: i32, %arg1: i32) -> (i32, i32, i32) {
    %c0_i32 = arith.constant 0 : i32
    %c0_i32_0 = arith.constant 0 : i32
    %c0_i32_1 = arith.constant 0 : i32
    return %arg0, %c0_i32, %c0_i32_0 : i32, i32, i32
  }
  func.func @transform_3(%arg0: i32, %arg1: i32) -> (i32, i32, i32) {
    %c0_i32 = arith.constant 0 : i32
    %c0_i32_0 = arith.constant 0 : i32
    return %arg0, %c0_i32, %arg1 : i32, i32, i32
  }
}

module attributes {stable_mosaic.version = 11 : i64} {
  func.func @_edge_kernel(%arg0: i32, %arg1: memref<2x33x65xf32, #tpu.memory_space<vmem>>, %arg2: memref<2x32x64xf32, #tpu.memory_space<vmem>>) attributes {dimension_semantics = [#tpu.dimension_semantics<arbitrary>], iteration_bounds = array<i64: 1>, scalar_prefetch = 0 : i64, scratch_operands = 0 : i64, tpu.core_type = #tpu.core_type<tc>, window_params = [{pipeline_mode = #tpu.pipeline_mode<synchronous>, transform_indices = @transform_0, window_bounds = array<i64: 2, 33, 65>}, {pipeline_mode = #tpu.pipeline_mode<synchronous>, transform_indices = @transform_1, window_bounds = array<i64: 2, 32, 64>}]} {
    %c0 = arith.constant 0 : index
    %c0_0 = arith.constant 0 : index
    %c0_1 = arith.constant 0 : index
    %0 = vector.load %arg1[%c0, %c0_0, %c0_1] : memref<2x33x65xf32, #tpu.memory_space<vmem>>, vector<2x32x64xf32>
    %c0_2 = arith.constant 0 : index
    %c0_3 = arith.constant 0 : index
    %c1 = arith.constant 1 : index
    %1 = vector.load %arg1[%c0_2, %c0_3, %c1] : memref<2x33x65xf32, #tpu.memory_space<vmem>>, vector<2x32x64xf32>
    %c0_4 = arith.constant 0 : index
    %c1_5 = arith.constant 1 : index
    %c0_6 = arith.constant 0 : index
    %2 = vector.load %arg1[%c0_4, %c1_5, %c0_6] : memref<2x33x65xf32, #tpu.memory_space<vmem>>, vector<2x32x64xf32>
    %c0_7 = arith.constant 0 : index
    %c1_8 = arith.constant 1 : index
    %c1_9 = arith.constant 1 : index
    %3 = vector.load %arg1[%c0_7, %c1_8, %c1_9] : memref<2x33x65xf32, #tpu.memory_space<vmem>>, vector<2x32x64xf32>
    %4 = arith.maximumf %0, %1 : vector<2x32x64xf32>
    %5 = arith.maximumf %2, %3 : vector<2x32x64xf32>
    %6 = arith.maximumf %4, %5 : vector<2x32x64xf32>
    %7 = arith.minimumf %0, %1 : vector<2x32x64xf32>
    %8 = arith.minimumf %2, %3 : vector<2x32x64xf32>
    %9 = arith.minimumf %7, %8 : vector<2x32x64xf32>
    %10 = arith.subf %6, %9 : vector<2x32x64xf32>
    %c0_10 = arith.constant 0 : index
    %c0_11 = arith.constant 0 : index
    %c0_12 = arith.constant 0 : index
    %11 = vector.load %arg2[%c0_10, %c0_11, %c0_12] : memref<2x32x64xf32, #tpu.memory_space<vmem>>, vector<2x32x64xf32>
    tpu.vector_store %arg2[%c0_10, %c0_11, %c0_12], %10 {strides = array<i32>} : memref<2x32x64xf32, #tpu.memory_space<vmem>>, vector<2x32x64xf32>,
    return
  }
  func.func @transform_0(%arg0: i32) -> (i32, i32, i32) {
    %c0_i32 = arith.constant 0 : i32
    %c0_i32_0 = arith.constant 0 : i32
    %c0_i32_1 = arith.constant 0 : i32
    %c0_i32_2 = arith.constant 0 : i32
    return %c0_i32, %c0_i32_0, %c0_i32_1 : i32, i32, i32
  }
  func.func @transform_1(%arg0: i32) -> (i32, i32, i32) {
    %c0_i32 = arith.constant 0 : i32
    %c0_i32_0 = arith.constant 0 : i32
    %c0_i32_1 = arith.constant 0 : i32
    %c0_i32_2 = arith.constant 0 : i32
    return %c0_i32, %c0_i32_0, %c0_i32_1 : i32, i32, i32
  }
}

</mosaic_0001>

<bundles_post_ra>
// kernel: fl2d_forward.30
= control target key start
LH: loop header
LB: loop body
LE: loop exit
PB: predicated region body
PF: predicated region fallthrough
CT: control target
= control target key end

     0   :  { %s587_s18 = smov 0   ;;  %s589_s19 = smov 0   ;;  %s697_s0 = inlined_call_operand.vmem [shape: bf16[32,1], index: 0, kind: input, shape index: {}]   ;;  %s698_s1 = inlined_call_operand.vmem [shape: bf16[1,1024], index: 1, kind: input, shape index: {}]   ;;  %s699_s2 = inlined_call_operand.vmem [shape: f32[32,1], index: 2, kind: input, shape index: {}]   ;;  %s700_s3 = inlined_call_operand.vmem [shape: f32[32,1], index: 3, kind: input, shape index: {}]   ;;  %s701_s4 = inlined_call_operand.vmem [shape: f32[32,1], index: 4, kind: input, shape index: {}]   ;;  %s702_s5 = inlined_call_operand.vmem [shape: f32[32,1024], index: 5, kind: output, shape index: {}]  }
   0x1   :  { %s591_s20 = smov 0  }
   0x2 LB: > { %s600_s21 = sadd.s32 4294967295, %s554_s20   ;;  %s602_s22 = sadd.s32 1, %s554_s20   ;;  %s554_s20 = sphi %s591_s20, %s706_s20   ;;  %s550_s19 = sphi %s589_s19, %s705_s19   ;;  %s546_s18 = sphi %s587_s18, %s704_s18  }
   0x3   : > { %s129_s23 = ssub.s32 %s554_s20, %s602_s22  ;;  %s132_s24 = sadd.s32 1, %s550_s19 }
   0x4   : > { %p130_p0 = scmp.eq.s32.totalorder %s129_s23, 0  ;;  %p142_p1 = scmp.ne.s32.totalorder %s550_s19, %s546_s18 }
   0x5   : > { %p143_p2 = scmp.eq.s32.totalorder %s600_s21, 3  ;;  %p479_p3 = scmp.ge.s32.totalorder %s554_s20, 1 }
   0x6   : > { %s610_s25 = scalar_select %p130_p0, %s550_s19, %s132_s24  }
   0x7   : > { %p612_p4 = por %p143_p2, %p142_p1  ;;  %p187_p5 = scmp.lt.s32.totalorder %s554_s20, 5 }
   0x9   : > { %p188_p6 = pnand %p479_p3, %p187_p5 }
   0xa   : > { %s481_s6 = sshll.u32 (!%p188_p6), %s600_s21, 1  ;;  %s210_s15 = sand.u32 (!%p188_p6), 1, %s546_s18  }
   0xb   : > { %191 = sbr.rel (%p188_p6) target bundleno = 188 (0xbc), region = 40  ;;  %p214_p7 = scmp.lt.s32.totalorder (!%p188_p6), %s481_s6, 7 }
   0xc   : > { %s480_s16 = sshll.u32 (!%p188_p6), %s210_s15, 6 }
   0xd   : > { %s663_s17 = scalar_lea.vmem (!%p188_p6), [#allocation2], %s480_s16 }
  0x10   : > { %v227_v0 = vld [vmem:[%s699_s2 + $0x10] sm:$0xff]  ;;  %v225_v1 = vld [vmem:[%s699_s2] sm:$0xff]  ;;  %v556_v2 = vmov 0   ;;  %s708_s6 = smov (!%p214_p7, %s481_s6), 7  ;;  %v228_v5 = vld [vmem:[%s699_s2 + $0x18] sm:$0xff]  ;;  %vm270_vm0 = vcmask 1040384  }
  0x11   : > { %530 = vset.pattern.permute.xlu1 %v556_v2  ;;  %529 = vset.pattern.permute.xlu0 %v556_v2  ;;  %v315_v3 = vld [vmem:[%s700_s3] sm:$0xff]  ;;  %s216_s11 = scalar_lea.vmem %s698_s1, %s708_s6  ;;  %v226_v6 = vld [vmem:[%s699_s2 + $0x8] sm:$0xff]  ;;  %v272_v8 = vsel %vm270_vm0, 65535, %v556_v2  ;;  %v318_v13 = vld [vmem:[%s700_s3 + $0x18] sm:$0xff]  ;;  %vm263_vm1 = vcmask 7168   ;;  %s501_s18 = sshll.u32 (%p612_p4), %s600_s21, 4 }
  0x12   : > { %241 = vperm.xlu1 %530, %v227_v0   ;;  %231 = vperm.xlu0 %529, %v225_v1   ;;  %v224_v4 = vld [vmem:[%s216_s11] sm:$0x3]  ;;  %v316_v7 = vld [vmem:[%s700_s3 + $0x8] sm:$0xff]  ;;  %v317_v14 = vld [vmem:[%s700_s3 + $0x10] sm:$0xff]  ;;  %s396_s24 = scalar_lea.vmem (%p612_p4), %s702_s5, %s501_s18 }
  0x13   : > { %531 = vset.pattern.permute.xlu2 %v556_v2  ;;  %260 = vst [vmem:[#allocation1] ss:$9 sm:$0xff] %v224_v4  ;;  %v499_v15 = vld [vmem:[%s697_s0] sm:$0xff]  ;;  %v500_v16 = vld [vmem:[%s697_s0 + $0x8] sm:$0xff]  ;;  %v349_v18 = vld [vmem:[%s701_s4 + $0x10] sm:$0xff] }
  0x14   : > { %321 = vperm.xlu2 %531, %v315_v3   ;;  %v347_v17 = vld [vmem:[%s701_s4] sm:$0xff]  ;;  %v348_v19 = vld [vmem:[%s701_s4 + $0x8] sm:$0xff]  ;;  %v350_v20 = vld [vmem:[%s701_s4 + $0x18] sm:$0xff] }
  0x1a   : > { %246 = vperm.xlu1 %530, %v228_v5   ;;  %236 = vperm.xlu0 %529, %v226_v6   ;;  %v261_v9 = vld [vmem:[#allocation1] sm:$0xff]  ;;  %v262_v10 = vld [vmem:[#allocation1 + $0x9] sm:$0xff] }
  0x1b   : > { %v273_v11 = vand.u32 %v272_v8, %v261_v9  ;;  %v275_v12 = vand.u32 %v272_v8, %v262_v10 }
  0x1c   : > { %326 = vperm.xlu2 %531, %v316_v7  }
  0x1d   : > { %284 = vmatpush.bf16.msra.mxu0 %v273_v11  ;;  %502 = vmatpush.bf16.msra.mxu2 %v273_v11 }
  0x1e   : > { %303 = vmatpush.bf16.msra.mxu1 %v275_v12  ;;  %503 = vmatpush.bf16.msra.mxu3 %v275_v12 }
  0x20   : > { %490 = vmatmul.msk.bf16.vlgmr.msra.gmra.mxu0 %vm263_vm1, %v499_v15  ;;  %491 = vmatmul.msk.bf16.vlgmr.msra.gmra.mxu2 %vm263_vm1, %v500_v16 }
  0x21   : > { %492 = vmatmul.msk.bf16.vlgmr.msra.gmra.mxu1 %vm263_vm1, %v499_v15  ;;  %493 = vmatmul.msk.bf16.vlgmr.msra.gmra.mxu3 %vm263_vm1, %v500_v16 }
  0x22   : > { %336 = vperm.xlu1 %530, %v318_v13   ;;  %331 = vperm.xlu0 %529, %v317_v14  }
  0x24   : > { %353 = vperm.xlu2 %531, %v347_v17  }
  0x2a   : > { %363 = vperm.xlu1 %530, %v349_v18   ;;  %358 = vperm.xlu0 %529, %v348_v19  }
  0x2c   : > { %368 = vperm.xlu2 %531, %v350_v20  }
  0x6e   : > { %v322_v23 = vpop.permute.xlu2 %321 }
  0x76   : > { %v327_v26 = vpop.permute.xlu2 %326 }
  0x7e   : > { %v354_v34 = vpop.permute.xlu2 %353 }
  0x84   : > { %v242_v21 = vpop.permute.xlu1 %241  ;;  %v232_v22 = vpop.permute.xlu0 %231 }
  0x86   : > { %v369_v61 = vpop.permute.xlu2 %368 }
  0x8c   : > { %v247_v24 = vpop.permute.xlu1 %246  ;;  %v237_v25 = vpop.permute.xlu0 %236 }
  0x94   : > { %v337_v27 = vpop.permute.xlu1 %336  ;;  %v332_v31 = vpop.permute.xlu0 %331 }
  0x9c   : > { %v364_v46 = vpop.permute.xlu1 %363  ;;  %v359_v51 = vpop.permute.xlu0 %358 }
  0x9d   : > { %v286_v28 = vpop.f32.mrf.mxu0 }
  0x9e   : > { %v287_v29 = vadd.f32 %v286_v28, %v232_v22  ;;  %v305_v30 = vpop.f32.mrf.mxu1 }
  0x9f   : > { %v306_v32 = vadd.f32 %v305_v30, %v232_v22 }
  0xa0   : > { %v339_v33 = vmul.f32 %v322_v23, %v287_v29 }
  0xa1   : > { %v340_v35 = vmul.f32 %v322_v23, %v306_v32 }
  0xa2   : > { %v371_v36 = vadd.f32 %v354_v34, %v339_v33 }
  0xa3   : > { %v372_v37 = vadd.f32 %v354_v34, %v340_v35  ;;  %v291_v38 = vpop.f32.mrf.mxu2 }
  0xa4   : > { %379 = vst [vmem:[%s663_s17] sm:$0xff] %v371_v36  ;;  %v292_v39 = vadd.f32 %v291_v38, %v242_v21  ;;  %v310_v40 = vpop.f32.mrf.mxu3 }
  0xa5   : > { %380 = vst [vmem:[%s663_s17 + $0x8] sm:$0xff] %v372_v37  ;;  %v311_v41 = vadd.f32 %v310_v40, %v242_v21  ;;  %v288_v42 = vpop.f32.mrf.mxu0 }
  0xa6   : > { %v343_v43 = vmul.f32 %v332_v31, %v292_v39  ;;  %v289_v44 = vadd.f32 %v288_v42, %v237_v25  ;;  %v307_v45 = vpop.f32.mrf.mxu1 }
  0xa7   : > { %v344_v47 = vmul.f32 %v332_v31, %v311_v41  ;;  %v308_v48 = vadd.f32 %v307_v45, %v237_v25 }
  0xa8   : > { %v375_v49 = vadd.f32 %v364_v46, %v343_v43  ;;  %v341_v50 = vmul.f32 %v327_v26, %v289_v44 }
  0xa9   : > { %v376_v52 = vadd.f32 %v364_v46, %v344_v47  ;;  %v342_v53 = vmul.f32 %v327_v26, %v308_v48 }
  0xaa   : > { %383 = vst [vmem:[%s663_s17 + $0x20] sm:$0xff] %v375_v49  ;;  %v373_v54 = vadd.f32 %v359_v51, %v341_v50 }
  0xab   : > { %384 = vst [vmem:[%s663_s17 + $0x28] sm:$0xff] %v376_v52  ;;  %v374_v55 = vadd.f32 %v359_v51, %v342_v53  ;;  %v293_v56 = vpop.f32.mrf.mxu2  ;;  %v409_v1 = vld [vmem:[%s663_s17] sm:$0xff] (%p612_p4) }
  0xac   : > { %381 = vst [vmem:[%s663_s17 + $0x10] sm:$0xff] %v373_v54  ;;  %v294_v57 = vadd.f32 %v293_v56, %v247_v24  ;;  %v312_v58 = vpop.f32.mrf.mxu3  ;;  %v411_v2 = vld [vmem:[%s663_s17 + $0x8] sm:$0xff] (%p612_p4) }
  0xad   : > { %382 = vst [vmem:[%s663_s17 + $0x18] sm:$0xff] %v374_v55  ;;  %v313_v59 = vadd.f32 %v312_v58, %v247_v24 }
  0xae   : > { %v345_v60 = vmul.f32 %v337_v27, %v294_v57  ;;  %410 = vst [vmem:[%s396_s24] sm:$0xff] (%p612_p4), %v409_v1 }
  0xaf   : > { %v346_v62 = vmul.f32 %v337_v27, %v313_v59  ;;  %393 = sbr.rel (!%p612_p4) target bundleno = 188 (0xbc), region = 44  ;;  %412 = vst [vmem:[%s396_s24 + $0x8] sm:$0xff] (%p612_p4), %v411_v2 }
  0xb0   : > { %v377_v63 = vadd.f32 %v369_v61, %v345_v60 }
  0xb1   : > { %v378_v0 = vadd.f32 %v369_v61, %v346_v62  ;;  %v417_v5 = vld [vmem:[%s663_s17 + $0x20] sm:$0xff] (%p612_p4) }
  0xb2   : > { %385 = vst [vmem:[%s663_s17 + $0x30] sm:$0xff] %v377_v63  ;;  %v419_v6 = vld [vmem:[%s663_s17 + $0x28] sm:$0xff] (%p612_p4) }
  0xb3   : > { %386 = vst [vmem:[%s663_s17 + $0x38] sm:$0xff] %v378_v0  ;;  %v413_v3 = vld [vmem:[%s663_s17 + $0x10] sm:$0xff] (%p612_p4) }
  0xb4   : > { %v415_v4 = vld [vmem:[%s663_s17 + $0x18] sm:$0xff]  ;;  %414 = vst [vmem:[%s396_s24 + $0x40] sm:$0xff] %v413_v3 }
  0xb5   : > { %416 = vst [vmem:[%s396_s24 + $0x48] sm:$0xff] %v415_v4 }
  0xb6   : > { %418 = vst [vmem:[%s396_s24 + $0x80] sm:$0xff] %v417_v5 }
  0xb7   : > { %420 = vst [vmem:[%s396_s24 + $0x88] sm:$0xff] %v419_v6 }
  0xb9   : > { %v421_v7 = vld [vmem:[%s663_s17 + $0x30] sm:$0xff] }
  0xba   : > { %v423_v8 = vld [vmem:[%s663_s17 + $0x38] sm:$0xff]  ;;  %422 = vst [vmem:[%s396_s24 + $0xc0] sm:$0xff] %v421_v7 }
  0xbb   : > { %424 = vst [vmem:[%s396_s24 + $0xc8] sm:$0xff] %v423_v8 }
  0xbc PF: > { %p12_p8 = scmp.ge.s32.totalorder %s602_s22, 6   ;;  %s704_s18 = smov %s550_s19 }
  0xbd   : > { %s705_s19 = smov %s610_s25  ;;  %s706_s20 = smov %s602_s22 }
  0xbe   :  { %14 = sbr.rel (!%p12_p8) target bundleno = 2 (0x2), region = 93 }

// kernel: fl2d_forward.40
= control target key start
LH: loop header
LB: loop body
LE: loop exit
PB: predicated region body
PF: predicated region fallthrough
CT: control target
= control target key end

     0   :  { %s1589_s18 = smov 0   ;;  %s1591_s19 = smov 0   ;;  %s2093_s0 = inlined_call_operand.vmem [shape: bf16[64,288], index: 0, kind: input, shape index: {}]   ;;  %s2094_s1 = inlined_call_operand.vmem [shape: bf16[288,512], index: 1, kind: input, shape index: {}]   ;;  %s2095_s2 = inlined_call_operand.vmem [shape: f32[64,1], index: 2, kind: input, shape index: {}]   ;;  %s2096_s3 = inlined_call_operand.vmem [shape: f32[64,1], index: 3, kind: input, shape index: {}]   ;;  %s2097_s4 = inlined_call_operand.vmem [shape: f32[64,1], index: 4, kind: input, shape index: {}]   ;;  %s2098_s5 = inlined_call_operand.vmem [shape: f32[64,512], index: 5, kind: output, shape index: {}]  }
   0x1   :  { %s1593_s20 = smov 0  }
   0x2 LB: > { %s1231_s21 = sadd.s32 4294967295, %s1556_s20   ;;  %s1606_s22 = sadd.s32 1, %s1556_s20   ;;  %s1556_s20 = sphi %s1593_s20, %s2102_s20   ;;  %s1552_s19 = sphi %s1591_s19, %s2101_s19   ;;  %s1548_s18 = sphi %s1589_s18, %s2100_s18  }
   0x3   : > { %s40_s23 = ssub.s32 %s1556_s20, %s1606_s22  ;;  %s43_s24 = sadd.s32 1, %s1552_s19 }
   0x4   : > { %p41_p0 = scmp.eq.s32.totalorder %s40_s23, 0  ;;  %p50_p1 = scmp.ne.s32.totalorder %s1552_s19, %s1548_s18 }
   0x5   : > { %p51_p2 = scmp.eq.s32.totalorder %s1556_s20, 0  ;;  %p143_p3 = scmp.eq.s32.totalorder %s1231_s21, 1 }
   0x6   : > { %s1617_s25 = scalar_select %p41_p0, %s1552_s19, %s43_s24  }
   0x7   : > { %p52_p4 = por %p51_p2, %p50_p1  ;;  %p1619_p5 = por %p143_p3, %p50_p1 }
   0x8   : > { %p1234_p6 = scmp.ge.s32.totalorder %s1556_s20, 2 }
   0xa   : > { %177 = sbr.rel (%p1234_p6) target bundleno = 55 (0x37), region = 32 }
   0xf   : > { %180 = sbr.rel (!%p52_p4) target bundleno = 55 (0x37), region = 36  ;;  %s182_s27 = sand.u32 (%p52_p4), 1, %s1552_s19  }
  0x10   : > { %s1444_s28 = sshll.u32 (%p52_p4), %s1556_s20, 3  ;;  %s1504_s29 = smul.u32 (%p52_p4), 288, %s182_s27 }
  0x11   : > { %s1629_s7 = scalar_lea.vmem (%p52_p4), %s2094_s1, %s1444_s28 }
  0x12   : > { %v286_v0 = vld [vmem:[%s1629_s7] sm:$0xff] (%p52_p4)  ;;  %v288_v1 = vld [vmem:[%s1629_s7 + $0x10] sm:$0xff] (%p52_p4)  ;;  %s1634_s8 = scalar_lea.vmem (%p52_p4), [#allocation2], %s1504_s29 }
  0x13   : > { %v290_v2 = vld [vmem:[%s1629_s7 + $0x20] sm:$0xff] (%p52_p4)  ;;  %287 = vst [vmem:[%s1634_s8] sm:$0xff] (%p52_p4), %v286_v0  ;;  %v292_v3 = vld [vmem:[%s1629_s7 + $0x30] sm:$0xff] (%p52_p4) }
  0x14   : > { %289 = vst [vmem:[%s1634_s8 + $0x8] sm:$0xff] %v288_v1  ;;  %v294_v4 = vld [vmem:[%s1629_s7 + $0x40] sm:$0xff]  ;;  %v296_v5 = vld [vmem:[%s1629_s7 + $0x50] sm:$0xff] }
  0x15   : > { %291 = vst [vmem:[%s1634_s8 + $0x10] sm:$0xff] %v290_v2  ;;  %v298_v6 = vld [vmem:[%s1629_s7 + $0x60] sm:$0xff]  ;;  %v300_v7 = vld [vmem:[%s1629_s7 + $0x70] sm:$0xff] }
  0x16   : > { %293 = vst [vmem:[%s1634_s8 + $0x18] sm:$0xff] %v292_v3  ;;  %v302_v8 = vld [vmem:[%s1629_s7 + $0x80] sm:$0xff]  ;;  %v304_v9 = vld [vmem:[%s1629_s7 + $0x90] sm:$0xff] }
  0x17   : > { %295 = vst [vmem:[%s1634_s8 + $0x20] sm:$0xff] %v294_v4  ;;  %v306_v10 = vld [vmem:[%s1629_s7 + $0xa0] sm:$0xff]  ;;  %v308_v11 = vld [vmem:[%s1629_s7 + $0xb0] sm:$0xff] }
  0x18   : > { %297 = vst [vmem:[%s1634_s8 + $0x28] sm:$0xff] %v296_v5  ;;  %v310_v12 = vld [vmem:[%s1629_s7 + $0xc0] sm:$0xff]  ;;  %v312_v13 = vld [vmem:[%s1629_s7 + $0xd0] sm:$0xff] }
  0x19   : > { %299 = vst [vmem:[%s1634_s8 + $0x30] sm:$0xff] %v298_v6  ;;  %v314_v14 = vld [vmem:[%s1629_s7 + $0xe0] sm:$0xff]  ;;  %v316_v15 = vld [vmem:[%s1629_s7 + $0xf0] sm:$0xff] }
  0x1a   : > { %301 = vst [vmem:[%s1634_s8 + $0x38] sm:$0xff] %v300_v7  ;;  %v318_v16 = vld [vmem:[%s1629_s7 + $0x100] sm:$0xff]  ;;  %v320_v17 = vld [vmem:[%s1629_s7 + $0x110] sm:$0xff] }
  0x1b   : > { %303 = vst [vmem:[%s1634_s8 + $0x40] sm:$0xff] %v302_v8  ;;  %v322_v18 = vld [vmem:[%s1629_s7 + $0x120] sm:$0xff]  ;;  %v324_v19 = vld [vmem:[%s1629_s7 + $0x130] sm:$0xff] }
  0x1c   : > { %305 = vst [vmem:[%s1634_s8 + $0x48] sm:$0xff] %v304_v9  ;;  %v326_v20 = vld [vmem:[%s1629_s7 + $0x140] sm:$0xff]  ;;  %v328_v21 = vld [vmem:[%s1629_s7 + $0x150] sm:$0xff] }
  0x1d   : > { %307 = vst [vmem:[%s1634_s8 + $0x50] sm:$0xff] %v306_v10  ;;  %v330_v22 = vld [vmem:[%s1629_s7 + $0x160] sm:$0xff]  ;;  %v332_v23 = vld [vmem:[%s1629_s7 + $0x170] sm:$0xff] }
  0x1e   : > { %309 = vst [vmem:[%s1634_s8 + $0x58] sm:$0xff] %v308_v11  ;;  %v334_v24 = vld [vmem:[%s1629_s7 + $0x180] sm:$0xff]  ;;  %v336_v25 = vld [vmem:[%s1629_s7 + $0x190] sm:$0xff] }
  0x1f   : > { %311 = vst [vmem:[%s1634_s8 + $0x60] sm:$0xff] %v310_v12  ;;  %v338_v26 = vld [vmem:[%s1629_s7 + $0x1a0] sm:$0xff]  ;;  %v340_v27 = vld [vmem:[%s1629_s7 + $0x1b0] sm:$0xff] }
  0x20   : > { %313 = vst [vmem:[%s1634_s8 + $0x68] sm:$0xff] %v312_v13  ;;  %v342_v28 = vld [vmem:[%s1629_s7 + $0x1c0] sm:$0xff]  ;;  %v344_v29 = vld [vmem:[%s1629_s7 + $0x1d0] sm:$0xff] }
  0x21   : > { %315 = vst [vmem:[%s1634_s8 + $0x70] sm:$0xff] %v314_v14  ;;  %v346_v30 = vld [vmem:[%s1629_s7 + $0x1e0] sm:$0xff]  ;;  %v348_v31 = vld [vmem:[%s1629_s7 + $0x1f0] sm:$0xff] }
  0x22   : > { %317 = vst [vmem:[%s1634_s8 + $0x78] sm:$0xff] %v316_v15  ;;  %v350_v32 = vld [vmem:[%s1629_s7 + $0x200] sm:$0xff]  ;;  %v352_v33 = vld [vmem:[%s1629_s7 + $0x210] sm:$0xff] }
  0x23   : > { %319 = vst [vmem:[%s1634_s8 + $0x80] sm:$0xff] %v318_v16  ;;  %v354_v34 = vld [vmem:[%s1629_s7 + $0x220] sm:$0xff]  ;;  %v356_v35 = vld [vmem:[%s1629_s7 + $0x230] sm:$0xff] }
  0x24   : > { %321 = vst [vmem:[%s1634_s8 + $0x88] sm:$0xff] %v320_v17 }
  0x25   : > { %323 = vst [vmem:[%s1634_s8 + $0x90] sm:$0xff] %v322_v18 }
  0x26   : > { %325 = vst [vmem:[%s1634_s8 + $0x98] sm:$0xff] %v324_v19 }
  0x27   : > { %327 = vst [vmem:[%s1634_s8 + $0xa0] sm:$0xff] %v326_v20 }
  0x28   : > { %329 = vst [vmem:[%s1634_s8 + $0xa8] sm:$0xff] %v328_v21 }
  0x29   : > { %331 = vst [vmem:[%s1634_s8 + $0xb0] sm:$0xff] %v330_v22 }
  0x2a   : > { %333 = vst [vmem:[%s1634_s8 + $0xb8] sm:$0xff] %v332_v23 }
  0x2b   : > { %335 = vst [vmem:[%s1634_s8 + $0xc0] sm:$0xff] %v334_v24 }
  0x2c   : > { %337 = vst [vmem:[%s1634_s8 + $0xc8] sm:$0xff] %v336_v25 }
  0x2d   : > { %339 = vst [vmem:[%s1634_s8 + $0xd0] sm:$0xff] %v338_v26 }
  0x2e   : > { %341 = vst [vmem:[%s1634_s8 + $0xd8] sm:$0xff] %v340_v27 }
  0x2f   : > { %343 = vst [vmem:[%s1634_s8 + $0xe0] sm:$0xff] %v342_v28 }
  0x30   : > { %345 = vst [vmem:[%s1634_s8 + $0xe8] sm:$0xff] %v344_v29 }
  0x31   : > { %347 = vst [vmem:[%s1634_s8 + $0xf0] sm:$0xff] %v346_v30 }
  0x32   : > { %349 = vst [vmem:[%s1634_s8 + $0xf8] sm:$0xff] %v348_v31 }
  0x33   : > { %351 = vst [vmem:[%s1634_s8 + $0x100] sm:$0xff] %v350_v32 }
  0x34   : > { %353 = vst [vmem:[%s1634_s8 + $0x108] sm:$0xff] %v352_v33 }
  0x35   : > { %355 = vst [vmem:[%s1634_s8 + $0x110] sm:$0xff] %v354_v34 }
  0x36   : > { %357 = vst [vmem:[%s1634_s8 + $0x118] sm:$0xff] %v356_v35 }
  0x37 PF: > { %p1237_p7 = scmp.ge.s32.totalorder %s1556_s20, 1  ;;  %p362_p8 = scmp.lt.s32.totalorder %s1556_s20, 3 }
  0x39   : > { %p363_p9 = pnand %p1237_p7, %p362_p8 }
  0x3a   : > { %s369_s9 = sand.u32 (!%p363_p9), 1, %s1548_s18  }
  0x3b   : > { %366 = sbr.rel (%p363_p9) target bundleno = 334 (0x14e), region = 74  ;;  %s1238_s8 = sshll.u32 (!%p363_p9), %s369_s9, 7 }
  0x3c   : > { %s1505_s10 = smul.u32 (!%p363_p9), 288, %s369_s9 }
  0x3e   : > { %s1716_s15 = scalar_lea.vmem (!%p363_p9), [#allocation2], %s1505_s10  ;;  %s2004_s10 = scalar_lea.vmem (!%p363_p9), [#allocation3], %s1238_s8 }
  0x40   : > { %v1558_v36 = vmov 0   ;;  %v452_v37 = vld [vmem:[%s2095_s2 + $0x10] sm:$0xff]  ;;  %v450_v38 = vld [vmem:[%s2095_s2] sm:$0xff]  ;;  %v1472_v40 = vld [vmem:[%s1716_s15 + $0x74] sm:$0xf0]  ;;  %vm738_vm0 = vcmask 261120  }
  0x41   : > { %1532 = vset.pattern.permute.xlu1 %v1558_v36  ;;  %1531 = vset.pattern.permute.xlu0 %v1558_v36  ;;  %v1345_v39 = vld [vmem:[%s1716_s15 + $0x70] sm:$0xf]  ;;  %v1492_v43 = vld [vmem:[%s1716_s15 + $0x114] sm:$0xf0]  ;;  %v1337_v44 = vld [vmem:[%s1716_s15 + $0x60] sm:$0xf] }
  0x42   : > { %470 = vperm.xlu1 %1532, %v452_v37   ;;  %1533 = vset.pattern.permute.xlu2 %v1558_v36  ;;  %v1425_v41 = vld [vmem:[%s1716_s15 + $0x110] sm:$0xf]  ;;  %v1346_v42 = vor.u32 %v1472_v40, %v1345_v39  ;;  %v1470_v45 = vld [vmem:[%s1716_s15 + $0x64] sm:$0xf0]  ;;  %v1417_v47 = vld [vmem:[%s1716_s15 + $0x100] sm:$0xf] }
  0x43   : > { %460 = vperm.xlu0 %1531, %v450_v38   ;;  %v1426_v46 = vor.u32 %v1492_v43, %v1425_v41  ;;  %v1490_v48 = vld [vmem:[%s1716_s15 + $0x104] sm:$0xf0]  ;;  %v1273_v49 = vld [vmem:[%s2093_s0 + $0x38] sm:$0xf]  ;;  %v1453_v50 = vld [vmem:[%s2093_s0 + $0x40] sm:$0xf0]  ;;  %v1338_v51 = vor.u32 %v1470_v45, %v1337_v44 }
  0x44   : > { %751 = vmatpush.bf16.msra.mxu0 %v1346_v42  ;;  %1494 = vmatpush.bf16.msra.mxu1 %v1346_v42  ;;  %v1329_v52 = vld [vmem:[%s1716_s15 + $0x50] sm:$0xf]  ;;  %v1471_v53 = vld [vmem:[%s1716_s15 + $0x74] sm:$0xf]  ;;  %v1347_v54 = vld [vmem:[%s1716_s15 + $0x78] sm:$0xf0]  ;;  %v1418_v55 = vor.u32 %v1490_v48, %v1417_v47  ;;  %v1748_v3 = vor.u32 %v1453_v50, %v1273_v49 }
  0x45   : > { %1502 = vmatpush.bf16.msra.mxu3 %v1426_v46  ;;  %815 = vmatpush.bf16.msra.mxu2 %v1426_v46  ;;  %v1468_v56 = vld [vmem:[%s1716_s15 + $0x54] sm:$0xf0]  ;;  %v1487_v57 = vld [vmem:[%s1716_s15 + $0xf4] sm:$0xf]  ;;  %v1411_v58 = vld [vmem:[%s1716_s15 + $0xf8] sm:$0xf0]  ;;  %v1350_v59 = vor.u32 %v1471_v53, %v1347_v54 }
  0x46   : > { %v1249_v60 = vld [vmem:[%s2093_s0 + $0x8] sm:$0xf]  ;;  %v1447_v61 = vld [vmem:[%s2093_s0 + $0x10] sm:$0xf0]  ;;  %v1414_v62 = vor.u32 %v1487_v57, %v1411_v58  ;;  %v1469_v63 = vld [vmem:[%s1716_s15 + $0x64] sm:$0xf]  ;;  %v1330_v4 = vor.u32 %v1468_v56, %v1329_v52 }
  0x47   : > { %v1339_v0 = vld [vmem:[%s1716_s15 + $0x68] sm:$0xf0]  ;;  %v1485_v1 = vld [vmem:[%s1716_s15 + $0xe4] sm:$0xf]  ;;  %v1750_v5 = vor.u32 %v1447_v61, %v1249_v60  ;;  %v1321_v6 = vld [vmem:[%s1716_s15 + $0x40] sm:$0xf] }
  0x48   : > { %v1403_v2 = vld [vmem:[%s1716_s15 + $0xe8] sm:$0xf0]  ;;  %752 = vmatpush.bf16.msra.mxu0 %v1338_v51  ;;  %1495 = vmatpush.bf16.msra.mxu1 %v1338_v51  ;;  %v1466_v7 = vld [vmem:[%s1716_s15 + $0x44] sm:$0xf0]  ;;  %v1342_v8 = vor.u32 %v1469_v63, %v1339_v0  ;;  %v1467_v10 = vld [vmem:[%s1716_s15 + $0x54] sm:$0xf] }
  0x49   : > { %1503 = vmatpush.bf16.msra.mxu3 %v1418_v55  ;;  %816 = vmatpush.bf16.msra.mxu2 %v1418_v55  ;;  %v1406_v9 = vor.u32 %v1485_v1, %v1403_v2  ;;  %v1331_v11 = vld [vmem:[%s1716_s15 + $0x58] sm:$0xf0]  ;;  %v1483_v12 = vld [vmem:[%s1716_s15 + $0xd4] sm:$0xf]  ;;  %v1322_v14 = vor.u32 %v1466_v7, %v1321_v6  ;;  %v1313_v15 = vld [vmem:[%s1716_s15 + $0x30] sm:$0xf] }
  0x4a   : > { %v1395_v13 = vld [vmem:[%s1716_s15 + $0xd8] sm:$0xf0]  ;;  %v1464_v16 = vld [vmem:[%s1716_s15 + $0x34] sm:$0xf0]  ;;  %v1334_v17 = vor.u32 %v1467_v10, %v1331_v11  ;;  %v1465_v19 = vld [vmem:[%s1716_s15 + $0x44] sm:$0xf] }
  0x4b   : > { %v1398_v18 = vor.u32 %v1483_v12, %v1395_v13  ;;  %v1323_v20 = vld [vmem:[%s1716_s15 + $0x48] sm:$0xf0]  ;;  %v1481_v21 = vld [vmem:[%s1716_s15 + $0xc4] sm:$0xf]  ;;  %v1314_v23 = vor.u32 %v1464_v16, %v1313_v15  ;;  %v1305_v24 = vld [vmem:[%s1716_s15 + $0x20] sm:$0xf] }
  0x4c   : > { %1433 = vmatmul.msk.bf16.vlgmr.msra.gmra.mxu3 %vm738_vm0, %v1748_v3  ;;  %753 = vmatpush.bf16.msra.mxu0 %v1330_v4  ;;  %v1387_v22 = vld [vmem:[%s1716_s15 + $0xc8] sm:$0xf0]  ;;  %v1462_v25 = vld [vmem:[%s1716_s15 + $0x24] sm:$0xf0]  ;;  %v453_v26 = vld [vmem:[%s2095_s2 + $0x18] sm:$0xff]  ;;  %v1326_v27 = vor.u32 %v1465_v19, %v1323_v20  ;;  %s1493_s18 = sshll.u32 (%p1619_p5), %s1231_s21, 4 }
  0x4d   : > { %838 = vmatpush.bf16.msrb.mxu3 %v1350_v59  ;;  %867 = vmatpush.bf16.msrb.mxu2 %v1414_v62  ;;  %v1390_v28 = vor.u32 %v1481_v21, %v1387_v22  ;;  %v1463_v29 = vld [vmem:[%s1716_s15 + $0x34] sm:$0xf]  ;;  %v451_v30 = vld [vmem:[%s2095_s2 + $0x8] sm:$0xff]  ;;  %v1315_v31 = vld [vmem:[%s1716_s15 + $0x38] sm:$0xf0]  ;;  %v1306_v34 = vor.u32 %v1462_v25, %v1305_v24  ;;  %s1127_s26 = scalar_lea.vmem (%p1619_p5), %s2098_s5, %s1493_s18 }
  0x4e   : > { %1496 = vmatpush.bf16.msra.mxu1 %v1330_v4  ;;  %1431 = vmatmul.msk.bf16.vlgmr.msra.gmra.mxu2 %vm738_vm0, %v1750_v5  ;;  %v1479_v32 = vld [vmem:[%s1716_s15 + $0xb4] sm:$0xf]  ;;  %v1379_v33 = vld [vmem:[%s1716_s15 + $0xb8] sm:$0xf0]  ;;  %v1285_v35 = vld [vmem:[%s2093_s0 + $0x50] sm:$0xf]  ;;  %v1318_v39 = vor.u32 %v1463_v29, %v1315_v31 }
  0x4f   : > { %475 = vperm.xlu1 %1532, %v453_v26   ;;  %465 = vperm.xlu0 %1531, %v451_v30   ;;  %v1456_v36 = vld [vmem:[%s2093_s0 + $0x58] sm:$0xf0]  ;;  %v1297_v37 = vld [vmem:[%s1716_s15 + $0x10] sm:$0xf]  ;;  %v1460_v38 = vld [vmem:[%s1716_s15 + $0x14] sm:$0xf0]  ;;  %v1382_v42 = vor.u32 %v1479_v32, %v1379_v33 }
  0x50   : > { %754 = vmatpush.bf16.msra.mxu0 %v1322_v14  ;;  %v1261_v40 = vld [vmem:[%s2093_s0 + $0x20] sm:$0xf]  ;;  %v1450_v41 = vld [vmem:[%s2093_s0 + $0x28] sm:$0xf0]  ;;  %v1461_v43 = vld [vmem:[%s1716_s15 + $0x24] sm:$0xf]  ;;  %v1798_v47 = vor.u32 %v1456_v36, %v1285_v35  ;;  %v1298_v48 = vor.u32 %v1460_v38, %v1297_v37 }
  0x51   : > { %839 = vmatpush.bf16.msrb.mxu3 %v1342_v8  ;;  %868 = vmatpush.bf16.msrb.mxu2 %v1406_v9  ;;  %v1307_v44 = vld [vmem:[%s1716_s15 + $0x28] sm:$0xf0]  ;;  %v1477_v45 = vld [vmem:[%s1716_s15 + $0xa4] sm:$0xf]  ;;  %v457_v49 = vld [vmem:[%s2095_s2 + $0x38] sm:$0xff]  ;;  %v1806_v51 = vor.u32 %v1450_v41, %v1261_v40 }
  0x52   : > { %1497 = vmatpush.bf16.msra.mxu1 %v1322_v14  ;;  %v1371_v46 = vld [vmem:[%s1716_s15 + $0xa8] sm:$0xf0]  ;;  %v456_v50 = vld [vmem:[%s2095_s2 + $0x30] sm:$0xff]  ;;  %v1289_v52 = vld [vmem:[%s1716_s15] sm:$0xf]  ;;  %v1310_v54 = vor.u32 %v1461_v43, %v1307_v44 }
  0x53   : > { %v1458_v53 = vld [vmem:[%s1716_s15 + $0x4] sm:$0xf0]  ;;  %v1374_v55 = vor.u32 %v1477_v45, %v1371_v46  ;;  %v1241_v56 = vld [vmem:[%s2093_s0] sm:$0xf]  ;;  %v1446_v57 = vld [vmem:[%s2093_s0 + $0x8] sm:$0xf0] }
  0x54   : > { %755 = vmatpush.bf16.msra.mxu0 %v1314_v23  ;;  %v1409_v58 = vld [vmem:[%s1716_s15 + $0xf0] sm:$0xf]  ;;  %v1491_v59 = vld [vmem:[%s1716_s15 + $0x114] sm:$0xf]  ;;  %v1427_v60 = vld [vmem:[%s1716_s15 + $0x118] sm:$0xf0]  ;;  %v1290_v0 = vor.u32 %v1458_v53, %v1289_v52  ;;  %v1242_v14 = vor.u32 %v1446_v57, %v1241_v56 }
  0x55   : > { %840 = vmatpush.bf16.msrb.mxu3 %v1334_v17  ;;  %869 = vmatpush.bf16.msrb.mxu2 %v1398_v18  ;;  %v1488_v61 = vld [vmem:[%s1716_s15 + $0xf4] sm:$0xf0]  ;;  %v1459_v62 = vld [vmem:[%s1716_s15 + $0x14] sm:$0xf]  ;;  %v1299_v63 = vld [vmem:[%s1716_s15 + $0x18] sm:$0xf0]  ;;  %v1430_v8 = vor.u32 %v1491_v59, %v1427_v60 }
  0x56   : > { %1498 = vmatpush.bf16.msra.mxu1 %v1314_v23  ;;  %v1475_v1 = vld [vmem:[%s1716_s15 + $0x94] sm:$0xf]  ;;  %v1363_v2 = vld [vmem:[%s1716_s15 + $0x98] sm:$0xf0]  ;;  %v454_v4 = vld [vmem:[%s2095_s2 + $0x20] sm:$0xff]  ;;  %v1410_v9 = vor.u32 %v1488_v61, %v1409_v58  ;;  %v1302_v10 = vor.u32 %v1459_v62, %v1299_v63 }
  0x57   : > { %495 = vperm.xlu1 %1532, %v457_v49   ;;  %490 = vperm.xlu0 %1531, %v456_v50   ;;  %v1265_v6 = vld [vmem:[%s2093_s0 + $0x30] sm:$0xf]  ;;  %v1452_v7 = vld [vmem:[%s2093_s0 + $0x38] sm:$0xf0]  ;;  %v1401_v11 = vld [vmem:[%s1716_s15 + $0xe0] sm:$0xf]  ;;  %v1366_v15 = vor.u32 %v1475_v1, %v1363_v2 }
  0x58   : > { %756 = vmatpush.bf16.msra.mxu0 %v1306_v34  ;;  %v1489_v12 = vld [vmem:[%s1716_s15 + $0x104] sm:$0xf]  ;;  %v1419_v13 = vld [vmem:[%s1716_s15 + $0x108] sm:$0xf0]  ;;  %v1486_v16 = vld [vmem:[%s1716_s15 + $0xe4] sm:$0xf0]  ;;  %480 = vperm.xlu2 %1533, %v454_v4   ;;  %v1843_v19 = vor.u32 %v1452_v7, %v1265_v6 }
  0x59   : > { %841 = vmatpush.bf16.msrb.mxu3 %v1326_v27  ;;  %870 = vmatpush.bf16.msrb.mxu2 %v1390_v28  ;;  %v1457_v17 = vld [vmem:[%s1716_s15 + $0x4] sm:$0xf]  ;;  %v1291_v18 = vld [vmem:[%s1716_s15 + $0x8] sm:$0xf0]  ;;  %v976_v22 = vld [vmem:[%s2096_s3 + $0x10] sm:$0xff]  ;;  %v1422_v23 = vor.u32 %v1489_v12, %v1419_v13  ;;  %v1402_v24 = vor.u32 %v1486_v16, %v1401_v11 }
  0x5a   : > { %1499 = vmatpush.bf16.msra.mxu1 %v1306_v34  ;;  %v1473_v20 = vld [vmem:[%s1716_s15 + $0x84] sm:$0xf]  ;;  %v1355_v21 = vld [vmem:[%s1716_s15 + $0x88] sm:$0xf0]  ;;  %v1294_v25 = vor.u32 %v1457_v17, %v1291_v18  ;;  %v1393_v28 = vld [vmem:[%s1716_s15 + $0xd0] sm:$0xf] }
  0x5b   : > { %v975_v26 = vld [vmem:[%s2096_s3 + $0x8] sm:$0xff]  ;;  %v1358_v27 = vor.u32 %v1473_v20, %v1355_v21  ;;  %v1484_v29 = vld [vmem:[%s1716_s15 + $0xd4] sm:$0xf0]  ;;  %v1445_v32 = vld [vmem:[%s2093_s0 + $0x4] sm:$0xf] }
  0x5c   : > { %1434 = vmatmul.msk.bf16.gmra.mxu3 %vm738_vm0, %v1798_v47  ;;  %757 = vmatpush.bf16.msra.mxu0 %v1298_v48  ;;  %v455_v30 = vld [vmem:[%s2095_s2 + $0x28] sm:$0xff]  ;;  %v1394_v31 = vor.u32 %v1484_v29, %v1393_v28  ;;  %v1243_v33 = vld [vmem:[%s2093_s0 + $0xc] sm:$0xf0]  ;;  %v1385_v34 = vld [vmem:[%s1716_s15 + $0xc0] sm:$0xf] }
  0x5d   : > { %842 = vmatpush.bf16.msrb.mxu3 %v1318_v39  ;;  %871 = vmatpush.bf16.msrb.mxu2 %v1382_v42  ;;  %v1482_v35 = vld [vmem:[%s1716_s15 + $0xc4] sm:$0xf0]  ;;  %v1246_v36 = vor.u32 %v1445_v32, %v1243_v33  ;;  %v978_v39 = vld [vmem:[%s2096_s3 + $0x20] sm:$0xff]  ;;  %v1377_v40 = vld [vmem:[%s1716_s15 + $0xb0] sm:$0xf] }
  0x5e   : > { %1500 = vmatpush.bf16.msra.mxu1 %v1298_v48  ;;  %1432 = vmatmul.msk.bf16.gmra.mxu2 %vm738_vm0, %v1806_v51  ;;  %v979_v37 = vld [vmem:[%s2096_s3 + $0x28] sm:$0xff]  ;;  %v1386_v38 = vor.u32 %v1482_v35, %v1385_v34  ;;  %v1480_v41 = vld [vmem:[%s1716_s15 + $0xb4] sm:$0xf0]  ;;  %v1449_v43 = vld [vmem:[%s2093_s0 + $0x20] sm:$0xf0] }
  0x5f   : > { %994 = vperm.xlu1 %1532, %v976_v22   ;;  %989 = vperm.xlu0 %1531, %v975_v26   ;;  %v1253_v42 = vld [vmem:[%s2093_s0 + $0x18] sm:$0xf]  ;;  %v974_v44 = vld [vmem:[%s2096_s3] sm:$0xff]  ;;  %v1277_v45 = vld [vmem:[%s2093_s0 + $0x48] sm:$0xf]  ;;  %v1378_v48 = vor.u32 %v1480_v41, %v1377_v40 }
  0x60   : > { %758 = vmatpush.bf16.msra.mxu0 %v1290_v0  ;;  %485 = vperm.xlu2 %1533, %v455_v30   ;;  %v1455_v46 = vld [vmem:[%s2093_s0 + $0x50] sm:$0xf0]  ;;  %v1254_v49 = vor.u32 %v1449_v43, %v1253_v42  ;;  %v1369_v50 = vld [vmem:[%s1716_s15 + $0xa0] sm:$0xf]  ;;  %v1478_v52 = vld [vmem:[%s1716_s15 + $0xa4] sm:$0xf0] }
  0x61   : > { %843 = vmatpush.bf16.msrb.mxu3 %v1310_v54  ;;  %872 = vmatpush.bf16.msrb.mxu2 %v1374_v55  ;;  %v1278_v53 = vor.u32 %v1455_v46, %v1277_v45  ;;  %v1038_v54 = vld [vmem:[%s2097_s4] sm:$0xff]  ;;  %v1370_v55 = vor.u32 %v1478_v52, %v1369_v50  ;;  %v981_v56 = vld [vmem:[%s2096_s3 + $0x38] sm:$0xff]  ;;  %v1361_v57 = vld [vmem:[%s1716_s15 + $0x90] sm:$0xf] }
  0x62   : > { %1501 = vmatpush.bf16.msra.mxu1 %v1290_v0  ;;  %v1476_v58 = vld [vmem:[%s1716_s15 + $0x94] sm:$0xf0]  ;;  %v1448_v61 = vld [vmem:[%s2093_s0 + $0x1c] sm:$0xf]  ;;  %v1255_v62 = vld [vmem:[%s2093_s0 + $0x24] sm:$0xf0] }
  0x63   : > { %759 = vmatmul.bf16.vlgmr.msra.gmra.mxu0 %v1242_v14  ;;  %v977_v59 = vld [vmem:[%s2096_s3 + $0x18] sm:$0xff]  ;;  %v1362_v60 = vor.u32 %v1476_v58, %v1361_v57  ;;  %v1353_v63 = vld [vmem:[%s1716_s15 + $0x80] sm:$0xf]  ;;  %v1474_v0 = vld [vmem:[%s1716_s15 + $0x84] sm:$0xf0]  ;;  %v1258_v1 = vor.u32 %v1448_v61, %v1255_v62 }
  0x64   : > { %902 = vmatpush.bf16.msrb.mxu0 %v1430_v8  ;;  %v1041_v2 = vld [vmem:[%s2097_s4 + $0x18] sm:$0xff]  ;;  %v1354_v4 = vor.u32 %v1474_v0, %v1353_v63  ;;  %v1040_v6 = vld [vmem:[%s2097_s4 + $0x10] sm:$0xff]  ;;  %v1267_v12 = vld [vmem:[%s2093_s0 + $0x3c] sm:$0xf0] }
  0x65   : > { %844 = vmatpush.bf16.msrb.mxu3 %v1302_v10  ;;  %873 = vmatpush.bf16.msrb.mxu2 %v1366_v15  ;;  %v980_v7 = vld [vmem:[%s2096_s3 + $0x30] sm:$0xff]  ;;  %v1039_v10 = vld [vmem:[%s2097_s4 + $0x8] sm:$0xff]  ;;  %v1279_v16 = vld [vmem:[%s2093_s0 + $0x54] sm:$0xf0] }
  0x66   : > { %780 = vmatpush.bf16.msrb.mxu1 %v1410_v9  ;;  %v1044_v8 = vld [vmem:[%s2097_s4 + $0x30] sm:$0xff]  ;;  %v1043_v9 = vld [vmem:[%s2097_s4 + $0x28] sm:$0xff] }
  0x67   : > { %769 = vmatmul.bf16.vlgmr.msra.gmra.mxu1 %v1843_v19  ;;  %1009 = vperm.xlu1 %1532, %v979_v37   ;;  %v1451_v11 = vld [vmem:[%s2093_s0 + $0x34] sm:$0xf]  ;;  %v1454_v15 = vld [vmem:[%s2093_s0 + $0x4c] sm:$0xf] }
  0x68   : > { %903 = vmatpush.bf16.msrb.mxu0 %v1422_v23  ;;  %1004 = vperm.xlu0 %1531, %v978_v39   ;;  %v1270_v13 = vor.u32 %v1451_v11, %v1267_v12  ;;  %v1282_v17 = vor.u32 %v1454_v15, %v1279_v16 }
  0x69   : > { %845 = vmatpush.bf16.msrb.mxu3 %v1294_v25  ;;  %874 = vmatpush.bf16.msrb.mxu2 %v1358_v27 }
  0x6a   : > { %781 = vmatpush.bf16.msrb.mxu1 %v1402_v24  ;;  %984 = vperm.xlu2 %1533, %v974_v44  }
  0x6c   : > { %846 = vmatmul.bf16.vlgmr.msrb.gmra.mxu3 %v1242_v14  ;;  %v1045_v14 = vld [vmem:[%s2097_s4 + $0x38] sm:$0xff] }
  0x6e   : > { %782 = vmatpush.bf16.msrb.mxu1 %v1394_v31  ;;  %875 = vmatmul.bf16.vlgmr.msrb.gmra.mxu2 %v1246_v36 }
  0x6f   : > { %1048 = vperm.xlu1 %1532, %v1038_v54  }
  0x70   : > { %1019 = vperm.xlu0 %1531, %v981_v56  }
  0x72   : > { %783 = vmatpush.bf16.msrb.mxu1 %v1386_v38  ;;  %999 = vperm.xlu2 %1533, %v977_v59  }
  0x73   : > { %764 = vmatmul.bf16.gmra.mxu0 %v1254_v49 }
  0x76   : > { %784 = vmatpush.bf16.msrb.mxu1 %v1378_v48 }
  0x77   : > { %774 = vmatmul.bf16.gmra.mxu1 %v1278_v53  ;;  %1063 = vperm.xlu1 %1532, %v1041_v2  }
  0x78   : > { %1058 = vperm.xlu0 %1531, %v1040_v6  }
  0x7a   : > { %785 = vmatpush.bf16.msrb.mxu1 %v1370_v55  ;;  %1014 = vperm.xlu2 %1533, %v980_v7  }
  0x7c   : > { %851 = vmatmul.bf16.gmra.mxu3 %v1254_v49 }
  0x7e   : > { %786 = vmatpush.bf16.msrb.mxu1 %v1362_v60  ;;  %880 = vmatmul.bf16.gmra.mxu2 %v1258_v1 }
  0x7f   : > { %1078 = vperm.xlu1 %1532, %v1044_v8  }
  0x80   : > { %1073 = vperm.xlu0 %1531, %v1043_v9  }
  0x82   : > { %787 = vmatpush.bf16.msrb.mxu1 %v1354_v4  ;;  %1053 = vperm.xlu2 %1533, %v1039_v10  }
  0x83   : > { %1435 = vmatmul.msk.bf16.vlgmr.msrb.gmra.mxu0 %vm738_vm0, %v1750_v5  ;;  %v1042_v5 = vld [vmem:[%s2097_s4 + $0x20] sm:$0xff] }
  0x87   : > { %788 = vmatmul.bf16.vlgmr.msrb.gmra.mxu1 %v1246_v36 }
  0x8a   : > { %1068 = vperm.xlu2 %1533, %v1042_v5  }
  0x8c   : > { %856 = vmatmul.bf16.gmra.mxu3 %v1843_v19 }
  0x8e   : > { %885 = vmatmul.bf16.gmra.mxu2 %v1270_v13 }
  0x92   : > { %1083 = vperm.xlu2 %1533, %v1045_v14  }
  0x93   : > { %1436 = vmatmul.msk.bf16.gmra.mxu0 %vm738_vm0, %v1806_v51 }
  0x97   : > { %793 = vmatmul.bf16.gmra.mxu1 %v1258_v1 }
  0x9c   : > { %861 = vmatmul.bf16.gmra.mxu3 %v1278_v53 }
  0x9e   : > { %890 = vmatmul.bf16.gmra.mxu2 %v1282_v17 }
  0xa3   : > { %1437 = vmatmul.msk.bf16.gmra.mxu0 %vm738_vm0, %v1748_v3 }
  0xa7   : > { %798 = vmatmul.bf16.gmra.mxu1 %v1270_v13 }
  0xb2   : > { %v1964_v23 = vpop.permute.xlu2 %480 }
  0xb3   : > { %1438 = vmatmul.msk.bf16.gmra.mxu0 %vm738_vm0, %v1798_v47 }
  0xb4   : > { %v1958_v19 = vpop.permute.xlu1 %470 }
  0xb5   : > { %v461_v22 = vpop.permute.xlu0 %460 }
  0xb7   : > { %803 = vmatmul.bf16.gmra.mxu1 %v1282_v17 }
  0xba   : > { %v1974_v28 = vpop.permute.xlu2 %485 }
  0xc1   : > { %v1966_v24 = vpop.permute.xlu1 %475  ;;  %v466_v27 = vpop.permute.xlu0 %465 }
  0xc4   : > { %v985_v35 = vpop.permute.xlu2 %984 }
  0xc9   : > { %v1976_v29 = vpop.permute.xlu1 %495  ;;  %v1984_v34 = vpop.permute.xlu0 %490 }
  0xcc   : > { %v1994_v48 = vpop.permute.xlu2 %999 }
  0xcf   : > { %v1956_v51 = vpop.f32.mrf.mxu3 }
  0xd1   : > { %v818_v18 = vpop.f32.mrf.mxu2  ;;  %v1988_v40 = vpop.permute.xlu1 %994 }
  0xd2   : > { %v990_v41 = vpop.permute.xlu0 %989 }
  0xd4   : > { %v2002_v62 = vpop.permute.xlu2 %1014 }
  0xd7   : > { %v1960_v20 = vpop.f32.mrf.mxu3 }
  0xd9   : > { %v1962_v21 = vpop.f32.mrf.mxu2  ;;  %v1996_v49 = vpop.permute.xlu1 %1009 }
  0xda   : > { %v1998_v57 = vpop.permute.xlu0 %1004 }
  0xdf   : > { %v1968_v3 = vpop.f32.mrf.mxu3 }
  0xe0   : > { %v760_v25 = vpop.f32.mrf.mxu0 }
  0xe1   : > { %v1970_v26 = vpop.f32.mrf.mxu2  ;;  %v761_v53 = vadd.f32 %v760_v25, %v461_v22  ;;  %v1049_v1 = vpop.permute.xlu1 %1048 }
  0xe2   : > { %v2008_v16 = vpop.permute.xlu0 %1019  ;;  %v1054_v25 = vpop.permute.xlu2 %1053 }
  0xe4   : > { %v1972_v47 = vpop.f32.mrf.mxu1 }
  0xe7   : > { %v1978_v30 = vpop.f32.mrf.mxu3 }
  0xe8   : > { %v762_v31 = vpop.f32.mrf.mxu0 }
  0xe9   : > { %v1980_v32 = vpop.f32.mrf.mxu2  ;;  %v763_v7 = vadd.f32 %v762_v31, %v466_v27 }
  0xec   : > { %v1982_v33 = vpop.f32.mrf.mxu1 }
  0xef   : > { %v847_v36 = vpop.f32.mrf.mxu3 }
  0xf0   : > { %v765_v37 = vpop.f32.mrf.mxu0  ;;  %v848_v45 = vadd.f32 %v847_v36, %v461_v22 }
  0xf1   : > { %v876_v38 = vpop.f32.mrf.mxu2  ;;  %v766_v36 = vadd.f32 %v765_v37, %v1958_v19 }
  0xf2   : > { %v877_v50 = vadd.f32 %v876_v38, %v848_v45 }
  0xf4   : > { %v1986_v39 = vpop.f32.mrf.mxu1 }
  0xf7   : > { %v849_v42 = vpop.f32.mrf.mxu3 }
  0xf8   : > { %v1990_v43 = vpop.f32.mrf.mxu0  ;;  %v850_v60 = vadd.f32 %v849_v42, %v466_v27 }
  0xf9   : > { %v878_v44 = vpop.f32.mrf.mxu2 }
  0xfa   : > { %v879_v4 = vadd.f32 %v878_v44, %v850_v60  ;;  %v768_v60 = vadd.f32 %v1990_v43, %v1966_v24 }
  0xfc   : > { %v1992_v46 = vpop.f32.mrf.mxu1 }
  0xff   : > { %v852_v52 = vpop.f32.mrf.mxu3 }
 0x100   : > { %v905_v54 = vpop.f32.mrf.mxu0  ;;  %v853_v14 = vadd.f32 %v852_v52, %v1958_v19 }
 0x101   : > { %v906_v56 = vadd.f32 %v905_v54, %v877_v50  ;;  %v881_v59 = vpop.f32.mrf.mxu2 }
 0x102   : > { %v882_v31 = vadd.f32 %v881_v59, %v853_v14 }
 0x103   : > { %v943_v61 = vmax.f32 %v906_v56, 0.0 }
 0x104   : > { %v789_v55 = vpop.f32.mrf.mxu1 }
 0x105   : > { %v790_v58 = vadd.f32 %v789_v55, %v761_v53  ;;  %v1023_v0 = vmul.f32 %v985_v35, %v943_v61 }
 0x107   : > { %v819_v63 = vadd.f32 %v818_v18, %v790_v58  ;;  %v1087_v6 = vadd.f32 %v1049_v1, %v1023_v0  ;;  %v854_v9 = vpop.f32.mrf.mxu3  ;;  %v1059_v58 = vpop.permute.xlu0 %1058 }
 0x108   : > { %v907_v10 = vpop.f32.mrf.mxu0 }
 0x109   : > { %v942_v2 = vmax.f32 %v819_v63, 0.0  ;;  %1103 = vst [vmem:[%s2004_s10 + $0x8] sm:$0xff] %v1087_v6  ;;  %v908_v12 = vadd.f32 %v907_v10, %v879_v4  ;;  %v883_v18 = vpop.f32.mrf.mxu2  ;;  %v1064_v10 = vpop.permute.xlu1 %1063 }
 0x10b   : > { %v1022_v8 = vmul.f32 %v985_v35, %v942_v2  ;;  %v945_v15 = vmax.f32 %v908_v12, 0.0 }
 0x10c   : > { %v791_v11 = vpop.f32.mrf.mxu1 }
 0x10d   : > { %v1086_v13 = vadd.f32 %v1049_v1, %v1022_v8  ;;  %v792_v5 = vadd.f32 %v791_v11, %v763_v7  ;;  %v1025_v22 = vmul.f32 %v990_v41, %v945_v15  ;;  %v771_v11 = vadd.f32 %v1972_v47, %v1964_v23 }
 0x10f   : > { %1102 = vst [vmem:[%s2004_s10] sm:$0xff] %v1086_v13  ;;  %v821_v17 = vadd.f32 %v1962_v21, %v792_v5  ;;  %v1089_v35 = vadd.f32 %v1054_v25, %v1025_v22  ;;  %v857_v52 = vpop.f32.mrf.mxu3  ;;  %v855_v21 = vadd.f32 %v854_v9, %v1966_v24 }
 0x110   : > { %v910_v42 = vpop.f32.mrf.mxu0  ;;  %v858_v4 = vadd.f32 %v857_v52, %v1964_v23 }
 0x111   : > { %v944_v27 = vmax.f32 %v821_v17, 0.0  ;;  %1105 = vst [vmem:[%s2004_s10 + $0x18] sm:$0xff] %v1089_v35  ;;  %v911_v45 = vadd.f32 %v910_v42, %v882_v31  ;;  %v886_v37 = vpop.f32.mrf.mxu2  ;;  %v773_v35 = vadd.f32 %v1982_v33, %v1974_v28 }
 0x113   : > { %v1024_v38 = vmul.f32 %v990_v41, %v944_v27  ;;  %v947_v54 = vmax.f32 %v911_v45, 0.0  ;;  %v884_v41 = vadd.f32 %v883_v18, %v855_v21 }
 0x114   : > { %v794_v44 = vpop.f32.mrf.mxu1 }
 0x115   : > { %v1088_v50 = vadd.f32 %v1054_v25, %v1024_v38  ;;  %v795_v53 = vadd.f32 %v794_v44, %v766_v36  ;;  %v1027_v56 = vmul.f32 %v1988_v40, %v947_v54  ;;  %v1069_v25 = vpop.permute.xlu2 %1068 }
 0x117   : > { %1104 = vst [vmem:[%s2004_s10 + $0x10] sm:$0xff] %v1088_v50  ;;  %v824_v55 = vadd.f32 %v1970_v26, %v795_v53  ;;  %v1091_v59 = vadd.f32 %v1059_v58, %v1027_v56  ;;  %v859_v7 = vpop.f32.mrf.mxu3  ;;  %v1074_v53 = vpop.permute.xlu0 %1073 }
 0x118   : > { %v912_v63 = vpop.f32.mrf.mxu0  ;;  %v860_v18 = vadd.f32 %v859_v7, %v1974_v28  ;;  %v776_v28 = vadd.f32 %v1986_v39, %v1984_v34 }
 0x119   : > { %v946_v19 = vmax.f32 %v824_v55, 0.0  ;;  %1107 = vst [vmem:[%s2004_s10 + $0x28] sm:$0xff] %v1091_v59  ;;  %v913_v1 = vadd.f32 %v912_v63, %v884_v41  ;;  %v888_v13 = vpop.f32.mrf.mxu2 }
 0x11a   : > { %v889_v31 = vadd.f32 %v888_v13, %v860_v18 }
 0x11b   : > { %v1026_v61 = vmul.f32 %v1988_v40, %v946_v19  ;;  %v949_v6 = vmax.f32 %v913_v1, 0.0  ;;  %v887_v40 = vadd.f32 %v886_v37, %v858_v4 }
 0x11c   : > { %v796_v0 = vpop.f32.mrf.mxu1 }
 0x11d   : > { %v1090_v2 = vadd.f32 %v1059_v58, %v1026_v61  ;;  %v797_v26 = vadd.f32 %v796_v0, %v768_v60  ;;  %v1029_v9 = vmul.f32 %v1994_v48, %v949_v6  ;;  %v1079_v60 = vpop.permute.xlu1 %1078  ;;  %v778_v0 = vadd.f32 %v1992_v46, %v1976_v29 }
 0x11e   : > { %v1144_v46 = vld [vmem:[%s2004_s10 + $0x10] sm:$0xff] (%p1619_p5) }
 0x11f   : > { %1106 = vst [vmem:[%s2004_s10 + $0x20] sm:$0xff] %v1090_v2  ;;  %v826_v8 = vadd.f32 %v1980_v32, %v797_v26  ;;  %v1093_v43 = vadd.f32 %v1064_v10, %v1029_v9  ;;  %v862_v47 = vpop.f32.mrf.mxu3 }
 0x120   : > { %v915_v5 = vpop.f32.mrf.mxu0  ;;  %1145 = vst [vmem:[%s1127_s26 + $0x20] sm:$0xff] (%p1619_p5), %v1144_v46 }
 0x121   : > { %v948_v24 = vmax.f32 %v826_v8, 0.0  ;;  %1109 = vst [vmem:[%s2004_s10 + $0x38] sm:$0xff] %v1093_v43  ;;  %v916_v15 = vadd.f32 %v915_v5, %v887_v40  ;;  %v891_v45 = vpop.f32.mrf.mxu2  ;;  %v1084_v8 = vpop.permute.xlu2 %1083  ;;  %v1150_v40 = vld [vmem:[%s2004_s10 + $0x28] sm:$0xff] (%p1619_p5) }
 0x122   : > { %1151 = vst [vmem:[%s1127_s26 + $0x48] sm:$0xff] (%p1619_p5), %v1150_v40 }
 0x123   : > { %v1028_v12 = vmul.f32 %v1994_v48, %v948_v24  ;;  %v1031_v22 = vmul.f32 %v1998_v57, %v916_v15 }
 0x124   : > { %v799_v14 = vpop.f32.mrf.mxu1 }
 0x125   : > { %v1092_v17 = vadd.f32 %v1064_v10, %v1028_v12  ;;  %v800_v32 = vadd.f32 %v799_v14, %v771_v11  ;;  %v1095_v23 = vadd.f32 %v1069_v25, %v1031_v22 }
 0x126   : > { %v1148_v24 = vld [vmem:[%s2004_s10 + $0x20] sm:$0xff] (%p1619_p5) }
 0x127   : > { %1108 = vst [vmem:[%s2004_s10 + $0x30] sm:$0xff] %v1092_v17  ;;  %v829_v27 = vadd.f32 %v1956_v51, %v800_v32  ;;  %v863_v51 = vadd.f32 %v862_v47, %v1984_v34  ;;  %v864_v33 = vpop.f32.mrf.mxu3 }
 0x128   : > { %1111 = vst [vmem:[%s2004_s10 + $0x48] sm:$0xff] %v1095_v23  ;;  %v917_v38 = vpop.f32.mrf.mxu0  ;;  %v865_v59 = vadd.f32 %v864_v33, %v1976_v29  ;;  %v1140_v29 = vld [vmem:[%s2004_s10] sm:$0xff] (%p1619_p5)  ;;  %v1154_v11 = vld [vmem:[%s2004_s10 + $0x38] sm:$0xff] (%p1619_p5) }
 0x129   : > { %v1030_v48 = vmul.f32 %v1998_v57, %v829_v27  ;;  %v918_v44 = vadd.f32 %v917_v38, %v889_v31  ;;  %v892_v55 = vadd.f32 %v891_v45, %v863_v51  ;;  %1141 = vst [vmem:[%s1127_s26] sm:$0xff] (%p1619_p5), %v1140_v29 }
 0x12a   : > { %1149 = vst [vmem:[%s1127_s26 + $0x40] sm:$0xff] (%p1619_p5), %v1148_v24 }
 0x12b   : > { %v1094_v36 = vadd.f32 %v1069_v25, %v1030_v48  ;;  %v1033_v52 = vmul.f32 %v1996_v49, %v918_v44  ;;  %1155 = vst [vmem:[%s1127_s26 + $0x68] sm:$0xff] (%p1619_p5), %v1154_v11 }
 0x12c   : > { %v801_v42 = vpop.f32.mrf.mxu1 }
 0x12d   : > { %1110 = vst [vmem:[%s2004_s10 + $0x40] sm:$0xff] %v1094_v36  ;;  %v802_v50 = vadd.f32 %v801_v42, %v773_v35  ;;  %v1097_v21 = vadd.f32 %v1074_v53, %v1033_v52 }
 0x12e   : > { %v1152_v43 = vld [vmem:[%s2004_s10 + $0x30] sm:$0xff] (%p1619_p5) }
 0x12f   : > { %v831_v57 = vadd.f32 %v1960_v20, %v802_v50  ;;  %1113 = vst [vmem:[%s2004_s10 + $0x58] sm:$0xff] %v1097_v21  ;;  %v1158_v13 = vld [vmem:[%s2004_s10 + $0x48] sm:$0xff] (%p1619_p5) }
 0x130   : > { %v920_v58 = vpop.f32.mrf.mxu0  ;;  %1153 = vst [vmem:[%s1127_s26 + $0x60] sm:$0xff] (%p1619_p5), %v1152_v43 }
 0x131   : > { %v1032_v54 = vmul.f32 %v1996_v49, %v831_v57  ;;  %v921_v37 = vadd.f32 %v920_v58, %v892_v55  ;;  %v893_v49 = vpop.f32.mrf.mxu2  ;;  %1159 = vst [vmem:[%s1127_s26 + $0x88] sm:$0xff] (%p1619_p5), %v1158_v13 }
 0x132   : > { %v894_v39 = vadd.f32 %v893_v49, %v865_v59 }
 0x133   : > { %v1096_v56 = vadd.f32 %v1074_v53, %v1032_v54  ;;  %v1035_v20 = vmul.f32 %v2002_v62, %v921_v37 }
 0x134   : > { %v804_v19 = vpop.f32.mrf.mxu1  ;;  %v1156_v12 = vld [vmem:[%s2004_s10 + $0x40] sm:$0xff] (%p1619_p5) }
 0x135   : > { %1112 = vst [vmem:[%s2004_s10 + $0x50] sm:$0xff] %v1096_v56  ;;  %v805_v41 = vadd.f32 %v804_v19, %v776_v28  ;;  %v1099_v63 = vadd.f32 %v1079_v60, %v1035_v20 }
 0x136   : > { %1157 = vst [vmem:[%s1127_s26 + $0x80] sm:$0xff] (%p1619_p5), %v1156_v12  ;;  %v1162_v14 = vld [vmem:[%s2004_s10 + $0x58] sm:$0xff] (%p1619_p5) }
 0x137   : > { %v834_v61 = vadd.f32 %v1968_v3, %v805_v41  ;;  %1115 = vst [vmem:[%s2004_s10 + $0x68] sm:$0xff] %v1099_v63 }
 0x138   : > { %v922_v2 = vpop.f32.mrf.mxu0  ;;  %1163 = vst [vmem:[%s1127_s26 + $0xa8] sm:$0xff] (%p1619_p5), %v1162_v14 }
 0x139   : > { %v1034_v34 = vmul.f32 %v2002_v62, %v834_v61  ;;  %v923_v4 = vadd.f32 %v922_v2, %v894_v39 }
 0x13b   : > { %v1098_v1 = vadd.f32 %v1079_v60, %v1034_v34  ;;  %v1037_v7 = vmul.f32 %v2008_v16, %v923_v4 }
 0x13c   : > { %v806_v26 = vpop.f32.mrf.mxu1  ;;  %v1160_v5 = vld [vmem:[%s2004_s10 + $0x50] sm:$0xff] (%p1619_p5) }
 0x13d   : > { %1114 = vst [vmem:[%s2004_s10 + $0x60] sm:$0xff] %v1098_v1  ;;  %v807_v6 = vadd.f32 %v806_v26, %v778_v0  ;;  %v1101_v9 = vadd.f32 %v1084_v8, %v1037_v7 }
 0x13e   : > { %1161 = vst [vmem:[%s1127_s26 + $0xa0] sm:$0xff] (%p1619_p5), %v1160_v5  ;;  %v1166_v17 = vld [vmem:[%s2004_s10 + $0x68] sm:$0xff] (%p1619_p5) }
 0x13f   : > { %v836_v3 = vadd.f32 %v1978_v30, %v807_v6  ;;  %1117 = vst [vmem:[%s2004_s10 + $0x78] sm:$0xff] %v1101_v9  ;;  %v1142_v30 = vld [vmem:[%s2004_s10 + $0x8] sm:$0xff] (%p1619_p5) }
 0x140   : > { %1143 = vst [vmem:[%s1127_s26 + $0x8] sm:$0xff] (%p1619_p5), %v1142_v30 }
 0x141   : > { %v1036_v62 = vmul.f32 %v2008_v16, %v836_v3  ;;  %1124 = sbr.rel (!%p1619_p5) target bundleno = 334 (0x14e), region = 82  ;;  %v1146_v16 = vld [vmem:[%s2004_s10 + $0x18] sm:$0xff] (%p1619_p5)  ;;  %1167 = vst [vmem:[%s1127_s26 + $0xc8] sm:$0xff] (%p1619_p5), %v1166_v17 }
 0x142   : > { %1147 = vst [vmem:[%s1127_s26 + $0x28] sm:$0xff] (%p1619_p5), %v1146_v16 }
 0x143   : > { %v1100_v10 = vadd.f32 %v1084_v8, %v1036_v62 }
 0x144   : > { %v1164_v15 = vld [vmem:[%s2004_s10 + $0x60] sm:$0xff] (%p1619_p5) }
 0x145   : > { %1116 = vst [vmem:[%s2004_s10 + $0x70] sm:$0xff] %v1100_v10 }
 0x146   : > { %1165 = vst [vmem:[%s1127_s26 + $0xc0] sm:$0xff] %v1164_v15  ;;  %v1170_v18 = vld [vmem:[%s2004_s10 + $0x78] sm:$0xff] }
 0x147   : > { %1171 = vst [vmem:[%s1127_s26 + $0xe8] sm:$0xff] %v1170_v18 }
 0x14c   : > { %v1168_v32 = vld [vmem:[%s2004_s10 + $0x70] sm:$0xff] }
 0x14d   : > { %1169 = vst [vmem:[%s1127_s26 + $0xe0] sm:$0xff] %v1168_v32 }
 0x14e PF: > { %p12_p10 = scmp.ge.s32.totalorder %s1606_s22, 4   ;;  %s2100_s18 = smov %s1552_s19 }
 0x14f   : > { %s2101_s19 = smov %s1617_s25  ;;  %s2102_s20 = smov %s1606_s22 }
 0x150   :  { %14 = sbr.rel (!%p12_p10) target bundleno = 2 (0x2), region = 136 }

// kernel: fl2d_forward.41
= control target key start
LH: loop header
LB: loop body
LE: loop exit
PB: predicated region body
PF: predicated region fallthrough
CT: control target
= control target key end

     0   :  { %s1295_s15 = smov 0   ;;  %s1297_s16 = smov 0   ;;  %s1610_s0 = inlined_call_operand.vmem [shape: bf16[32,288], index: 0, kind: input, shape index: {}]   ;;  %s1611_s1 = inlined_call_operand.vmem [shape: bf16[288,512], index: 1, kind: input, shape index: {}]   ;;  %s1612_s2 = inlined_call_operand.vmem [shape: f32[32,1], index: 2, kind: input, shape index: {}]   ;;  %s1613_s3 = inlined_call_operand.vmem [shape: f32[32,512], index: 3, kind: input, shape index: {}]   ;;  %s1614_s4 = inlined_call_operand.vmem [shape: f32[32,512], index: 4, kind: output, shape index: {}]  }
   0x1   :  { %s1299_s17 = smov 0  }
   0x2 LB: > { %s980_s18 = sadd.s32 4294967295, %s1267_s17   ;;  %s1312_s19 = sadd.s32 1, %s1267_s17   ;;  %s1267_s17 = sphi %s1299_s17, %s1619_s17   ;;  %s1263_s16 = sphi %s1297_s16, %s1618_s16   ;;  %s1259_s15 = sphi %s1295_s15, %s1617_s15  }
   0x3   : > { %s39_s20 = ssub.s32 %s1267_s17, %s1312_s19  ;;  %s42_s21 = sadd.s32 1, %s1263_s16 }
   0x4   : > { %p40_p0 = scmp.eq.s32.totalorder %s39_s20, 0  ;;  %p49_p1 = scmp.ne.s32.totalorder %s1263_s16, %s1259_s15 }
   0x5   : > { %p50_p2 = scmp.eq.s32.totalorder %s1267_s17, 0  ;;  %p126_p3 = scmp.eq.s32.totalorder %s980_s18, 1 }
   0x6   : > { %s1323_s22 = scalar_select %p40_p0, %s1263_s16, %s42_s21  }
   0x7   : > { %p1325_p4 = por %p50_p2, %p49_p1  ;;  %p1329_p5 = por %p126_p3, %p49_p1 }
   0x8   : > { %p983_p6 = scmp.ge.s32.totalorder %s1267_s17, 2 }
   0xa   : > { %154 = sbr.rel (%p983_p6) target bundleno = 67 (0x43), region = 24 }
   0xf   : > { %157 = sbr.rel (!%p1325_p4) target bundleno = 55 (0x37), region = 28  ;;  %s159_s25 = sand.u32 (%p1325_p4), 1, %s1263_s16  }
  0x10   : > { %s1169_s26 = sshll.u32 (%p1325_p4), %s1267_s17, 3  ;;  %s1216_s27 = smul.u32 (%p1325_p4), 288, %s159_s25 }
  0x11   : > { %s1341_s30 = scalar_lea.vmem (%p1325_p4), %s1611_s1, %s1169_s26 }
  0x12   : > { %v263_v0 = vld [vmem:[%s1341_s30] sm:$0xff] (%p1325_p4)  ;;  %v265_v1 = vld [vmem:[%s1341_s30 + $0x10] sm:$0xff] (%p1325_p4)  ;;  %s1346_s5 = scalar_lea.vmem (%p1325_p4), [#allocation2], %s1216_s27 }
  0x13   : > { %v267_v2 = vld [vmem:[%s1341_s30 + $0x20] sm:$0xff] (%p1325_p4)  ;;  %264 = vst [vmem:[%s1346_s5] sm:$0xff] (%p1325_p4), %v263_v0  ;;  %v269_v3 = vld [vmem:[%s1341_s30 + $0x30] sm:$0xff] (%p1325_p4) }
  0x14   : > { %266 = vst [vmem:[%s1346_s5 + $0x8] sm:$0xff] %v265_v1  ;;  %v271_v4 = vld [vmem:[%s1341_s30 + $0x40] sm:$0xff]  ;;  %v273_v5 = vld [vmem:[%s1341_s30 + $0x50] sm:$0xff] }
  0x15   : > { %268 = vst [vmem:[%s1346_s5 + $0x10] sm:$0xff] %v267_v2  ;;  %v275_v6 = vld [vmem:[%s1341_s30 + $0x60] sm:$0xff]  ;;  %v277_v7 = vld [vmem:[%s1341_s30 + $0x70] sm:$0xff] }
  0x16   : > { %270 = vst [vmem:[%s1346_s5 + $0x18] sm:$0xff] %v269_v3  ;;  %v279_v8 = vld [vmem:[%s1341_s30 + $0x80] sm:$0xff]  ;;  %v281_v9 = vld [vmem:[%s1341_s30 + $0x90] sm:$0xff] }
  0x17   : > { %272 = vst [vmem:[%s1346_s5 + $0x20] sm:$0xff] %v271_v4  ;;  %v283_v10 = vld [vmem:[%s1341_s30 + $0xa0] sm:$0xff]  ;;  %v285_v11 = vld [vmem:[%s1341_s30 + $0xb0] sm:$0xff] }
  0x18   : > { %274 = vst [vmem:[%s1346_s5 + $0x28] sm:$0xff] %v273_v5  ;;  %v287_v12 = vld [vmem:[%s1341_s30 + $0xc0] sm:$0xff]  ;;  %v289_v13 = vld [vmem:[%s1341_s30 + $0xd0] sm:$0xff] }
  0x19   : > { %276 = vst [vmem:[%s1346_s5 + $0x30] sm:$0xff] %v275_v6  ;;  %v291_v14 = vld [vmem:[%s1341_s30 + $0xe0] sm:$0xff]  ;;  %v293_v15 = vld [vmem:[%s1341_s30 + $0xf0] sm:$0xff] }
  0x1a   : > { %278 = vst [vmem:[%s1346_s5 + $0x38] sm:$0xff] %v277_v7  ;;  %v295_v16 = vld [vmem:[%s1341_s30 + $0x100] sm:$0xff]  ;;  %v297_v17 = vld [vmem:[%s1341_s30 + $0x110] sm:$0xff] }
  0x1b   : > { %280 = vst [vmem:[%s1346_s5 + $0x40] sm:$0xff] %v279_v8  ;;  %v299_v18 = vld [vmem:[%s1341_s30 + $0x120] sm:$0xff]  ;;  %v301_v19 = vld [vmem:[%s1341_s30 + $0x130] sm:$0xff] }
  0x1c   : > { %282 = vst [vmem:[%s1346_s5 + $0x48] sm:$0xff] %v281_v9  ;;  %v303_v20 = vld [vmem:[%s1341_s30 + $0x140] sm:$0xff]  ;;  %v305_v21 = vld [vmem:[%s1341_s30 + $0x150] sm:$0xff] }
  0x1d   : > { %284 = vst [vmem:[%s1346_s5 + $0x50] sm:$0xff] %v283_v10  ;;  %v307_v22 = vld [vmem:[%s1341_s30 + $0x160] sm:$0xff]  ;;  %v309_v23 = vld [vmem:[%s1341_s30 + $0x170] sm:$0xff] }
  0x1e   : > { %286 = vst [vmem:[%s1346_s5 + $0x58] sm:$0xff] %v285_v11  ;;  %v311_v24 = vld [vmem:[%s1341_s30 + $0x180] sm:$0xff]  ;;  %v313_v25 = vld [vmem:[%s1341_s30 + $0x190] sm:$0xff] }
  0x1f   : > { %288 = vst [vmem:[%s1346_s5 + $0x60] sm:$0xff] %v287_v12  ;;  %v315_v26 = vld [vmem:[%s1341_s30 + $0x1a0] sm:$0xff]  ;;  %v317_v27 = vld [vmem:[%s1341_s30 + $0x1b0] sm:$0xff] }
  0x20   : > { %290 = vst [vmem:[%s1346_s5 + $0x68] sm:$0xff] %v289_v13  ;;  %v319_v28 = vld [vmem:[%s1341_s30 + $0x1c0] sm:$0xff]  ;;  %v321_v29 = vld [vmem:[%s1341_s30 + $0x1d0] sm:$0xff] }
  0x21   : > { %292 = vst [vmem:[%s1346_s5 + $0x70] sm:$0xff] %v291_v14  ;;  %v323_v30 = vld [vmem:[%s1341_s30 + $0x1e0] sm:$0xff]  ;;  %v325_v31 = vld [vmem:[%s1341_s30 + $0x1f0] sm:$0xff] }
  0x22   : > { %294 = vst [vmem:[%s1346_s5 + $0x78] sm:$0xff] %v293_v15  ;;  %v327_v32 = vld [vmem:[%s1341_s30 + $0x200] sm:$0xff]  ;;  %v329_v33 = vld [vmem:[%s1341_s30 + $0x210] sm:$0xff] }
  0x23   : > { %296 = vst [vmem:[%s1346_s5 + $0x80] sm:$0xff] %v295_v16  ;;  %v331_v34 = vld [vmem:[%s1341_s30 + $0x220] sm:$0xff]  ;;  %v333_v35 = vld [vmem:[%s1341_s30 + $0x230] sm:$0xff] }
  0x24   : > { %298 = vst [vmem:[%s1346_s5 + $0x88] sm:$0xff] %v297_v17 }
  0x25   : > { %300 = vst [vmem:[%s1346_s5 + $0x90] sm:$0xff] %v299_v18 }
  0x26   : > { %302 = vst [vmem:[%s1346_s5 + $0x98] sm:$0xff] %v301_v19 }
  0x27   : > { %304 = vst [vmem:[%s1346_s5 + $0xa0] sm:$0xff] %v303_v20 }
  0x28   : > { %306 = vst [vmem:[%s1346_s5 + $0xa8] sm:$0xff] %v305_v21 }
  0x29   : > { %308 = vst [vmem:[%s1346_s5 + $0xb0] sm:$0xff] %v307_v22 }
  0x2a   : > { %310 = vst [vmem:[%s1346_s5 + $0xb8] sm:$0xff] %v309_v23 }
  0x2b   : > { %312 = vst [vmem:[%s1346_s5 + $0xc0] sm:$0xff] %v311_v24 }
  0x2c   : > { %314 = vst [vmem:[%s1346_s5 + $0xc8] sm:$0xff] %v313_v25 }
  0x2d   : > { %316 = vst [vmem:[%s1346_s5 + $0xd0] sm:$0xff] %v315_v26 }
  0x2e   : > { %318 = vst [vmem:[%s1346_s5 + $0xd8] sm:$0xff] %v317_v27 }
  0x2f   : > { %320 = vst [vmem:[%s1346_s5 + $0xe0] sm:$0xff] %v319_v28 }
  0x30   : > { %322 = vst [vmem:[%s1346_s5 + $0xe8] sm:$0xff] %v321_v29 }
  0x31   : > { %324 = vst [vmem:[%s1346_s5 + $0xf0] sm:$0xff] %v323_v30 }
  0x32   : > { %326 = vst [vmem:[%s1346_s5 + $0xf8] sm:$0xff] %v325_v31 }
  0x33   : > { %328 = vst [vmem:[%s1346_s5 + $0x100] sm:$0xff] %v327_v32 }
  0x34   : > { %330 = vst [vmem:[%s1346_s5 + $0x108] sm:$0xff] %v329_v33 }
  0x35   : > { %332 = vst [vmem:[%s1346_s5 + $0x110] sm:$0xff] %v331_v34 }
  0x36   : > { %334 = vst [vmem:[%s1346_s5 + $0x118] sm:$0xff] %v333_v35 }
  0x37 PF: > { %340 = sbr.rel (!%p1325_p4) target bundleno = 67 (0x43), region = 66  ;;  %s342_s6 = sand.u32 (%p1325_p4), 1, %s1263_s16  }
  0x38   : > { %s1170_s7 = sshll.u32 (%p1325_p4), %s1267_s17, 4  ;;  %s986_s8 = sshll.u32 (%p1325_p4), %s342_s6, 6 }
  0x39   : > { %s347_s11 = scalar_lea.vmem (%p1325_p4), %s1613_s3, %s1170_s7  ;;  %s344_s12 = scalar_lea.vmem (%p1325_p4), [#allocation3], %s986_s8 }
  0x3a   : > { %v360_v36 = vld [vmem:[%s347_s11] sm:$0xff] (%p1325_p4)  ;;  %v362_v37 = vld [vmem:[%s347_s11 + $0x8] sm:$0xff] (%p1325_p4) }
  0x3b   : > { %v364_v38 = vld [vmem:[%s347_s11 + $0x20] sm:$0xff] (%p1325_p4)  ;;  %361 = vst [vmem:[%s344_s12] sm:$0xff] (%p1325_p4), %v360_v36  ;;  %v366_v39 = vld [vmem:[%s347_s11 + $0x28] sm:$0xff] (%p1325_p4) }
  0x3c   : > { %363 = vst [vmem:[%s344_s12 + $0x8] sm:$0xff] %v362_v37  ;;  %v368_v40 = vld [vmem:[%s347_s11 + $0x40] sm:$0xff]  ;;  %v370_v41 = vld [vmem:[%s347_s11 + $0x48] sm:$0xff] }
  0x3d   : > { %365 = vst [vmem:[%s344_s12 + $0x10] sm:$0xff] %v364_v38  ;;  %v372_v42 = vld [vmem:[%s347_s11 + $0x60] sm:$0xff]  ;;  %v374_v43 = vld [vmem:[%s347_s11 + $0x68] sm:$0xff] }
  0x3e   : > { %367 = vst [vmem:[%s344_s12 + $0x18] sm:$0xff] %v366_v39 }
  0x3f   : > { %369 = vst [vmem:[%s344_s12 + $0x20] sm:$0xff] %v368_v40 }
  0x40   : > { %371 = vst [vmem:[%s344_s12 + $0x28] sm:$0xff] %v370_v41 }
  0x41   : > { %373 = vst [vmem:[%s344_s12 + $0x30] sm:$0xff] %v372_v42 }
  0x42   : > { %375 = vst [vmem:[%s344_s12 + $0x38] sm:$0xff] %v374_v43 }
  0x43 PF: > { %p989_p7 = scmp.ge.s32.totalorder %s1267_s17, 1  ;;  %p380_p8 = scmp.lt.s32.totalorder %s1267_s17, 3 }
  0x45   : > { %p381_p9 = pnand %p989_p7, %p380_p8 }
  0x46   : > { %s387_s13 = sand.u32 (!%p381_p9), 1, %s1259_s15  }
  0x47   : > { %384 = sbr.rel (%p381_p9) target bundleno = 295 (0x127), region = 89  ;;  %s990_s11 = sshll.u32 (!%p381_p9), %s387_s13, 6 }
  0x48   : > { %s1217_s14 = smul.u32 (!%p381_p9), 288, %s387_s13  ;;  %s1565_s12 = scalar_lea.vmem (!%p381_p9), [#allocation3], %s990_s11 }
  0x49   : > { %s1568_s15 = scalar_lea.vmem (!%p381_p9), [#allocation4], %s990_s11 }
  0x4a   : > { %s1429_s20 = scalar_lea.vmem (!%p381_p9), [#allocation2], %s1217_s14 }
  0x4c   : > { %v1074_v44 = vld [vmem:[%s1429_s20 + $0x70] sm:$0xf]  ;;  %v1192_v45 = vld [vmem:[%s1429_s20 + $0x74] sm:$0xf0]  ;;  %vm704_vm0 = vcmask 261120   ;;  %s1213_s13 = sshll.u32 (%p1329_p5), %s980_s18, 4 }
  0x4d   : > { %v1138_v46 = vld [vmem:[%s1429_s20 + $0xf0] sm:$0xf]  ;;  %v1075_v47 = vor.u32 %v1192_v45, %v1074_v44  ;;  %v1208_v48 = vld [vmem:[%s1429_s20 + $0xf4] sm:$0xf0]  ;;  %v1191_v53 = vld [vmem:[%s1429_s20 + $0x74] sm:$0xf]  ;;  %s874_s23 = scalar_lea.vmem (%p1329_p5), %s1614_s4, %s1213_s13 }
  0x4e   : > { %v1154_v49 = vld [vmem:[%s1429_s20 + $0x110] sm:$0xf]  ;;  %v1212_v50 = vld [vmem:[%s1429_s20 + $0x114] sm:$0xf0]  ;;  %v1139_v51 = vor.u32 %v1208_v48, %v1138_v46  ;;  %v1076_v54 = vld [vmem:[%s1429_s20 + $0x78] sm:$0xf0] }
  0x4f   : > { %v1155_v52 = vor.u32 %v1212_v50, %v1154_v49  ;;  %v1066_v55 = vld [vmem:[%s1429_s20 + $0x60] sm:$0xf]  ;;  %v1002_v56 = vld [vmem:[%s1610_s0 + $0x8] sm:$0xf]  ;;  %v1173_v57 = vld [vmem:[%s1610_s0 + $0x10] sm:$0xf0]  ;;  %711 = vmatpush.bf16.msra.mxu0 %v1075_v47  ;;  %v1079_v58 = vor.u32 %v1191_v53, %v1076_v54 }
  0x50   : > { %v1190_v59 = vld [vmem:[%s1429_s20 + $0x64] sm:$0xf0]  ;;  %v1130_v60 = vld [vmem:[%s1429_s20 + $0xe0] sm:$0xf]  ;;  %730 = vmatpush.bf16.msra.mxu1 %v1139_v51  ;;  %v1189_v2 = vld [vmem:[%s1429_s20 + $0x64] sm:$0xf]  ;;  %v1458_v12 = vor.u32 %v1173_v57, %v1002_v56 }
  0x51   : > { %v1206_v61 = vld [vmem:[%s1429_s20 + $0xe4] sm:$0xf0]  ;;  %755 = vmatpush.bf16.msra.mxu2 %v1155_v52  ;;  %v1067_v62 = vor.u32 %v1190_v59, %v1066_v55  ;;  %v1146_v0 = vld [vmem:[%s1429_s20 + $0x100] sm:$0xf]  ;;  %768 = vmatpush.bf16.msra.mxu3 %v1079_v58  ;;  %v1068_v4 = vld [vmem:[%s1429_s20 + $0x68] sm:$0xf0] }
  0x52   : > { %v1131_v63 = vor.u32 %v1206_v61, %v1130_v60  ;;  %v1210_v1 = vld [vmem:[%s1429_s20 + $0x104] sm:$0xf0]  ;;  %v1207_v5 = vld [vmem:[%s1429_s20 + $0xf4] sm:$0xf]  ;;  %v1140_v6 = vld [vmem:[%s1429_s20 + $0xf8] sm:$0xf0]  ;;  %v1071_v7 = vor.u32 %v1189_v2, %v1068_v4 }
  0x53   : > { %v1147_v3 = vor.u32 %v1210_v1, %v1146_v0  ;;  %v1143_v8 = vor.u32 %v1207_v5, %v1140_v6  ;;  %v1058_v9 = vld [vmem:[%s1429_s20 + $0x50] sm:$0xf]  ;;  %v1188_v10 = vld [vmem:[%s1429_s20 + $0x54] sm:$0xf0]  ;;  %712 = vmatpush.bf16.msra.mxu0 %v1067_v62  ;;  %v1187_v15 = vld [vmem:[%s1429_s20 + $0x54] sm:$0xf] }
  0x54   : > { %v1122_v11 = vld [vmem:[%s1429_s20 + $0xd0] sm:$0xf]  ;;  %v1059_v13 = vor.u32 %v1188_v10, %v1058_v9  ;;  %v1204_v14 = vld [vmem:[%s1429_s20 + $0xd4] sm:$0xf0]  ;;  %v1060_v16 = vld [vmem:[%s1429_s20 + $0x58] sm:$0xf0]  ;;  %731 = vmatpush.bf16.msra.mxu1 %v1131_v63 }
  0x55   : > { %756 = vmatpush.bf16.msra.mxu2 %v1147_v3  ;;  %v1123_v17 = vor.u32 %v1204_v14, %v1122_v11  ;;  %v1205_v18 = vld [vmem:[%s1429_s20 + $0xe4] sm:$0xf]  ;;  %v1132_v19 = vld [vmem:[%s1429_s20 + $0xe8] sm:$0xf0]  ;;  %v1050_v20 = vld [vmem:[%s1429_s20 + $0x40] sm:$0xf]  ;;  %769 = vmatpush.bf16.msra.mxu3 %v1071_v7  ;;  %v1063_v21 = vor.u32 %v1187_v15, %v1060_v16 }
  0x56   : > { %v1135_v22 = vor.u32 %v1205_v18, %v1132_v19  ;;  %v1186_v23 = vld [vmem:[%s1429_s20 + $0x44] sm:$0xf0]  ;;  %v1114_v24 = vld [vmem:[%s1429_s20 + $0xc0] sm:$0xf]  ;;  %v1185_v26 = vld [vmem:[%s1429_s20 + $0x44] sm:$0xf] }
  0x57   : > { %v1202_v25 = vld [vmem:[%s1429_s20 + $0xc4] sm:$0xf0]  ;;  %v1052_v27 = vld [vmem:[%s1429_s20 + $0x48] sm:$0xf0]  ;;  %v1203_v28 = vld [vmem:[%s1429_s20 + $0xd4] sm:$0xf]  ;;  %713 = vmatpush.bf16.msra.mxu0 %v1059_v13  ;;  %v1051_v29 = vor.u32 %v1186_v23, %v1050_v20 }
  0x58   : > { %1160 = vmatmul.msk.bf16.vlgmr.msra.gmra.mxu2 %vm704_vm0, %v1458_v12  ;;  %v1124_v30 = vld [vmem:[%s1429_s20 + $0xd8] sm:$0xf0]  ;;  %732 = vmatpush.bf16.msra.mxu1 %v1123_v17  ;;  %v1115_v31 = vor.u32 %v1202_v25, %v1114_v24  ;;  %v1042_v32 = vld [vmem:[%s1429_s20 + $0x30] sm:$0xf]  ;;  %v1184_v33 = vld [vmem:[%s1429_s20 + $0x34] sm:$0xf0]  ;;  %v1055_v34 = vor.u32 %v1185_v26, %v1052_v27 }
  0x59   : > { %787 = vmatpush.bf16.msrb.mxu2 %v1143_v8  ;;  %770 = vmatpush.bf16.msra.mxu3 %v1063_v21  ;;  %v1127_v35 = vor.u32 %v1203_v28, %v1124_v30  ;;  %v1106_v36 = vld [vmem:[%s1429_s20 + $0xb0] sm:$0xf]  ;;  %v1200_v37 = vld [vmem:[%s1429_s20 + $0xb4] sm:$0xf0]  ;;  %v1183_v38 = vld [vmem:[%s1429_s20 + $0x34] sm:$0xf]  ;;  %v1043_v42 = vor.u32 %v1184_v33, %v1042_v32 }
  0x5a   : > { %v1044_v39 = vld [vmem:[%s1429_s20 + $0x38] sm:$0xf0]  ;;  %v1201_v40 = vld [vmem:[%s1429_s20 + $0xc4] sm:$0xf]  ;;  %v1116_v41 = vld [vmem:[%s1429_s20 + $0xc8] sm:$0xf0]  ;;  %v1107_v43 = vor.u32 %v1200_v37, %v1106_v36 }
  0x5b   : > { %714 = vmatpush.bf16.msra.mxu0 %v1051_v29  ;;  %v1034_v44 = vld [vmem:[%s1429_s20 + $0x20] sm:$0xf]  ;;  %v1182_v45 = vld [vmem:[%s1429_s20 + $0x24] sm:$0xf0]  ;;  %v1047_v46 = vor.u32 %v1183_v38, %v1044_v39  ;;  %v1119_v47 = vor.u32 %v1201_v40, %v1116_v41  ;;  %v1181_v50 = vld [vmem:[%s1429_s20 + $0x24] sm:$0xf] }
  0x5c   : > { %733 = vmatpush.bf16.msra.mxu1 %v1115_v31  ;;  %v1098_v48 = vld [vmem:[%s1429_s20 + $0xa0] sm:$0xf]  ;;  %v1198_v49 = vld [vmem:[%s1429_s20 + $0xa4] sm:$0xf0]  ;;  %v1036_v51 = vld [vmem:[%s1429_s20 + $0x28] sm:$0xf0]  ;;  %v1035_v54 = vor.u32 %v1182_v45, %v1034_v44 }
  0x5d   : > { %788 = vmatpush.bf16.msrb.mxu2 %v1135_v22  ;;  %771 = vmatpush.bf16.msra.mxu3 %v1055_v34  ;;  %v1199_v52 = vld [vmem:[%s1429_s20 + $0xb4] sm:$0xf]  ;;  %v1108_v53 = vld [vmem:[%s1429_s20 + $0xb8] sm:$0xf0]  ;;  %v1014_v55 = vld [vmem:[%s1610_s0 + $0x20] sm:$0xf]  ;;  %v1099_v56 = vor.u32 %v1198_v49, %v1098_v48  ;;  %v1039_v60 = vor.u32 %v1181_v50, %v1036_v51 }
  0x5e   : > { %v1176_v57 = vld [vmem:[%s1610_s0 + $0x28] sm:$0xf0]  ;;  %v1026_v58 = vld [vmem:[%s1429_s20 + $0x10] sm:$0xf]  ;;  %v1180_v59 = vld [vmem:[%s1429_s20 + $0x14] sm:$0xf0]  ;;  %v1111_v61 = vor.u32 %v1199_v52, %v1108_v53 }
  0x5f   : > { %715 = vmatpush.bf16.msra.mxu0 %v1043_v42  ;;  %v1090_v62 = vld [vmem:[%s1429_s20 + $0x90] sm:$0xf]  ;;  %v1196_v63 = vld [vmem:[%s1429_s20 + $0x94] sm:$0xf0]  ;;  %v1179_v0 = vld [vmem:[%s1429_s20 + $0x14] sm:$0xf]  ;;  %v1505_v4 = vor.u32 %v1176_v57, %v1014_v55  ;;  %v1027_v5 = vor.u32 %v1180_v59, %v1026_v58 }
  0x60   : > { %734 = vmatpush.bf16.msra.mxu1 %v1107_v43  ;;  %v1028_v1 = vld [vmem:[%s1429_s20 + $0x18] sm:$0xf0]  ;;  %v1197_v2 = vld [vmem:[%s1429_s20 + $0xa4] sm:$0xf]  ;;  %v1100_v3 = vld [vmem:[%s1429_s20 + $0xa8] sm:$0xf0]  ;;  %v1091_v9 = vor.u32 %v1196_v63, %v1090_v62 }
  0x61   : > { %789 = vmatpush.bf16.msrb.mxu2 %v1127_v35  ;;  %772 = vmatpush.bf16.msra.mxu3 %v1047_v46  ;;  %v1018_v6 = vld [vmem:[%s1429_s20] sm:$0xf]  ;;  %v1178_v7 = vld [vmem:[%s1429_s20 + $0x4] sm:$0xf0]  ;;  %v1177_v11 = vld [vmem:[%s1429_s20 + $0x4] sm:$0xf]  ;;  %v1031_v13 = vor.u32 %v1179_v0, %v1028_v1  ;;  %v1103_v14 = vor.u32 %v1197_v2, %v1100_v3 }
  0x62   : > { %v1082_v8 = vld [vmem:[%s1429_s20 + $0x80] sm:$0xf]  ;;  %v1194_v10 = vld [vmem:[%s1429_s20 + $0x84] sm:$0xf0]  ;;  %v1211_v15 = vld [vmem:[%s1429_s20 + $0x114] sm:$0xf]  ;;  %v1019_v22 = vor.u32 %v1178_v7, %v1018_v6 }
  0x63   : > { %716 = vmatpush.bf16.msra.mxu0 %v1035_v54  ;;  %v1156_v16 = vld [vmem:[%s1429_s20 + $0x118] sm:$0xf0]  ;;  %v470_v17 = vld [vmem:[%s1612_s2] sm:$0xff]  ;;  %v1020_v18 = vld [vmem:[%s1429_s20 + $0x8] sm:$0xf0]  ;;  %v1269_v21 = vmov 0   ;;  %v1083_v26 = vor.u32 %v1194_v10, %v1082_v8 }
  0x64   : > { %735 = vmatpush.bf16.msra.mxu1 %v1099_v56  ;;  %v1195_v19 = vld [vmem:[%s1429_s20 + $0x94] sm:$0xf]  ;;  %v1092_v20 = vld [vmem:[%s1429_s20 + $0x98] sm:$0xf0]  ;;  %1243 = vset.pattern.permute.xlu0 %v1269_v21  ;;  %v994_v23 = vld [vmem:[%s1610_s0] sm:$0xf]  ;;  %v1159_v29 = vor.u32 %v1211_v15, %v1156_v16  ;;  %v1023_v30 = vor.u32 %v1177_v11, %v1020_v18 }
  0x65   : > { %790 = vmatpush.bf16.msrb.mxu2 %v1119_v47  ;;  %773 = vmatpush.bf16.msra.mxu3 %v1039_v60  ;;  %v1172_v24 = vld [vmem:[%s1610_s0 + $0x8] sm:$0xf0]  ;;  %v472_v25 = vld [vmem:[%s1612_s2 + $0x10] sm:$0xff]  ;;  %v1171_v27 = vld [vmem:[%s1610_s0 + $0x4] sm:$0xf]  ;;  %v1095_v31 = vor.u32 %v1195_v19, %v1092_v20 }
  0x66   : > { %1244 = vset.pattern.permute.xlu1 %v1269_v21  ;;  %v996_v28 = vld [vmem:[%s1610_s0 + $0xc] sm:$0xf0]  ;;  %476 = vperm.xlu0 %1243, %v470_v17   ;;  %v1209_v32 = vld [vmem:[%s1429_s20 + $0x104] sm:$0xf]  ;;  %v1148_v33 = vld [vmem:[%s1429_s20 + $0x108] sm:$0xf0]  ;;  %v995_v34 = vor.u32 %v1172_v24, %v994_v23 }
  0x67   : > { %717 = vmatpush.bf16.msra.mxu0 %v1027_v5  ;;  %v1193_v35 = vld [vmem:[%s1429_s20 + $0x84] sm:$0xf]  ;;  %v1084_v36 = vld [vmem:[%s1429_s20 + $0x88] sm:$0xf0]  ;;  %486 = vperm.xlu1 %1244, %v472_v25   ;;  %v999_v37 = vor.u32 %v1171_v27, %v996_v28  ;;  %v1151_v38 = vor.u32 %v1209_v32, %v1148_v33  ;;  %v473_v41 = vld [vmem:[%s1612_s2 + $0x18] sm:$0xff] }
  0x68   : > { %1161 = vmatmul.msk.bf16.gmra.mxu2 %vm704_vm0, %v1505_v4  ;;  %736 = vmatpush.bf16.msra.mxu1 %v1091_v9  ;;  %v1087_v39 = vor.u32 %v1193_v35, %v1084_v36  ;;  %v471_v40 = vld [vmem:[%s1612_s2 + $0x8] sm:$0xff]  ;;  %v1006_v42 = vld [vmem:[%s1610_s0 + $0x18] sm:$0xf]  ;;  %v1175_v43 = vld [vmem:[%s1610_s0 + $0x20] sm:$0xf0] }
  0x69   : > { %791 = vmatpush.bf16.msrb.mxu2 %v1111_v61  ;;  %774 = vmatpush.bf16.msra.mxu3 %v1031_v13  ;;  %v1174_v44 = vld [vmem:[%s1610_s0 + $0x1c] sm:$0xf]  ;;  %v1008_v45 = vld [vmem:[%s1610_s0 + $0x24] sm:$0xf0]  ;;  %v1007_v46 = vor.u32 %v1175_v43, %v1006_v42  ;;  %v833_v57 = vld [vmem:[%s1565_s12] sm:$0xff] }
  0x6a   : > { %v1011_v47 = vor.u32 %v1174_v44, %v1008_v45  ;;  %v835_v5 = vld [vmem:[%s1565_s12 + $0x10] sm:$0xff]  ;;  %v837_v17 = vld [vmem:[%s1565_s12 + $0x20] sm:$0xff]  ;;  %v838_v45 = vld [vmem:[%s1565_s12 + $0x28] sm:$0xff] }
  0x6b   : > { %718 = vmatpush.bf16.msra.mxu0 %v1019_v22 }
  0x6c   : > { %737 = vmatpush.bf16.msra.mxu1 %v1083_v26 }
  0x6d   : > { %792 = vmatpush.bf16.msrb.mxu2 %v1103_v14  ;;  %775 = vmatpush.bf16.msra.mxu3 %v1023_v30 }
  0x6e   : > { %719 = vmatmul.bf16.vlgmr.msra.gmra.mxu0 %v995_v34  ;;  %481 = vperm.xlu0 %1243, %v471_v40   ;;  %v834_v40 = vld [vmem:[%s1565_s12 + $0x8] sm:$0xff] }
  0x6f   : > { %812 = vmatpush.bf16.msrb.mxu0 %v1159_v29  ;;  %738 = vmatmul.bf16.vlgmr.msra.gmra.mxu1 %v999_v37 }
  0x70   : > { %1214 = vmatpush.bf16.msrb.mxu1 %v1159_v29  ;;  %776 = vmatmul.bf16.vlgmr.msra.gmra.mxu3 %v995_v34 }
  0x71   : > { %793 = vmatpush.bf16.msrb.mxu2 %v1095_v31  ;;  %491 = vperm.xlu1 %1244, %v473_v41   ;;  %v839_v31 = vld [vmem:[%s1565_s12 + $0x30] sm:$0xff] }
  0x73   : > { %813 = vmatpush.bf16.msrb.mxu0 %v1151_v38 }
  0x74   : > { %1215 = vmatpush.bf16.msrb.mxu1 %v1151_v38 }
  0x75   : > { %794 = vmatpush.bf16.msrb.mxu2 %v1087_v39 }
  0x78   : > { %795 = vmatmul.bf16.vlgmr.msrb.gmra.mxu2 %v999_v37 }
  0x7e   : > { %724 = vmatmul.bf16.gmra.mxu0 %v1007_v46 }
  0x7f   : > { %743 = vmatmul.bf16.gmra.mxu1 %v1011_v47 }
  0x80   : > { %781 = vmatmul.bf16.gmra.mxu3 %v1007_v46 }
  0x88   : > { %800 = vmatmul.bf16.gmra.mxu2 %v1011_v47 }
  0x8e   : > { %1162 = vmatmul.msk.bf16.vlgmr.msrb.gmra.mxu0 %vm704_vm0, %v1458_v12 }
  0x8f   : > { %1163 = vmatmul.msk.bf16.vlgmr.msrb.gmra.mxu1 %vm704_vm0, %v1505_v4 }
  0xd8   : > { %v477_v50 = vpop.permute.xlu0 %476 }
  0xd9   : > { %v487_v3 = vpop.permute.xlu1 %486 }
  0xdb   : > { %v758_v48 = vpop.f32.mrf.mxu2 }
  0xe0   : > { %v482_v12 = vpop.permute.xlu0 %481 }
  0xe3   : > { %v760_v49 = vpop.f32.mrf.mxu2  ;;  %v492_v18 = vpop.permute.xlu1 %491 }
  0xeb   : > { %v763_v51 = vpop.f32.mrf.mxu2  ;;  %v720_v52 = vpop.f32.mrf.mxu0 }
  0xec   : > { %v721_v53 = vadd.f32 %v720_v52, %v477_v50  ;;  %v739_v54 = vpop.f32.mrf.mxu1 }
  0xee   : > { %v740_v55 = vadd.f32 %v739_v54, %v721_v53 }
  0xf0   : > { %v759_v56 = vadd.f32 %v758_v48, %v740_v55 }
  0xf2   : > { %v825_v58 = vmax.f32 %v759_v56, 0.0 }
  0xf3   : > { %v765_v59 = vpop.f32.mrf.mxu2  ;;  %v777_v60 = vpop.f32.mrf.mxu3 }
  0xf4   : > { %v722_v61 = vpop.f32.mrf.mxu0  ;;  %v841_v62 = vadd.f32 %v833_v57, %v825_v58  ;;  %v741_v0 = vpop.f32.mrf.mxu1  ;;  %v778_v26 = vadd.f32 %v777_v60, %v477_v50 }
  0xf5   : > { %v723_v63 = vadd.f32 %v722_v61, %v482_v12  ;;  %v840_v61 = vld [vmem:[%s1565_s12 + $0x38] sm:$0xff] }
  0xf6   : > { %v849_v1 = vmax.f32 %v841_v62, 0.0 }
  0xf7   : > { %v742_v2 = vadd.f32 %v741_v0, %v723_v63 }
  0xf8   : > { %857 = vst [vmem:[%s1568_s15] sm:$0xff] %v849_v1 }
  0xf9   : > { %v761_v4 = vadd.f32 %v760_v49, %v742_v2 }
  0xfb   : > { %v827_v6 = vmax.f32 %v761_v4, 0.0  ;;  %v796_v7 = vpop.f32.mrf.mxu2  ;;  %v779_v8 = vpop.f32.mrf.mxu3 }
  0xfc   : > { %v725_v9 = vpop.f32.mrf.mxu0  ;;  %v744_v13 = vpop.f32.mrf.mxu1  ;;  %v797_v32 = vadd.f32 %v796_v7, %v778_v26  ;;  %v780_v47 = vadd.f32 %v779_v8, %v482_v12 }
  0xfd   : > { %v843_v10 = vadd.f32 %v835_v5, %v827_v6  ;;  %v726_v11 = vadd.f32 %v725_v9, %v487_v3 }
  0xff   : > { %v851_v14 = vmax.f32 %v843_v10, 0.0  ;;  %v745_v15 = vadd.f32 %v744_v13, %v726_v11 }
 0x101   : > { %859 = vst [vmem:[%s1568_s15 + $0x10] sm:$0xff] %v851_v14  ;;  %v764_v16 = vadd.f32 %v763_v51, %v745_v15 }
 0x103   : > { %v829_v19 = vmax.f32 %v764_v16, 0.0  ;;  %v798_v20 = vpop.f32.mrf.mxu2  ;;  %v782_v23 = vpop.f32.mrf.mxu3 }
 0x104   : > { %v727_v21 = vpop.f32.mrf.mxu0  ;;  %v746_v25 = vpop.f32.mrf.mxu1  ;;  %v783_v29 = vadd.f32 %v782_v23, %v487_v3  ;;  %v799_v51 = vadd.f32 %v798_v20, %v780_v47  ;;  %v887_v3 = vld [vmem:[%s1568_s15] sm:$0xff] (%p1329_p5) }
 0x105   : > { %v845_v22 = vadd.f32 %v837_v17, %v829_v19  ;;  %v728_v24 = vadd.f32 %v727_v21, %v492_v18  ;;  %888 = vst [vmem:[%s874_s23] sm:$0xff] (%p1329_p5), %v887_v3 }
 0x107   : > { %v853_v27 = vmax.f32 %v845_v22, 0.0  ;;  %v747_v28 = vadd.f32 %v746_v25, %v728_v24 }
 0x108   : > { %v891_v5 = vld [vmem:[%s1568_s15 + $0x10] sm:$0xff] (%p1329_p5) }
 0x109   : > { %861 = vst [vmem:[%s1568_s15 + $0x20] sm:$0xff] %v853_v27  ;;  %v766_v30 = vadd.f32 %v765_v59, %v747_v28  ;;  %v836_v59 = vld [vmem:[%s1565_s12 + $0x18] sm:$0xff] }
 0x10a   : > { %892 = vst [vmem:[%s874_s23 + $0x20] sm:$0xff] (%p1329_p5), %v891_v5 }
 0x10b   : > { %v831_v33 = vmax.f32 %v766_v30, 0.0  ;;  %v801_v34 = vpop.f32.mrf.mxu2  ;;  %v784_v43 = vpop.f32.mrf.mxu3 }
 0x10c   : > { %v802_v35 = vadd.f32 %v801_v34, %v783_v29  ;;  %v815_v36 = vpop.f32.mrf.mxu0  ;;  %v820_v39 = vpop.f32.mrf.mxu1  ;;  %v785_v49 = vadd.f32 %v784_v43, %v492_v18 }
 0x10d   : > { %v847_v37 = vadd.f32 %v839_v31, %v831_v33  ;;  %v816_v38 = vadd.f32 %v815_v36, %v797_v32 }
 0x10e   : > { %v821_v41 = vadd.f32 %v820_v39, %v802_v35 }
 0x10f   : > { %v855_v42 = vmax.f32 %v847_v37, 0.0  ;;  %v826_v44 = vmax.f32 %v816_v38, 0.0 }
 0x110   : > { %v830_v46 = vmax.f32 %v821_v41, 0.0  ;;  %v895_v7 = vld [vmem:[%s1568_s15 + $0x20] sm:$0xff] (%p1329_p5) }
 0x111   : > { %863 = vst [vmem:[%s1568_s15 + $0x30] sm:$0xff] %v855_v42  ;;  %v842_v48 = vadd.f32 %v834_v40, %v826_v44 }
 0x112   : > { %v846_v50 = vadd.f32 %v838_v45, %v830_v46  ;;  %896 = vst [vmem:[%s874_s23 + $0x40] sm:$0xff] (%p1329_p5), %v895_v7 }
 0x113   : > { %v850_v52 = vmax.f32 %v842_v48, 0.0  ;;  %v803_v53 = vpop.f32.mrf.mxu2 }
 0x114   : > { %v854_v54 = vmax.f32 %v846_v50, 0.0  ;;  %v804_v55 = vadd.f32 %v803_v53, %v785_v49  ;;  %v817_v56 = vpop.f32.mrf.mxu0  ;;  %v822_v58 = vpop.f32.mrf.mxu1 }
 0x115   : > { %858 = vst [vmem:[%s1568_s15 + $0x8] sm:$0xff] %v850_v52  ;;  %v818_v57 = vadd.f32 %v817_v56, %v799_v51 }
 0x116   : > { %862 = vst [vmem:[%s1568_s15 + $0x28] sm:$0xff] %v854_v54  ;;  %v823_v60 = vadd.f32 %v822_v58, %v804_v55 }
 0x117   : > { %v828_v12 = vmax.f32 %v818_v57, 0.0 }
 0x118   : > { %v832_v62 = vmax.f32 %v823_v60, 0.0  ;;  %v899_v9 = vld [vmem:[%s1568_s15 + $0x30] sm:$0xff] (%p1329_p5) }
 0x119   : > { %v844_v63 = vadd.f32 %v836_v59, %v828_v12  ;;  %900 = vst [vmem:[%s874_s23 + $0x60] sm:$0xff] (%p1329_p5), %v899_v9 }
 0x11a   : > { %v848_v0 = vadd.f32 %v840_v61, %v832_v62  ;;  %871 = sbr.rel (!%p1329_p5) target bundleno = 295 (0x127), region = 101 }
 0x11b   : > { %v852_v1 = vmax.f32 %v844_v63, 0.0 }
 0x11c   : > { %v856_v2 = vmax.f32 %v848_v0, 0.0  ;;  %v889_v4 = vld [vmem:[%s1568_s15 + $0x8] sm:$0xff] (%p1329_p5) }
 0x11d   : > { %860 = vst [vmem:[%s1568_s15 + $0x18] sm:$0xff] %v852_v1  ;;  %v897_v8 = vld [vmem:[%s1568_s15 + $0x28] sm:$0xff] (%p1329_p5) }
 0x11e   : > { %864 = vst [vmem:[%s1568_s15 + $0x38] sm:$0xff] %v856_v2 }
 0x11f   : > { %890 = vst [vmem:[%s874_s23 + $0x8] sm:$0xff] %v889_v4 }
 0x120   : > { %898 = vst [vmem:[%s874_s23 + $0x48] sm:$0xff] %v897_v8 }
 0x124   : > { %v893_v6 = vld [vmem:[%s1568_s15 + $0x18] sm:$0xff] }
 0x125   : > { %894 = vst [vmem:[%s874_s23 + $0x28] sm:$0xff] %v893_v6  ;;  %v901_v10 = vld [vmem:[%s1568_s15 + $0x38] sm:$0xff] }
 0x126   : > { %902 = vst [vmem:[%s874_s23 + $0x68] sm:$0xff] %v901_v10 }
 0x127 PF: > { %p11_p10 = scmp.ge.s32.totalorder %s1312_s19, 4   ;;  %s1617_s15 = smov %s1263_s16 }
 0x128   : > { %s1618_s16 = smov %s1323_s22  ;;  %s1619_s17 = smov %s1312_s19 }
 0x129   :  { %13 = sbr.rel (!%p11_p10) target bundleno = 2 (0x2), region = 163 }

// kernel: fl2d_forward.42
= control target key start
LH: loop header
LB: loop body
LE: loop exit
PB: predicated region body
PF: predicated region fallthrough
CT: control target
= control target key end

     0   :  { %s1556_s18 = smov 0   ;;  %s1558_s19 = smov 0   ;;  %s2060_s0 = inlined_call_operand.vmem [shape: bf16[64,288], index: 0, kind: input, shape index: {}]   ;;  %s2061_s1 = inlined_call_operand.vmem [shape: bf16[288,512], index: 1, kind: input, shape index: {}]   ;;  %s2062_s2 = inlined_call_operand.vmem [shape: f32[64,1], index: 2, kind: input, shape index: {}]   ;;  %s2063_s3 = inlined_call_operand.vmem [shape: f32[64,1], index: 3, kind: input, shape index: {}]   ;;  %s2064_s4 = inlined_call_operand.vmem [shape: f32[64,1], index: 4, kind: input, shape index: {}]   ;;  %s2065_s5 = inlined_call_operand.vmem [shape: f32[64,512], index: 5, kind: output, shape index: {}]  }
   0x1   :  { %s1560_s20 = smov 0  }
   0x2 LB: > { %s1198_s21 = sadd.s32 4294967295, %s1523_s20   ;;  %s1573_s22 = sadd.s32 1, %s1523_s20   ;;  %s1523_s20 = sphi %s1560_s20, %s2069_s20   ;;  %s1519_s19 = sphi %s1558_s19, %s2068_s19   ;;  %s1515_s18 = sphi %s1556_s18, %s2067_s18  }
   0x3   : > { %s40_s23 = ssub.s32 %s1523_s20, %s1573_s22  ;;  %s43_s24 = sadd.s32 1, %s1519_s19 }
   0x4   : > { %p41_p0 = scmp.eq.s32.totalorder %s40_s23, 0  ;;  %p50_p1 = scmp.ne.s32.totalorder %s1519_s19, %s1515_s18 }
   0x5   : > { %p51_p2 = scmp.eq.s32.totalorder %s1523_s20, 0  ;;  %p143_p3 = scmp.eq.s32.totalorder %s1198_s21, 1 }
   0x6   : > { %s1584_s25 = scalar_select %p41_p0, %s1519_s19, %s43_s24  }
   0x7   : > { %p52_p4 = por %p51_p2, %p50_p1  ;;  %p1586_p5 = por %p143_p3, %p50_p1 }
   0x8   : > { %p1201_p6 = scmp.ge.s32.totalorder %s1523_s20, 2 }
   0xa   : > { %177 = sbr.rel (%p1201_p6) target bundleno = 55 (0x37), region = 32 }
   0xf   : > { %180 = sbr.rel (!%p52_p4) target bundleno = 55 (0x37), region = 36  ;;  %s182_s27 = sand.u32 (%p52_p4), 1, %s1519_s19  }
  0x10   : > { %s1411_s28 = sshll.u32 (%p52_p4), %s1523_s20, 3  ;;  %s1471_s29 = smul.u32 (%p52_p4), 288, %s182_s27 }
  0x11   : > { %s1596_s7 = scalar_lea.vmem (%p52_p4), %s2061_s1, %s1411_s28 }
  0x12   : > { %v286_v0 = vld [vmem:[%s1596_s7] sm:$0xff] (%p52_p4)  ;;  %v288_v1 = vld [vmem:[%s1596_s7 + $0x10] sm:$0xff] (%p52_p4)  ;;  %s1601_s8 = scalar_lea.vmem (%p52_p4), [#allocation2], %s1471_s29 }
  0x13   : > { %v290_v2 = vld [vmem:[%s1596_s7 + $0x20] sm:$0xff] (%p52_p4)  ;;  %287 = vst [vmem:[%s1601_s8] sm:$0xff] (%p52_p4), %v286_v0  ;;  %v292_v3 = vld [vmem:[%s1596_s7 + $0x30] sm:$0xff] (%p52_p4) }
  0x14   : > { %289 = vst [vmem:[%s1601_s8 + $0x8] sm:$0xff] %v288_v1  ;;  %v294_v4 = vld [vmem:[%s1596_s7 + $0x40] sm:$0xff]  ;;  %v296_v5 = vld [vmem:[%s1596_s7 + $0x50] sm:$0xff] }
  0x15   : > { %291 = vst [vmem:[%s1601_s8 + $0x10] sm:$0xff] %v290_v2  ;;  %v298_v6 = vld [vmem:[%s1596_s7 + $0x60] sm:$0xff]  ;;  %v300_v7 = vld [vmem:[%s1596_s7 + $0x70] sm:$0xff] }
  0x16   : > { %293 = vst [vmem:[%s1601_s8 + $0x18] sm:$0xff] %v292_v3  ;;  %v302_v8 = vld [vmem:[%s1596_s7 + $0x80] sm:$0xff]  ;;  %v304_v9 = vld [vmem:[%s1596_s7 + $0x90] sm:$0xff] }
  0x17   : > { %295 = vst [vmem:[%s1601_s8 + $0x20] sm:$0xff] %v294_v4  ;;  %v306_v10 = vld [vmem:[%s1596_s7 + $0xa0] sm:$0xff]  ;;  %v308_v11 = vld [vmem:[%s1596_s7 + $0xb0] sm:$0xff] }
  0x18   : > { %297 = vst [vmem:[%s1601_s8 + $0x28] sm:$0xff] %v296_v5  ;;  %v310_v12 = vld [vmem:[%s1596_s7 + $0xc0] sm:$0xff]  ;;  %v312_v13 = vld [vmem:[%s1596_s7 + $0xd0] sm:$0xff] }
  0x19   : > { %299 = vst [vmem:[%s1601_s8 + $0x30] sm:$0xff] %v298_v6  ;;  %v314_v14 = vld [vmem:[%s1596_s7 + $0xe0] sm:$0xff]  ;;  %v316_v15 = vld [vmem:[%s1596_s7 + $0xf0] sm:$0xff] }
  0x1a   : > { %301 = vst [vmem:[%s1601_s8 + $0x38] sm:$0xff] %v300_v7  ;;  %v318_v16 = vld [vmem:[%s1596_s7 + $0x100] sm:$0xff]  ;;  %v320_v17 = vld [vmem:[%s1596_s7 + $0x110] sm:$0xff] }
  0x1b   : > { %303 = vst [vmem:[%s1601_s8 + $0x40] sm:$0xff] %v302_v8  ;;  %v322_v18 = vld [vmem:[%s1596_s7 + $0x120] sm:$0xff]  ;;  %v324_v19 = vld [vmem:[%s1596_s7 + $0x130] sm:$0xff] }
  0x1c   : > { %305 = vst [vmem:[%s1601_s8 + $0x48] sm:$0xff] %v304_v9  ;;  %v326_v20 = vld [vmem:[%s1596_s7 + $0x140] sm:$0xff]  ;;  %v328_v21 = vld [vmem:[%s1596_s7 + $0x150] sm:$0xff] }
  0x1d   : > { %307 = vst [vmem:[%s1601_s8 + $0x50] sm:$0xff] %v306_v10  ;;  %v330_v22 = vld [vmem:[%s1596_s7 + $0x160] sm:$0xff]  ;;  %v332_v23 = vld [vmem:[%s1596_s7 + $0x170] sm:$0xff] }
  0x1e   : > { %309 = vst [vmem:[%s1601_s8 + $0x58] sm:$0xff] %v308_v11  ;;  %v334_v24 = vld [vmem:[%s1596_s7 + $0x180] sm:$0xff]  ;;  %v336_v25 = vld [vmem:[%s1596_s7 + $0x190] sm:$0xff] }
  0x1f   : > { %311 = vst [vmem:[%s1601_s8 + $0x60] sm:$0xff] %v310_v12  ;;  %v338_v26 = vld [vmem:[%s1596_s7 + $0x1a0] sm:$0xff]  ;;  %v340_v27 = vld [vmem:[%s1596_s7 + $0x1b0] sm:$0xff] }
  0x20   : > { %313 = vst [vmem:[%s1601_s8 + $0x68] sm:$0xff] %v312_v13  ;;  %v342_v28 = vld [vmem:[%s1596_s7 + $0x1c0] sm:$0xff]  ;;  %v344_v29 = vld [vmem:[%s1596_s7 + $0x1d0] sm:$0xff] }
  0x21   : > { %315 = vst [vmem:[%s1601_s8 + $0x70] sm:$0xff] %v314_v14  ;;  %v346_v30 = vld [vmem:[%s1596_s7 + $0x1e0] sm:$0xff]  ;;  %v348_v31 = vld [vmem:[%s1596_s7 + $0x1f0] sm:$0xff] }
  0x22   : > { %317 = vst [vmem:[%s1601_s8 + $0x78] sm:$0xff] %v316_v15  ;;  %v350_v32 = vld [vmem:[%s1596_s7 + $0x200] sm:$0xff]  ;;  %v352_v33 = vld [vmem:[%s1596_s7 + $0x210] sm:$0xff] }
  0x23   : > { %319 = vst [vmem:[%s1601_s8 + $0x80] sm:$0xff] %v318_v16  ;;  %v354_v34 = vld [vmem:[%s1596_s7 + $0x220] sm:$0xff]  ;;  %v356_v35 = vld [vmem:[%s1596_s7 + $0x230] sm:$0xff] }
  0x24   : > { %321 = vst [vmem:[%s1601_s8 + $0x88] sm:$0xff] %v320_v17 }
  0x25   : > { %323 = vst [vmem:[%s1601_s8 + $0x90] sm:$0xff] %v322_v18 }
  0x26   : > { %325 = vst [vmem:[%s1601_s8 + $0x98] sm:$0xff] %v324_v19 }
  0x27   : > { %327 = vst [vmem:[%s1601_s8 + $0xa0] sm:$0xff] %v326_v20 }
  0x28   : > { %329 = vst [vmem:[%s1601_s8 + $0xa8] sm:$0xff] %v328_v21 }
  0x29   : > { %331 = vst [vmem:[%s1601_s8 + $0xb0] sm:$0xff] %v330_v22 }
  0x2a   : > { %333 = vst [vmem:[%s1601_s8 + $0xb8] sm:$0xff] %v332_v23 }
  0x2b   : > { %335 = vst [vmem:[%s1601_s8 + $0xc0] sm:$0xff] %v334_v24 }
  0x2c   : > { %337 = vst [vmem:[%s1601_s8 + $0xc8] sm:$0xff] %v336_v25 }
  0x2d   : > { %339 = vst [vmem:[%s1601_s8 + $0xd0] sm:$0xff] %v338_v26 }
  0x2e   : > { %341 = vst [vmem:[%s1601_s8 + $0xd8] sm:$0xff] %v340_v27 }
  0x2f   : > { %343 = vst [vmem:[%s1601_s8 + $0xe0] sm:$0xff] %v342_v28 }
  0x30   : > { %345 = vst [vmem:[%s1601_s8 + $0xe8] sm:$0xff] %v344_v29 }
  0x31   : > { %347 = vst [vmem:[%s1601_s8 + $0xf0] sm:$0xff] %v346_v30 }
  0x32   : > { %349 = vst [vmem:[%s1601_s8 + $0xf8] sm:$0xff] %v348_v31 }
  0x33   : > { %351 = vst [vmem:[%s1601_s8 + $0x100] sm:$0xff] %v350_v32 }
  0x34   : > { %353 = vst [vmem:[%s1601_s8 + $0x108] sm:$0xff] %v352_v33 }
  0x35   : > { %355 = vst [vmem:[%s1601_s8 + $0x110] sm:$0xff] %v354_v34 }
  0x36   : > { %357 = vst [vmem:[%s1601_s8 + $0x118] sm:$0xff] %v356_v35 }
  0x37 PF: > { %p1204_p7 = scmp.ge.s32.totalorder %s1523_s20, 1  ;;  %p362_p8 = scmp.lt.s32.totalorder %s1523_s20, 3 }
  0x39   : > { %p363_p9 = pnand %p1204_p7, %p362_p8 }
  0x3a   : > { %s369_s9 = sand.u32 (!%p363_p9), 1, %s1515_s18  }
  0x3b   : > { %366 = sbr.rel (%p363_p9) target bundleno = 336 (0x150), region = 74  ;;  %s1205_s8 = sshll.u32 (!%p363_p9), %s369_s9, 7 }
  0x3c   : > { %s1472_s10 = smul.u32 (!%p363_p9), 288, %s369_s9 }
  0x3e   : > { %s1683_s15 = scalar_lea.vmem (!%p363_p9), [#allocation2], %s1472_s10  ;;  %s1971_s10 = scalar_lea.vmem (!%p363_p9), [#allocation3], %s1205_s8 }
  0x40   : > { %v1525_v36 = vmov 0   ;;  %v452_v37 = vld [vmem:[%s2062_s2 + $0x10] sm:$0xff]  ;;  %v450_v38 = vld [vmem:[%s2062_s2] sm:$0xff]  ;;  %v1439_v40 = vld [vmem:[%s1683_s15 + $0x74] sm:$0xf0]  ;;  %vm738_vm0 = vcmask 261120  }
  0x41   : > { %1499 = vset.pattern.permute.xlu1 %v1525_v36  ;;  %1498 = vset.pattern.permute.xlu0 %v1525_v36  ;;  %v1312_v39 = vld [vmem:[%s1683_s15 + $0x70] sm:$0xf]  ;;  %v1459_v43 = vld [vmem:[%s1683_s15 + $0x114] sm:$0xf0]  ;;  %v1304_v44 = vld [vmem:[%s1683_s15 + $0x60] sm:$0xf] }
  0x42   : > { %1500 = vset.pattern.permute.xlu2 %v1525_v36  ;;  %v1392_v41 = vld [vmem:[%s1683_s15 + $0x110] sm:$0xf]  ;;  %470 = vperm.xlu1 %1499, %v452_v37   ;;  %v1313_v42 = vor.u32 %v1439_v40, %v1312_v39  ;;  %v1437_v45 = vld [vmem:[%s1683_s15 + $0x64] sm:$0xf0]  ;;  %v1384_v47 = vld [vmem:[%s1683_s15 + $0x100] sm:$0xf] }
  0x43   : > { %460 = vperm.xlu0 %1498, %v450_v38   ;;  %v1393_v46 = vor.u32 %v1459_v43, %v1392_v41  ;;  %v1457_v48 = vld [vmem:[%s1683_s15 + $0x104] sm:$0xf0]  ;;  %v1240_v49 = vld [vmem:[%s2060_s0 + $0x38] sm:$0xf]  ;;  %v1420_v50 = vld [vmem:[%s2060_s0 + $0x40] sm:$0xf0]  ;;  %v1305_v51 = vor.u32 %v1437_v45, %v1304_v44 }
  0x44   : > { %751 = vmatpush.bf16.msra.mxu0 %v1313_v42  ;;  %1461 = vmatpush.bf16.msra.mxu1 %v1313_v42  ;;  %v1296_v52 = vld [vmem:[%s1683_s15 + $0x50] sm:$0xf]  ;;  %v1438_v53 = vld [vmem:[%s1683_s15 + $0x74] sm:$0xf]  ;;  %v1314_v54 = vld [vmem:[%s1683_s15 + $0x78] sm:$0xf0]  ;;  %v1385_v55 = vor.u32 %v1457_v48, %v1384_v47  ;;  %v1715_v3 = vor.u32 %v1420_v50, %v1240_v49 }
  0x45   : > { %1469 = vmatpush.bf16.msra.mxu3 %v1393_v46  ;;  %815 = vmatpush.bf16.msra.mxu2 %v1393_v46  ;;  %v1435_v56 = vld [vmem:[%s1683_s15 + $0x54] sm:$0xf0]  ;;  %v1454_v57 = vld [vmem:[%s1683_s15 + $0xf4] sm:$0xf]  ;;  %v1378_v58 = vld [vmem:[%s1683_s15 + $0xf8] sm:$0xf0]  ;;  %v1317_v59 = vor.u32 %v1438_v53, %v1314_v54 }
  0x46   : > { %v1216_v60 = vld [vmem:[%s2060_s0 + $0x8] sm:$0xf]  ;;  %v1414_v61 = vld [vmem:[%s2060_s0 + $0x10] sm:$0xf0]  ;;  %v1381_v62 = vor.u32 %v1454_v57, %v1378_v58  ;;  %v1436_v63 = vld [vmem:[%s1683_s15 + $0x64] sm:$0xf]  ;;  %v1297_v4 = vor.u32 %v1435_v56, %v1296_v52 }
  0x47   : > { %v1306_v0 = vld [vmem:[%s1683_s15 + $0x68] sm:$0xf0]  ;;  %v1452_v1 = vld [vmem:[%s1683_s15 + $0xe4] sm:$0xf]  ;;  %v1717_v5 = vor.u32 %v1414_v61, %v1216_v60  ;;  %v1288_v6 = vld [vmem:[%s1683_s15 + $0x40] sm:$0xf] }
  0x48   : > { %v1370_v2 = vld [vmem:[%s1683_s15 + $0xe8] sm:$0xf0]  ;;  %752 = vmatpush.bf16.msra.mxu0 %v1305_v51  ;;  %1462 = vmatpush.bf16.msra.mxu1 %v1305_v51  ;;  %v1433_v7 = vld [vmem:[%s1683_s15 + $0x44] sm:$0xf0]  ;;  %v1309_v8 = vor.u32 %v1436_v63, %v1306_v0  ;;  %v1434_v10 = vld [vmem:[%s1683_s15 + $0x54] sm:$0xf] }
  0x49   : > { %1470 = vmatpush.bf16.msra.mxu3 %v1385_v55  ;;  %816 = vmatpush.bf16.msra.mxu2 %v1385_v55  ;;  %v1373_v9 = vor.u32 %v1452_v1, %v1370_v2  ;;  %v1298_v11 = vld [vmem:[%s1683_s15 + $0x58] sm:$0xf0]  ;;  %v1450_v12 = vld [vmem:[%s1683_s15 + $0xd4] sm:$0xf]  ;;  %v1289_v14 = vor.u32 %v1433_v7, %v1288_v6  ;;  %v1280_v15 = vld [vmem:[%s1683_s15 + $0x30] sm:$0xf] }
  0x4a   : > { %v1362_v13 = vld [vmem:[%s1683_s15 + $0xd8] sm:$0xf0]  ;;  %v1431_v16 = vld [vmem:[%s1683_s15 + $0x34] sm:$0xf0]  ;;  %v1301_v17 = vor.u32 %v1434_v10, %v1298_v11  ;;  %v1432_v19 = vld [vmem:[%s1683_s15 + $0x44] sm:$0xf] }
  0x4b   : > { %v1365_v18 = vor.u32 %v1450_v12, %v1362_v13  ;;  %v1290_v20 = vld [vmem:[%s1683_s15 + $0x48] sm:$0xf0]  ;;  %v1448_v21 = vld [vmem:[%s1683_s15 + $0xc4] sm:$0xf]  ;;  %v1281_v23 = vor.u32 %v1431_v16, %v1280_v15  ;;  %v1272_v24 = vld [vmem:[%s1683_s15 + $0x20] sm:$0xf] }
  0x4c   : > { %1400 = vmatmul.msk.bf16.vlgmr.msra.gmra.mxu3 %vm738_vm0, %v1715_v3  ;;  %753 = vmatpush.bf16.msra.mxu0 %v1297_v4  ;;  %v1354_v22 = vld [vmem:[%s1683_s15 + $0xc8] sm:$0xf0]  ;;  %v1429_v25 = vld [vmem:[%s1683_s15 + $0x24] sm:$0xf0]  ;;  %v1293_v26 = vor.u32 %v1432_v19, %v1290_v20  ;;  %v1430_v28 = vld [vmem:[%s1683_s15 + $0x34] sm:$0xf] }
  0x4d   : > { %838 = vmatpush.bf16.msrb.mxu3 %v1317_v59  ;;  %867 = vmatpush.bf16.msrb.mxu2 %v1381_v62  ;;  %v1357_v27 = vor.u32 %v1448_v21, %v1354_v22  ;;  %v1282_v29 = vld [vmem:[%s1683_s15 + $0x38] sm:$0xf0]  ;;  %v1446_v30 = vld [vmem:[%s1683_s15 + $0xb4] sm:$0xf]  ;;  %v451_v33 = vld [vmem:[%s2062_s2 + $0x8] sm:$0xff]  ;;  %v1273_v34 = vor.u32 %v1429_v25, %v1272_v24  ;;  %s1460_s18 = sshll.u32 (%p1586_p5), %s1198_s21, 4 }
  0x4e   : > { %1463 = vmatpush.bf16.msra.mxu1 %v1297_v4  ;;  %1398 = vmatmul.msk.bf16.vlgmr.msra.gmra.mxu2 %vm738_vm0, %v1717_v5  ;;  %v1346_v31 = vld [vmem:[%s1683_s15 + $0xb8] sm:$0xf0]  ;;  %v1252_v35 = vld [vmem:[%s2060_s0 + $0x50] sm:$0xf]  ;;  %v1427_v38 = vld [vmem:[%s1683_s15 + $0x14] sm:$0xf0]  ;;  %v1285_v39 = vor.u32 %v1430_v28, %v1282_v29  ;;  %s1094_s26 = scalar_lea.vmem (%p1586_p5), %s2065_s5, %s1460_s18 }
  0x4f   : > { %v453_v32 = vld [vmem:[%s2062_s2 + $0x18] sm:$0xff]  ;;  %v1264_v37 = vld [vmem:[%s1683_s15 + $0x10] sm:$0xf]  ;;  %465 = vperm.xlu0 %1498, %v451_v33   ;;  %v1228_v40 = vld [vmem:[%s2060_s0 + $0x20] sm:$0xf]  ;;  %v1349_v42 = vor.u32 %v1446_v30, %v1346_v31 }
  0x50   : > { %754 = vmatpush.bf16.msra.mxu0 %v1289_v14  ;;  %475 = vperm.xlu1 %1499, %v453_v32   ;;  %v1423_v36 = vld [vmem:[%s2060_s0 + $0x58] sm:$0xf0]  ;;  %v1417_v41 = vld [vmem:[%s2060_s0 + $0x28] sm:$0xf0]  ;;  %v1428_v43 = vld [vmem:[%s1683_s15 + $0x24] sm:$0xf]  ;;  %v1265_v48 = vor.u32 %v1427_v38, %v1264_v37 }
  0x51   : > { %839 = vmatpush.bf16.msrb.mxu3 %v1309_v8  ;;  %868 = vmatpush.bf16.msrb.mxu2 %v1373_v9  ;;  %v1274_v44 = vld [vmem:[%s1683_s15 + $0x28] sm:$0xf0]  ;;  %v1444_v45 = vld [vmem:[%s1683_s15 + $0xa4] sm:$0xf]  ;;  %v1765_v47 = vor.u32 %v1423_v36, %v1252_v35  ;;  %v1767_v49 = vor.u32 %v1417_v41, %v1228_v40  ;;  %v1256_v50 = vld [vmem:[%s1683_s15] sm:$0xf] }
  0x52   : > { %1464 = vmatpush.bf16.msra.mxu1 %v1289_v14  ;;  %v1338_v46 = vld [vmem:[%s1683_s15 + $0xa8] sm:$0xf0]  ;;  %v1425_v51 = vld [vmem:[%s1683_s15 + $0x4] sm:$0xf0]  ;;  %v1376_v52 = vld [vmem:[%s1683_s15 + $0xf0] sm:$0xf]  ;;  %v1277_v53 = vor.u32 %v1428_v43, %v1274_v44 }
  0x53   : > { %v1341_v54 = vor.u32 %v1444_v45, %v1338_v46  ;;  %v1208_v55 = vld [vmem:[%s2060_s0] sm:$0xf]  ;;  %v1413_v56 = vld [vmem:[%s2060_s0 + $0x8] sm:$0xf0]  ;;  %v1455_v57 = vld [vmem:[%s1683_s15 + $0xf4] sm:$0xf0]  ;;  %v1257_v63 = vor.u32 %v1425_v51, %v1256_v50 }
  0x54   : > { %755 = vmatpush.bf16.msra.mxu0 %v1281_v23  ;;  %v1458_v58 = vld [vmem:[%s1683_s15 + $0x114] sm:$0xf]  ;;  %v1394_v59 = vld [vmem:[%s1683_s15 + $0x118] sm:$0xf0]  ;;  %v1232_v4 = vld [vmem:[%s2060_s0 + $0x30] sm:$0xf]  ;;  %v1377_v9 = vor.u32 %v1455_v57, %v1376_v52  ;;  %v1209_v14 = vor.u32 %v1413_v56, %v1208_v55 }
  0x55   : > { %840 = vmatpush.bf16.msrb.mxu3 %v1301_v17  ;;  %869 = vmatpush.bf16.msrb.mxu2 %v1365_v18  ;;  %v1426_v60 = vld [vmem:[%s1683_s15 + $0x14] sm:$0xf]  ;;  %v1266_v61 = vld [vmem:[%s1683_s15 + $0x18] sm:$0xf0]  ;;  %v1397_v7 = vor.u32 %v1458_v58, %v1394_v59  ;;  %v454_v8 = vld [vmem:[%s2062_s2 + $0x20] sm:$0xff] }
  0x56   : > { %1465 = vmatpush.bf16.msra.mxu1 %v1281_v23  ;;  %v1442_v62 = vld [vmem:[%s1683_s15 + $0x94] sm:$0xf]  ;;  %v1330_v0 = vld [vmem:[%s1683_s15 + $0x98] sm:$0xf0]  ;;  %v1269_v10 = vor.u32 %v1426_v60, %v1266_v61  ;;  %v1368_v11 = vld [vmem:[%s1683_s15 + $0xe0] sm:$0xf]  ;;  %480 = vperm.xlu2 %1500, %v454_v8  }
  0x57   : > { %v457_v1 = vld [vmem:[%s2062_s2 + $0x38] sm:$0xff]  ;;  %v456_v2 = vld [vmem:[%s2062_s2 + $0x30] sm:$0xff]  ;;  %v1456_v12 = vld [vmem:[%s1683_s15 + $0x104] sm:$0xf]  ;;  %v1333_v15 = vor.u32 %v1442_v62, %v1330_v0 }
  0x58   : > { %756 = vmatpush.bf16.msra.mxu0 %v1273_v34  ;;  %v1419_v6 = vld [vmem:[%s2060_s0 + $0x38] sm:$0xf0]  ;;  %v1386_v13 = vld [vmem:[%s1683_s15 + $0x108] sm:$0xf0]  ;;  %v1453_v16 = vld [vmem:[%s1683_s15 + $0xe4] sm:$0xf0]  ;;  %495 = vperm.xlu1 %1499, %v457_v1  }
  0x59   : > { %841 = vmatpush.bf16.msrb.mxu3 %v1293_v26  ;;  %870 = vmatpush.bf16.msrb.mxu2 %v1357_v27  ;;  %v1424_v17 = vld [vmem:[%s1683_s15 + $0x4] sm:$0xf]  ;;  %v1258_v18 = vld [vmem:[%s1683_s15 + $0x8] sm:$0xf0]  ;;  %v1810_v19 = vor.u32 %v1419_v6, %v1232_v4  ;;  %v1389_v22 = vor.u32 %v1456_v12, %v1386_v13  ;;  %v1369_v23 = vor.u32 %v1453_v16, %v1368_v11  ;;  %v1360_v26 = vld [vmem:[%s1683_s15 + $0xd0] sm:$0xf] }
  0x5a   : > { %1466 = vmatpush.bf16.msra.mxu1 %v1273_v34  ;;  %490 = vperm.xlu0 %1498, %v456_v2   ;;  %v1440_v20 = vld [vmem:[%s1683_s15 + $0x84] sm:$0xf]  ;;  %v1322_v21 = vld [vmem:[%s1683_s15 + $0x88] sm:$0xf0]  ;;  %v1261_v24 = vor.u32 %v1424_v17, %v1258_v18  ;;  %v1451_v27 = vld [vmem:[%s1683_s15 + $0xd4] sm:$0xf0] }
  0x5b   : > { %v1325_v25 = vor.u32 %v1440_v20, %v1322_v21  ;;  %v943_v28 = vld [vmem:[%s2063_s3 + $0x10] sm:$0xff]  ;;  %v942_v29 = vld [vmem:[%s2063_s3 + $0x8] sm:$0xff]  ;;  %v1361_v31 = vor.u32 %v1451_v27, %v1360_v26  ;;  %v1412_v32 = vld [vmem:[%s2060_s0 + $0x4] sm:$0xf] }
  0x5c   : > { %1401 = vmatmul.msk.bf16.gmra.mxu3 %vm738_vm0, %v1765_v47  ;;  %757 = vmatpush.bf16.msra.mxu0 %v1265_v48  ;;  %v455_v30 = vld [vmem:[%s2062_s2 + $0x28] sm:$0xff]  ;;  %v1210_v33 = vld [vmem:[%s2060_s0 + $0xc] sm:$0xf0]  ;;  %v1352_v34 = vld [vmem:[%s1683_s15 + $0xc0] sm:$0xf] }
  0x5d   : > { %842 = vmatpush.bf16.msrb.mxu3 %v1285_v39  ;;  %871 = vmatpush.bf16.msrb.mxu2 %v1349_v42  ;;  %v1449_v35 = vld [vmem:[%s1683_s15 + $0xc4] sm:$0xf0]  ;;  %v1213_v36 = vor.u32 %v1412_v32, %v1210_v33  ;;  %v1220_v38 = vld [vmem:[%s2060_s0 + $0x18] sm:$0xf]  ;;  %v1344_v39 = vld [vmem:[%s1683_s15 + $0xb0] sm:$0xf] }
  0x5e   : > { %1467 = vmatpush.bf16.msra.mxu1 %v1265_v48  ;;  %1399 = vmatmul.msk.bf16.gmra.mxu2 %vm738_vm0, %v1767_v49  ;;  %v1353_v37 = vor.u32 %v1449_v35, %v1352_v34  ;;  %v1447_v40 = vld [vmem:[%s1683_s15 + $0xb4] sm:$0xf0]  ;;  %v1416_v41 = vld [vmem:[%s2060_s0 + $0x20] sm:$0xf0]  ;;  %v1244_v42 = vld [vmem:[%s2060_s0 + $0x48] sm:$0xf] }
  0x5f   : > { %485 = vperm.xlu2 %1500, %v455_v30   ;;  %v946_v43 = vld [vmem:[%s2063_s3 + $0x28] sm:$0xff]  ;;  %v1422_v44 = vld [vmem:[%s2060_s0 + $0x50] sm:$0xf0]  ;;  %v945_v45 = vld [vmem:[%s2063_s3 + $0x20] sm:$0xff]  ;;  %v1345_v48 = vor.u32 %v1447_v40, %v1344_v39  ;;  %v1221_v50 = vor.u32 %v1416_v41, %v1220_v38 }
  0x60   : > { %758 = vmatpush.bf16.msra.mxu0 %v1257_v63  ;;  %961 = vperm.xlu1 %1499, %v943_v28   ;;  %v941_v46 = vld [vmem:[%s2063_s3] sm:$0xff]  ;;  %v1445_v52 = vld [vmem:[%s1683_s15 + $0xa4] sm:$0xf0]  ;;  %v1328_v55 = vld [vmem:[%s1683_s15 + $0x90] sm:$0xf] }
  0x61   : > { %843 = vmatpush.bf16.msrb.mxu3 %v1277_v53  ;;  %872 = vmatpush.bf16.msrb.mxu2 %v1341_v54  ;;  %v1336_v51 = vld [vmem:[%s1683_s15 + $0xa0] sm:$0xf]  ;;  %v1245_v53 = vor.u32 %v1422_v44, %v1244_v42  ;;  %v1443_v56 = vld [vmem:[%s1683_s15 + $0x94] sm:$0xf0]  ;;  %v1415_v61 = vld [vmem:[%s2060_s0 + $0x1c] sm:$0xf] }
  0x62   : > { %1468 = vmatpush.bf16.msra.mxu1 %v1257_v63  ;;  %956 = vperm.xlu0 %1498, %v942_v29   ;;  %v1337_v54 = vor.u32 %v1445_v52, %v1336_v51  ;;  %v1005_v57 = vld [vmem:[%s2064_s4] sm:$0xff]  ;;  %v948_v58 = vld [vmem:[%s2063_s3 + $0x38] sm:$0xff]  ;;  %v1329_v60 = vor.u32 %v1443_v56, %v1328_v55  ;;  %v1222_v62 = vld [vmem:[%s2060_s0 + $0x24] sm:$0xf0] }
  0x63   : > { %759 = vmatmul.bf16.vlgmr.msra.gmra.mxu0 %v1209_v14  ;;  %v944_v59 = vld [vmem:[%s2063_s3 + $0x18] sm:$0xff]  ;;  %v1320_v63 = vld [vmem:[%s1683_s15 + $0x80] sm:$0xf]  ;;  %v1441_v0 = vld [vmem:[%s1683_s15 + $0x84] sm:$0xf0]  ;;  %v1225_v1 = vor.u32 %v1415_v61, %v1222_v62 }
  0x64   : > { %902 = vmatpush.bf16.msrb.mxu0 %v1397_v7  ;;  %v1321_v2 = vor.u32 %v1441_v0, %v1320_v63  ;;  %v1008_v4 = vld [vmem:[%s2064_s4 + $0x18] sm:$0xff]  ;;  %v1007_v6 = vld [vmem:[%s2064_s4 + $0x10] sm:$0xff]  ;;  %v1009_v13 = vld [vmem:[%s2064_s4 + $0x20] sm:$0xff] }
  0x65   : > { %844 = vmatpush.bf16.msrb.mxu3 %v1269_v10  ;;  %873 = vmatpush.bf16.msrb.mxu2 %v1333_v15  ;;  %v947_v7 = vld [vmem:[%s2063_s3 + $0x30] sm:$0xff]  ;;  %v1006_v10 = vld [vmem:[%s2064_s4 + $0x8] sm:$0xff]  ;;  %v1246_v16 = vld [vmem:[%s2060_s0 + $0x54] sm:$0xf0] }
  0x66   : > { %780 = vmatpush.bf16.msrb.mxu1 %v1377_v9  ;;  %v1011_v8 = vld [vmem:[%s2064_s4 + $0x30] sm:$0xff]  ;;  %v1010_v9 = vld [vmem:[%s2064_s4 + $0x28] sm:$0xff] }
  0x67   : > { %769 = vmatmul.bf16.vlgmr.msra.gmra.mxu1 %v1810_v19  ;;  %951 = vperm.xlu2 %1500, %v941_v46   ;;  %v1418_v11 = vld [vmem:[%s2060_s0 + $0x34] sm:$0xf]  ;;  %v1421_v15 = vld [vmem:[%s2060_s0 + $0x4c] sm:$0xf] }
  0x68   : > { %903 = vmatpush.bf16.msrb.mxu0 %v1389_v22  ;;  %976 = vperm.xlu1 %1499, %v946_v43   ;;  %v1249_v17 = vor.u32 %v1421_v15, %v1246_v16 }
  0x69   : > { %845 = vmatpush.bf16.msrb.mxu3 %v1261_v24  ;;  %874 = vmatpush.bf16.msrb.mxu2 %v1325_v25 }
  0x6a   : > { %781 = vmatpush.bf16.msrb.mxu1 %v1369_v23  ;;  %971 = vperm.xlu0 %1498, %v945_v45  }
  0x6c   : > { %846 = vmatmul.bf16.vlgmr.msrb.gmra.mxu3 %v1209_v14  ;;  %v1012_v14 = vld [vmem:[%s2064_s4 + $0x38] sm:$0xff] }
  0x6e   : > { %782 = vmatpush.bf16.msrb.mxu1 %v1361_v31  ;;  %875 = vmatmul.bf16.vlgmr.msrb.gmra.mxu2 %v1213_v36 }
  0x6f   : > { %966 = vperm.xlu2 %1500, %v944_v59  }
  0x70   : > { %1015 = vperm.xlu1 %1499, %v1005_v57  }
  0x72   : > { %783 = vmatpush.bf16.msrb.mxu1 %v1353_v37  ;;  %986 = vperm.xlu0 %1498, %v948_v58  }
  0x73   : > { %764 = vmatmul.bf16.gmra.mxu0 %v1221_v50 }
  0x76   : > { %784 = vmatpush.bf16.msrb.mxu1 %v1345_v48 }
  0x77   : > { %774 = vmatmul.bf16.gmra.mxu1 %v1245_v53  ;;  %981 = vperm.xlu2 %1500, %v947_v7  }
  0x78   : > { %1030 = vperm.xlu1 %1499, %v1008_v4  }
  0x7a   : > { %785 = vmatpush.bf16.msrb.mxu1 %v1337_v54  ;;  %1025 = vperm.xlu0 %1498, %v1007_v6  }
  0x7c   : > { %851 = vmatmul.bf16.gmra.mxu3 %v1221_v50 }
  0x7e   : > { %786 = vmatpush.bf16.msrb.mxu1 %v1329_v60  ;;  %880 = vmatmul.bf16.gmra.mxu2 %v1225_v1 }
  0x7f   : > { %1020 = vperm.xlu2 %1500, %v1006_v10  }
  0x80   : > { %1045 = vperm.xlu1 %1499, %v1011_v8  }
  0x82   : > { %787 = vmatpush.bf16.msrb.mxu1 %v1321_v2  ;;  %1040 = vperm.xlu0 %1498, %v1010_v9  }
  0x83   : > { %1402 = vmatmul.msk.bf16.vlgmr.msrb.gmra.mxu0 %vm738_vm0, %v1717_v5  ;;  %v1234_v5 = vld [vmem:[%s2060_s0 + $0x3c] sm:$0xf0] }
  0x84   : > { %v1237_v12 = vor.u32 %v1418_v11, %v1234_v5 }
  0x87   : > { %788 = vmatmul.bf16.vlgmr.msrb.gmra.mxu1 %v1213_v36  ;;  %1035 = vperm.xlu2 %1500, %v1009_v13  }
  0x8c   : > { %856 = vmatmul.bf16.gmra.mxu3 %v1810_v19 }
  0x8e   : > { %885 = vmatmul.bf16.gmra.mxu2 %v1237_v12 }
  0x8f   : > { %1050 = vperm.xlu2 %1500, %v1012_v14  }
  0x93   : > { %1403 = vmatmul.msk.bf16.gmra.mxu0 %vm738_vm0, %v1767_v49 }
  0x97   : > { %793 = vmatmul.bf16.gmra.mxu1 %v1225_v1 }
  0x9c   : > { %861 = vmatmul.bf16.gmra.mxu3 %v1245_v53 }
  0x9e   : > { %890 = vmatmul.bf16.gmra.mxu2 %v1249_v17 }
  0xa3   : > { %1404 = vmatmul.msk.bf16.gmra.mxu0 %vm738_vm0, %v1715_v3 }
  0xa7   : > { %798 = vmatmul.bf16.gmra.mxu1 %v1237_v12 }
  0xb0   : > { %v1931_v23 = vpop.permute.xlu2 %480 }
  0xb3   : > { %1405 = vmatmul.msk.bf16.gmra.mxu0 %vm738_vm0, %v1765_v47 }
  0xb4   : > { %v1925_v19 = vpop.permute.xlu1 %470 }
  0xb5   : > { %v461_v22 = vpop.permute.xlu0 %460 }
  0xb7   : > { %803 = vmatmul.bf16.gmra.mxu1 %v1249_v17 }
  0xb9   : > { %v1941_v28 = vpop.permute.xlu2 %485 }
  0xc1   : > { %v466_v27 = vpop.permute.xlu0 %465  ;;  %v952_v35 = vpop.permute.xlu2 %951 }
  0xc2   : > { %v1933_v24 = vpop.permute.xlu1 %475 }
  0xc9   : > { %v1961_v48 = vpop.permute.xlu2 %966 }
  0xca   : > { %v1943_v29 = vpop.permute.xlu1 %495 }
  0xcc   : > { %v1951_v34 = vpop.permute.xlu0 %490 }
  0xcf   : > { %v1923_v49 = vpop.f32.mrf.mxu3 }
  0xd1   : > { %v818_v18 = vpop.f32.mrf.mxu2  ;;  %v1969_v62 = vpop.permute.xlu2 %981 }
  0xd2   : > { %v1955_v40 = vpop.permute.xlu1 %961 }
  0xd4   : > { %v957_v41 = vpop.permute.xlu0 %956 }
  0xd7   : > { %v1927_v20 = vpop.f32.mrf.mxu3 }
  0xd9   : > { %v1929_v21 = vpop.f32.mrf.mxu2 }
  0xda   : > { %v1963_v50 = vpop.permute.xlu1 %976 }
  0xdc   : > { %v1965_v57 = vpop.permute.xlu0 %971 }
  0xdf   : > { %v1935_v3 = vpop.f32.mrf.mxu3 }
  0xe0   : > { %v760_v25 = vpop.f32.mrf.mxu0 }
  0xe1   : > { %v1937_v26 = vpop.f32.mrf.mxu2  ;;  %v761_v53 = vadd.f32 %v760_v25, %v461_v22  ;;  %v1021_v25 = vpop.permute.xlu2 %1020 }
  0xe2   : > { %v1016_v1 = vpop.permute.xlu1 %1015 }
  0xe4   : > { %v1939_v47 = vpop.f32.mrf.mxu1  ;;  %v1975_v16 = vpop.permute.xlu0 %986 }
  0xe7   : > { %v1945_v30 = vpop.f32.mrf.mxu3 }
  0xe8   : > { %v762_v31 = vpop.f32.mrf.mxu0 }
  0xe9   : > { %v1947_v32 = vpop.f32.mrf.mxu2  ;;  %v763_v7 = vadd.f32 %v762_v31, %v466_v27 }
  0xec   : > { %v1949_v33 = vpop.f32.mrf.mxu1 }
  0xef   : > { %v847_v36 = vpop.f32.mrf.mxu3 }
  0xf0   : > { %v765_v37 = vpop.f32.mrf.mxu0  ;;  %v848_v45 = vadd.f32 %v847_v36, %v461_v22 }
  0xf1   : > { %v876_v38 = vpop.f32.mrf.mxu2  ;;  %v766_v36 = vadd.f32 %v765_v37, %v1925_v19 }
  0xf2   : > { %v877_v51 = vadd.f32 %v876_v38, %v848_v45 }
  0xf4   : > { %v1953_v39 = vpop.f32.mrf.mxu1 }
  0xf7   : > { %v849_v42 = vpop.f32.mrf.mxu3 }
  0xf8   : > { %v1957_v43 = vpop.f32.mrf.mxu0  ;;  %v850_v60 = vadd.f32 %v849_v42, %v466_v27 }
  0xf9   : > { %v878_v44 = vpop.f32.mrf.mxu2 }
  0xfa   : > { %v879_v4 = vadd.f32 %v878_v44, %v850_v60  ;;  %v768_v60 = vadd.f32 %v1957_v43, %v1933_v24 }
  0xfc   : > { %v1959_v46 = vpop.f32.mrf.mxu1 }
  0xff   : > { %v852_v52 = vpop.f32.mrf.mxu3 }
 0x100   : > { %v905_v54 = vpop.f32.mrf.mxu0  ;;  %v853_v14 = vadd.f32 %v852_v52, %v1925_v19 }
 0x101   : > { %v906_v56 = vadd.f32 %v905_v54, %v877_v51  ;;  %v881_v59 = vpop.f32.mrf.mxu2 }
 0x102   : > { %v882_v31 = vadd.f32 %v881_v59, %v853_v14 }
 0x103   : > { %v926_v61 = vmax.f32 %v906_v56, 0.0 }
 0x104   : > { %v789_v55 = vpop.f32.mrf.mxu1 }
 0x105   : > { %v790_v58 = vadd.f32 %v789_v55, %v761_v53  ;;  %v990_v0 = vmul.f32 %v952_v35, %v926_v61 }
 0x107   : > { %v819_v63 = vadd.f32 %v818_v18, %v790_v58  ;;  %v1054_v6 = vadd.f32 %v1016_v1, %v990_v0  ;;  %v854_v9 = vpop.f32.mrf.mxu3  ;;  %v1026_v58 = vpop.permute.xlu0 %1025 }
 0x108   : > { %v907_v10 = vpop.f32.mrf.mxu0 }
 0x109   : > { %v925_v2 = vmax.f32 %v819_v63, 0.0  ;;  %1070 = vst [vmem:[%s1971_s10 + $0x8] sm:$0xff] %v1054_v6  ;;  %v908_v5 = vadd.f32 %v907_v10, %v879_v4  ;;  %v883_v18 = vpop.f32.mrf.mxu2 }
 0x10b   : > { %v989_v8 = vmul.f32 %v952_v35, %v925_v2  ;;  %v928_v15 = vmax.f32 %v908_v5, 0.0 }
 0x10c   : > { %v791_v11 = vpop.f32.mrf.mxu1 }
 0x10d   : > { %v1053_v12 = vadd.f32 %v1016_v1, %v989_v8  ;;  %v792_v13 = vadd.f32 %v791_v11, %v763_v7  ;;  %v992_v22 = vmul.f32 %v957_v41, %v928_v15  ;;  %v771_v11 = vadd.f32 %v1939_v47, %v1931_v23 }
 0x10f   : > { %1069 = vst [vmem:[%s1971_s10] sm:$0xff] %v1053_v12  ;;  %v821_v17 = vadd.f32 %v1929_v21, %v792_v13  ;;  %v1056_v35 = vadd.f32 %v1021_v25, %v992_v22  ;;  %v857_v52 = vpop.f32.mrf.mxu3  ;;  %v855_v21 = vadd.f32 %v854_v9, %v1933_v24  ;;  %v1031_v24 = vpop.permute.xlu1 %1030 }
 0x110   : > { %v910_v42 = vpop.f32.mrf.mxu0  ;;  %v858_v4 = vadd.f32 %v857_v52, %v1931_v23 }
 0x111   : > { %v927_v27 = vmax.f32 %v821_v17, 0.0  ;;  %1072 = vst [vmem:[%s1971_s10 + $0x18] sm:$0xff] %v1056_v35  ;;  %v911_v45 = vadd.f32 %v910_v42, %v882_v31  ;;  %v886_v37 = vpop.f32.mrf.mxu2  ;;  %v1036_v31 = vpop.permute.xlu2 %1035 }
 0x113   : > { %v991_v38 = vmul.f32 %v957_v41, %v927_v27  ;;  %v930_v54 = vmax.f32 %v911_v45, 0.0  ;;  %v884_v41 = vadd.f32 %v883_v18, %v855_v21 }
 0x114   : > { %v794_v44 = vpop.f32.mrf.mxu1 }
 0x115   : > { %v1055_v51 = vadd.f32 %v1021_v25, %v991_v38  ;;  %v795_v53 = vadd.f32 %v794_v44, %v766_v36  ;;  %v994_v56 = vmul.f32 %v1955_v40, %v930_v54  ;;  %v773_v36 = vadd.f32 %v1949_v33, %v1941_v28 }
 0x117   : > { %1071 = vst [vmem:[%s1971_s10 + $0x10] sm:$0xff] %v1055_v51  ;;  %v824_v55 = vadd.f32 %v1937_v26, %v795_v53  ;;  %v1058_v59 = vadd.f32 %v1026_v58, %v994_v56  ;;  %v859_v7 = vpop.f32.mrf.mxu3 }
 0x118   : > { %v912_v63 = vpop.f32.mrf.mxu0  ;;  %v860_v18 = vadd.f32 %v859_v7, %v1941_v28  ;;  %v1041_v28 = vpop.permute.xlu0 %1040 }
 0x119   : > { %v929_v19 = vmax.f32 %v824_v55, 0.0  ;;  %1074 = vst [vmem:[%s1971_s10 + $0x28] sm:$0xff] %v1058_v59  ;;  %v913_v1 = vadd.f32 %v912_v63, %v884_v41  ;;  %v888_v12 = vpop.f32.mrf.mxu2 }
 0x11b   : > { %v993_v61 = vmul.f32 %v1955_v40, %v929_v19  ;;  %v932_v6 = vmax.f32 %v913_v1, 0.0  ;;  %v887_v40 = vadd.f32 %v886_v37, %v858_v4 }
 0x11c   : > { %v796_v0 = vpop.f32.mrf.mxu1 }
 0x11d   : > { %v1057_v2 = vadd.f32 %v1026_v58, %v993_v61  ;;  %v797_v26 = vadd.f32 %v796_v0, %v768_v60  ;;  %v996_v9 = vmul.f32 %v1961_v48, %v932_v6  ;;  %v776_v58 = vadd.f32 %v1953_v39, %v1951_v34  ;;  %v1046_v39 = vpop.permute.xlu1 %1045 }
 0x11e   : > { %v778_v6 = vadd.f32 %v1959_v46, %v1943_v29 }
 0x11f   : > { %1073 = vst [vmem:[%s1971_s10 + $0x20] sm:$0xff] %v1057_v2  ;;  %v826_v8 = vadd.f32 %v1947_v32, %v797_v26  ;;  %v1060_v10 = vadd.f32 %v1031_v24, %v996_v9  ;;  %v862_v23 = vpop.f32.mrf.mxu3 }
 0x120   : > { %v915_v13 = vpop.f32.mrf.mxu0  ;;  %v863_v53 = vadd.f32 %v862_v23, %v1951_v34 }
 0x121   : > { %v931_v43 = vmax.f32 %v826_v8, 0.0  ;;  %1076 = vst [vmem:[%s1971_s10 + $0x38] sm:$0xff] %v1060_v10  ;;  %v916_v15 = vadd.f32 %v915_v13, %v887_v40 }
 0x123   : > { %v995_v5 = vmul.f32 %v1961_v48, %v931_v43  ;;  %v934_v22 = vmax.f32 %v916_v15, 0.0  ;;  %v889_v48 = vadd.f32 %v888_v12, %v860_v18 }
 0x124   : > { %v799_v14 = vpop.f32.mrf.mxu1 }
 0x125   : > { %v1059_v17 = vadd.f32 %v1031_v24, %v995_v5  ;;  %v800_v32 = vadd.f32 %v799_v14, %v771_v11  ;;  %v998_v27 = vmul.f32 %v1965_v57, %v934_v22  ;;  %v1051_v5 = vpop.permute.xlu2 %1050  ;;  %v1113_v14 = vld [vmem:[%s1971_s10 + $0x18] sm:$0xff] (%p1586_p5) }
 0x126   : > { %v1115_v15 = vld [vmem:[%s1971_s10 + $0x20] sm:$0xff] (%p1586_p5)  ;;  %1114 = vst [vmem:[%s1094_s26 + $0x28] sm:$0xff] (%p1586_p5), %v1113_v14 }
 0x127   : > { %1075 = vst [vmem:[%s1971_s10 + $0x30] sm:$0xff] %v1059_v17  ;;  %v829_v25 = vadd.f32 %v1923_v49, %v800_v32  ;;  %v1062_v35 = vadd.f32 %v1036_v31, %v998_v27  ;;  %v891_v49 = vpop.f32.mrf.mxu2  ;;  %v864_v19 = vpop.f32.mrf.mxu3  ;;  %v1117_v17 = vld [vmem:[%s1971_s10 + $0x28] sm:$0xff] (%p1586_p5) }
 0x128   : > { %v917_v42 = vpop.f32.mrf.mxu0  ;;  %v865_v63 = vadd.f32 %v864_v19, %v1943_v29  ;;  %1116 = vst [vmem:[%s1094_s26 + $0x40] sm:$0xff] (%p1586_p5), %v1115_v15  ;;  %v1121_v18 = vld [vmem:[%s1971_s10 + $0x38] sm:$0xff] (%p1586_p5) }
 0x129   : > { %v933_v47 = vmax.f32 %v829_v25, 0.0  ;;  %1078 = vst [vmem:[%s1971_s10 + $0x48] sm:$0xff] %v1062_v35  ;;  %v918_v45 = vadd.f32 %v917_v42, %v889_v48 }
 0x12a   : > { %1118 = vst [vmem:[%s1094_s26 + $0x48] sm:$0xff] (%p1586_p5), %v1117_v17 }
 0x12b   : > { %v997_v38 = vmul.f32 %v1965_v57, %v933_v47  ;;  %v936_v21 = vmax.f32 %v918_v45, 0.0  ;;  %v892_v57 = vadd.f32 %v891_v49, %v863_v53  ;;  %1122 = vst [vmem:[%s1094_s26 + $0x68] sm:$0xff] (%p1586_p5), %v1121_v18 }
 0x12c   : > { %v801_v44 = vpop.f32.mrf.mxu1 }
 0x12d   : > { %v1061_v51 = vadd.f32 %v1036_v31, %v997_v38  ;;  %v802_v52 = vadd.f32 %v801_v44, %v773_v36  ;;  %v1000_v55 = vmul.f32 %v1963_v50, %v936_v21 }
 0x12e   : > { %v1119_v32 = vld [vmem:[%s1971_s10 + $0x30] sm:$0xff] (%p1586_p5) }
 0x12f   : > { %1077 = vst [vmem:[%s1971_s10 + $0x40] sm:$0xff] %v1061_v51  ;;  %v831_v54 = vadd.f32 %v1927_v20, %v802_v52  ;;  %v1064_v56 = vadd.f32 %v1041_v28, %v1000_v55  ;;  %v893_v1 = vpop.f32.mrf.mxu2 }
 0x130   : > { %v920_v41 = vpop.f32.mrf.mxu0  ;;  %1120 = vst [vmem:[%s1094_s26 + $0x60] sm:$0xff] (%p1586_p5), %v1119_v32  ;;  %v1125_v25 = vld [vmem:[%s1971_s10 + $0x48] sm:$0xff] (%p1586_p5) }
 0x131   : > { %v935_v33 = vmax.f32 %v831_v54, 0.0  ;;  %1080 = vst [vmem:[%s1971_s10 + $0x58] sm:$0xff] %v1064_v56  ;;  %v921_v60 = vadd.f32 %v920_v41, %v892_v57 }
 0x132   : > { %1126 = vst [vmem:[%s1094_s26 + $0x88] sm:$0xff] (%p1586_p5), %v1125_v25 }
 0x133   : > { %v999_v37 = vmul.f32 %v1963_v50, %v935_v33  ;;  %v938_v0 = vmax.f32 %v921_v60, 0.0  ;;  %v894_v50 = vadd.f32 %v893_v1, %v865_v63 }
 0x134   : > { %v804_v59 = vpop.f32.mrf.mxu1 }
 0x135   : > { %v1063_v61 = vadd.f32 %v1041_v28, %v999_v37  ;;  %v805_v20 = vadd.f32 %v804_v59, %v776_v58  ;;  %v1002_v34 = vmul.f32 %v1969_v62, %v938_v0 }
 0x136   : > { %v1123_v22 = vld [vmem:[%s1971_s10 + $0x40] sm:$0xff] (%p1586_p5) }
 0x137   : > { %1079 = vst [vmem:[%s1971_s10 + $0x50] sm:$0xff] %v1063_v61  ;;  %v834_v2 = vadd.f32 %v1935_v3, %v805_v20  ;;  %v1066_v4 = vadd.f32 %v1046_v39, %v1002_v34 }
 0x138   : > { %v922_v8 = vpop.f32.mrf.mxu0  ;;  %1124 = vst [vmem:[%s1094_s26 + $0x80] sm:$0xff] (%p1586_p5), %v1123_v22  ;;  %v1129_v31 = vld [vmem:[%s1971_s10 + $0x58] sm:$0xff] (%p1586_p5) }
 0x139   : > { %v937_v26 = vmax.f32 %v834_v2, 0.0  ;;  %1082 = vst [vmem:[%s1971_s10 + $0x68] sm:$0xff] %v1066_v4  ;;  %v923_v24 = vadd.f32 %v922_v8, %v894_v50 }
 0x13a   : > { %1130 = vst [vmem:[%s1094_s26 + $0xa8] sm:$0xff] (%p1586_p5), %v1129_v31 }
 0x13b   : > { %v1001_v7 = vmul.f32 %v1969_v62, %v937_v26  ;;  %v940_v3 = vmax.f32 %v923_v24, 0.0  ;;  %v1109_v62 = vld [vmem:[%s1971_s10 + $0x8] sm:$0xff] (%p1586_p5) }
 0x13c   : > { %v806_v9 = vpop.f32.mrf.mxu1  ;;  %1110 = vst [vmem:[%s1094_s26 + $0x8] sm:$0xff] (%p1586_p5), %v1109_v62 }
 0x13d   : > { %v1065_v43 = vadd.f32 %v1046_v39, %v1001_v7  ;;  %v807_v40 = vadd.f32 %v806_v9, %v778_v6  ;;  %v1004_v11 = vmul.f32 %v1975_v16, %v940_v3 }
 0x13e   : > { %v1127_v27 = vld [vmem:[%s1971_s10 + $0x50] sm:$0xff] (%p1586_p5) }
 0x13f   : > { %1081 = vst [vmem:[%s1971_s10 + $0x60] sm:$0xff] %v1065_v43  ;;  %v836_v10 = vadd.f32 %v1945_v30, %v807_v40  ;;  %v1068_v13 = vadd.f32 %v1051_v5, %v1004_v11  ;;  %v1107_v30 = vld [vmem:[%s1971_s10] sm:$0xff] (%p1586_p5) }
 0x140   : > { %1108 = vst [vmem:[%s1094_s26] sm:$0xff] (%p1586_p5), %v1107_v30  ;;  %v1133_v47 = vld [vmem:[%s1971_s10 + $0x68] sm:$0xff] (%p1586_p5) }
 0x141   : > { %v939_v12 = vmax.f32 %v836_v10, 0.0  ;;  %1084 = vst [vmem:[%s1971_s10 + $0x78] sm:$0xff] %v1068_v13 }
 0x142   : > { %1128 = vst [vmem:[%s1094_s26 + $0xa0] sm:$0xff] (%p1586_p5), %v1127_v27 }
 0x143   : > { %v1003_v29 = vmul.f32 %v1975_v16, %v939_v12  ;;  %1091 = sbr.rel (!%p1586_p5) target bundleno = 336 (0x150), region = 82  ;;  %v1111_v16 = vld [vmem:[%s1971_s10 + $0x10] sm:$0xff] (%p1586_p5)  ;;  %1134 = vst [vmem:[%s1094_s26 + $0xc8] sm:$0xff] (%p1586_p5), %v1133_v47 }
 0x144   : > { %1112 = vst [vmem:[%s1094_s26 + $0x20] sm:$0xff] (%p1586_p5), %v1111_v16 }
 0x145   : > { %v1067_v46 = vadd.f32 %v1051_v5, %v1003_v29 }
 0x146   : > { %v1131_v23 = vld [vmem:[%s1971_s10 + $0x60] sm:$0xff] (%p1586_p5) }
 0x147   : > { %1083 = vst [vmem:[%s1971_s10 + $0x70] sm:$0xff] %v1067_v46 }
 0x148   : > { %1132 = vst [vmem:[%s1094_s26 + $0xc0] sm:$0xff] %v1131_v23  ;;  %v1137_v35 = vld [vmem:[%s1971_s10 + $0x78] sm:$0xff] }
 0x149   : > { %1138 = vst [vmem:[%s1094_s26 + $0xe8] sm:$0xff] %v1137_v35 }
 0x14e   : > { %v1135_v48 = vld [vmem:[%s1971_s10 + $0x70] sm:$0xff] }
 0x14f   : > { %1136 = vst [vmem:[%s1094_s26 + $0xe0] sm:$0xff] %v1135_v48 }
 0x150 PF: > { %p12_p10 = scmp.ge.s32.totalorder %s1573_s22, 4   ;;  %s2067_s18 = smov %s1519_s19 }
 0x151   : > { %s2068_s19 = smov %s1584_s25  ;;  %s2069_s20 = smov %s1573_s22 }
 0x152   :  { %14 = sbr.rel (!%p12_p10) target bundleno = 2 (0x2), region = 136 }

// kernel: fl2d_forward.43
= control target key start
LH: loop header
LB: loop body
LE: loop exit
PB: predicated region body
PF: predicated region fallthrough
CT: control target
= control target key end

     0   :  { %s1960_s18 = smov 0   ;;  %s1962_s19 = smov 0   ;;  %s2516_s0 = inlined_call_operand.vmem [shape: bf16[32,576], index: 0, kind: input, shape index: {}]   ;;  %s2517_s1 = inlined_call_operand.vmem [shape: bf16[576,512], index: 1, kind: input, shape index: {}]   ;;  %s2518_s2 = inlined_call_operand.vmem [shape: f32[32,1], index: 2, kind: input, shape index: {}]   ;;  %s2519_s3 = inlined_call_operand.vmem [shape: f32[32,1], index: 3, kind: input, shape index: {}]   ;;  %s2520_s4 = inlined_call_operand.vmem [shape: f32[32,1], index: 4, kind: input, shape index: {}]   ;;  %s2521_s5 = inlined_call_operand.vmem [shape: f32[32,512], index: 5, kind: output, shape index: {}]  }
   0x1   :  { %s1964_s20 = smov 0  }
   0x2 LB: > { %s1434_s21 = sadd.s32 4294967295, %s1927_s20   ;;  %s1977_s22 = sadd.s32 1, %s1927_s20   ;;  %s1927_s20 = sphi %s1964_s20, %s2525_s20   ;;  %s1923_s19 = sphi %s1962_s19, %s2524_s19   ;;  %s1919_s18 = sphi %s1960_s18, %s2523_s18  }
   0x3   : > { %s40_s23 = ssub.s32 %s1927_s20, %s1977_s22  ;;  %s43_s24 = sadd.s32 1, %s1923_s19 }
   0x4   : > { %p41_p0 = scmp.eq.s32.totalorder %s40_s23, 0  ;;  %p50_p1 = scmp.ne.s32.totalorder %s1923_s19, %s1919_s18 }
   0x5   : > { %p51_p2 = scmp.eq.s32.totalorder %s1927_s20, 0  ;;  %p143_p3 = scmp.eq.s32.totalorder %s1434_s21, 1 }
   0x6   : > { %s1988_s25 = scalar_select %p41_p0, %s1923_s19, %s43_s24  }
   0x7   : > { %p52_p4 = por %p51_p2, %p50_p1  ;;  %p1990_p5 = por %p143_p3, %p50_p1 }
   0x8   : > { %p1437_p6 = scmp.ge.s32.totalorder %s1927_s20, 2 }
   0xa   : > { %177 = sbr.rel (%p1437_p6) target bundleno = 91 (0x5b), region = 32 }
   0xf   : > { %180 = sbr.rel (!%p52_p4) target bundleno = 91 (0x5b), region = 36  ;;  %s182_s27 = sand.u32 (%p52_p4), 1, %s1923_s19  }
  0x10   : > { %s1779_s28 = sshll.u32 (%p52_p4), %s1927_s20, 3  ;;  %s1875_s29 = smul.u32 (%p52_p4), 576, %s182_s27 }
  0x11   : > { %s2000_s7 = scalar_lea.vmem (%p52_p4), %s2517_s1, %s1779_s28 }
  0x12   : > { %v358_v0 = vld [vmem:[%s2000_s7] sm:$0xff] (%p52_p4)  ;;  %v360_v1 = vld [vmem:[%s2000_s7 + $0x10] sm:$0xff] (%p52_p4)  ;;  %s2005_s8 = scalar_lea.vmem (%p52_p4), [#allocation2], %s1875_s29 }
  0x13   : > { %v362_v2 = vld [vmem:[%s2000_s7 + $0x20] sm:$0xff] (%p52_p4)  ;;  %359 = vst [vmem:[%s2005_s8] sm:$0xff] (%p52_p4), %v358_v0  ;;  %v364_v3 = vld [vmem:[%s2000_s7 + $0x30] sm:$0xff] (%p52_p4) }
  0x14   : > { %361 = vst [vmem:[%s2005_s8 + $0x8] sm:$0xff] %v360_v1  ;;  %v366_v4 = vld [vmem:[%s2000_s7 + $0x40] sm:$0xff]  ;;  %v368_v5 = vld [vmem:[%s2000_s7 + $0x50] sm:$0xff] }
  0x15   : > { %363 = vst [vmem:[%s2005_s8 + $0x10] sm:$0xff] %v362_v2  ;;  %v370_v6 = vld [vmem:[%s2000_s7 + $0x60] sm:$0xff]  ;;  %v372_v7 = vld [vmem:[%s2000_s7 + $0x70] sm:$0xff] }
  0x16   : > { %365 = vst [vmem:[%s2005_s8 + $0x18] sm:$0xff] %v364_v3  ;;  %v374_v8 = vld [vmem:[%s2000_s7 + $0x80] sm:$0xff]  ;;  %v376_v9 = vld [vmem:[%s2000_s7 + $0x90] sm:$0xff] }
  0x17   : > { %367 = vst [vmem:[%s2005_s8 + $0x20] sm:$0xff] %v366_v4  ;;  %v378_v10 = vld [vmem:[%s2000_s7 + $0xa0] sm:$0xff]  ;;  %v380_v11 = vld [vmem:[%s2000_s7 + $0xb0] sm:$0xff] }
  0x18   : > { %369 = vst [vmem:[%s2005_s8 + $0x28] sm:$0xff] %v368_v5  ;;  %v382_v12 = vld [vmem:[%s2000_s7 + $0xc0] sm:$0xff]  ;;  %v384_v13 = vld [vmem:[%s2000_s7 + $0xd0] sm:$0xff] }
  0x19   : > { %371 = vst [vmem:[%s2005_s8 + $0x30] sm:$0xff] %v370_v6  ;;  %v386_v14 = vld [vmem:[%s2000_s7 + $0xe0] sm:$0xff]  ;;  %v388_v15 = vld [vmem:[%s2000_s7 + $0xf0] sm:$0xff] }
  0x1a   : > { %373 = vst [vmem:[%s2005_s8 + $0x38] sm:$0xff] %v372_v7  ;;  %v390_v16 = vld [vmem:[%s2000_s7 + $0x100] sm:$0xff]  ;;  %v392_v17 = vld [vmem:[%s2000_s7 + $0x110] sm:$0xff] }
  0x1b   : > { %375 = vst [vmem:[%s2005_s8 + $0x40] sm:$0xff] %v374_v8  ;;  %v394_v18 = vld [vmem:[%s2000_s7 + $0x120] sm:$0xff]  ;;  %v396_v19 = vld [vmem:[%s2000_s7 + $0x130] sm:$0xff] }
  0x1c   : > { %377 = vst [vmem:[%s2005_s8 + $0x48] sm:$0xff] %v376_v9  ;;  %v398_v20 = vld [vmem:[%s2000_s7 + $0x140] sm:$0xff]  ;;  %v400_v21 = vld [vmem:[%s2000_s7 + $0x150] sm:$0xff] }
  0x1d   : > { %379 = vst [vmem:[%s2005_s8 + $0x50] sm:$0xff] %v378_v10  ;;  %v402_v22 = vld [vmem:[%s2000_s7 + $0x160] sm:$0xff]  ;;  %v404_v23 = vld [vmem:[%s2000_s7 + $0x170] sm:$0xff] }
  0x1e   : > { %381 = vst [vmem:[%s2005_s8 + $0x58] sm:$0xff] %v380_v11  ;;  %v406_v24 = vld [vmem:[%s2000_s7 + $0x180] sm:$0xff]  ;;  %v408_v25 = vld [vmem:[%s2000_s7 + $0x190] sm:$0xff] }
  0x1f   : > { %383 = vst [vmem:[%s2005_s8 + $0x60] sm:$0xff] %v382_v12  ;;  %v410_v26 = vld [vmem:[%s2000_s7 + $0x1a0] sm:$0xff]  ;;  %v412_v27 = vld [vmem:[%s2000_s7 + $0x1b0] sm:$0xff] }
  0x20   : > { %385 = vst [vmem:[%s2005_s8 + $0x68] sm:$0xff] %v384_v13  ;;  %v414_v28 = vld [vmem:[%s2000_s7 + $0x1c0] sm:$0xff]  ;;  %v416_v29 = vld [vmem:[%s2000_s7 + $0x1d0] sm:$0xff] }
  0x21   : > { %387 = vst [vmem:[%s2005_s8 + $0x70] sm:$0xff] %v386_v14  ;;  %v418_v30 = vld [vmem:[%s2000_s7 + $0x1e0] sm:$0xff]  ;;  %v420_v31 = vld [vmem:[%s2000_s7 + $0x1f0] sm:$0xff] }
  0x22   : > { %389 = vst [vmem:[%s2005_s8 + $0x78] sm:$0xff] %v388_v15  ;;  %v422_v32 = vld [vmem:[%s2000_s7 + $0x200] sm:$0xff]  ;;  %v424_v33 = vld [vmem:[%s2000_s7 + $0x210] sm:$0xff] }
  0x23   : > { %391 = vst [vmem:[%s2005_s8 + $0x80] sm:$0xff] %v390_v16  ;;  %v426_v34 = vld [vmem:[%s2000_s7 + $0x220] sm:$0xff]  ;;  %v428_v35 = vld [vmem:[%s2000_s7 + $0x230] sm:$0xff] }
  0x24   : > { %393 = vst [vmem:[%s2005_s8 + $0x88] sm:$0xff] %v392_v17  ;;  %v430_v36 = vld [vmem:[%s2000_s7 + $0x240] sm:$0xff]  ;;  %v432_v37 = vld [vmem:[%s2000_s7 + $0x250] sm:$0xff] }
  0x25   : > { %395 = vst [vmem:[%s2005_s8 + $0x90] sm:$0xff] %v394_v18  ;;  %v434_v38 = vld [vmem:[%s2000_s7 + $0x260] sm:$0xff]  ;;  %v436_v39 = vld [vmem:[%s2000_s7 + $0x270] sm:$0xff] }
  0x26   : > { %397 = vst [vmem:[%s2005_s8 + $0x98] sm:$0xff] %v396_v19  ;;  %v438_v40 = vld [vmem:[%s2000_s7 + $0x280] sm:$0xff]  ;;  %v440_v41 = vld [vmem:[%s2000_s7 + $0x290] sm:$0xff] }
  0x27   : > { %399 = vst [vmem:[%s2005_s8 + $0xa0] sm:$0xff] %v398_v20  ;;  %v442_v42 = vld [vmem:[%s2000_s7 + $0x2a0] sm:$0xff]  ;;  %v444_v43 = vld [vmem:[%s2000_s7 + $0x2b0] sm:$0xff] }
  0x28   : > { %401 = vst [vmem:[%s2005_s8 + $0xa8] sm:$0xff] %v400_v21  ;;  %v446_v44 = vld [vmem:[%s2000_s7 + $0x2c0] sm:$0xff]  ;;  %v448_v45 = vld [vmem:[%s2000_s7 + $0x2d0] sm:$0xff] }
  0x29   : > { %403 = vst [vmem:[%s2005_s8 + $0xb0] sm:$0xff] %v402_v22  ;;  %v450_v46 = vld [vmem:[%s2000_s7 + $0x2e0] sm:$0xff]  ;;  %v452_v47 = vld [vmem:[%s2000_s7 + $0x2f0] sm:$0xff] }
  0x2a   : > { %405 = vst [vmem:[%s2005_s8 + $0xb8] sm:$0xff] %v404_v23  ;;  %v454_v48 = vld [vmem:[%s2000_s7 + $0x300] sm:$0xff]  ;;  %v456_v49 = vld [vmem:[%s2000_s7 + $0x310] sm:$0xff] }
  0x2b   : > { %407 = vst [vmem:[%s2005_s8 + $0xc0] sm:$0xff] %v406_v24  ;;  %v458_v50 = vld [vmem:[%s2000_s7 + $0x320] sm:$0xff]  ;;  %v460_v51 = vld [vmem:[%s2000_s7 + $0x330] sm:$0xff] }
  0x2c   : > { %409 = vst [vmem:[%s2005_s8 + $0xc8] sm:$0xff] %v408_v25  ;;  %v462_v52 = vld [vmem:[%s2000_s7 + $0x340] sm:$0xff]  ;;  %v464_v53 = vld [vmem:[%s2000_s7 + $0x350] sm:$0xff] }
  0x2d   : > { %411 = vst [vmem:[%s2005_s8 + $0xd0] sm:$0xff] %v410_v26  ;;  %v466_v54 = vld [vmem:[%s2000_s7 + $0x360] sm:$0xff]  ;;  %v468_v55 = vld [vmem:[%s2000_s7 + $0x370] sm:$0xff] }
  0x2e   : > { %413 = vst [vmem:[%s2005_s8 + $0xd8] sm:$0xff] %v412_v27  ;;  %v470_v56 = vld [vmem:[%s2000_s7 + $0x380] sm:$0xff]  ;;  %v472_v57 = vld [vmem:[%s2000_s7 + $0x390] sm:$0xff] }
  0x2f   : > { %415 = vst [vmem:[%s2005_s8 + $0xe0] sm:$0xff] %v414_v28  ;;  %v474_v58 = vld [vmem:[%s2000_s7 + $0x3a0] sm:$0xff]  ;;  %v476_v59 = vld [vmem:[%s2000_s7 + $0x3b0] sm:$0xff] }
  0x30   : > { %417 = vst [vmem:[%s2005_s8 + $0xe8] sm:$0xff] %v416_v29  ;;  %v478_v60 = vld [vmem:[%s2000_s7 + $0x3c0] sm:$0xff]  ;;  %v480_v61 = vld [vmem:[%s2000_s7 + $0x3d0] sm:$0xff] }
  0x31   : > { %419 = vst [vmem:[%s2005_s8 + $0xf0] sm:$0xff] %v418_v30  ;;  %v482_v62 = vld [vmem:[%s2000_s7 + $0x3e0] sm:$0xff]  ;;  %v484_v63 = vld [vmem:[%s2000_s7 + $0x3f0] sm:$0xff] }
  0x32   : > { %421 = vst [vmem:[%s2005_s8 + $0xf8] sm:$0xff] %v420_v31  ;;  %v486_v0 = vld [vmem:[%s2000_s7 + $0x400] sm:$0xff]  ;;  %v488_v1 = vld [vmem:[%s2000_s7 + $0x410] sm:$0xff] }
  0x33   : > { %423 = vst [vmem:[%s2005_s8 + $0x100] sm:$0xff] %v422_v32  ;;  %v490_v2 = vld [vmem:[%s2000_s7 + $0x420] sm:$0xff]  ;;  %v492_v3 = vld [vmem:[%s2000_s7 + $0x430] sm:$0xff] }
  0x34   : > { %425 = vst [vmem:[%s2005_s8 + $0x108] sm:$0xff] %v424_v33  ;;  %v494_v4 = vld [vmem:[%s2000_s7 + $0x440] sm:$0xff]  ;;  %v496_v5 = vld [vmem:[%s2000_s7 + $0x450] sm:$0xff] }
  0x35   : > { %427 = vst [vmem:[%s2005_s8 + $0x110] sm:$0xff] %v426_v34  ;;  %v498_v6 = vld [vmem:[%s2000_s7 + $0x460] sm:$0xff]  ;;  %v500_v7 = vld [vmem:[%s2000_s7 + $0x470] sm:$0xff] }
  0x36   : > { %429 = vst [vmem:[%s2005_s8 + $0x118] sm:$0xff] %v428_v35 }
  0x37   : > { %431 = vst [vmem:[%s2005_s8 + $0x120] sm:$0xff] %v430_v36 }
  0x38   : > { %433 = vst [vmem:[%s2005_s8 + $0x128] sm:$0xff] %v432_v37 }
  0x39   : > { %435 = vst [vmem:[%s2005_s8 + $0x130] sm:$0xff] %v434_v38 }
  0x3a   : > { %437 = vst [vmem:[%s2005_s8 + $0x138] sm:$0xff] %v436_v39 }
  0x3b   : > { %439 = vst [vmem:[%s2005_s8 + $0x140] sm:$0xff] %v438_v40 }
  0x3c   : > { %441 = vst [vmem:[%s2005_s8 + $0x148] sm:$0xff] %v440_v41 }
  0x3d   : > { %443 = vst [vmem:[%s2005_s8 + $0x150] sm:$0xff] %v442_v42 }
  0x3e   : > { %445 = vst [vmem:[%s2005_s8 + $0x158] sm:$0xff] %v444_v43 }
  0x3f   : > { %447 = vst [vmem:[%s2005_s8 + $0x160] sm:$0xff] %v446_v44 }
  0x40   : > { %449 = vst [vmem:[%s2005_s8 + $0x168] sm:$0xff] %v448_v45 }
  0x41   : > { %451 = vst [vmem:[%s2005_s8 + $0x170] sm:$0xff] %v450_v46 }
  0x42   : > { %453 = vst [vmem:[%s2005_s8 + $0x178] sm:$0xff] %v452_v47 }
  0x43   : > { %455 = vst [vmem:[%s2005_s8 + $0x180] sm:$0xff] %v454_v48 }
  0x44   : > { %457 = vst [vmem:[%s2005_s8 + $0x188] sm:$0xff] %v456_v49 }
  0x45   : > { %459 = vst [vmem:[%s2005_s8 + $0x190] sm:$0xff] %v458_v50 }
  0x46   : > { %461 = vst [vmem:[%s2005_s8 + $0x198] sm:$0xff] %v460_v51 }
  0x47   : > { %463 = vst [vmem:[%s2005_s8 + $0x1a0] sm:$0xff] %v462_v52 }
  0x48   : > { %465 = vst [vmem:[%s2005_s8 + $0x1a8] sm:$0xff] %v464_v53 }
  0x49   : > { %467 = vst [vmem:[%s2005_s8 + $0x1b0] sm:$0xff] %v466_v54 }
  0x4a   : > { %469 = vst [vmem:[%s2005_s8 + $0x1b8] sm:$0xff] %v468_v55 }
  0x4b   : > { %471 = vst [vmem:[%s2005_s8 + $0x1c0] sm:$0xff] %v470_v56 }
  0x4c   : > { %473 = vst [vmem:[%s2005_s8 + $0x1c8] sm:$0xff] %v472_v57 }
  0x4d   : > { %475 = vst [vmem:[%s2005_s8 + $0x1d0] sm:$0xff] %v474_v58 }
  0x4e   : > { %477 = vst [vmem:[%s2005_s8 + $0x1d8] sm:$0xff] %v476_v59 }
  0x4f   : > { %479 = vst [vmem:[%s2005_s8 + $0x1e0] sm:$0xff] %v478_v60 }
  0x50   : > { %481 = vst [vmem:[%s2005_s8 + $0x1e8] sm:$0xff] %v480_v61 }
  0x51   : > { %483 = vst [vmem:[%s2005_s8 + $0x1f0] sm:$0xff] %v482_v62 }
  0x52   : > { %485 = vst [vmem:[%s2005_s8 + $0x1f8] sm:$0xff] %v484_v63 }
  0x53   : > { %487 = vst [vmem:[%s2005_s8 + $0x200] sm:$0xff] %v486_v0 }
  0x54   : > { %489 = vst [vmem:[%s2005_s8 + $0x208] sm:$0xff] %v488_v1 }
  0x55   : > { %491 = vst [vmem:[%s2005_s8 + $0x210] sm:$0xff] %v490_v2 }
  0x56   : > { %493 = vst [vmem:[%s2005_s8 + $0x218] sm:$0xff] %v492_v3 }
  0x57   : > { %495 = vst [vmem:[%s2005_s8 + $0x220] sm:$0xff] %v494_v4 }
  0x58   : > { %497 = vst [vmem:[%s2005_s8 + $0x228] sm:$0xff] %v496_v5 }
  0x59   : > { %499 = vst [vmem:[%s2005_s8 + $0x230] sm:$0xff] %v498_v6 }
  0x5a   : > { %501 = vst [vmem:[%s2005_s8 + $0x238] sm:$0xff] %v500_v7 }
  0x5b PF: > { %p1440_p7 = scmp.ge.s32.totalorder %s1927_s20, 1  ;;  %p506_p8 = scmp.lt.s32.totalorder %s1927_s20, 3 }
  0x5d   : > { %p507_p9 = pnand %p1440_p7, %p506_p8 }
  0x5e   : > { %s513_s9 = sand.u32 (!%p507_p9), 1, %s1919_s18  }
  0x5f   : > { %510 = sbr.rel (%p507_p9) target bundleno = 359 (0x167), region = 74 }
  0x60   : > { %s1876_s10 = smul.u32 (!%p507_p9), 576, %s513_s9 }
  0x62   : > { %s2153_s11 = scalar_lea.vmem (!%p507_p9), [#allocation2], %s1876_s10  ;;  %s1441_s10 = sshll.u32 (!%p507_p9), %s513_s9, 6 }
  0x63   : > { %s2463_s12 = scalar_lea.vmem (!%p507_p9), [#allocation3], %s1441_s10 }
  0x64   : > { %v1540_v8 = vld [vmem:[%s2153_s11 + $0x70] sm:$0xf]  ;;  %v1805_v9 = vld [vmem:[%s2153_s11 + $0x74] sm:$0xf0]  ;;  %v1532_v19 = vld [vmem:[%s2153_s11 + $0x60] sm:$0xf] }
  0x65   : > { %v1604_v10 = vld [vmem:[%s2153_s11 + $0xf0] sm:$0xf]  ;;  %v1541_v11 = vor.u32 %v1805_v9, %v1540_v8  ;;  %v1821_v12 = vld [vmem:[%s2153_s11 + $0xf4] sm:$0xf0]  ;;  %v1803_v21 = vld [vmem:[%s2153_s11 + $0x64] sm:$0xf0] }
  0x66   : > { %v1668_v13 = vld [vmem:[%s2153_s11 + $0x170] sm:$0xf]  ;;  %v1837_v14 = vld [vmem:[%s2153_s11 + $0x174] sm:$0xf0]  ;;  %v1605_v15 = vor.u32 %v1821_v12, %v1604_v10  ;;  %v1596_v22 = vld [vmem:[%s2153_s11 + $0xe0] sm:$0xf]  ;;  %v1533_v24 = vor.u32 %v1803_v21, %v1532_v19 }
  0x67   : > { %v1669_v16 = vor.u32 %v1837_v14, %v1668_v13  ;;  %v1732_v17 = vld [vmem:[%s2153_s11 + $0x1f0] sm:$0xf]  ;;  %v1853_v18 = vld [vmem:[%s2153_s11 + $0x1f4] sm:$0xf0]  ;;  %1067 = vmatpush.bf16.msra.mxu0 %v1541_v11  ;;  %v1819_v23 = vld [vmem:[%s2153_s11 + $0xe4] sm:$0xf0] }
  0x68   : > { %v1733_v20 = vor.u32 %v1853_v18, %v1732_v17  ;;  %1086 = vmatpush.bf16.msra.mxu1 %v1605_v15  ;;  %v1597_v25 = vor.u32 %v1819_v23, %v1596_v22  ;;  %v1660_v26 = vld [vmem:[%s2153_s11 + $0x160] sm:$0xf]  ;;  %v1835_v27 = vld [vmem:[%s2153_s11 + $0x164] sm:$0xf0]  ;;  %v1524_v31 = vld [vmem:[%s2153_s11 + $0x50] sm:$0xf] }
  0x69   : > { %1105 = vmatpush.bf16.msra.mxu2 %v1669_v16  ;;  %v1724_v28 = vld [vmem:[%s2153_s11 + $0x1e0] sm:$0xf]  ;;  %v1661_v29 = vor.u32 %v1835_v27, %v1660_v26  ;;  %v1851_v30 = vld [vmem:[%s2153_s11 + $0x1e4] sm:$0xf0]  ;;  %v1801_v32 = vld [vmem:[%s2153_s11 + $0x54] sm:$0xf0] }
  0x6a   : > { %1124 = vmatpush.bf16.msra.mxu3 %v1733_v20  ;;  %v1725_v33 = vor.u32 %v1851_v30, %v1724_v28  ;;  %v1588_v34 = vld [vmem:[%s2153_s11 + $0xd0] sm:$0xf]  ;;  %v1817_v35 = vld [vmem:[%s2153_s11 + $0xd4] sm:$0xf0]  ;;  %v1525_v37 = vor.u32 %v1801_v32, %v1524_v31  ;;  %v1516_v43 = vld [vmem:[%s2153_s11 + $0x40] sm:$0xf] }
  0x6b   : > { %v1652_v36 = vld [vmem:[%s2153_s11 + $0x150] sm:$0xf]  ;;  %1068 = vmatpush.bf16.msra.mxu0 %v1533_v24  ;;  %v1833_v38 = vld [vmem:[%s2153_s11 + $0x154] sm:$0xf0]  ;;  %v1589_v41 = vor.u32 %v1817_v35, %v1588_v34  ;;  %v1799_v44 = vld [vmem:[%s2153_s11 + $0x44] sm:$0xf0] }
  0x6c   : > { %v1716_v39 = vld [vmem:[%s2153_s11 + $0x1d0] sm:$0xf]  ;;  %v1849_v40 = vld [vmem:[%s2153_s11 + $0x1d4] sm:$0xf0]  ;;  %1087 = vmatpush.bf16.msra.mxu1 %v1597_v25  ;;  %v1653_v42 = vor.u32 %v1833_v38, %v1652_v36  ;;  %v1580_v45 = vld [vmem:[%s2153_s11 + $0xc0] sm:$0xf]  ;;  %v1517_v52 = vor.u32 %v1799_v44, %v1516_v43 }
  0x6d   : > { %1106 = vmatpush.bf16.msra.mxu2 %v1661_v29  ;;  %v1717_v46 = vor.u32 %v1849_v40, %v1716_v39  ;;  %v1815_v47 = vld [vmem:[%s2153_s11 + $0xc4] sm:$0xf0]  ;;  %v1644_v48 = vld [vmem:[%s2153_s11 + $0x140] sm:$0xf]  ;;  %v1508_v55 = vld [vmem:[%s2153_s11 + $0x30] sm:$0xf] }
  0x6e   : > { %1125 = vmatpush.bf16.msra.mxu3 %v1725_v33  ;;  %v1831_v49 = vld [vmem:[%s2153_s11 + $0x144] sm:$0xf0]  ;;  %v1708_v50 = vld [vmem:[%s2153_s11 + $0x1c0] sm:$0xf]  ;;  %v1581_v53 = vor.u32 %v1815_v47, %v1580_v45  ;;  %v1797_v56 = vld [vmem:[%s2153_s11 + $0x34] sm:$0xf0] }
  0x6f   : > { %v1847_v51 = vld [vmem:[%s2153_s11 + $0x1c4] sm:$0xf0]  ;;  %1069 = vmatpush.bf16.msra.mxu0 %v1525_v37  ;;  %v1645_v54 = vor.u32 %v1831_v49, %v1644_v48  ;;  %v1572_v57 = vld [vmem:[%s2153_s11 + $0xb0] sm:$0xf]  ;;  %v1813_v59 = vld [vmem:[%s2153_s11 + $0xb4] sm:$0xf0]  ;;  %v1509_v0 = vor.u32 %v1797_v56, %v1508_v55 }
  0x70   : > { %1088 = vmatpush.bf16.msra.mxu1 %v1589_v41  ;;  %v1709_v58 = vor.u32 %v1847_v51, %v1708_v50  ;;  %v1636_v60 = vld [vmem:[%s2153_s11 + $0x130] sm:$0xf]  ;;  %v1829_v61 = vld [vmem:[%s2153_s11 + $0x134] sm:$0xf0]  ;;  %v1573_v1 = vor.u32 %v1813_v59, %v1572_v57  ;;  %v1500_v3 = vld [vmem:[%s2153_s11 + $0x20] sm:$0xf] }
  0x71   : > { %1107 = vmatpush.bf16.msra.mxu2 %v1653_v42  ;;  %v1700_v62 = vld [vmem:[%s2153_s11 + $0x1b0] sm:$0xf]  ;;  %v1845_v63 = vld [vmem:[%s2153_s11 + $0x1b4] sm:$0xf0]  ;;  %v1637_v2 = vor.u32 %v1829_v61, %v1636_v60  ;;  %v1795_v4 = vld [vmem:[%s2153_s11 + $0x24] sm:$0xf0] }
  0x72   : > { %1126 = vmatpush.bf16.msra.mxu3 %v1717_v46  ;;  %v1564_v5 = vld [vmem:[%s2153_s11 + $0xa0] sm:$0xf]  ;;  %v1701_v6 = vor.u32 %v1845_v63, %v1700_v62  ;;  %v1811_v7 = vld [vmem:[%s2153_s11 + $0xa4] sm:$0xf0]  ;;  %v1501_v12 = vor.u32 %v1795_v4, %v1500_v3  ;;  %v1492_v15 = vld [vmem:[%s2153_s11 + $0x10] sm:$0xf] }
  0x73   : > { %1070 = vmatpush.bf16.msra.mxu0 %v1517_v52  ;;  %v1628_v8 = vld [vmem:[%s2153_s11 + $0x120] sm:$0xf]  ;;  %v1827_v9 = vld [vmem:[%s2153_s11 + $0x124] sm:$0xf0]  ;;  %v1565_v13 = vor.u32 %v1811_v7, %v1564_v5  ;;  %v1793_v16 = vld [vmem:[%s2153_s11 + $0x14] sm:$0xf0] }
  0x74   : > { %1089 = vmatpush.bf16.msra.mxu1 %v1581_v53  ;;  %v1692_v10 = vld [vmem:[%s2153_s11 + $0x1a0] sm:$0xf]  ;;  %v1843_v11 = vld [vmem:[%s2153_s11 + $0x1a4] sm:$0xf0]  ;;  %v1629_v14 = vor.u32 %v1827_v9, %v1628_v8  ;;  %v1556_v17 = vld [vmem:[%s2153_s11 + $0x90] sm:$0xf]  ;;  %v1493_v25 = vor.u32 %v1793_v16, %v1492_v15 }
  0x75   : > { %1108 = vmatpush.bf16.msra.mxu2 %v1645_v54  ;;  %v1693_v18 = vor.u32 %v1843_v11, %v1692_v10  ;;  %v1809_v19 = vld [vmem:[%s2153_s11 + $0x94] sm:$0xf0]  ;;  %v1620_v20 = vld [vmem:[%s2153_s11 + $0x110] sm:$0xf]  ;;  %v1484_v24 = vld [vmem:[%s2153_s11] sm:$0xf] }
  0x76   : > { %1127 = vmatpush.bf16.msra.mxu3 %v1709_v58  ;;  %v1825_v21 = vld [vmem:[%s2153_s11 + $0x114] sm:$0xf0]  ;;  %v1684_v22 = vld [vmem:[%s2153_s11 + $0x190] sm:$0xf]  ;;  %v1791_v26 = vld [vmem:[%s2153_s11 + $0x4] sm:$0xf0]  ;;  %v1557_v29 = vor.u32 %v1809_v19, %v1556_v17 }
  0x77   : > { %1071 = vmatpush.bf16.msra.mxu0 %v1509_v0  ;;  %v1841_v23 = vld [vmem:[%s2153_s11 + $0x194] sm:$0xf0]  ;;  %v1548_v27 = vld [vmem:[%s2153_s11 + $0x80] sm:$0xf]  ;;  %v1807_v28 = vld [vmem:[%s2153_s11 + $0x84] sm:$0xf0]  ;;  %v1621_v30 = vor.u32 %v1825_v21, %v1620_v20  ;;  %v1485_v43 = vor.u32 %v1791_v26, %v1484_v24 }
  0x78   : > { %1090 = vmatpush.bf16.msra.mxu1 %v1573_v1  ;;  %v1612_v31 = vld [vmem:[%s2153_s11 + $0x100] sm:$0xf]  ;;  %v1823_v32 = vld [vmem:[%s2153_s11 + $0x104] sm:$0xf0]  ;;  %v1685_v34 = vor.u32 %v1841_v23, %v1684_v22  ;;  %v1782_v37 = vld [vmem:[%s2516_s0 + $0x10] sm:$0xf0]  ;;  %v1549_v47 = vor.u32 %v1807_v28, %v1548_v27 }
  0x79   : > { %1109 = vmatpush.bf16.msra.mxu2 %v1637_v2  ;;  %v1676_v33 = vld [vmem:[%s2153_s11 + $0x180] sm:$0xf]  ;;  %v1839_v35 = vld [vmem:[%s2153_s11 + $0x184] sm:$0xf0]  ;;  %v1780_v38 = vld [vmem:[%s2516_s0 + $0x4] sm:$0xf]  ;;  %v1613_v48 = vor.u32 %v1823_v32, %v1612_v31 }
  0x7a   : > { %1128 = vmatpush.bf16.msra.mxu3 %v1701_v6  ;;  %v1444_v36 = vld [vmem:[%s2516_s0] sm:$0xf]  ;;  %v1446_v39 = vld [vmem:[%s2516_s0 + $0x14] sm:$0xf0]  ;;  %v1452_v40 = vld [vmem:[%s2516_s0 + $0x8] sm:$0xf]  ;;  %v1677_v52 = vor.u32 %v1839_v35, %v1676_v33 }
  0x7b   : > { %1072 = vmatpush.bf16.msra.mxu0 %v1501_v12  ;;  %v1820_v41 = vld [vmem:[%s2153_s11 + $0xf4] sm:$0xf]  ;;  %v1606_v42 = vld [vmem:[%s2153_s11 + $0xf8] sm:$0xf0]  ;;  %v1781_v49 = vld [vmem:[%s2516_s0 + $0xc] sm:$0xf]  ;;  %v2251_v57 = vor.u32 %v1782_v37, %v1444_v36  ;;  %v2255_v61 = vor.u32 %v1780_v38, %v1446_v39 }
  0x7c   : > { %1091 = vmatpush.bf16.msra.mxu1 %v1565_v13  ;;  %v1783_v44 = vld [vmem:[%s2516_s0 + $0x18] sm:$0xf0]  ;;  %v1804_v45 = vld [vmem:[%s2153_s11 + $0x74] sm:$0xf]  ;;  %v1454_v50 = vld [vmem:[%s2516_s0 + $0x1c] sm:$0xf0]  ;;  %v1609_v53 = vor.u32 %v1820_v41, %v1606_v42 }
  0x7d   : > { %1110 = vmatpush.bf16.msra.mxu2 %v1629_v14  ;;  %v1542_v46 = vld [vmem:[%s2153_s11 + $0x78] sm:$0xf0]  ;;  %v1836_v51 = vld [vmem:[%s2153_s11 + $0x174] sm:$0xf]  ;;  %v1764_v55 = vld [vmem:[%s2153_s11 + $0x230] sm:$0xf]  ;;  %v2257_v62 = vor.u32 %v1783_v44, %v1452_v40  ;;  %v2261_v2 = vor.u32 %v1781_v49, %v1454_v50 }
  0x7e   : > { %1129 = vmatpush.bf16.msra.mxu3 %v1693_v18  ;;  %v1670_v54 = vld [vmem:[%s2153_s11 + $0x178] sm:$0xf0]  ;;  %v1861_v56 = vld [vmem:[%s2153_s11 + $0x234] sm:$0xf0]  ;;  %v1545_v58 = vor.u32 %v1804_v45, %v1542_v46  ;;  %v1818_v59 = vld [vmem:[%s2153_s11 + $0xe4] sm:$0xf] }
  0x7f   : > { %1073 = vmatpush.bf16.msra.mxu0 %v1493_v25  ;;  %v1598_v60 = vld [vmem:[%s2153_s11 + $0xe8] sm:$0xf0]  ;;  %v1802_v63 = vld [vmem:[%s2153_s11 + $0x64] sm:$0xf]  ;;  %v1929_v1 = vmov 0   ;;  %v1765_v3 = vor.u32 %v1861_v56, %v1764_v55  ;;  %v1673_v4 = vor.u32 %v1836_v51, %v1670_v54  ;;  %v628_v45 = vld [vmem:[%s2518_s2 + $0x10] sm:$0xff] }
  0x80   : > { %1092 = vmatpush.bf16.msra.mxu1 %v1557_v29  ;;  %v1534_v0 = vld [vmem:[%s2153_s11 + $0x68] sm:$0xf0]  ;;  %1902 = vset.pattern.permute.xlu0 %v1929_v1  ;;  %v1601_v5 = vor.u32 %v1818_v59, %v1598_v60  ;;  %v1834_v6 = vld [vmem:[%s2153_s11 + $0x164] sm:$0xf]  ;;  %v1756_v7 = vld [vmem:[%s2153_s11 + $0x220] sm:$0xf] }
  0x81   : > { %1111 = vmatpush.bf16.msra.mxu2 %v1621_v30  ;;  %v1859_v8 = vld [vmem:[%s2153_s11 + $0x224] sm:$0xf0]  ;;  %v1537_v9 = vor.u32 %v1802_v63, %v1534_v0  ;;  %v1662_v10 = vld [vmem:[%s2153_s11 + $0x168] sm:$0xf0]  ;;  %v1816_v11 = vld [vmem:[%s2153_s11 + $0xd4] sm:$0xf]  ;;  %1903 = vset.pattern.permute.xlu1 %v1929_v1 }
  0x82   : > { %1130 = vmatpush.bf16.msra.mxu3 %v1685_v34  ;;  %v1590_v12 = vld [vmem:[%s2153_s11 + $0xd8] sm:$0xf0]  ;;  %v1800_v13 = vld [vmem:[%s2153_s11 + $0x54] sm:$0xf]  ;;  %v626_v15 = vld [vmem:[%s2518_s2] sm:$0xff]  ;;  %v1757_v16 = vor.u32 %v1859_v8, %v1756_v7  ;;  %v1665_v17 = vor.u32 %v1834_v6, %v1662_v10  ;;  %1904 = vset.pattern.permute.xlu2 %v1929_v1  ;;  %vm1060_vm0 = vcmask 523264  }
  0x83   : > { %1074 = vmatpush.bf16.msra.mxu0 %v1485_v43  ;;  %v1526_v14 = vld [vmem:[%s2153_s11 + $0x58] sm:$0xf0]  ;;  %v1593_v18 = vor.u32 %v1816_v11, %v1590_v12  ;;  %v1832_v19 = vld [vmem:[%s2153_s11 + $0x154] sm:$0xf]  ;;  %632 = vperm.xlu0 %1902, %v626_v15   ;;  %v1814_v22 = vld [vmem:[%s2153_s11 + $0xc4] sm:$0xf] }
  0x84   : > { %1093 = vmatpush.bf16.msra.mxu1 %v1549_v47  ;;  %v1529_v20 = vor.u32 %v1800_v13, %v1526_v14  ;;  %v1654_v21 = vld [vmem:[%s2153_s11 + $0x158] sm:$0xf0]  ;;  %v1582_v23 = vld [vmem:[%s2153_s11 + $0xc8] sm:$0xf0]  ;;  %v1798_v24 = vld [vmem:[%s2153_s11 + $0x44] sm:$0xf]  ;;  %642 = vperm.xlu1 %1903, %v628_v45  }
  0x85   : > { %1112 = vmatpush.bf16.msra.mxu2 %v1613_v48  ;;  %v1518_v25 = vld [vmem:[%s2153_s11 + $0x48] sm:$0xf0]  ;;  %v1830_v26 = vld [vmem:[%s2153_s11 + $0x144] sm:$0xf]  ;;  %v1748_v28 = vld [vmem:[%s2153_s11 + $0x210] sm:$0xf]  ;;  %v1657_v29 = vor.u32 %v1832_v19, %v1654_v21  ;;  %v1585_v30 = vor.u32 %v1814_v22, %v1582_v23 }
  0x86   : > { %1131 = vmatpush.bf16.msra.mxu3 %v1677_v52  ;;  %1075 = vmatmul.bf16.vlgmr.msra.gmra.mxu0 %v2251_v57  ;;  %v1646_v27 = vld [vmem:[%s2153_s11 + $0x148] sm:$0xf0]  ;;  %v1464_v31 = vld [vmem:[%s2516_s0 + $0x28] sm:$0xf]  ;;  %v1787_v32 = vld [vmem:[%s2516_s0 + $0x38] sm:$0xf0]  ;;  %v1521_v34 = vor.u32 %v1798_v24, %v1518_v25 }
  0x87   : > { %1094 = vmatmul.bf16.vlgmr.msra.gmra.mxu1 %v2255_v61  ;;  %1147 = vmatpush.bf16.msrb.mxu0 %v1765_v3  ;;  %v1857_v33 = vld [vmem:[%s2153_s11 + $0x214] sm:$0xf0]  ;;  %v1785_v35 = vld [vmem:[%s2516_s0 + $0x2c] sm:$0xf]  ;;  %v1466_v36 = vld [vmem:[%s2516_s0 + $0x3c] sm:$0xf0]  ;;  %v1649_v49 = vor.u32 %v1830_v26, %v1646_v27  ;;  %v2326_v55 = vor.u32 %v1787_v32, %v1464_v31 }
  0x88   : > { %1162 = vmatpush.bf16.msrb.mxu1 %v1545_v58  ;;  %1113 = vmatmul.bf16.vlgmr.msra.gmra.mxu2 %v2257_v62  ;;  %v1472_v37 = vld [vmem:[%s2516_s0 + $0x30] sm:$0xf]  ;;  %v1788_v38 = vld [vmem:[%s2516_s0 + $0x40] sm:$0xf0]  ;;  %v1812_v39 = vld [vmem:[%s2153_s11 + $0xb4] sm:$0xf]  ;;  %v1749_v42 = vor.u32 %v1857_v33, %v1748_v28  ;;  %v2331_v63 = vor.u32 %v1785_v35, %v1466_v36 }
  0x89   : > { %1181 = vmatpush.bf16.msrb.mxu2 %v1609_v53  ;;  %1132 = vmatmul.bf16.vlgmr.msra.gmra.mxu3 %v2261_v2  ;;  %v1574_v40 = vld [vmem:[%s2153_s11 + $0xb8] sm:$0xf0]  ;;  %v1796_v41 = vld [vmem:[%s2153_s11 + $0x34] sm:$0xf]  ;;  %v627_v44 = vld [vmem:[%s2518_s2 + $0x8] sm:$0xff]  ;;  %v2333_v0 = vor.u32 %v1788_v38, %v1472_v37  ;;  %s1862_s18 = sshll.u32 (%p1990_p5), %s1434_s21, 4 }
  0x8a   : > { %1200 = vmatpush.bf16.msrb.mxu3 %v1673_v4  ;;  %v1510_v43 = vld [vmem:[%s2153_s11 + $0x38] sm:$0xf0]  ;;  %v1786_v46 = vld [vmem:[%s2516_s0 + $0x34] sm:$0xf]  ;;  %v1740_v47 = vld [vmem:[%s2153_s11 + $0x200] sm:$0xf]  ;;  %v1577_v51 = vor.u32 %v1812_v39, %v1574_v40  ;;  %s1346_s14 = scalar_lea.vmem (%p1990_p5), %s2521_s5, %s1862_s18 }
  0x8b   : > { %1148 = vmatpush.bf16.msrb.mxu0 %v1757_v16  ;;  %v1855_v48 = vld [vmem:[%s2153_s11 + $0x204] sm:$0xf0]  ;;  %v1828_v52 = vld [vmem:[%s2153_s11 + $0x134] sm:$0xf]  ;;  %v1638_v53 = vld [vmem:[%s2153_s11 + $0x138] sm:$0xf0]  ;;  %v1513_v56 = vor.u32 %v1796_v41, %v1510_v43  ;;  %637 = vperm.xlu0 %1902, %v627_v44  }
  0x8c   : > { %1163 = vmatpush.bf16.msrb.mxu1 %v1537_v9  ;;  %v1474_v50 = vld [vmem:[%s2516_s0 + $0x44] sm:$0xf0]  ;;  %v1741_v54 = vor.u32 %v1855_v48, %v1740_v47  ;;  %v1810_v58 = vld [vmem:[%s2153_s11 + $0xa4] sm:$0xf]  ;;  %v1566_v59 = vld [vmem:[%s2153_s11 + $0xa8] sm:$0xf0]  ;;  %v1641_v7 = vor.u32 %v1828_v52, %v1638_v53 }
  0x8d   : > { %1182 = vmatpush.bf16.msrb.mxu2 %v1601_v5  ;;  %v1794_v60 = vld [vmem:[%s2153_s11 + $0x24] sm:$0xf]  ;;  %v1502_v1 = vld [vmem:[%s2153_s11 + $0x28] sm:$0xf0]  ;;  %v1852_v3 = vld [vmem:[%s2153_s11 + $0x1f4] sm:$0xf]  ;;  %v2338_v5 = vor.u32 %v1786_v46, %v1474_v50  ;;  %v1569_v8 = vor.u32 %v1810_v58, %v1566_v59 }
  0x8e   : > { %1201 = vmatpush.bf16.msrb.mxu3 %v1665_v17  ;;  %v1734_v4 = vld [vmem:[%s2153_s11 + $0x1f8] sm:$0xf0]  ;;  %v1826_v9 = vld [vmem:[%s2153_s11 + $0x124] sm:$0xf]  ;;  %v1726_v11 = vld [vmem:[%s2153_s11 + $0x1e8] sm:$0xf0]  ;;  %v1505_v12 = vor.u32 %v1794_v60, %v1502_v1 }
  0x8f   : > { %1149 = vmatpush.bf16.msrb.mxu0 %v1749_v42  ;;  %v2340_v6 = vor.u32 %v1852_v3, %v1734_v4  ;;  %v1850_v10 = vld [vmem:[%s2153_s11 + $0x1e4] sm:$0xf]  ;;  %v1630_v13 = vld [vmem:[%s2153_s11 + $0x128] sm:$0xf0]  ;;  %v1808_v14 = vld [vmem:[%s2153_s11 + $0x94] sm:$0xf] }
  0x90   : > { %1164 = vmatpush.bf16.msrb.mxu1 %v1529_v20  ;;  %v1558_v15 = vld [vmem:[%s2153_s11 + $0x98] sm:$0xf0]  ;;  %v1792_v16 = vld [vmem:[%s2153_s11 + $0x14] sm:$0xf]  ;;  %v2358_v19 = vor.u32 %v1850_v10, %v1726_v11  ;;  %v1633_v21 = vor.u32 %v1826_v9, %v1630_v13  ;;  %v1806_v28 = vld [vmem:[%s2153_s11 + $0x84] sm:$0xf] }
  0x91   : > { %1183 = vmatpush.bf16.msrb.mxu2 %v1593_v18  ;;  %v1494_v17 = vld [vmem:[%s2153_s11 + $0x18] sm:$0xf0]  ;;  %v1267_v20 = vld [vmem:[%s2519_s3 + $0x10] sm:$0xff]  ;;  %v1561_v22 = vor.u32 %v1808_v14, %v1558_v15  ;;  %v1486_v31 = vld [vmem:[%s2153_s11 + $0x8] sm:$0xf0] }
  0x92   : > { %1202 = vmatpush.bf16.msrb.mxu3 %v1657_v29  ;;  %v629_v18 = vld [vmem:[%s2518_s2 + $0x18] sm:$0xff]  ;;  %v1824_v23 = vld [vmem:[%s2153_s11 + $0x114] sm:$0xf]  ;;  %v1497_v26 = vor.u32 %v1792_v16, %v1494_v17  ;;  %v1550_v29 = vld [vmem:[%s2153_s11 + $0x88] sm:$0xf0] }
  0x93   : > { %1150 = vmatpush.bf16.msrb.mxu0 %v1741_v54  ;;  %v1848_v24 = vld [vmem:[%s2153_s11 + $0x1d4] sm:$0xf]  ;;  %v1718_v25 = vld [vmem:[%s2153_s11 + $0x1d8] sm:$0xf0]  ;;  %647 = vperm.xlu1 %1903, %v629_v18   ;;  %v1265_v35 = vld [vmem:[%s2519_s3] sm:$0xff]  ;;  %v1553_v37 = vor.u32 %v1806_v28, %v1550_v29 }
  0x94   : > { %1165 = vmatpush.bf16.msrb.mxu1 %v1521_v34  ;;  %v1622_v27 = vld [vmem:[%s2153_s11 + $0x118] sm:$0xf0]  ;;  %1281 = vperm.xlu0 %1902, %v1267_v20   ;;  %v1860_v32 = vld [vmem:[%s2153_s11 + $0x234] sm:$0xf]  ;;  %v1721_v34 = vor.u32 %v1848_v24, %v1718_v25  ;;  %v1846_v38 = vld [vmem:[%s2153_s11 + $0x1c4] sm:$0xf] }
  0x95   : > { %1184 = vmatpush.bf16.msrb.mxu2 %v1585_v30  ;;  %v1790_v30 = vld [vmem:[%s2153_s11 + $0x4] sm:$0xf]  ;;  %v1766_v33 = vld [vmem:[%s2153_s11 + $0x238] sm:$0xf0]  ;;  %v1625_v36 = vor.u32 %v1824_v23, %v1622_v27  ;;  %v1710_v39 = vld [vmem:[%s2153_s11 + $0x1c8] sm:$0xf0]  ;;  %1271 = vperm.xlu2 %1904, %v1265_v35  }
  0x96   : > { %1203 = vmatpush.bf16.msrb.mxu3 %v1649_v49  ;;  %1080 = vmatmul.bf16.gmra.mxu0 %v2326_v55  ;;  %v1489_v40 = vor.u32 %v1790_v30, %v1486_v31  ;;  %v1822_v41 = vld [vmem:[%s2153_s11 + $0x104] sm:$0xf]  ;;  %v1614_v42 = vld [vmem:[%s2153_s11 + $0x108] sm:$0xf0]  ;;  %v1460_v43 = vld [vmem:[%s2516_s0 + $0x10] sm:$0xf]  ;;  %v1769_v45 = vor.u32 %v1860_v32, %v1766_v33  ;;  %v1713_v46 = vor.u32 %v1846_v38, %v1710_v39 }
  0x97   : > { %1099 = vmatmul.bf16.gmra.mxu1 %v2331_v63  ;;  %1219 = vmatpush.bf16.msra.mxu0 %v2340_v6  ;;  %v1784_v44 = vld [vmem:[%s2516_s0 + $0x20] sm:$0xf0]  ;;  %v1268_v47 = vld [vmem:[%s2519_s3 + $0x18] sm:$0xff]  ;;  %v1617_v48 = vor.u32 %v1822_v41, %v1614_v42  ;;  %v1298_v50 = vld [vmem:[%s2520_s4 + $0x8] sm:$0xff] }
  0x98   : > { %1166 = vmatpush.bf16.msrb.mxu1 %v1513_v56  ;;  %1118 = vmatmul.bf16.gmra.mxu2 %v2333_v0  ;;  %v1858_v49 = vld [vmem:[%s2153_s11 + $0x224] sm:$0xf]  ;;  %v1758_v52 = vld [vmem:[%s2153_s11 + $0x228] sm:$0xf0]  ;;  %v1844_v53 = vld [vmem:[%s2153_s11 + $0x1b4] sm:$0xf] }
  0x99   : > { %1185 = vmatpush.bf16.msrb.mxu2 %v1577_v51  ;;  %1137 = vmatmul.bf16.gmra.mxu3 %v2338_v5  ;;  %v2394_v51 = vor.u32 %v1784_v44, %v1460_v43  ;;  %v1702_v54 = vld [vmem:[%s2153_s11 + $0x1b8] sm:$0xf0]  ;;  %v1761_v56 = vor.u32 %v1858_v49, %v1758_v52  ;;  %v1856_v59 = vld [vmem:[%s2153_s11 + $0x214] sm:$0xf]  ;;  %v1842_v1 = vld [vmem:[%s2153_s11 + $0x1a4] sm:$0xf] }
  0x9a   : > { %1204 = vmatpush.bf16.msrb.mxu3 %v1641_v7  ;;  %v1705_v58 = vor.u32 %v1844_v53, %v1702_v54  ;;  %v1750_v60 = vld [vmem:[%s2153_s11 + $0x218] sm:$0xf0]  ;;  %v1694_v3 = vld [vmem:[%s2153_s11 + $0x1a8] sm:$0xf0]  ;;  %v1480_v14 = vld [vmem:[%s2516_s0 + $0x38] sm:$0xf] }
  0x9b   : > { %1220 = vmatpush.bf16.msra.mxu0 %v2358_v19  ;;  %1286 = vperm.xlu1 %1903, %v1268_v47   ;;  %v1266_v4 = vld [vmem:[%s2519_s3 + $0x8] sm:$0xff]  ;;  %v1753_v7 = vor.u32 %v1856_v59, %v1750_v60  ;;  %v1297_v16 = vld [vmem:[%s2520_s4] sm:$0xff] }
  0x9c   : > { %1167 = vmatpush.bf16.msrb.mxu1 %v1505_v12  ;;  %1308 = vperm.xlu0 %1902, %v1298_v50   ;;  %v1742_v9 = vld [vmem:[%s2153_s11 + $0x208] sm:$0xf0]  ;;  %v1838_v12 = vld [vmem:[%s2153_s11 + $0x184] sm:$0xf] }
  0x9d   : > { %1186 = vmatpush.bf16.msrb.mxu2 %v1569_v8  ;;  %v1840_v8 = vld [vmem:[%s2153_s11 + $0x194] sm:$0xf]  ;;  %1276 = vperm.xlu2 %1904, %v1266_v4   ;;  %v1678_v13 = vld [vmem:[%s2153_s11 + $0x188] sm:$0xf0] }
  0x9e   : > { %1205 = vmatpush.bf16.msrb.mxu3 %v1633_v21  ;;  %v1789_v15 = vld [vmem:[%s2516_s0 + $0x48] sm:$0xf0]  ;;  %v1681_v17 = vor.u32 %v1838_v12, %v1678_v13 }
  0x9f   : > { %1221 = vmatpush.bf16.msra.mxu0 %v1721_v34  ;;  %v1481_v18 = vor.u32 %v1789_v15, %v1480_v14 }
  0xa0   : > { %1168 = vmatpush.bf16.msrb.mxu1 %v1497_v26 }
  0xa1   : > { %1187 = vmatpush.bf16.msrb.mxu2 %v1561_v22 }
  0xa2   : > { %1206 = vmatpush.bf16.msrb.mxu3 %v1625_v36 }
  0xa3   : > { %1222 = vmatpush.bf16.msra.mxu0 %v1713_v46 }
  0xa4   : > { %1169 = vmatpush.bf16.msrb.mxu1 %v1489_v40 }
  0xa5   : > { %1188 = vmatpush.bf16.msrb.mxu2 %v1553_v37  ;;  %1303 = vperm.xlu2 %1904, %v1297_v16  }
  0xa6   : > { %1207 = vmatpush.bf16.msrb.mxu3 %v1617_v48  ;;  %1770 = vmatmul.msk.bf16.vlgmr.msrb.gmra.mxu0 %vm1060_vm0, %v2394_v51 }
  0xa7   : > { %1170 = vmatmul.bf16.vlgmr.msrb.gmra.mxu1 %v2251_v57  ;;  %1223 = vmatpush.bf16.msra.mxu0 %v1705_v58  ;;  %v1697_v57 = vor.u32 %v1842_v1, %v1694_v3 }
  0xa8   : > { %1242 = vmatpush.bf16.msra.mxu1 %v1769_v45  ;;  %1189 = vmatmul.bf16.vlgmr.msrb.gmra.mxu2 %v2255_v61  ;;  %v1686_v61 = vld [vmem:[%s2153_s11 + $0x198] sm:$0xf0] }
  0xa9   : > { %1863 = vmatpush.bf16.msra.mxu2 %v2340_v6  ;;  %1208 = vmatmul.bf16.vlgmr.msrb.gmra.mxu3 %v2257_v62  ;;  %v1299_v6 = vld [vmem:[%s2520_s4 + $0x10] sm:$0xff]  ;;  %v1854_v62 = vld [vmem:[%s2153_s11 + $0x204] sm:$0xf]  ;;  %v1689_v10 = vor.u32 %v1840_v8, %v1686_v61 }
  0xaa   : > { %1871 = vmatpush.bf16.msra.mxu3 %v1769_v45  ;;  %1313 = vperm.xlu1 %1903, %v1299_v6   ;;  %v1745_v11 = vor.u32 %v1854_v62, %v1742_v9 }
  0xab   : > { %1224 = vmatpush.bf16.msra.mxu0 %v1697_v57 }
  0xac   : > { %1243 = vmatpush.bf16.msra.mxu1 %v1761_v56 }
  0xad   : > { %1864 = vmatpush.bf16.msra.mxu2 %v2358_v19  ;;  %v1300_v19 = vld [vmem:[%s2520_s4 + $0x18] sm:$0xff] }
  0xae   : > { %1872 = vmatpush.bf16.msra.mxu3 %v1761_v56  ;;  %1318 = vperm.xlu2 %1904, %v1300_v19  }
  0xaf   : > { %1225 = vmatpush.bf16.msra.mxu0 %v1689_v10 }
  0xb0   : > { %1244 = vmatpush.bf16.msra.mxu1 %v1753_v7 }
  0xb1   : > { %1865 = vmatpush.bf16.msra.mxu2 %v1721_v34 }
  0xb2   : > { %1873 = vmatpush.bf16.msra.mxu3 %v1753_v7 }
  0xb3   : > { %1226 = vmatpush.bf16.msra.mxu0 %v1681_v17 }
  0xb4   : > { %1245 = vmatpush.bf16.msra.mxu1 %v1745_v11 }
  0xb5   : > { %1866 = vmatpush.bf16.msra.mxu2 %v1713_v46 }
  0xb6   : > { %1874 = vmatpush.bf16.msra.mxu3 %v1745_v11  ;;  %1771 = vmatmul.msk.bf16.gmra.mxu0 %vm1060_vm0, %v1481_v18 }
  0xb7   : > { %1175 = vmatmul.bf16.gmra.mxu1 %v2326_v55 }
  0xb8   : > { %1194 = vmatmul.bf16.gmra.mxu2 %v2331_v63 }
  0xb9   : > { %1867 = vmatpush.bf16.msra.mxu2 %v1705_v58  ;;  %1213 = vmatmul.bf16.gmra.mxu3 %v2333_v0 }
  0xbd   : > { %1868 = vmatpush.bf16.msra.mxu2 %v1697_v57 }
  0xc1   : > { %1869 = vmatpush.bf16.msra.mxu2 %v1689_v10 }
  0xc5   : > { %1870 = vmatpush.bf16.msra.mxu2 %v1681_v17 }
  0xc6   : > { %1227 = vmatmul.bf16.vlgmr.msra.gmra.mxu0 %v2261_v2 }
  0xc7   : > { %1772 = vmatmul.msk.bf16.vlgmr.msra.gmra.mxu1 %vm1060_vm0, %v2394_v51 }
  0xc8   : > { %1232 = vmatmul.bf16.vlgmr.msra.gmra.mxu2 %v2338_v5 }
  0xc9   : > { %1773 = vmatmul.msk.bf16.vlgmr.msra.gmra.mxu3 %vm1060_vm0, %v1481_v18 }
  0xef   : > { %v2443_v0 = vpop.permute.xlu2 %1271 }
  0xf5   : > { %v633_v24 = vpop.permute.xlu0 %632 }
  0xf6   : > { %v2445_v29 = vpop.permute.xlu1 %642 }
  0xf7   : > { %v2449_v35 = vpop.permute.xlu2 %1276 }
  0xfd   : > { %v2447_v34 = vpop.permute.xlu0 %637 }
  0xff   : > { %v2459_v50 = vpop.permute.xlu2 %1303 }
 0x103   : > { %v1076_v55 = vpop.f32.mrf.mxu0 }
 0x104   : > { %v1095_v63 = vpop.f32.mrf.mxu1  ;;  %v1077_v28 = vadd.f32 %v1076_v55, %v633_v24 }
 0x105   : > { %v2452_v45 = vpop.permute.xlu1 %647 }
 0x106   : > { %v1096_v5 = vadd.f32 %v1095_v63, %v1077_v28  ;;  %v2454_v46 = vpop.permute.xlu0 %1281 }
 0x10b   : > { %v1114_v20 = vpop.f32.mrf.mxu2  ;;  %v1078_v22 = vpop.f32.mrf.mxu0 }
 0x10c   : > { %v1133_v21 = vpop.f32.mrf.mxu3  ;;  %v1097_v23 = vpop.f32.mrf.mxu1  ;;  %v1115_v36 = vadd.f32 %v1114_v20, %v1096_v5  ;;  %v1079_v37 = vadd.f32 %v1078_v22, %v2447_v34 }
 0x10d   : > { %v2466_v3 = vpop.permute.xlu1 %1286 }
 0x10e   : > { %v1134_v38 = vadd.f32 %v1133_v21, %v1115_v36  ;;  %v1098_v42 = vadd.f32 %v1097_v23, %v1079_v37  ;;  %v2468_v7 = vpop.permute.xlu0 %1308 }
 0x113   : > { %v1116_v25 = vpop.f32.mrf.mxu2  ;;  %v1081_v27 = vpop.f32.mrf.mxu0 }
 0x114   : > { %v1135_v26 = vpop.f32.mrf.mxu3  ;;  %v1100_v2 = vpop.f32.mrf.mxu1  ;;  %v1117_v47 = vadd.f32 %v1116_v25, %v1098_v42  ;;  %v1082_v48 = vadd.f32 %v1081_v27, %v2445_v29 }
 0x116   : > { %v1136_v52 = vadd.f32 %v1135_v26, %v1117_v47  ;;  %v1101_v53 = vadd.f32 %v1100_v2, %v1082_v48  ;;  %v1319_v2 = vpop.permute.xlu2 %1318 }
 0x11b   : > { %v1119_v30 = vpop.f32.mrf.mxu2  ;;  %v1083_v32 = vpop.f32.mrf.mxu0 }
 0x11c   : > { %v1138_v31 = vpop.f32.mrf.mxu3  ;;  %v1102_v33 = vpop.f32.mrf.mxu1  ;;  %v1120_v4 = vadd.f32 %v1119_v30, %v1101_v53  ;;  %v1084_v57 = vadd.f32 %v1083_v32, %v2452_v45 }
 0x11d   : > { %v1314_v17 = vpop.permute.xlu1 %1313 }
 0x11e   : > { %v1139_v61 = vadd.f32 %v1138_v31, %v1120_v4  ;;  %v1103_v12 = vadd.f32 %v1102_v33, %v1084_v57 }
 0x123   : > { %v1121_v39 = vpop.f32.mrf.mxu2  ;;  %v1152_v41 = vpop.f32.mrf.mxu0 }
 0x124   : > { %v1140_v40 = vpop.f32.mrf.mxu3  ;;  %v1153_v43 = vadd.f32 %v1152_v41, %v1134_v38  ;;  %v1171_v44 = vpop.f32.mrf.mxu1  ;;  %v1122_v15 = vadd.f32 %v1121_v39, %v1103_v12 }
 0x125   : > { %v1172_v55 = vadd.f32 %v1171_v44, %v633_v24 }
 0x126   : > { %v1257_v49 = vmax.f32 %v1153_v43, 0.0  ;;  %v1141_v19 = vadd.f32 %v1140_v40, %v1122_v15 }
 0x128   : > { %v1289_v51 = vmul.f32 %v2443_v0, %v1257_v49 }
 0x12a   : > { %v1321_v54 = vadd.f32 %v2459_v50, %v1289_v51 }
 0x12b   : > { %v1190_v56 = vpop.f32.mrf.mxu2  ;;  %v1154_v59 = vpop.f32.mrf.mxu0 }
 0x12c   : > { %v1209_v58 = vpop.f32.mrf.mxu3  ;;  %1329 = vst [vmem:[%s2463_s12] sm:$0xff] %v1321_v54  ;;  %v1155_v60 = vadd.f32 %v1154_v59, %v1136_v52  ;;  %v1173_v1 = vpop.f32.mrf.mxu1  ;;  %v1191_v26 = vadd.f32 %v1190_v56, %v1172_v55 }
 0x12d   : > { %v1174_v36 = vadd.f32 %v1173_v1, %v2447_v34 }
 0x12e   : > { %v1259_v6 = vmax.f32 %v1155_v60, 0.0  ;;  %v1210_v30 = vadd.f32 %v1209_v58, %v1191_v26 }
 0x130   : > { %v1291_v8 = vmul.f32 %v2449_v35, %v1259_v6 }
 0x132   : > { %v1323_v62 = vadd.f32 %v2468_v7, %v1291_v8 }
 0x133   : > { %v1192_v9 = vpop.f32.mrf.mxu2  ;;  %v1157_v11 = vpop.f32.mrf.mxu0 }
 0x134   : > { %v1211_v10 = vpop.f32.mrf.mxu3  ;;  %1331 = vst [vmem:[%s2463_s12 + $0x10] sm:$0xff] %v1323_v62  ;;  %v1158_v13 = vadd.f32 %v1157_v11, %v1139_v61  ;;  %v1176_v14 = vpop.f32.mrf.mxu1  ;;  %v1193_v40 = vadd.f32 %v1192_v9, %v1174_v36 }
 0x135   : > { %v1177_v5 = vadd.f32 %v1176_v14, %v2445_v29 }
 0x136   : > { %v1261_v16 = vmax.f32 %v1158_v13, 0.0  ;;  %v1212_v44 = vadd.f32 %v1211_v10, %v1193_v40 }
 0x138   : > { %v1293_v18 = vmul.f32 %v2454_v46, %v1261_v16 }
 0x13a   : > { %v1325_v63 = vadd.f32 %v1314_v17, %v1293_v18 }
 0x13b   : > { %v1195_v20 = vpop.f32.mrf.mxu2  ;;  %v1159_v22 = vpop.f32.mrf.mxu0 }
 0x13c   : > { %v1214_v21 = vpop.f32.mrf.mxu3  ;;  %1333 = vst [vmem:[%s2463_s12 + $0x20] sm:$0xff] %v1325_v63  ;;  %v1160_v23 = vadd.f32 %v1159_v22, %v1141_v19  ;;  %v1178_v25 = vpop.f32.mrf.mxu1  ;;  %v1196_v39 = vadd.f32 %v1195_v20, %v1177_v5 }
 0x13d   : > { %v1179_v48 = vadd.f32 %v1178_v25, %v2452_v45 }
 0x13e   : > { %v1263_v27 = vmax.f32 %v1160_v23, 0.0  ;;  %v1215_v43 = vadd.f32 %v1214_v21, %v1196_v39 }
 0x140   : > { %v1295_v28 = vmul.f32 %v2466_v3, %v1263_v27 }
 0x142   : > { %v1327_v31 = vadd.f32 %v1319_v2, %v1295_v28 }
 0x143   : > { %v1197_v32 = vpop.f32.mrf.mxu2  ;;  %v1228_v24 = vpop.f32.mrf.mxu0  ;;  %v1367_v12 = vld [vmem:[%s2463_s12 + $0x20] sm:$0xff] (%p1990_p5) }
 0x144   : > { %v1216_v33 = vpop.f32.mrf.mxu3  ;;  %1335 = vst [vmem:[%s2463_s12 + $0x30] sm:$0xff] %v1327_v31  ;;  %v1229_v37 = vadd.f32 %v1228_v24, %v1210_v30  ;;  %v1247_v38 = vpop.f32.mrf.mxu1  ;;  %v1198_v54 = vadd.f32 %v1197_v32, %v1179_v48 }
 0x145   : > { %1368 = vst [vmem:[%s1346_s14 + $0x40] sm:$0xff] (%p1990_p5), %v1367_v12 }
 0x146   : > { %v1248_v41 = vadd.f32 %v1247_v38, %v1229_v37 }
 0x148   : > { %v1258_v42 = vmax.f32 %v1248_v41, 0.0 }
 0x14a   : > { %v1290_v47 = vmul.f32 %v2443_v0, %v1258_v42  ;;  %v1217_v0 = vadd.f32 %v1216_v33, %v1198_v54 }
 0x14b   : > { %v1233_v29 = vpop.f32.mrf.mxu2  ;;  %v1230_v52 = vpop.f32.mrf.mxu0  ;;  %v1371_v14 = vld [vmem:[%s2463_s12 + $0x30] sm:$0xff] (%p1990_p5) }
 0x14c   : > { %v1234_v49 = vadd.f32 %v1233_v29, %v1215_v43  ;;  %v1252_v51 = vpop.f32.mrf.mxu3  ;;  %v1322_v34 = vadd.f32 %v2459_v50, %v1290_v47  ;;  %v1231_v53 = vadd.f32 %v1230_v52, %v1212_v44  ;;  %v1249_v58 = vpop.f32.mrf.mxu1  ;;  %1372 = vst [vmem:[%s1346_s14 + $0x60] sm:$0xff] (%p1990_p5), %v1371_v14 }
 0x14e   : > { %v1253_v56 = vadd.f32 %v1252_v51, %v1234_v49  ;;  %1330 = vst [vmem:[%s2463_s12 + $0x8] sm:$0xff] %v1322_v34  ;;  %v1250_v59 = vadd.f32 %v1249_v58, %v1231_v53 }
 0x150   : > { %v1262_v60 = vmax.f32 %v1253_v56, 0.0  ;;  %v1260_v1 = vmax.f32 %v1250_v59, 0.0 }
 0x152   : > { %v1294_v4 = vmul.f32 %v2454_v46, %v1262_v60  ;;  %v1292_v45 = vmul.f32 %v2449_v35, %v1260_v1  ;;  %v1359_v35 = vld [vmem:[%s2463_s12] sm:$0xff] (%p1990_p5) }
 0x153   : > { %v1235_v6 = vpop.f32.mrf.mxu2  ;;  %1360 = vst [vmem:[%s1346_s14] sm:$0xff] (%p1990_p5), %v1359_v35 }
 0x154   : > { %v1326_v57 = vadd.f32 %v1314_v17, %v1294_v4  ;;  %v1236_v8 = vadd.f32 %v1235_v6, %v1217_v0  ;;  %v1324_v50 = vadd.f32 %v2468_v7, %v1292_v45  ;;  %v1254_v61 = vpop.f32.mrf.mxu3 }
 0x155   : > { %v1361_v46 = vld [vmem:[%s2463_s12 + $0x8] sm:$0xff] (%p1990_p5) }
 0x156   : > { %1334 = vst [vmem:[%s2463_s12 + $0x28] sm:$0xff] %v1326_v57  ;;  %v1255_v62 = vadd.f32 %v1254_v61, %v1236_v8 }
 0x157   : > { %1332 = vst [vmem:[%s2463_s12 + $0x18] sm:$0xff] %v1324_v50 }
 0x158   : > { %v1264_v9 = vmax.f32 %v1255_v62, 0.0  ;;  %1362 = vst [vmem:[%s1346_s14 + $0x8] sm:$0xff] (%p1990_p5), %v1361_v46 }
 0x15a   : > { %v1296_v10 = vmul.f32 %v2466_v3, %v1264_v9  ;;  %1343 = sbr.rel (!%p1990_p5) target bundleno = 359 (0x167), region = 82  ;;  %v1363_v3 = vld [vmem:[%s2463_s12 + $0x10] sm:$0xff] (%p1990_p5) }
 0x15b   : > { %1364 = vst [vmem:[%s1346_s14 + $0x20] sm:$0xff] (%p1990_p5), %v1363_v3 }
 0x15c   : > { %v1328_v11 = vadd.f32 %v1319_v2, %v1296_v10 }
 0x15d   : > { %v1369_v13 = vld [vmem:[%s2463_s12 + $0x28] sm:$0xff] (%p1990_p5) }
 0x15e   : > { %1336 = vst [vmem:[%s2463_s12 + $0x38] sm:$0xff] %v1328_v11  ;;  %v1365_v7 = vld [vmem:[%s2463_s12 + $0x18] sm:$0xff] (%p1990_p5) }
 0x15f   : > { %1366 = vst [vmem:[%s1346_s14 + $0x28] sm:$0xff] %v1365_v7 }
 0x160   : > { %1370 = vst [vmem:[%s1346_s14 + $0x48] sm:$0xff] %v1369_v13 }
 0x165   : > { %v1373_v15 = vld [vmem:[%s2463_s12 + $0x38] sm:$0xff] }
 0x166   : > { %1374 = vst [vmem:[%s1346_s14 + $0x68] sm:$0xff] %v1373_v15 }
 0x167 PF: > { %p12_p10 = scmp.ge.s32.totalorder %s1977_s22, 4   ;;  %s2523_s18 = smov %s1923_s19 }
 0x168   : > { %s2524_s19 = smov %s1988_s25  ;;  %s2525_s20 = smov %s1977_s22 }
 0x169   :  { %14 = sbr.rel (!%p12_p10) target bundleno = 2 (0x2), region = 136 }

// kernel: fl2d_forward.35
= control target key start
LH: loop header
LB: loop body
LE: loop exit
PB: predicated region body
PF: predicated region fallthrough
CT: control target
= control target key end

     0   :  { %s2072_s18 = smov 0   ;;  %s2074_s19 = smov 0   ;;  %s2965_s0 = inlined_call_operand.vmem [shape: bf16[128,288], index: 0, kind: input, shape index: {}]   ;;  %s2966_s1 = inlined_call_operand.vmem [shape: bf16[288,512], index: 1, kind: input, shape index: {}]   ;;  %s2967_s2 = inlined_call_operand.vmem [shape: f32[128,1], index: 2, kind: input, shape index: {}]   ;;  %s2968_s3 = inlined_call_operand.vmem [shape: f32[128,1], index: 3, kind: input, shape index: {}]   ;;  %s2969_s4 = inlined_call_operand.vmem [shape: f32[128,1], index: 4, kind: input, shape index: {}]   ;;  %s2970_s5 = inlined_call_operand.vmem [shape: f32[128,512], index: 5, kind: output, shape index: {}]  }
   0x1   :  { %s2076_s20 = smov 0  }
   0x2 LB: > { %s1646_s21 = sadd.s32 4294967295, %s2039_s20   ;;  %s2089_s22 = sadd.s32 1, %s2039_s20   ;;  %s2039_s20 = sphi %s2076_s20, %s3015_s20   ;;  %s2035_s19 = sphi %s2074_s19, %s3014_s19   ;;  %s2031_s18 = sphi %s2072_s18, %s3013_s18  }
   0x3   : > { %s40_s23 = ssub.s32 %s2039_s20, %s2089_s22  ;;  %s43_s24 = sadd.s32 1, %s2035_s19 }
   0x4   : > { %p41_p0 = scmp.eq.s32.totalorder %s40_s23, 0  ;;  %p50_p1 = scmp.ne.s32.totalorder %s2035_s19, %s2031_s18 }
   0x5   : > { %p51_p2 = scmp.eq.s32.totalorder %s2039_s20, 0  ;;  %p143_p3 = scmp.eq.s32.totalorder %s1646_s21, 1 }
   0x6   : > { %s2100_s25 = scalar_select %p41_p0, %s2035_s19, %s43_s24  }
   0x7   : > { %p52_p4 = por %p51_p2, %p50_p1  ;;  %p2102_p5 = por %p143_p3, %p50_p1 }
   0x8   : > { %p1649_p6 = scmp.ge.s32.totalorder %s2039_s20, 2 }
   0xa   : > { %177 = sbr.rel (%p1649_p6) target bundleno = 55 (0x37), region = 32 }
   0xf   : > { %180 = sbr.rel (!%p52_p4) target bundleno = 55 (0x37), region = 36  ;;  %s182_s27 = sand.u32 (%p52_p4), 1, %s2035_s19  }
  0x10   : > { %s1915_s28 = sshll.u32 (%p52_p4), %s2039_s20, 3  ;;  %s1987_s29 = smul.u32 (%p52_p4), 288, %s182_s27 }
  0x11   : > { %s2112_s7 = scalar_lea.vmem (%p52_p4), %s2966_s1, %s1915_s28 }
  0x12   : > { %v286_v0 = vld [vmem:[%s2112_s7] sm:$0xff] (%p52_p4)  ;;  %v288_v1 = vld [vmem:[%s2112_s7 + $0x10] sm:$0xff] (%p52_p4)  ;;  %s2117_s8 = scalar_lea.vmem (%p52_p4), [#allocation2], %s1987_s29 }
  0x13   : > { %v290_v2 = vld [vmem:[%s2112_s7 + $0x20] sm:$0xff] (%p52_p4)  ;;  %287 = vst [vmem:[%s2117_s8] sm:$0xff] (%p52_p4), %v286_v0  ;;  %v292_v3 = vld [vmem:[%s2112_s7 + $0x30] sm:$0xff] (%p52_p4) }
  0x14   : > { %289 = vst [vmem:[%s2117_s8 + $0x8] sm:$0xff] %v288_v1  ;;  %v294_v4 = vld [vmem:[%s2112_s7 + $0x40] sm:$0xff]  ;;  %v296_v5 = vld [vmem:[%s2112_s7 + $0x50] sm:$0xff] }
  0x15   : > { %291 = vst [vmem:[%s2117_s8 + $0x10] sm:$0xff] %v290_v2  ;;  %v298_v6 = vld [vmem:[%s2112_s7 + $0x60] sm:$0xff]  ;;  %v300_v7 = vld [vmem:[%s2112_s7 + $0x70] sm:$0xff] }
  0x16   : > { %293 = vst [vmem:[%s2117_s8 + $0x18] sm:$0xff] %v292_v3  ;;  %v302_v8 = vld [vmem:[%s2112_s7 + $0x80] sm:$0xff]  ;;  %v304_v9 = vld [vmem:[%s2112_s7 + $0x90] sm:$0xff] }
  0x17   : > { %295 = vst [vmem:[%s2117_s8 + $0x20] sm:$0xff] %v294_v4  ;;  %v306_v10 = vld [vmem:[%s2112_s7 + $0xa0] sm:$0xff]  ;;  %v308_v11 = vld [vmem:[%s2112_s7 + $0xb0] sm:$0xff] }
  0x18   : > { %297 = vst [vmem:[%s2117_s8 + $0x28] sm:$0xff] %v296_v5  ;;  %v310_v12 = vld [vmem:[%s2112_s7 + $0xc0] sm:$0xff]  ;;  %v312_v13 = vld [vmem:[%s2112_s7 + $0xd0] sm:$0xff] }
  0x19   : > { %299 = vst [vmem:[%s2117_s8 + $0x30] sm:$0xff] %v298_v6  ;;  %v314_v14 = vld [vmem:[%s2112_s7 + $0xe0] sm:$0xff]  ;;  %v316_v15 = vld [vmem:[%s2112_s7 + $0xf0] sm:$0xff] }
  0x1a   : > { %301 = vst [vmem:[%s2117_s8 + $0x38] sm:$0xff] %v300_v7  ;;  %v318_v16 = vld [vmem:[%s2112_s7 + $0x100] sm:$0xff]  ;;  %v320_v17 = vld [vmem:[%s2112_s7 + $0x110] sm:$0xff] }
  0x1b   : > { %303 = vst [vmem:[%s2117_s8 + $0x40] sm:$0xff] %v302_v8  ;;  %v322_v18 = vld [vmem:[%s2112_s7 + $0x120] sm:$0xff]  ;;  %v324_v19 = vld [vmem:[%s2112_s7 + $0x130] sm:$0xff] }
  0x1c   : > { %305 = vst [vmem:[%s2117_s8 + $0x48] sm:$0xff] %v304_v9  ;;  %v326_v20 = vld [vmem:[%s2112_s7 + $0x140] sm:$0xff]  ;;  %v328_v21 = vld [vmem:[%s2112_s7 + $0x150] sm:$0xff] }
  0x1d   : > { %307 = vst [vmem:[%s2117_s8 + $0x50] sm:$0xff] %v306_v10  ;;  %v330_v22 = vld [vmem:[%s2112_s7 + $0x160] sm:$0xff]  ;;  %v332_v23 = vld [vmem:[%s2112_s7 + $0x170] sm:$0xff] }
  0x1e   : > { %309 = vst [vmem:[%s2117_s8 + $0x58] sm:$0xff] %v308_v11  ;;  %v334_v24 = vld [vmem:[%s2112_s7 + $0x180] sm:$0xff]  ;;  %v336_v25 = vld [vmem:[%s2112_s7 + $0x190] sm:$0xff] }
  0x1f   : > { %311 = vst [vmem:[%s2117_s8 + $0x60] sm:$0xff] %v310_v12  ;;  %v338_v26 = vld [vmem:[%s2112_s7 + $0x1a0] sm:$0xff]  ;;  %v340_v27 = vld [vmem:[%s2112_s7 + $0x1b0] sm:$0xff] }
  0x20   : > { %313 = vst [vmem:[%s2117_s8 + $0x68] sm:$0xff] %v312_v13  ;;  %v342_v28 = vld [vmem:[%s2112_s7 + $0x1c0] sm:$0xff]  ;;  %v344_v29 = vld [vmem:[%s2112_s7 + $0x1d0] sm:$0xff] }
  0x21   : > { %315 = vst [vmem:[%s2117_s8 + $0x70] sm:$0xff] %v314_v14  ;;  %v346_v30 = vld [vmem:[%s2112_s7 + $0x1e0] sm:$0xff]  ;;  %v348_v31 = vld [vmem:[%s2112_s7 + $0x1f0] sm:$0xff] }
  0x22   : > { %317 = vst [vmem:[%s2117_s8 + $0x78] sm:$0xff] %v316_v15  ;;  %v350_v32 = vld [vmem:[%s2112_s7 + $0x200] sm:$0xff]  ;;  %v352_v33 = vld [vmem:[%s2112_s7 + $0x210] sm:$0xff] }
  0x23   : > { %319 = vst [vmem:[%s2117_s8 + $0x80] sm:$0xff] %v318_v16  ;;  %v354_v34 = vld [vmem:[%s2112_s7 + $0x220] sm:$0xff]  ;;  %v356_v35 = vld [vmem:[%s2112_s7 + $0x230] sm:$0xff] }
  0x24   : > { %321 = vst [vmem:[%s2117_s8 + $0x88] sm:$0xff] %v320_v17 }
  0x25   : > { %323 = vst [vmem:[%s2117_s8 + $0x90] sm:$0xff] %v322_v18 }
  0x26   : > { %325 = vst [vmem:[%s2117_s8 + $0x98] sm:$0xff] %v324_v19 }
  0x27   : > { %327 = vst [vmem:[%s2117_s8 + $0xa0] sm:$0xff] %v326_v20 }
  0x28   : > { %329 = vst [vmem:[%s2117_s8 + $0xa8] sm:$0xff] %v328_v21 }
  0x29   : > { %331 = vst [vmem:[%s2117_s8 + $0xb0] sm:$0xff] %v330_v22 }
  0x2a   : > { %333 = vst [vmem:[%s2117_s8 + $0xb8] sm:$0xff] %v332_v23 }
  0x2b   : > { %335 = vst [vmem:[%s2117_s8 + $0xc0] sm:$0xff] %v334_v24 }
  0x2c   : > { %337 = vst [vmem:[%s2117_s8 + $0xc8] sm:$0xff] %v336_v25 }
  0x2d   : > { %339 = vst [vmem:[%s2117_s8 + $0xd0] sm:$0xff] %v338_v26 }
  0x2e   : > { %341 = vst [vmem:[%s2117_s8 + $0xd8] sm:$0xff] %v340_v27 }
  0x2f   : > { %343 = vst [vmem:[%s2117_s8 + $0xe0] sm:$0xff] %v342_v28 }
  0x30   : > { %345 = vst [vmem:[%s2117_s8 + $0xe8] sm:$0xff] %v344_v29 }
  0x31   : > { %347 = vst [vmem:[%s2117_s8 + $0xf0] sm:$0xff] %v346_v30 }
  0x32   : > { %349 = vst [vmem:[%s2117_s8 + $0xf8] sm:$0xff] %v348_v31 }
  0x33   : > { %351 = vst [vmem:[%s2117_s8 + $0x100] sm:$0xff] %v350_v32 }
  0x34   : > { %353 = vst [vmem:[%s2117_s8 + $0x108] sm:$0xff] %v352_v33 }
  0x35   : > { %355 = vst [vmem:[%s2117_s8 + $0x110] sm:$0xff] %v354_v34 }
  0x36   : > { %357 = vst [vmem:[%s2117_s8 + $0x118] sm:$0xff] %v356_v35 }
  0x37 PF: > { %p1652_p7 = scmp.ge.s32.totalorder %s2039_s20, 1  ;;  %p362_p8 = scmp.lt.s32.totalorder %s2039_s20, 3 }
  0x39   : > { %p363_p9 = pnand %p1652_p7, %p362_p8 }
  0x3b   : > { %366 = sbr.rel (%p363_p9) target bundleno = 433 (0x1b1), region = 74 }
  0x40   : > { %v468_v36 = vld [vmem:[%s2967_s2 + $0x10] sm:$0xff]  ;;  %v466_v37 = vld [vmem:[%s2967_s2] sm:$0xff]  ;;  %s369_s13 = sand.u32 1, %s2031_s18   ;;  %v2041_v38 = vmov 0   ;;  %v469_v45 = vld [vmem:[%s2967_s2 + $0x18] sm:$0xff]  ;;  %vm862_vm0 = vcmask 261120  }
  0x41   : > { %2015 = vset.pattern.permute.xlu1 %v2041_v38  ;;  %2014 = vset.pattern.permute.xlu0 %v2041_v38  ;;  %s1988_s14 = smul.u32 288, %s369_s13  ;;  %v470_v39 = vld [vmem:[%s2967_s2 + $0x20] sm:$0xff]  ;;  %v467_v49 = vld [vmem:[%s2967_s2 + $0x8] sm:$0xff]  ;;  %v1918_v57 = vld [vmem:[%s2965_s0 + $0x10] sm:$0xf0]  ;;  %s1653_s29 = sshll.u32 %s369_s13, 8 }
  0x42   : > { %494 = vperm.xlu1 %2015, %v468_v36   ;;  %484 = vperm.xlu0 %2014, %v466_v37   ;;  %v1664_v53 = vld [vmem:[%s2965_s0 + $0x8] sm:$0xf]  ;;  %v1724_v58 = vld [vmem:[%s2965_s0 + $0x80] sm:$0xf]  ;;  %v1933_v59 = vld [vmem:[%s2965_s0 + $0x88] sm:$0xf0] }
  0x43   : > { %2016 = vset.pattern.permute.xlu2 %v2041_v38  ;;  %s2202_s17 = scalar_lea.vmem [#allocation2], %s1988_s14  ;;  %v2236_v1 = vor.u32 %v1918_v57, %v1664_v53  ;;  %v2238_v2 = vor.u32 %v1933_v59, %v1724_v58  ;;  %v471_v9 = vld [vmem:[%s2967_s2 + $0x28] sm:$0xff]  ;;  %v473_v10 = vld [vmem:[%s2967_s2 + $0x38] sm:$0xff]  ;;  %v472_v12 = vld [vmem:[%s2967_s2 + $0x30] sm:$0xff]  ;;  %s2758_s18 = scalar_lea.vmem [#allocation3], %s1653_s29 }
  0x44   : > { %v1808_v40 = vld [vmem:[%s2202_s17 + $0x70] sm:$0xf]  ;;  %v1955_v41 = vld [vmem:[%s2202_s17 + $0x74] sm:$0xf0]  ;;  %504 = vperm.xlu2 %2016, %v470_v39   ;;  %v1800_v46 = vld [vmem:[%s2202_s17 + $0x60] sm:$0xf] }
  0x45   : > { %v1888_v42 = vld [vmem:[%s2202_s17 + $0x110] sm:$0xf]  ;;  %v1809_v43 = vor.u32 %v1955_v41, %v1808_v40  ;;  %v1975_v44 = vld [vmem:[%s2202_s17 + $0x114] sm:$0xf0]  ;;  %v1953_v47 = vld [vmem:[%s2202_s17 + $0x64] sm:$0xf0] }
  0x46   : > { %v1889_v48 = vor.u32 %v1975_v44, %v1888_v42  ;;  %v1880_v50 = vld [vmem:[%s2202_s17 + $0x100] sm:$0xf]  ;;  %v1973_v51 = vld [vmem:[%s2202_s17 + $0x104] sm:$0xf0]  ;;  %v1801_v52 = vor.u32 %v1953_v47, %v1800_v46  ;;  %v1970_v54 = vld [vmem:[%s2202_s17 + $0xf4] sm:$0xf] }
  0x47   : > { %887 = vmatpush.bf16.msra.mxu0 %v1809_v43  ;;  %1977 = vmatpush.bf16.msra.mxu1 %v1809_v43  ;;  %v1874_v55 = vld [vmem:[%s2202_s17 + $0xf8] sm:$0xf0]  ;;  %v1881_v56 = vor.u32 %v1973_v51, %v1880_v50  ;;  %v1792_v60 = vld [vmem:[%s2202_s17 + $0x50] sm:$0xf]  ;;  %v1951_v61 = vld [vmem:[%s2202_s17 + $0x54] sm:$0xf0] }
  0x48   : > { %991 = vmatpush.bf16.msra.mxu2 %v1889_v48  ;;  %1985 = vmatpush.bf16.msra.mxu3 %v1889_v48  ;;  %v1877_v62 = vor.u32 %v1970_v54, %v1874_v55  ;;  %v1968_v63 = vld [vmem:[%s2202_s17 + $0xe4] sm:$0xf]  ;;  %v1866_v0 = vld [vmem:[%s2202_s17 + $0xe8] sm:$0xf0]  ;;  %v1793_v3 = vor.u32 %v1951_v61, %v1792_v60  ;;  %v1784_v4 = vld [vmem:[%s2202_s17 + $0x40] sm:$0xf] }
  0x49   : > { %v1949_v5 = vld [vmem:[%s2202_s17 + $0x44] sm:$0xf0]  ;;  %v1869_v6 = vor.u32 %v1968_v63, %v1866_v0  ;;  %v1954_v7 = vld [vmem:[%s2202_s17 + $0x74] sm:$0xf]  ;;  %v1810_v8 = vld [vmem:[%s2202_s17 + $0x78] sm:$0xf0] }
  0x4a   : > { %499 = vperm.xlu1 %2015, %v469_v45   ;;  %489 = vperm.xlu0 %2014, %v467_v49   ;;  %v1813_v11 = vor.u32 %v1954_v7, %v1810_v8  ;;  %v1952_v13 = vld [vmem:[%s2202_s17 + $0x64] sm:$0xf]  ;;  %v1802_v14 = vld [vmem:[%s2202_s17 + $0x68] sm:$0xf0]  ;;  %v1785_v15 = vor.u32 %v1949_v5, %v1784_v4  ;;  %v1966_v16 = vld [vmem:[%s2202_s17 + $0xd4] sm:$0xf] }
  0x4b   : > { %888 = vmatpush.bf16.msra.mxu0 %v1801_v52  ;;  %1978 = vmatpush.bf16.msra.mxu1 %v1801_v52  ;;  %v1858_v17 = vld [vmem:[%s2202_s17 + $0xd8] sm:$0xf0]  ;;  %v1776_v18 = vld [vmem:[%s2202_s17 + $0x30] sm:$0xf]  ;;  %v1947_v19 = vld [vmem:[%s2202_s17 + $0x34] sm:$0xf0]  ;;  %v1805_v20 = vor.u32 %v1952_v13, %v1802_v14 }
  0x4c   : > { %992 = vmatpush.bf16.msra.mxu2 %v1881_v56  ;;  %1986 = vmatpush.bf16.msra.mxu3 %v1881_v56  ;;  %v1861_v21 = vor.u32 %v1966_v16, %v1858_v17  ;;  %v1950_v22 = vld [vmem:[%s2202_s17 + $0x54] sm:$0xf]  ;;  %v1794_v23 = vld [vmem:[%s2202_s17 + $0x58] sm:$0xf0]  ;;  %v1777_v24 = vor.u32 %v1947_v19, %v1776_v18  ;;  %v474_v25 = vld [vmem:[%s2967_s2 + $0x40] sm:$0xff]  ;;  %s1976_s13 = sshll.u32 (%p2102_p5), %s1646_s21, 4 }
  0x4d   : > { %509 = vperm.xlu2 %2016, %v471_v9   ;;  %v476_v26 = vld [vmem:[%s2967_s2 + $0x50] sm:$0xff]  ;;  %v1768_v27 = vld [vmem:[%s2202_s17 + $0x20] sm:$0xf]  ;;  %v1945_v28 = vld [vmem:[%s2202_s17 + $0x24] sm:$0xf0]  ;;  %v1797_v29 = vor.u32 %v1950_v22, %v1794_v23  ;;  %s2891_s26 = scalar_lea.vmem (%p2102_p5), %s2970_s5, %s1976_s13 }
  0x4e   : > { %v475_v30 = vld [vmem:[%s2967_s2 + $0x48] sm:$0xff]  ;;  %v1948_v31 = vld [vmem:[%s2202_s17 + $0x44] sm:$0xf]  ;;  %v1676_v33 = vld [vmem:[%s2965_s0 + $0x20] sm:$0xf]  ;;  %v1769_v36 = vor.u32 %v1945_v28, %v1768_v27 }
  0x4f   : > { %1894 = vmatmul.msk.bf16.vlgmr.msra.gmra.mxu2 %vm862_vm0, %v2236_v1  ;;  %1899 = vmatmul.msk.bf16.vlgmr.msra.gmra.mxu3 %vm862_vm0, %v2238_v2  ;;  %v1786_v32 = vld [vmem:[%s2202_s17 + $0x48] sm:$0xf0]  ;;  %v1964_v35 = vld [vmem:[%s2202_s17 + $0xc4] sm:$0xf]  ;;  %v1736_v37 = vld [vmem:[%s2965_s0 + $0x98] sm:$0xf] }
  0x50   : > { %1083 = vmatpush.bf16.msrb.mxu2 %v1877_v62  ;;  %889 = vmatpush.bf16.msra.mxu0 %v1793_v3  ;;  %v1921_v34 = vld [vmem:[%s2965_s0 + $0x28] sm:$0xf0]  ;;  %v1936_v38 = vld [vmem:[%s2965_s0 + $0xa0] sm:$0xf0]  ;;  %v1760_v40 = vld [vmem:[%s2202_s17 + $0x10] sm:$0xf]  ;;  %v1789_v42 = vor.u32 %v1948_v31, %v1786_v32 }
  0x51   : > { %1979 = vmatpush.bf16.msra.mxu1 %v1793_v3  ;;  %1034 = vmatpush.bf16.msrb.mxu3 %v1813_v11  ;;  %v1850_v39 = vld [vmem:[%s2202_s17 + $0xc8] sm:$0xf0]  ;;  %v1943_v41 = vld [vmem:[%s2202_s17 + $0x14] sm:$0xf0]  ;;  %v1946_v44 = vld [vmem:[%s2202_s17 + $0x34] sm:$0xf]  ;;  %v2296_v46 = vor.u32 %v1921_v34, %v1676_v33  ;;  %v2298_v47 = vor.u32 %v1936_v38, %v1736_v37 }
  0x52   : > { %519 = vperm.xlu1 %2015, %v473_v10   ;;  %514 = vperm.xlu0 %2014, %v472_v12   ;;  %v1853_v43 = vor.u32 %v1964_v35, %v1850_v39  ;;  %v1778_v45 = vld [vmem:[%s2202_s17 + $0x38] sm:$0xf0]  ;;  %v1761_v49 = vor.u32 %v1943_v41, %v1760_v40  ;;  %v1752_v50 = vld [vmem:[%s2202_s17] sm:$0xf]  ;;  %v1941_v51 = vld [vmem:[%s2202_s17 + $0x4] sm:$0xf0] }
  0x53   : > { %v477_v48 = vld [vmem:[%s2967_s2 + $0x58] sm:$0xff]  ;;  %v479_v52 = vld [vmem:[%s2967_s2 + $0x68] sm:$0xff]  ;;  %v478_v53 = vld [vmem:[%s2967_s2 + $0x60] sm:$0xff]  ;;  %v1781_v55 = vor.u32 %v1946_v44, %v1778_v45  ;;  %v1753_v3 = vor.u32 %v1941_v51, %v1752_v50 }
  0x54   : > { %1084 = vmatpush.bf16.msrb.mxu2 %v1869_v6  ;;  %890 = vmatpush.bf16.msra.mxu0 %v1785_v15  ;;  %v1872_v54 = vld [vmem:[%s2202_s17 + $0xf0] sm:$0xf]  ;;  %v1962_v56 = vld [vmem:[%s2202_s17 + $0xb4] sm:$0xf]  ;;  %v1842_v57 = vld [vmem:[%s2202_s17 + $0xb8] sm:$0xf0] }
  0x55   : > { %1980 = vmatpush.bf16.msra.mxu1 %v1785_v15  ;;  %1035 = vmatpush.bf16.msrb.mxu3 %v1805_v20  ;;  %v1971_v58 = vld [vmem:[%s2202_s17 + $0xf4] sm:$0xf0]  ;;  %v1974_v59 = vld [vmem:[%s2202_s17 + $0x114] sm:$0xf]  ;;  %v1890_v60 = vld [vmem:[%s2202_s17 + $0x118] sm:$0xf0]  ;;  %v1845_v61 = vor.u32 %v1962_v56, %v1842_v57 }
  0x56   : > { %524 = vperm.xlu2 %2016, %v474_v25   ;;  %v1656_v62 = vld [vmem:[%s2965_s0] sm:$0xf]  ;;  %v1944_v63 = vld [vmem:[%s2202_s17 + $0x24] sm:$0xf]  ;;  %v1770_v0 = vld [vmem:[%s2202_s17 + $0x28] sm:$0xf0]  ;;  %v1873_v7 = vor.u32 %v1971_v58, %v1872_v54  ;;  %v1893_v8 = vor.u32 %v1974_v59, %v1890_v60 }
  0x57   : > { %v1917_v4 = vld [vmem:[%s2965_s0 + $0x8] sm:$0xf0]  ;;  %v1704_v5 = vld [vmem:[%s2965_s0 + $0x60] sm:$0xf]  ;;  %v1969_v10 = vld [vmem:[%s2202_s17 + $0xe4] sm:$0xf0]  ;;  %v1773_v11 = vor.u32 %v1944_v63, %v1770_v0 }
  0x58   : > { %1085 = vmatpush.bf16.msrb.mxu2 %v1861_v21  ;;  %891 = vmatpush.bf16.msra.mxu0 %v1777_v24  ;;  %v1929_v6 = vld [vmem:[%s2965_s0 + $0x68] sm:$0xf0]  ;;  %v1864_v9 = vld [vmem:[%s2202_s17 + $0xe0] sm:$0xf]  ;;  %v1960_v12 = vld [vmem:[%s2202_s17 + $0xa4] sm:$0xf]  ;;  %v2339_v14 = vor.u32 %v1917_v4, %v1656_v62 }
  0x59   : > { %1981 = vmatpush.bf16.msra.mxu1 %v1777_v24  ;;  %1036 = vmatpush.bf16.msrb.mxu3 %v1797_v29  ;;  %v1834_v13 = vld [vmem:[%s2202_s17 + $0xa8] sm:$0xf0]  ;;  %v2341_v15 = vor.u32 %v1929_v6, %v1704_v5  ;;  %v480_v16 = vld [vmem:[%s2967_s2 + $0x70] sm:$0xff]  ;;  %v1762_v18 = vld [vmem:[%s2202_s17 + $0x18] sm:$0xf0]  ;;  %v1865_v21 = vor.u32 %v1969_v10, %v1864_v9 }
  0x5a   : > { %534 = vperm.xlu1 %2015, %v476_v26   ;;  %529 = vperm.xlu0 %2014, %v475_v30   ;;  %v1942_v17 = vld [vmem:[%s2202_s17 + $0x14] sm:$0xf]  ;;  %v1837_v19 = vor.u32 %v1960_v12, %v1834_v13  ;;  %v1213_v20 = vld [vmem:[%s2968_s3] sm:$0xff]  ;;  %v481_v22 = vld [vmem:[%s2967_s2 + $0x78] sm:$0xff] }
  0x5b   : > { %v1856_v23 = vld [vmem:[%s2202_s17 + $0xd0] sm:$0xf]  ;;  %v1967_v24 = vld [vmem:[%s2202_s17 + $0xd4] sm:$0xf0]  ;;  %v1924_v26 = vld [vmem:[%s2965_s0 + $0x40] sm:$0xf0]  ;;  %v1765_v27 = vor.u32 %v1942_v17, %v1762_v18 }
  0x5c   : > { %1086 = vmatpush.bf16.msrb.mxu2 %v1853_v43  ;;  %892 = vmatpush.bf16.msra.mxu0 %v1769_v36  ;;  %v1688_v25 = vld [vmem:[%s2965_s0 + $0x38] sm:$0xf]  ;;  %v1972_v28 = vld [vmem:[%s2202_s17 + $0x104] sm:$0xf]  ;;  %v1748_v29 = vld [vmem:[%s2965_s0 + $0xb0] sm:$0xf]  ;;  %v1857_v32 = vor.u32 %v1967_v24, %v1856_v23 }
  0x5d   : > { %1982 = vmatpush.bf16.msra.mxu1 %v1769_v36  ;;  %1037 = vmatpush.bf16.msrb.mxu3 %v1789_v42  ;;  %v1939_v30 = vld [vmem:[%s2965_s0 + $0xb8] sm:$0xf0]  ;;  %v1882_v31 = vld [vmem:[%s2202_s17 + $0x108] sm:$0xf0]  ;;  %v1940_v33 = vld [vmem:[%s2202_s17 + $0x4] sm:$0xf]  ;;  %v2378_v40 = vor.u32 %v1924_v26, %v1688_v25 }
  0x5e   : > { %539 = vperm.xlu2 %2016, %v477_v48   ;;  %v1754_v34 = vld [vmem:[%s2202_s17 + $0x8] sm:$0xf0]  ;;  %v1848_v35 = vld [vmem:[%s2202_s17 + $0xc0] sm:$0xf]  ;;  %v1885_v36 = vor.u32 %v1972_v28, %v1882_v31  ;;  %v1965_v37 = vld [vmem:[%s2202_s17 + $0xc4] sm:$0xf0]  ;;  %v2380_v41 = vor.u32 %v1939_v30, %v1748_v29 }
  0x5f   : > { %1895 = vmatmul.msk.bf16.gmra.mxu2 %vm862_vm0, %v2296_v46  ;;  %1900 = vmatmul.msk.bf16.gmra.mxu3 %vm862_vm0, %v2298_v47  ;;  %v1958_v38 = vld [vmem:[%s2202_s17 + $0x94] sm:$0xf]  ;;  %v1826_v39 = vld [vmem:[%s2202_s17 + $0x98] sm:$0xf0]  ;;  %v1214_v42 = vld [vmem:[%s2968_s3 + $0x8] sm:$0xff]  ;;  %v1757_v44 = vor.u32 %v1940_v33, %v1754_v34  ;;  %v1849_v45 = vor.u32 %v1965_v37, %v1848_v35 }
  0x60   : > { %893 = vmatpush.bf16.msra.mxu0 %v1761_v49  ;;  %1087 = vmatpush.bf16.msrb.mxu2 %v1845_v61  ;;  %v1829_v43 = vor.u32 %v1958_v38, %v1826_v39  ;;  %v1840_v48 = vld [vmem:[%s2202_s17 + $0xb0] sm:$0xf]  ;;  %v1216_v50 = vld [vmem:[%s2968_s3 + $0x18] sm:$0xff]  ;;  %v1832_v57 = vld [vmem:[%s2202_s17 + $0xa0] sm:$0xf] }
  0x61   : > { %1983 = vmatpush.bf16.msra.mxu1 %v1761_v49  ;;  %1038 = vmatpush.bf16.msrb.mxu3 %v1781_v55  ;;  %v1963_v49 = vld [vmem:[%s2202_s17 + $0xb4] sm:$0xf0]  ;;  %v1215_v51 = vld [vmem:[%s2968_s3 + $0x10] sm:$0xff]  ;;  %v1932_v55 = vld [vmem:[%s2965_s0 + $0x80] sm:$0xf0] }
  0x62   : > { %549 = vperm.xlu1 %2015, %v479_v52   ;;  %544 = vperm.xlu0 %2014, %v478_v53   ;;  %v1668_v52 = vld [vmem:[%s2965_s0 + $0x18] sm:$0xf]  ;;  %v1920_v53 = vld [vmem:[%s2965_s0 + $0x20] sm:$0xf0]  ;;  %v1841_v56 = vor.u32 %v1963_v49, %v1840_v48  ;;  %v1961_v58 = vld [vmem:[%s2202_s17 + $0xa4] sm:$0xf0] }
  0x63   : > { %v1716_v54 = vld [vmem:[%s2965_s0 + $0x78] sm:$0xf]  ;;  %v1669_v59 = vor.u32 %v1920_v53, %v1668_v52  ;;  %v1217_v61 = vld [vmem:[%s2968_s3 + $0x20] sm:$0xff]  ;;  %v1833_v62 = vor.u32 %v1961_v58, %v1832_v57  ;;  %v1219_v63 = vld [vmem:[%s2968_s3 + $0x30] sm:$0xff] }
  0x64   : > { %894 = vmatpush.bf16.msra.mxu0 %v1753_v3  ;;  %1088 = vmatpush.bf16.msrb.mxu2 %v1837_v19  ;;  %v2411_v60 = vor.u32 %v1932_v55, %v1716_v54  ;;  %v1218_v0 = vld [vmem:[%s2968_s3 + $0x28] sm:$0xff]  ;;  %v1959_v4 = vld [vmem:[%s2202_s17 + $0x94] sm:$0xf0]  ;;  %v1956_v5 = vld [vmem:[%s2202_s17 + $0x84] sm:$0xf] }
  0x65   : > { %1984 = vmatpush.bf16.msra.mxu1 %v1753_v3  ;;  %1039 = vmatpush.bf16.msrb.mxu3 %v1773_v11  ;;  %v1824_v3 = vld [vmem:[%s2202_s17 + $0x90] sm:$0xf]  ;;  %v1816_v11 = vld [vmem:[%s2202_s17 + $0x80] sm:$0xf]  ;;  %v1957_v12 = vld [vmem:[%s2202_s17 + $0x84] sm:$0xf0] }
  0x66   : > { %554 = vperm.xlu2 %2016, %v480_v16   ;;  %v1700_v6 = vld [vmem:[%s2965_s0 + $0x50] sm:$0xf]  ;;  %v1825_v9 = vor.u32 %v1959_v4, %v1824_v3  ;;  %v1220_v16 = vld [vmem:[%s2968_s3 + $0x38] sm:$0xff]  ;;  %v1817_v17 = vor.u32 %v1957_v12, %v1816_v11  ;;  %v1222_v18 = vld [vmem:[%s2968_s3 + $0x48] sm:$0xff] }
  0x67   : > { %895 = vmatmul.bf16.vlgmr.msra.gmra.mxu0 %v2339_v14  ;;  %v1221_v19 = vld [vmem:[%s2968_s3 + $0x40] sm:$0xff]  ;;  %v1223_v25 = vld [vmem:[%s2968_s3 + $0x50] sm:$0xff]  ;;  %v1712_v28 = vld [vmem:[%s2965_s0 + $0x68] sm:$0xf] }
  0x68   : > { %1138 = vmatpush.bf16.msrb.mxu0 %v1893_v8  ;;  %915 = vmatmul.bf16.vlgmr.msra.gmra.mxu1 %v2341_v15  ;;  %v1818_v8 = vld [vmem:[%s2202_s17 + $0x88] sm:$0xf0]  ;;  %v1225_v26 = vld [vmem:[%s2968_s3 + $0x60] sm:$0xff]  ;;  %v1930_v29 = vld [vmem:[%s2965_s0 + $0x70] sm:$0xf0] }
  0x69   : > { %936 = vmatpush.bf16.msrb.mxu1 %v1873_v7  ;;  %1040 = vmatpush.bf16.msrb.mxu3 %v1765_v27  ;;  %v1927_v7 = vld [vmem:[%s2965_s0 + $0x58] sm:$0xf0]  ;;  %v1821_v10 = vor.u32 %v1956_v5, %v1818_v8  ;;  %v2479_v30 = vor.u32 %v1930_v29, %v1712_v28  ;;  %v1226_v31 = vld [vmem:[%s2968_s3 + $0x68] sm:$0xff]  ;;  %v1227_v33 = vld [vmem:[%s2968_s3 + $0x70] sm:$0xff] }
  0x6a   : > { %1231 = vperm.xlu1 %2015, %v1213_v20   ;;  %559 = vperm.xlu0 %2014, %v481_v22   ;;  %v2435_v13 = vor.u32 %v1927_v7, %v1700_v6  ;;  %v1680_v20 = vld [vmem:[%s2965_s0 + $0x30] sm:$0xf]  ;;  %v1935_v22 = vld [vmem:[%s2965_s0 + $0x98] sm:$0xf0]  ;;  %v1692_v34 = vld [vmem:[%s2965_s0 + $0x48] sm:$0xf] }
  0x6b   : > { %1089 = vmatpush.bf16.msrb.mxu2 %v1829_v43  ;;  %v1224_v27 = vld [vmem:[%s2968_s3 + $0x58] sm:$0xff]  ;;  %v1926_v35 = vld [vmem:[%s2965_s0 + $0x50] sm:$0xf0]  ;;  %v1658_v48 = vld [vmem:[%s2965_s0 + $0xc] sm:$0xf0] }
  0x6c   : > { %1139 = vmatpush.bf16.msrb.mxu0 %v1885_v36  ;;  %v1740_v36 = vld [vmem:[%s2965_s0 + $0xa8] sm:$0xf]  ;;  %v1938_v37 = vld [vmem:[%s2965_s0 + $0xb0] sm:$0xf0]  ;;  %v1693_v38 = vor.u32 %v1926_v35, %v1692_v34  ;;  %v1345_v52 = vld [vmem:[%s2969_s4 + $0x20] sm:$0xff] }
  0x6d   : > { %937 = vmatpush.bf16.msrb.mxu1 %v1865_v21  ;;  %1041 = vmatpush.bf16.msrb.mxu3 %v1757_v44  ;;  %v1923_v21 = vld [vmem:[%s2965_s0 + $0x38] sm:$0xf0]  ;;  %v2504_v39 = vor.u32 %v1938_v37, %v1740_v36  ;;  %v1343_v43 = vld [vmem:[%s2969_s4 + $0x10] sm:$0xff]  ;;  %v1342_v44 = vld [vmem:[%s2969_s4 + $0x8] sm:$0xff] }
  0x6e   : > { %1236 = vperm.xlu2 %2016, %v1214_v42   ;;  %v1681_v23 = vor.u32 %v1923_v21, %v1680_v20  ;;  %v1341_v42 = vld [vmem:[%s2969_s4] sm:$0xff]  ;;  %v1347_v53 = vld [vmem:[%s2969_s4 + $0x30] sm:$0xff]  ;;  %v1348_v55 = vld [vmem:[%s2969_s4 + $0x38] sm:$0xff] }
  0x6f   : > { %1896 = vmatmul.msk.bf16.gmra.mxu2 %vm862_vm0, %v2378_v40  ;;  %1901 = vmatmul.msk.bf16.gmra.mxu3 %vm862_vm0, %v2380_v41  ;;  %v1349_v54 = vld [vmem:[%s2969_s4 + $0x40] sm:$0xff]  ;;  %v1670_v57 = vld [vmem:[%s2965_s0 + $0x24] sm:$0xf0]  ;;  %v1922_v3 = vld [vmem:[%s2965_s0 + $0x34] sm:$0xf] }
  0x70   : > { %1090 = vmatpush.bf16.msrb.mxu2 %v1821_v10  ;;  %v1682_v4 = vld [vmem:[%s2965_s0 + $0x3c] sm:$0xf0]  ;;  %v1925_v8 = vld [vmem:[%s2965_s0 + $0x4c] sm:$0xf] }
  0x71   : > { %938 = vmatpush.bf16.msrb.mxu1 %v1857_v32  ;;  %v1228_v32 = vld [vmem:[%s2968_s3 + $0x78] sm:$0xff]  ;;  %v1685_v5 = vor.u32 %v1922_v3, %v1682_v4 }
  0x72   : > { %1246 = vperm.xlu1 %2015, %v1216_v50   ;;  %1241 = vperm.xlu0 %2014, %v1215_v51   ;;  %v1344_v50 = vld [vmem:[%s2969_s4 + $0x18] sm:$0xff]  ;;  %v1346_v51 = vld [vmem:[%s2969_s4 + $0x28] sm:$0xff] }
  0x73   : > { %v1742_v3 = vld [vmem:[%s2965_s0 + $0xb4] sm:$0xf0] }
  0x75   : > { %939 = vmatpush.bf16.msrb.mxu1 %v1849_v45  ;;  %v1916_v45 = vld [vmem:[%s2965_s0 + $0x4] sm:$0xf] }
  0x76   : > { %1251 = vperm.xlu2 %2016, %v1217_v61   ;;  %v1661_v49 = vor.u32 %v1916_v45, %v1658_v48  ;;  %v1351_v61 = vld [vmem:[%s2969_s4 + $0x50] sm:$0xff] }
  0x77   : > { %900 = vmatmul.bf16.gmra.mxu0 %v1669_v59 }
  0x78   : > { %920 = vmatmul.bf16.gmra.mxu1 %v2411_v60 }
  0x79   : > { %940 = vmatpush.bf16.msrb.mxu1 %v1841_v56  ;;  %v1919_v56 = vld [vmem:[%s2965_s0 + $0x1c] sm:$0xf] }
  0x7a   : > { %1261 = vperm.xlu1 %2015, %v1219_v63   ;;  %1256 = vperm.xlu0 %2014, %v1218_v0   ;;  %v1673_v58 = vor.u32 %v1919_v56, %v1670_v57  ;;  %v1355_v63 = vld [vmem:[%s2969_s4 + $0x70] sm:$0xff]  ;;  %v1354_v0 = vld [vmem:[%s2969_s4 + $0x68] sm:$0xff] }
  0x7d   : > { %941 = vmatpush.bf16.msrb.mxu1 %v1833_v62  ;;  %v1353_v62 = vld [vmem:[%s2969_s4 + $0x60] sm:$0xff] }
  0x7e   : > { %1266 = vperm.xlu2 %2016, %v1220_v16  }
  0x7f   : > { %1897 = vmatmul.msk.bf16.gmra.mxu2 %vm862_vm0, %v2435_v13  ;;  %1042 = vmatmul.bf16.vlgmr.msrb.gmra.mxu3 %v2339_v14  ;;  %v1728_v14 = vld [vmem:[%s2965_s0 + $0x90] sm:$0xf] }
  0x80   : > { %v2461_v24 = vor.u32 %v1935_v22, %v1728_v14 }
  0x81   : > { %942 = vmatpush.bf16.msrb.mxu1 %v1825_v9  ;;  %v1694_v9 = vld [vmem:[%s2965_s0 + $0x54] sm:$0xf0] }
  0x82   : > { %1276 = vperm.xlu1 %2015, %v1222_v18   ;;  %1271 = vperm.xlu0 %2014, %v1221_v19   ;;  %v1928_v19 = vld [vmem:[%s2965_s0 + $0x64] sm:$0xf] }
  0x85   : > { %943 = vmatpush.bf16.msrb.mxu1 %v1817_v17 }
  0x86   : > { %1281 = vperm.xlu2 %2016, %v1223_v25  }
  0x87   : > { %905 = vmatmul.bf16.gmra.mxu0 %v1681_v23 }
  0x88   : > { %925 = vmatmul.bf16.gmra.mxu1 %v2461_v24 }
  0x8a   : > { %1291 = vperm.xlu1 %2015, %v1225_v26   ;;  %1286 = vperm.xlu0 %2014, %v1224_v27  }
  0x8e   : > { %1296 = vperm.xlu2 %2016, %v1226_v31   ;;  %v1718_v31 = vld [vmem:[%s2965_s0 + $0x84] sm:$0xf0] }
  0x8f   : > { %1898 = vmatmul.msk.bf16.gmra.mxu2 %vm862_vm0, %v2479_v30  ;;  %1047 = vmatmul.bf16.gmra.mxu3 %v1669_v59  ;;  %v1352_v59 = vld [vmem:[%s2969_s4 + $0x58] sm:$0xff] }
  0x92   : > { %1306 = vperm.xlu1 %2015, %v1228_v32   ;;  %1301 = vperm.xlu0 %2014, %v1227_v33  }
  0x96   : > { %1359 = vperm.xlu2 %2016, %v1341_v42  }
  0x97   : > { %910 = vmatmul.bf16.gmra.mxu0 %v1693_v38 }
  0x98   : > { %930 = vmatmul.bf16.gmra.mxu1 %v2504_v39 }
  0x9a   : > { %1369 = vperm.xlu1 %2015, %v1343_v43   ;;  %1364 = vperm.xlu0 %2014, %v1342_v44  }
  0x9e   : > { %1374 = vperm.xlu2 %2016, %v1344_v50   ;;  %v2580_v7 = vpop.permute.xlu2 %504 }
  0x9f   : > { %1052 = vmatmul.bf16.gmra.mxu3 %v1681_v23  ;;  %1091 = vmatmul.bf16.vlgmr.msrb.gmra.mxu2 %v1661_v49 }
  0xa2   : > { %1384 = vperm.xlu1 %2015, %v1346_v51   ;;  %1379 = vperm.xlu0 %2014, %v1345_v52   ;;  %v1730_v51 = vld [vmem:[%s2965_s0 + $0x9c] sm:$0xf0] }
  0xa6   : > { %1389 = vperm.xlu2 %2016, %v1347_v53  }
  0xa7   : > { %1902 = vmatmul.msk.bf16.vlgmr.msrb.gmra.mxu0 %vm862_vm0, %v2236_v1  ;;  %v1350_v1 = vld [vmem:[%s2969_s4 + $0x48] sm:$0xff]  ;;  %v2594_v12 = vpop.permute.xlu2 %509 }
  0xa8   : > { %944 = vmatmul.bf16.vlgmr.msrb.gmra.mxu1 %v1661_v49 }
  0xaa   : > { %1399 = vperm.xlu1 %2015, %v1349_v54   ;;  %1394 = vperm.xlu0 %2014, %v1348_v55  }
  0xae   : > { %1404 = vperm.xlu2 %2016, %v1350_v1  }
  0xaf   : > { %1057 = vmatmul.bf16.gmra.mxu3 %v1693_v38  ;;  %1096 = vmatmul.bf16.gmra.mxu2 %v1673_v58 }
  0xb0   : > { %v2613_v20 = vpop.permute.xlu2 %524 }
  0xb2   : > { %1414 = vperm.xlu1 %2015, %v1352_v59   ;;  %1409 = vperm.xlu0 %2014, %v1351_v61  }
  0xb4   : > { %v2578_v6 = vpop.permute.xlu0 %484  ;;  %v2590_v10 = vpop.permute.xlu1 %494 }
  0xb6   : > { %1419 = vperm.xlu2 %2016, %v1353_v62  }
  0xb7   : > { %1903 = vmatmul.msk.bf16.gmra.mxu0 %vm862_vm0, %v2296_v46  ;;  %v1356_v46 = vld [vmem:[%s2969_s4 + $0x78] sm:$0xff] }
  0xb8   : > { %949 = vmatmul.bf16.gmra.mxu1 %v1673_v58  ;;  %v2628_v27 = vpop.permute.xlu2 %539 }
  0xba   : > { %1429 = vperm.xlu1 %2015, %v1355_v63   ;;  %1424 = vperm.xlu0 %2014, %v1354_v0   ;;  %v1937_v0 = vld [vmem:[%s2965_s0 + $0xac] sm:$0xf] }
  0xbc   : > { %v2592_v11 = vpop.permute.xlu0 %489  ;;  %v2601_v17 = vpop.permute.xlu1 %499 }
  0xbe   : > { %1434 = vperm.xlu2 %2016, %v1356_v46  }
  0xbf   : > { %1062 = vmatmul.bf16.gmra.mxu3 %v2341_v15  ;;  %1101 = vmatmul.bf16.gmra.mxu2 %v1685_v5  ;;  %v1697_v15 = vor.u32 %v1925_v8, %v1694_v9  ;;  %v1745_v9 = vor.u32 %v1937_v0, %v1742_v3 }
  0xc0   : > { %v2654_v38 = vpop.permute.xlu2 %554 }
  0xc1   : > { %2983 = vst [vmem:[#allocation8_spill] sm:$0xff] %v2654_v38 }
  0xc4   : > { %v2603_v18 = vpop.permute.xlu0 %514  ;;  %v2619_v23 = vpop.permute.xlu1 %519 }
  0xc7   : > { %1904 = vmatmul.msk.bf16.gmra.mxu0 %vm862_vm0, %v2378_v40 }
  0xc8   : > { %954 = vmatmul.bf16.gmra.mxu1 %v1685_v5  ;;  %v2669_v50 = vpop.permute.xlu2 %1236 }
  0xcc   : > { %v2642_v32 = vpop.permute.xlu1 %534 }
  0xcf   : > { %1067 = vmatmul.bf16.gmra.mxu3 %v2411_v60  ;;  %1106 = vmatmul.bf16.gmra.mxu2 %v1697_v15  ;;  %v1706_v60 = vld [vmem:[%s2965_s0 + $0x6c] sm:$0xf0] }
  0xd0   : > { %v1709_v22 = vor.u32 %v1928_v19, %v1706_v60 }
  0xd2   : > { %v2597_v16 = vpop.f32.mrf.mxu2  ;;  %v2599_v40 = vpop.f32.mrf.mxu3 }
  0xd4   : > { %v2661_v44 = vpop.permute.xlu1 %549 }
  0xd5   : > { %2985 = vst [vmem:[#allocation10_spill] sm:$0xff] %v2661_v44 }
  0xd7   : > { %1905 = vmatmul.msk.bf16.gmra.mxu0 %vm862_vm0, %v2435_v13  ;;  %v2622_v13 = vpop.permute.xlu0 %529 }
  0xd8   : > { %959 = vmatmul.bf16.gmra.mxu1 %v1697_v15 }
  0xda   : > { %v2615_v21 = vpop.f32.mrf.mxu2  ;;  %v2617_v14 = vpop.f32.mrf.mxu3 }
  0xdb   : > { %2979 = vst [vmem:[#allocation4_spill] sm:$0xff] %v2617_v14 }
  0xdc   : > { %v1232_v57 = vpop.permute.xlu1 %1231 }
  0xdf   : > { %1072 = vmatmul.bf16.gmra.mxu3 %v2461_v24  ;;  %1111 = vmatmul.bf16.gmra.mxu2 %v1709_v22  ;;  %v1931_v24 = vld [vmem:[%s2965_s0 + $0x7c] sm:$0xf]  ;;  %v2648_v35 = vpop.permute.xlu0 %544 }
  0xe0   : > { %2982 = vst [vmem:[#allocation7_spill] sm:$0xff] %v2648_v35  ;;  %v1721_v36 = vor.u32 %v1931_v24, %v1718_v31 }
  0xe2   : > { %v2624_v25 = vpop.f32.mrf.mxu2  ;;  %v2626_v26 = vpop.f32.mrf.mxu3 }
  0xe3   : > { %2980 = vst [vmem:[#allocation5_spill] sm:$0xff] %v2626_v26 }
  0xe4   : > { %v2630_v28 = vpop.f32.mrf.mxu0  ;;  %v2697_v63 = vpop.permute.xlu1 %1246 }
  0xe5   : > { %v2632_v29 = vpop.f32.mrf.mxu1 }
  0xe7   : > { %1906 = vmatmul.msk.bf16.gmra.mxu0 %vm862_vm0, %v2479_v30  ;;  %v2667_v49 = vpop.permute.xlu0 %559 }
  0xe8   : > { %964 = vmatmul.bf16.gmra.mxu1 %v1709_v22  ;;  %2986 = vst [vmem:[#allocation11_spill] sm:$0xff] %v2667_v49 }
  0xea   : > { %v2644_v33 = vpop.f32.mrf.mxu2  ;;  %v2646_v34 = vpop.f32.mrf.mxu3 }
  0xeb   : > { %2981 = vst [vmem:[#allocation6_spill] sm:$0xff] %v2646_v34 }
  0xec   : > { %v2650_v37 = vpop.f32.mrf.mxu0 }
  0xed   : > { %v2652_v30 = vpop.f32.mrf.mxu1 }
  0xef   : > { %1077 = vmatmul.bf16.gmra.mxu3 %v2504_v39  ;;  %1116 = vmatmul.bf16.gmra.mxu2 %v1721_v36  ;;  %v1934_v39 = vld [vmem:[%s2965_s0 + $0x94] sm:$0xf]  ;;  %v2687_v58 = vpop.permute.xlu0 %1241 }
  0xf0   : > { %v1733_v54 = vor.u32 %v1934_v39, %v1730_v51 }
  0xf2   : > { %v2657_v42 = vpop.f32.mrf.mxu2  ;;  %v2659_v43 = vpop.f32.mrf.mxu3 }
  0xf3   : > { %2984 = vst [vmem:[#allocation9_spill] sm:$0xff] %v2659_v43 }
  0xf4   : > { %v2663_v45 = vpop.f32.mrf.mxu0 }
  0xf5   : > { %v2665_v48 = vpop.f32.mrf.mxu1 }
  0xf7   : > { %1907 = vmatmul.msk.bf16.gmra.mxu0 %vm862_vm0, %v2238_v2  ;;  %v2689_v2 = vpop.permute.xlu2 %1251  ;;  %v2707_v4 = vpop.permute.xlu0 %1256 }
  0xf8   : > { %969 = vmatmul.bf16.gmra.mxu1 %v1721_v36 }
  0xfa   : > { %v2679_v52 = vpop.f32.mrf.mxu2  ;;  %v2681_v53 = vpop.f32.mrf.mxu3 }
  0xfb   : > { %2987 = vst [vmem:[#allocation12_spill] sm:$0xff] %v2681_v53 }
  0xfc   : > { %v2683_v55 = vpop.f32.mrf.mxu0 }
  0xfd   : > { %v2685_v56 = vpop.f32.mrf.mxu1 }
  0xfe   : > { %2988 = vst [vmem:[#allocation13_spill] sm:$0xff] %v2685_v56 }
  0xff   : > { %1121 = vmatmul.bf16.gmra.mxu2 %v1733_v54  ;;  %v2711_v8 = vpop.permute.xlu2 %1266  ;;  %v2721_v22 = vpop.permute.xlu0 %1271 }
 0x102   : > { %v2691_v1 = vpop.f32.mrf.mxu2  ;;  %v1043_v59 = vpop.f32.mrf.mxu3 }
 0x103   : > { %v1044_v43 = vadd.f32 %v1043_v59, %v2578_v6 }
 0x104   : > { %v2693_v61 = vpop.f32.mrf.mxu0 }
 0x105   : > { %v2695_v62 = vpop.f32.mrf.mxu1 }
 0x106   : > { %2989 = vst [vmem:[#allocation14_spill] sm:$0xff] %v2695_v62 }
 0x107   : > { %1908 = vmatmul.msk.bf16.gmra.mxu0 %vm862_vm0, %v2298_v47  ;;  %v2717_v47 = vpop.permute.xlu1 %1261  ;;  %v2727_v39 = vpop.permute.xlu2 %1281 }
 0x108   : > { %974 = vmatmul.bf16.gmra.mxu1 %v1733_v54  ;;  %v2739_v49 = vpop.permute.xlu0 %1286 }
 0x109   : > { %2993 = vst [vmem:[#allocation18_spill] sm:$0xff] %v2739_v49 }
 0x10a   : > { %v2709_v5 = vpop.f32.mrf.mxu2  ;;  %v1045_v46 = vpop.f32.mrf.mxu3 }
 0x10c   : > { %v2713_v15 = vpop.f32.mrf.mxu0 }
 0x10d   : > { %v2715_v19 = vpop.f32.mrf.mxu1 }
 0x10e   : > { %2990 = vst [vmem:[#allocation15_spill] sm:$0xff] %v2715_v19 }
 0x10f   : > { %1126 = vmatmul.bf16.gmra.mxu2 %v1745_v9  ;;  %v2733_v54 = vpop.permute.xlu1 %1276 }
 0x110   : > { %v2753_v49 = vpop.permute.xlu0 %1301 }
 0x112   : > { %v2719_v60 = vpop.f32.mrf.mxu2  ;;  %v1048_v24 = vpop.f32.mrf.mxu3 }
 0x114   : > { %v2723_v31 = vpop.f32.mrf.mxu0 }
 0x115   : > { %v2725_v36 = vpop.f32.mrf.mxu1 }
 0x116   : > { %2991 = vst [vmem:[#allocation16_spill] sm:$0xff] %v2725_v36  ;;  %v2742_v36 = vpop.permute.xlu2 %1296 }
 0x117   : > { %1909 = vmatmul.msk.bf16.gmra.mxu0 %vm862_vm0, %v2380_v41  ;;  %2994 = vst [vmem:[#allocation19_spill] sm:$0xff] %v2742_v36  ;;  %v897_v41 = vadd.f32 %v2630_v28, %v2578_v6  ;;  %v2746_v62 = vpop.permute.xlu1 %1291  ;;  %v1046_v36 = vadd.f32 %v1045_v46, %v2592_v11 }
 0x118   : > { %979 = vmatmul.bf16.gmra.mxu1 %v1745_v9  ;;  %2995 = vst [vmem:[#allocation20_spill] sm:$0xff] %v2746_v62 }
 0x11a   : > { %v2731_v51 = vpop.f32.mrf.mxu2  ;;  %v1050_v53 = vpop.f32.mrf.mxu3 }
 0x11c   : > { %v2735_v0 = vpop.f32.mrf.mxu0 }
 0x11d   : > { %v2737_v3 = vpop.f32.mrf.mxu1 }
 0x11e   : > { %2992 = vst [vmem:[#allocation17_spill] sm:$0xff] %v2737_v3  ;;  %v1360_v28 = vpop.permute.xlu2 %1359 }
 0x122   : > { %v1092_v9 = vpop.f32.mrf.mxu2  ;;  %v2748_v35 = vpop.f32.mrf.mxu3 }
 0x123   : > { %v1093_v38 = vadd.f32 %v1092_v9, %v1044_v43 }
 0x124   : > { %v1141_v19 = vpop.f32.mrf.mxu0 }
 0x125   : > { %v945_v34 = vpop.f32.mrf.mxu1  ;;  %v1142_v26 = vadd.f32 %v1141_v19, %v1093_v38 }
 0x126   : > { %v946_v44 = vadd.f32 %v945_v34, %v897_v41  ;;  %v899_v34 = vadd.f32 %v2650_v37, %v2592_v11  ;;  %v1049_v11 = vadd.f32 %v1048_v24, %v2590_v10 }
 0x127   : > { %v1182_v59 = vmax.f32 %v1142_v26, 0.0 }
 0x128   : > { %v995_v3 = vadd.f32 %v2597_v16, %v946_v44 }
 0x129   : > { %v1310_v6 = vmul.f32 %v1232_v57, %v1182_v59 }
 0x12a   : > { %v1181_v14 = vmax.f32 %v995_v3, 0.0  ;;  %v1094_v43 = vpop.f32.mrf.mxu2  ;;  %v2763_v3 = vpop.permute.xlu1 %1306 }
 0x12b   : > { %v1438_v19 = vadd.f32 %v1360_v28, %v1310_v6  ;;  %v1095_v9 = vadd.f32 %v1094_v43, %v1046_v36  ;;  %v1365_v36 = vpop.permute.xlu0 %1364  ;;  %v902_v6 = vadd.f32 %v2663_v45, %v2590_v10 }
 0x12c   : > { %v1309_v38 = vmul.f32 %v1232_v57, %v1181_v14  ;;  %v1143_v62 = vpop.f32.mrf.mxu0  ;;  %v1055_v14 = vpop.f32.mrf.mxu3 }
 0x12d   : > { %v947_v41 = vpop.f32.mrf.mxu1  ;;  %1470 = vst [vmem:[%s2758_s18 + $0x8] sm:$0xff] %v1438_v19  ;;  %v1144_v26 = vadd.f32 %v1143_v62, %v1095_v9 }
 0x12e   : > { %v1437_v56 = vadd.f32 %v1360_v28, %v1309_v38  ;;  %v948_v16 = vadd.f32 %v947_v41, %v899_v34  ;;  %v1051_v41 = vadd.f32 %v1050_v53, %v2601_v17 }
 0x12f   : > { %v1184_v46 = vmax.f32 %v1144_v26, 0.0  ;;  %v904_v26 = vadd.f32 %v2683_v55, %v2601_v17 }
 0x130   : > { %1469 = vst [vmem:[%s2758_s18] sm:$0xff] %v1437_v56  ;;  %v997_v44 = vadd.f32 %v2615_v21, %v948_v16 }
 0x131   : > { %v1312_v57 = vmul.f32 %v2669_v50, %v1184_v46 }
 0x132   : > { %v1183_v37 = vmax.f32 %v997_v44, 0.0  ;;  %v1097_v59 = vpop.f32.mrf.mxu2  ;;  %v1370_v45 = vpop.permute.xlu1 %1369 }
 0x133   : > { %v1440_v62 = vadd.f32 %v1365_v36, %v1312_v57  ;;  %v1098_v21 = vadd.f32 %v1097_v59, %v1049_v11 }
 0x134   : > { %v1311_v56 = vmul.f32 %v2669_v50, %v1183_v37  ;;  %v1146_v43 = vpop.f32.mrf.mxu0  ;;  %v1058_v44 = vpop.f32.mrf.mxu3 }
 0x135   : > { %v950_v28 = vpop.f32.mrf.mxu1  ;;  %1472 = vst [vmem:[%s2758_s18 + $0x18] sm:$0xff] %v1440_v62  ;;  %v1147_v24 = vadd.f32 %v1146_v43, %v1098_v21  ;;  %v1054_v62 = vadd.f32 %v2748_v35, %v2580_v7 }
 0x136   : > { %v1439_v34 = vadd.f32 %v1365_v36, %v1311_v56  ;;  %v951_v38 = vadd.f32 %v950_v28, %v902_v6  ;;  %v907_v28 = vadd.f32 %v2693_v61, %v2580_v7 }
 0x137   : > { %v1186_v9 = vmax.f32 %v1147_v24, 0.0 }
 0x138   : > { %1471 = vst [vmem:[%s2758_s18 + $0x10] sm:$0xff] %v1439_v34  ;;  %v1000_v19 = vadd.f32 %v2624_v25, %v951_v38 }
 0x139   : > { %v1314_v10 = vmul.f32 %v2687_v58, %v1186_v9 }
 0x13a   : > { %v1185_v16 = vmax.f32 %v1000_v19, 0.0  ;;  %v1099_v50 = vpop.f32.mrf.mxu2 }
 0x13b   : > { %v1442_v11 = vadd.f32 %v1370_v45, %v1314_v10  ;;  %v1100_v37 = vadd.f32 %v1099_v50, %v1051_v41 }
 0x13c   : > { %v1313_v46 = vmul.f32 %v2687_v58, %v1185_v16  ;;  %v1148_v36 = vpop.f32.mrf.mxu0  ;;  %v1375_v58 = vpop.permute.xlu2 %1374 }
 0x13d   : > { %v952_v57 = vpop.f32.mrf.mxu1  ;;  %1474 = vst [vmem:[%s2758_s18 + $0x28] sm:$0xff] %v1442_v11  ;;  %v1149_v53 = vadd.f32 %v1148_v36, %v1100_v37 }
 0x13e   : > { %v1441_v25 = vadd.f32 %v1370_v45, %v1313_v46  ;;  %v953_v59 = vadd.f32 %v952_v57, %v904_v26  ;;  %v1056_v45 = vadd.f32 %v1055_v14, %v2594_v12  ;;  %v909_v26 = vadd.f32 %v2713_v15, %v2594_v12  ;;  %v1385_v15 = vpop.permute.xlu1 %1384 }
 0x13f   : > { %v1188_v56 = vmax.f32 %v1149_v53, 0.0 }
 0x140   : > { %1473 = vst [vmem:[%s2758_s18 + $0x20] sm:$0xff] %v1441_v25  ;;  %v1002_v6 = vadd.f32 %v2644_v33, %v953_v59  ;;  %v1060_v33 = vpop.f32.mrf.mxu3 }
 0x141   : > { %v1316_v55 = vmul.f32 %v2697_v63, %v1188_v56  ;;  %v1059_v56 = vadd.f32 %v1058_v44, %v2603_v18 }
 0x142   : > { %v1187_v17 = vmax.f32 %v1002_v6, 0.0  ;;  %v1102_v21 = vpop.f32.mrf.mxu2 }
 0x143   : > { %v1444_v34 = vadd.f32 %v1375_v58, %v1316_v55  ;;  %v1103_v38 = vadd.f32 %v1102_v21, %v1054_v62 }
 0x144   : > { %v1315_v43 = vmul.f32 %v2697_v63, %v1187_v17  ;;  %v1151_v19 = vpop.f32.mrf.mxu0  ;;  %v1380_v63 = vpop.permute.xlu0 %1379  ;;  %v912_v17 = vadd.f32 %v2723_v31, %v2603_v18 }
 0x145   : > { %v955_v24 = vpop.f32.mrf.mxu1  ;;  %1476 = vst [vmem:[%s2758_s18 + $0x38] sm:$0xff] %v1444_v34  ;;  %v1152_v35 = vadd.f32 %v1151_v19, %v1103_v38  ;;  %v1061_v19 = vadd.f32 %v1060_v33, %v2619_v23  ;;  %v1390_v31 = vpop.permute.xlu2 %1389 }
 0x146   : > { %v1443_v9 = vadd.f32 %v1375_v58, %v1315_v43  ;;  %v956_v41 = vadd.f32 %v955_v24, %v907_v28 }
 0x147   : > { %v1190_v10 = vmax.f32 %v1152_v35, 0.0  ;;  %v914_v35 = vadd.f32 %v2735_v0, %v2619_v23 }
 0x148   : > { %1475 = vst [vmem:[%s2758_s18 + $0x30] sm:$0xff] %v1443_v9  ;;  %v1005_v16 = vadd.f32 %v2657_v42, %v956_v41  ;;  %v1063_v14 = vpop.f32.mrf.mxu3 }
 0x149   : > { %v1318_v61 = vmul.f32 %v2689_v2, %v1190_v10 }
 0x14a   : > { %v1189_v7 = vmax.f32 %v1005_v16, 0.0  ;;  %v1104_v50 = vpop.f32.mrf.mxu2 }
 0x14b   : > { %v1446_v11 = vadd.f32 %v1380_v63, %v1318_v61  ;;  %v1105_v37 = vadd.f32 %v1104_v50, %v1056_v45 }
 0x14c   : > { %v1317_v46 = vmul.f32 %v2689_v2, %v1189_v7  ;;  %v1153_v36 = vpop.f32.mrf.mxu0 }
 0x14d   : > { %v957_v57 = vpop.f32.mrf.mxu1  ;;  %1478 = vst [vmem:[%s2758_s18 + $0x48] sm:$0xff] %v1446_v11  ;;  %v1154_v59 = vadd.f32 %v1153_v36, %v1105_v37  ;;  %v917_v37 = vadd.f32 %v2632_v29, %v2613_v20 }
 0x14e   : > { %v1445_v25 = vadd.f32 %v1380_v63, %v1317_v46  ;;  %v958_v42 = vadd.f32 %v957_v57, %v909_v26  ;;  %v1064_v46 = vadd.f32 %v1063_v14, %v2613_v20 }
 0x14f   : > { %v1192_v6 = vmax.f32 %v1154_v59, 0.0 }
 0x150   : > { %1477 = vst [vmem:[%s2758_s18 + $0x40] sm:$0xff] %v1445_v25  ;;  %v1007_v53 = vadd.f32 %v2679_v52, %v958_v42  ;;  %v1065_v9 = vpop.f32.mrf.mxu3 }
 0x151   : > { %v1320_v2 = vmul.f32 %v2707_v4, %v1192_v6 }
 0x152   : > { %v1191_v12 = vmax.f32 %v1007_v53, 0.0  ;;  %v1107_v62 = vpop.f32.mrf.mxu2 }
 0x153   : > { %v1448_v58 = vadd.f32 %v1385_v15, %v1320_v2  ;;  %v1108_v21 = vadd.f32 %v1107_v62, %v1059_v56  ;;  %v1066_v2 = vadd.f32 %v1065_v9, %v2622_v13  ;;  %v919_v62 = vadd.f32 %v2652_v30, %v2622_v13 }
 0x154   : > { %v1319_v55 = vmul.f32 %v2707_v4, %v1191_v12  ;;  %v1156_v43 = vpop.f32.mrf.mxu0  ;;  %v922_v9 = vadd.f32 %v2665_v48, %v2642_v32 }
 0x155   : > { %v960_v28 = vpop.f32.mrf.mxu1  ;;  %1480 = vst [vmem:[%s2758_s18 + $0x58] sm:$0xff] %v1448_v58  ;;  %v1157_v38 = vadd.f32 %v1156_v43, %v1108_v21 }
 0x156   : > { %v1447_v34 = vadd.f32 %v1385_v15, %v1319_v55  ;;  %v961_v52 = vadd.f32 %v960_v28, %v912_v17 }
 0x157   : > { %v1194_v24 = vmax.f32 %v1157_v38, 0.0 }
 0x158   : > { %1479 = vst [vmem:[%s2758_s18 + $0x50] sm:$0xff] %v1447_v34  ;;  %v1010_v44 = vadd.f32 %v2691_v1, %v961_v52  ;;  %v1068_v57 = vpop.f32.mrf.mxu3 }
 0x159   : > { %v1322_v4 = vmul.f32 %v2717_v47, %v1194_v24  ;;  %v1069_v24 = vadd.f32 %v1068_v57, %v2642_v32  ;;  %v2997_v57 = vld [vmem:[#allocation4_spill] sm:$0xff] }
 0x15a   : > { %v1193_v18 = vmax.f32 %v1010_v44, 0.0  ;;  %v1109_v41 = vpop.f32.mrf.mxu2 }
 0x15b   : > { %v1450_v10 = vadd.f32 %v1390_v31, %v1322_v4  ;;  %v1110_v45 = vadd.f32 %v1109_v41, %v1061_v19 }
 0x15c   : > { %v1321_v16 = vmul.f32 %v2717_v47, %v1193_v18  ;;  %v1158_v61 = vpop.f32.mrf.mxu0  ;;  %v1395_v47 = vpop.permute.xlu0 %1394 }
 0x15d   : > { %v962_v7 = vpop.f32.mrf.mxu1  ;;  %1482 = vst [vmem:[%s2758_s18 + $0x68] sm:$0xff] %v1450_v10  ;;  %v1159_v33 = vadd.f32 %v1158_v61, %v1110_v45 }
 0x15e   : > { %v1449_v1 = vadd.f32 %v1390_v31, %v1321_v16  ;;  %v963_v63 = vadd.f32 %v962_v7, %v914_v35 }
 0x15f   : > { %v1196_v26 = vmax.f32 %v1159_v33, 0.0  ;;  %v2996_v33 = vld [vmem:[#allocation13_spill] sm:$0xff] }
 0x160   : > { %1481 = vst [vmem:[%s2758_s18 + $0x60] sm:$0xff] %v1449_v1  ;;  %v1012_v50 = vadd.f32 %v2709_v5, %v963_v63  ;;  %v1070_v43 = vpop.f32.mrf.mxu3 }
 0x161   : > { %v1324_v23 = vmul.f32 %v2711_v8, %v1196_v26  ;;  %v1071_v1 = vadd.f32 %v1070_v43, %v2628_v27  ;;  %v3002_v43 = vld [vmem:[#allocation10_spill] sm:$0xff] }
 0x162   : > { %v1195_v11 = vmax.f32 %v1012_v50, 0.0  ;;  %v1112_v0 = vpop.f32.mrf.mxu2  ;;  %v924_v50 = vadd.f32 %v2996_v33, %v2628_v27  ;;  %v3008_v33 = vld [vmem:[#allocation16_spill] sm:$0xff] }
 0x163   : > { %v1452_v25 = vadd.f32 %v1395_v47, %v1324_v23  ;;  %v1113_v42 = vadd.f32 %v1112_v0, %v1064_v46 }
 0x164   : > { %v1323_v36 = vmul.f32 %v2711_v8, %v1195_v11  ;;  %v1161_v53 = vpop.f32.mrf.mxu0  ;;  %v1400_v8 = vpop.permute.xlu1 %1399 }
 0x165   : > { %v965_v59 = vpop.f32.mrf.mxu1  ;;  %1484 = vst [vmem:[%s2758_s18 + $0x78] sm:$0xff] %v1452_v25  ;;  %v1162_v14 = vadd.f32 %v1161_v53, %v1113_v42  ;;  %v2998_v42 = vld [vmem:[#allocation7_spill] sm:$0xff] }
 0x166   : > { %v1451_v5 = vadd.f32 %v1395_v47, %v1323_v36  ;;  %v966_v6 = vadd.f32 %v965_v59, %v917_v37 }
 0x167   : > { %v1198_v12 = vmax.f32 %v1162_v14, 0.0 }
 0x168   : > { %1483 = vst [vmem:[%s2758_s18 + $0x70] sm:$0xff] %v1451_v5  ;;  %v1015_v56 = vadd.f32 %v2719_v60, %v966_v6  ;;  %v1073_v45 = vpop.f32.mrf.mxu3  ;;  %v2999_v5 = vld [vmem:[#allocation18_spill] sm:$0xff] }
 0x169   : > { %v1326_v29 = vmul.f32 %v2721_v22, %v1198_v12  ;;  %v1074_v59 = vadd.f32 %v1073_v45, %v2998_v42 }
 0x16a   : > { %v1197_v20 = vmax.f32 %v1015_v56, 0.0  ;;  %v1114_v15 = vpop.f32.mrf.mxu2  ;;  %v3000_v56 = vld [vmem:[#allocation14_spill] sm:$0xff] }
 0x16b   : > { %v1454_v55 = vadd.f32 %v1400_v8, %v1326_v29  ;;  %v1115_v58 = vadd.f32 %v1114_v15, %v1066_v2  ;;  %v927_v12 = vadd.f32 %v3000_v56, %v2998_v42 }
 0x16c   : > { %v1325_v17 = vmul.f32 %v2721_v22, %v1197_v20  ;;  %v1163_v28 = vpop.f32.mrf.mxu0  ;;  %v1405_v22 = vpop.permute.xlu2 %1404 }
 0x16d   : > { %v967_v21 = vpop.f32.mrf.mxu1  ;;  %1486 = vst [vmem:[%s2758_s18 + $0x88] sm:$0xff] %v1454_v55  ;;  %v1164_v52 = vadd.f32 %v1163_v28, %v1115_v58  ;;  %v1415_v6 = vpop.permute.xlu1 %1414  ;;  %v3001_v58 = vld [vmem:[#allocation5_spill] sm:$0xff] }
 0x16e   : > { %v1453_v60 = vadd.f32 %v1400_v8, %v1325_v17  ;;  %v968_v34 = vadd.f32 %v967_v21, %v919_v62 }
 0x16f   : > { %v1200_v44 = vmax.f32 %v1164_v52, 0.0  ;;  %v3003_v52 = vld [vmem:[#allocation20_spill] sm:$0xff] }
 0x170   : > { %1485 = vst [vmem:[%s2758_s18 + $0x80] sm:$0xff] %v1453_v60  ;;  %v1017_v38 = vadd.f32 %v2731_v51, %v968_v34  ;;  %v1075_v53 = vpop.f32.mrf.mxu3 }
 0x171   : > { %v1328_v30 = vmul.f32 %v2733_v54, %v1200_v44  ;;  %v1076_v60 = vadd.f32 %v1075_v53, %v3002_v43 }
 0x172   : > { %v1199_v13 = vmax.f32 %v1017_v38, 0.0  ;;  %v1117_v19 = vpop.f32.mrf.mxu2 }
 0x173   : > { %v1456_v4 = vadd.f32 %v1405_v22, %v1328_v30  ;;  %v1118_v31 = vadd.f32 %v1117_v19, %v1069_v24 }
 0x174   : > { %v1327_v18 = vmul.f32 %v2733_v54, %v1199_v13  ;;  %v1166_v35 = vpop.f32.mrf.mxu0  ;;  %v1410_v54 = vpop.permute.xlu0 %1409  ;;  %v3004_v13 = vld [vmem:[#allocation15_spill] sm:$0xff] }
 0x175   : > { %v970_v41 = vpop.f32.mrf.mxu1  ;;  %1488 = vst [vmem:[%s2758_s18 + $0x98] sm:$0xff] %v1456_v4  ;;  %v1167_v10 = vadd.f32 %v1166_v35, %v1118_v31  ;;  %v1420_v44 = vpop.permute.xlu2 %1419  ;;  %v929_v30 = vadd.f32 %v3004_v13, %v3002_v43  ;;  %v1531_v13 = vld [vmem:[%s2758_s18 + $0x20] sm:$0xff] (%p2102_p5) }
 0x176   : > { %v1455_v16 = vadd.f32 %v1405_v22, %v1327_v18  ;;  %v971_v51 = vadd.f32 %v970_v41, %v922_v9  ;;  %1532 = vst [vmem:[%s2891_s26 + $0x40] sm:$0xff] (%p2102_p5), %v1531_v13 }
 0x177   : > { %v1202_v61 = vmax.f32 %v1167_v10, 0.0 }
 0x178   : > { %1487 = vst [vmem:[%s2758_s18 + $0x90] sm:$0xff] %v1455_v16  ;;  %v1020_v7 = vadd.f32 %v2599_v40, %v971_v51  ;;  %v1078_v22 = vpop.f32.mrf.mxu3  ;;  %v3005_v51 = vld [vmem:[#allocation6_spill] sm:$0xff] }
 0x179   : > { %v1330_v48 = vmul.f32 %v2727_v39, %v1202_v61 }
 0x17a   : > { %v1201_v32 = vmax.f32 %v1020_v7, 0.0  ;;  %v1119_v63 = vpop.f32.mrf.mxu2  ;;  %v3006_v7 = vld [vmem:[#allocation8_spill] sm:$0xff] }
 0x17b   : > { %v1458_v46 = vadd.f32 %v1410_v54, %v1330_v48  ;;  %v1120_v11 = vadd.f32 %v1119_v63, %v1071_v1  ;;  %v1079_v61 = vadd.f32 %v1078_v22, %v3006_v7  ;;  %v1535_v22 = vld [vmem:[%s2758_s18 + $0x30] sm:$0xff] (%p2102_p5) }
 0x17c   : > { %v1329_v26 = vmul.f32 %v2727_v39, %v1201_v32  ;;  %v1168_v47 = vpop.f32.mrf.mxu0  ;;  %v3007_v32 = vld [vmem:[#allocation19_spill] sm:$0xff]  ;;  %1536 = vst [vmem:[%s2891_s26 + $0x60] sm:$0xff] (%p2102_p5), %v1535_v22 }
 0x17d   : > { %v972_v23 = vpop.f32.mrf.mxu1  ;;  %1490 = vst [vmem:[%s2758_s18 + $0xa8] sm:$0xff] %v1458_v46  ;;  %v1169_v37 = vadd.f32 %v1168_v47, %v1120_v11 }
 0x17e   : > { %v1457_v0 = vadd.f32 %v1410_v54, %v1329_v26  ;;  %v973_v40 = vadd.f32 %v972_v23, %v924_v50  ;;  %v1425_v54 = vpop.permute.xlu0 %1424  ;;  %v932_v50 = vadd.f32 %v3008_v33, %v3006_v7 }
 0x17f   : > { %v1204_v25 = vmax.f32 %v1169_v37, 0.0  ;;  %v1559_v7 = vld [vmem:[%s2758_s18 + $0x90] sm:$0xff] (%p2102_p5) }
 0x180   : > { %1489 = vst [vmem:[%s2758_s18 + $0xa0] sm:$0xff] %v1457_v0  ;;  %v1022_v36 = vadd.f32 %v2997_v57, %v973_v40  ;;  %v1080_v57 = vpop.f32.mrf.mxu3 }
 0x181   : > { %v1332_v39 = vmul.f32 %v2999_v5, %v1204_v25  ;;  %1560 = vst [vmem:[%s2891_s26 + $0x120] sm:$0xff] (%p2102_p5), %v1559_v7 }
 0x182   : > { %v1203_v27 = vmax.f32 %v1022_v36, 0.0  ;;  %v1122_v14 = vpop.f32.mrf.mxu2  ;;  %v3009_v36 = vld [vmem:[#allocation9_spill] sm:$0xff] }
 0x183   : > { %v1460_v20 = vadd.f32 %v1415_v6, %v1332_v39  ;;  %v1123_v29 = vadd.f32 %v1122_v14, %v1074_v59  ;;  %v3010_v59 = vld [vmem:[#allocation11_spill] sm:$0xff]  ;;  %v1430_v39 = vpop.permute.xlu1 %1429  ;;  %v3011_v14 = vld [vmem:[#allocation17_spill] sm:$0xff] }
 0x184   : > { %v1331_v2 = vmul.f32 %v2999_v5, %v1203_v27  ;;  %v1171_v15 = vpop.f32.mrf.mxu0  ;;  %v1081_v53 = vadd.f32 %v1080_v57, %v3010_v59  ;;  %v934_v56 = vadd.f32 %v3011_v14, %v3010_v59 }
 0x185   : > { %v975_v8 = vpop.f32.mrf.mxu1  ;;  %1492 = vst [vmem:[%s2758_s18 + $0xb8] sm:$0xff] %v1460_v20  ;;  %v1172_v55 = vadd.f32 %v1171_v15, %v1123_v29 }
 0x186   : > { %v1459_v62 = vadd.f32 %v1415_v6, %v1331_v2  ;;  %v976_v17 = vadd.f32 %v975_v8, %v927_v12 }
 0x187   : > { %v1206_v28 = vmax.f32 %v1172_v55, 0.0  ;;  %v3012_v55 = vld [vmem:[#allocation12_spill] sm:$0xff] }
 0x188   : > { %1491 = vst [vmem:[%s2758_s18 + $0xb0] sm:$0xff] %v1459_v62  ;;  %v1025_v21 = vadd.f32 %v3001_v58, %v976_v17 }
 0x189   : > { %v1334_v38 = vmul.f32 %v3003_v52, %v1206_v28 }
 0x18a   : > { %v1205_v34 = vmax.f32 %v1025_v21, 0.0  ;;  %v1124_v24 = vpop.f32.mrf.mxu2 }
 0x18b   : > { %v1462_v9 = vadd.f32 %v1420_v44, %v1334_v38  ;;  %v1125_v18 = vadd.f32 %v1124_v24, %v1076_v60  ;;  %v1435_v60 = vpop.permute.xlu2 %1434  ;;  %v1525_v38 = vld [vmem:[%s2758_s18 + $0x8] sm:$0xff] (%p2102_p5)  ;;  %v1529_v24 = vld [vmem:[%s2758_s18 + $0x18] sm:$0xff] (%p2102_p5) }
 0x18c   : > { %v1333_v19 = vmul.f32 %v3003_v52, %v1205_v34  ;;  %v1173_v31 = vpop.f32.mrf.mxu0  ;;  %1526 = vst [vmem:[%s2891_s26 + $0x8] sm:$0xff] (%p2102_p5), %v1525_v38 }
 0x18d   : > { %v977_v4 = vpop.f32.mrf.mxu1  ;;  %1494 = vst [vmem:[%s2758_s18 + $0xc8] sm:$0xff] %v1462_v9  ;;  %v1174_v16 = vadd.f32 %v1173_v31, %v1125_v18  ;;  %v1539_v9 = vld [vmem:[%s2758_s18 + $0x40] sm:$0xff] (%p2102_p5)  ;;  %v1541_v18 = vld [vmem:[%s2758_s18 + $0x48] sm:$0xff] (%p2102_p5)  ;;  %v1545_v31 = vld [vmem:[%s2758_s18 + $0x58] sm:$0xff] (%p2102_p5) }
 0x18e   : > { %v1461_v41 = vadd.f32 %v1420_v44, %v1333_v19  ;;  %v978_v35 = vadd.f32 %v977_v4, %v929_v30  ;;  %v1527_v44 = vld [vmem:[%s2758_s18 + $0x10] sm:$0xff] (%p2102_p5)  ;;  %v1533_v30 = vld [vmem:[%s2758_s18 + $0x28] sm:$0xff] (%p2102_p5)  ;;  %1530 = vst [vmem:[%s2891_s26 + $0x28] sm:$0xff] (%p2102_p5), %v1529_v24  ;;  %v1537_v19 = vld [vmem:[%s2758_s18 + $0x38] sm:$0xff] (%p2102_p5) }
 0x18f   : > { %v1208_v45 = vmax.f32 %v1174_v16, 0.0  ;;  %1528 = vst [vmem:[%s2891_s26 + $0x20] sm:$0xff] (%p2102_p5), %v1527_v44  ;;  %v1543_v4 = vld [vmem:[%s2758_s18 + $0x50] sm:$0xff] (%p2102_p5) }
 0x190   : > { %1493 = vst [vmem:[%s2758_s18 + $0xc0] sm:$0xff] %v1461_v41  ;;  %v1027_v10 = vadd.f32 %v3005_v51, %v978_v35  ;;  %v1547_v41 = vld [vmem:[%s2758_s18 + $0x60] sm:$0xff] (%p2102_p5)  ;;  %v1549_v35 = vld [vmem:[%s2758_s18 + $0x68] sm:$0xff] (%p2102_p5)  ;;  %v1551_v16 = vld [vmem:[%s2758_s18 + $0x70] sm:$0xff] (%p2102_p5) }
 0x191   : > { %v1336_v48 = vmul.f32 %v3007_v32, %v1208_v45  ;;  %1534 = vst [vmem:[%s2891_s26 + $0x48] sm:$0xff] (%p2102_p5), %v1533_v30  ;;  %v1553_v51 = vld [vmem:[%s2758_s18 + $0x78] sm:$0xff] (%p2102_p5)  ;;  %v1557_v45 = vld [vmem:[%s2758_s18 + $0x88] sm:$0xff] (%p2102_p5) }
 0x192   : > { %v1207_v1 = vmax.f32 %v1027_v10, 0.0  ;;  %v1127_v63 = vpop.f32.mrf.mxu2  ;;  %1538 = vst [vmem:[%s2891_s26 + $0x68] sm:$0xff] (%p2102_p5), %v1537_v19  ;;  %v1555_v10 = vld [vmem:[%s2758_s18 + $0x80] sm:$0xff] (%p2102_p5) }
 0x193   : > { %v1464_v46 = vadd.f32 %v1425_v54, %v1336_v48  ;;  %v1128_v11 = vadd.f32 %v1127_v63, %v1079_v61  ;;  %1540 = vst [vmem:[%s2891_s26 + $0x80] sm:$0xff] (%p2102_p5), %v1539_v9  ;;  %v1561_v61 = vld [vmem:[%s2758_s18 + $0x98] sm:$0xff] (%p2102_p5)  ;;  %v1567_v48 = vld [vmem:[%s2758_s18 + $0xb0] sm:$0xff] (%p2102_p5) }
 0x194   : > { %v1335_v26 = vmul.f32 %v3007_v32, %v1207_v1  ;;  %v1176_v47 = vpop.f32.mrf.mxu0  ;;  %1542 = vst [vmem:[%s2891_s26 + $0x88] sm:$0xff] (%p2102_p5), %v1541_v18  ;;  %v1563_v1 = vld [vmem:[%s2758_s18 + $0xa0] sm:$0xff] (%p2102_p5)  ;;  %v1565_v32 = vld [vmem:[%s2758_s18 + $0xa8] sm:$0xff] (%p2102_p5) }
 0x195   : > { %v980_v23 = vpop.f32.mrf.mxu1  ;;  %1496 = vst [vmem:[%s2758_s18 + $0xd8] sm:$0xff] %v1464_v46  ;;  %v1177_v37 = vadd.f32 %v1176_v47, %v1128_v11  ;;  %v1573_v33 = vld [vmem:[%s2758_s18 + $0xc8] sm:$0xff] (%p2102_p5) }
 0x196   : > { %v1463_v0 = vadd.f32 %v1425_v54, %v1335_v26  ;;  %v981_v40 = vadd.f32 %v980_v23, %v932_v50  ;;  %1544 = vst [vmem:[%s2891_s26 + $0xa0] sm:$0xff] (%p2102_p5), %v1543_v4  ;;  %v1569_v54 = vld [vmem:[%s2758_s18 + $0xb8] sm:$0xff] (%p2102_p5) }
 0x197   : > { %v1210_v42 = vmax.f32 %v1177_v37, 0.0  ;;  %1546 = vst [vmem:[%s2891_s26 + $0xa8] sm:$0xff] (%p2102_p5), %v1545_v31  ;;  %v1571_v63 = vld [vmem:[%s2758_s18 + $0xc0] sm:$0xff] (%p2102_p5) }
 0x198   : > { %1495 = vst [vmem:[%s2758_s18 + $0xd0] sm:$0xff] %v1463_v0  ;;  %v1030_v25 = vadd.f32 %v3009_v36, %v981_v40 }
 0x199   : > { %v1338_v5 = vmul.f32 %v2753_v49, %v1210_v42  ;;  %1548 = vst [vmem:[%s2891_s26 + $0xc0] sm:$0xff] (%p2102_p5), %v1547_v41 }
 0x19a   : > { %v1209_v27 = vmax.f32 %v1030_v25, 0.0  ;;  %v1129_v6 = vpop.f32.mrf.mxu2  ;;  %1550 = vst [vmem:[%s2891_s26 + $0xc8] sm:$0xff] (%p2102_p5), %v1549_v35 }
 0x19b   : > { %v1466_v2 = vadd.f32 %v1430_v39, %v1338_v5  ;;  %v1130_v20 = vadd.f32 %v1129_v6, %v1081_v53  ;;  %1552 = vst [vmem:[%s2891_s26 + $0xe0] sm:$0xff] (%p2102_p5), %v1551_v16 }
 0x19c   : > { %v1337_v12 = vmul.f32 %v2753_v49, %v1209_v27  ;;  %v1178_v8 = vpop.f32.mrf.mxu0  ;;  %1554 = vst [vmem:[%s2891_s26 + $0xe8] sm:$0xff] (%p2102_p5), %v1553_v51  ;;  %v1577_v26 = vld [vmem:[%s2758_s18 + $0xd8] sm:$0xff] (%p2102_p5) }
 0x19d   : > { %v982_v29 = vpop.f32.mrf.mxu1  ;;  %1498 = vst [vmem:[%s2758_s18 + $0xe8] sm:$0xff] %v1466_v2  ;;  %v1179_v17 = vadd.f32 %v1178_v8, %v1130_v20 }
 0x19e   : > { %v1465_v15 = vadd.f32 %v1430_v39, %v1337_v12  ;;  %v983_v62 = vadd.f32 %v982_v29, %v934_v56  ;;  %1556 = vst [vmem:[%s2891_s26 + $0x100] sm:$0xff] (%p2102_p5), %v1555_v10 }
 0x19f   : > { %v1212_v21 = vmax.f32 %v1179_v17, 0.0  ;;  %1558 = vst [vmem:[%s2891_s26 + $0x108] sm:$0xff] (%p2102_p5), %v1557_v45  ;;  %v1575_v50 = vld [vmem:[%s2758_s18 + $0xd0] sm:$0xff] (%p2102_p5) }
 0x1a0   : > { %1497 = vst [vmem:[%s2758_s18 + $0xe0] sm:$0xff] %v1465_v15  ;;  %v1032_v58 = vadd.f32 %v3012_v55, %v983_v62 }
 0x1a1   : > { %v1340_v43 = vmul.f32 %v2763_v3, %v1212_v21  ;;  %1562 = vst [vmem:[%s2891_s26 + $0x128] sm:$0xff] (%p2102_p5), %v1561_v61 }
 0x1a2   : > { %v1211_v28 = vmax.f32 %v1032_v58, 0.0  ;;  %1564 = vst [vmem:[%s2891_s26 + $0x140] sm:$0xff] (%p2102_p5), %v1563_v1 }
 0x1a3   : > { %v1468_v34 = vadd.f32 %v1435_v60, %v1340_v43  ;;  %1566 = vst [vmem:[%s2891_s26 + $0x148] sm:$0xff] (%p2102_p5), %v1565_v32 }
 0x1a4   : > { %v1339_v49 = vmul.f32 %v2763_v3, %v1211_v28  ;;  %1507 = sbr.rel (!%p2102_p5) target bundleno = 433 (0x1b1), region = 82  ;;  %v1523_v3 = vld [vmem:[%s2758_s18] sm:$0xff] (%p2102_p5)  ;;  %1568 = vst [vmem:[%s2891_s26 + $0x160] sm:$0xff] (%p2102_p5), %v1567_v48  ;;  %v1581_v11 = vld [vmem:[%s2758_s18 + $0xe8] sm:$0xff] (%p2102_p5) }
 0x1a5   : > { %1500 = vst [vmem:[%s2758_s18 + $0xf8] sm:$0xff] %v1468_v34 }
 0x1a6   : > { %v1467_v52 = vadd.f32 %v1435_v60, %v1339_v49  ;;  %1524 = vst [vmem:[%s2891_s26] sm:$0xff] (%p2102_p5), %v1523_v3 }
 0x1a7   : > { %1570 = vst [vmem:[%s2891_s26 + $0x168] sm:$0xff] (%p2102_p5), %v1569_v54  ;;  %v1579_v46 = vld [vmem:[%s2758_s18 + $0xe0] sm:$0xff] (%p2102_p5) }
 0x1a8   : > { %1499 = vst [vmem:[%s2758_s18 + $0xf0] sm:$0xff] %v1467_v52 }
 0x1a9   : > { %1572 = vst [vmem:[%s2891_s26 + $0x180] sm:$0xff] %v1571_v63 }
 0x1aa   : > { %1574 = vst [vmem:[%s2891_s26 + $0x188] sm:$0xff] %v1573_v33 }
 0x1ab   : > { %1576 = vst [vmem:[%s2891_s26 + $0x1a0] sm:$0xff] %v1575_v50 }
 0x1ac   : > { %1578 = vst [vmem:[%s2891_s26 + $0x1a8] sm:$0xff] %v1577_v26  ;;  %v1585_v47 = vld [vmem:[%s2758_s18 + $0xf8] sm:$0xff] }
 0x1ad   : > { %1580 = vst [vmem:[%s2891_s26 + $0x1c0] sm:$0xff] %v1579_v46 }
 0x1ae   : > { %1582 = vst [vmem:[%s2891_s26 + $0x1c8] sm:$0xff] %v1581_v11 }
 0x1af   : > { %v1583_v23 = vld [vmem:[%s2758_s18 + $0xf0] sm:$0xff]  ;;  %1586 = vst [vmem:[%s2891_s26 + $0x1e8] sm:$0xff] %v1585_v47 }
 0x1b0   : > { %1584 = vst [vmem:[%s2891_s26 + $0x1e0] sm:$0xff] %v1583_v23 }
 0x1b1 PF: > { %p12_p10 = scmp.ge.s32.totalorder %s2089_s22, 4   ;;  %s3013_s18 = smov %s2035_s19 }
 0x1b2   : > { %s3014_s19 = smov %s2100_s25  ;;  %s3015_s20 = smov %s2089_s22 }
 0x1b3   :  { %14 = sbr.rel (!%p12_p10) target bundleno = 2 (0x2), region = 136 }

// kernel: fl2d_forward.45
= control target key start
LH: loop header
LB: loop body
LE: loop exit
PB: predicated region body
PF: predicated region fallthrough
CT: control target
= control target key end

     0   :  { %s3172_s0 = inlined_call_operand.vmem [shape: bf16[32,576], index: 0, kind: input, shape index: {}]   ;;  %s3173_s1 = inlined_call_operand.vmem [shape: bf16[576,512], index: 1, kind: input, shape index: {}]   ;;  %s3174_s2 = inlined_call_operand.vmem [shape: f32[32,1], index: 2, kind: input, shape index: {}]   ;;  %s3175_s3 = inlined_call_operand.vmem [shape: f32[32,512], index: 3, kind: input, shape index: {}]   ;;  %s3176_s4 = inlined_call_operand.vmem [shape: f32[32,512], index: 4, kind: input, shape index: {}]   ;;  %s3177_s5 = inlined_call_operand.hbm [shape: f32[32,512], index: 5, kind: output, shape index: {0}]   ;;  %s3178_s6 = inlined_call_operand.vmem [shape: f32[32,512], index: 6, kind: output, shape index: {1}]  }
   0x1   :  { %3179 = sst [smem:[#allocation9_spill]] %s3172_s0 }
   0x2   :  { %12 = vsyncpa [#allocation6], 0 }
   0x3   :  { %14 = vsyncpa [#allocation6 + $0x1], 0  ;;  %s2464_s21 = smov 0   ;;  %s2466_s22 = smov 0  }
   0x4   :  { %s2468_s23 = smov 0   ;;  %s2470_s24 = smov 0  }
   0x5 LB: > { %s1818_s25 = sadd.s32 4294967295, %s2423_s24   ;;  %s1819_s26 = sadd.s32 4294967294, %s2423_s24   ;;  %s2423_s24 = sphi %s2470_s24, %s3187_s24   ;;  %s2419_s23 = sphi %s2468_s23, %s3186_s23   ;;  %s2415_s22 = sphi %s2466_s22, %s3185_s22   ;;  %s2411_s21 = sphi %s2464_s21, %s3184_s21  }
   0x6   : > { %s2487_s27 = sadd.s32 1, %s2423_s24   ;;  %s48_s28 = sadd.s32 1, %s2419_s23 }
   0x7   : > { %s45_s29 = ssub.s32 %s2423_s24, %s2487_s27  ;;  %p55_p0 = scmp.ne.s32.totalorder %s2419_s23, %s2415_s22 }
   0x8   : > { %p46_p1 = scmp.eq.s32.totalorder %s45_s29, 0  ;;  %p56_p2 = scmp.eq.s32.totalorder %s2423_s24, 0 }
   0x9   : > { %p158_p3 = scmp.eq.s32.totalorder %s1818_s25, 1  ;;  %p163_p4 = scmp.ne.s32.totalorder %s2415_s22, %s2411_s21 }
   0xa   : > { %s2500_s30 = scalar_select %p46_p1, %s2419_s23, %s48_s28  }
   0xb   : > { %p2502_p5 = por %p56_p2, %p55_p0  ;;  %p2506_p6 = por %p158_p3, %p55_p0 }
   0xc   : > { %p164_p7 = scmp.eq.s32.totalorder %s1819_s26, 1  ;;  %p1821_p9 = scmp.ge.s32.totalorder %s2423_s24, 2 }
   0xe   : > { %p2510_p8 = por %p164_p7, %p163_p4  ;;  %212 = sbr.rel (%p1821_p9) target bundleno = 119 (0x77), region = 24 }
  0x13   : > { %215 = sbr.rel (!%p2502_p5) target bundleno = 95 (0x5f), region = 28  ;;  %s217_s10 = sand.u32 (%p2502_p5), 1, %s2419_s23  }
  0x14   : > { %s2183_s11 = sshll.u32 (%p2502_p5), %s2423_s24, 3  ;;  %s2282_s12 = smul.u32 (%p2502_p5), 576, %s217_s10 }
  0x15   : > { %s2524_s15 = scalar_lea.vmem (%p2502_p5), %s3173_s1, %s2183_s11 }
  0x16   : > { %v393_v0 = vld [vmem:[%s2524_s15] sm:$0xff] (%p2502_p5)  ;;  %v395_v1 = vld [vmem:[%s2524_s15 + $0x10] sm:$0xff] (%p2502_p5)  ;;  %s2529_s16 = scalar_lea.vmem (%p2502_p5), [#allocation2], %s2282_s12 }
  0x17   : > { %v397_v2 = vld [vmem:[%s2524_s15 + $0x20] sm:$0xff] (%p2502_p5)  ;;  %394 = vst [vmem:[%s2529_s16] sm:$0xff] (%p2502_p5), %v393_v0  ;;  %v399_v3 = vld [vmem:[%s2524_s15 + $0x30] sm:$0xff] (%p2502_p5) }
  0x18   : > { %396 = vst [vmem:[%s2529_s16 + $0x8] sm:$0xff] %v395_v1  ;;  %v401_v4 = vld [vmem:[%s2524_s15 + $0x40] sm:$0xff]  ;;  %v403_v5 = vld [vmem:[%s2524_s15 + $0x50] sm:$0xff] }
  0x19   : > { %398 = vst [vmem:[%s2529_s16 + $0x10] sm:$0xff] %v397_v2  ;;  %v405_v6 = vld [vmem:[%s2524_s15 + $0x60] sm:$0xff]  ;;  %v407_v7 = vld [vmem:[%s2524_s15 + $0x70] sm:$0xff] }
  0x1a   : > { %400 = vst [vmem:[%s2529_s16 + $0x18] sm:$0xff] %v399_v3  ;;  %v409_v8 = vld [vmem:[%s2524_s15 + $0x80] sm:$0xff]  ;;  %v411_v9 = vld [vmem:[%s2524_s15 + $0x90] sm:$0xff] }
  0x1b   : > { %402 = vst [vmem:[%s2529_s16 + $0x20] sm:$0xff] %v401_v4  ;;  %v413_v10 = vld [vmem:[%s2524_s15 + $0xa0] sm:$0xff]  ;;  %v415_v11 = vld [vmem:[%s2524_s15 + $0xb0] sm:$0xff] }
  0x1c   : > { %404 = vst [vmem:[%s2529_s16 + $0x28] sm:$0xff] %v403_v5  ;;  %v417_v12 = vld [vmem:[%s2524_s15 + $0xc0] sm:$0xff]  ;;  %v419_v13 = vld [vmem:[%s2524_s15 + $0xd0] sm:$0xff] }
  0x1d   : > { %406 = vst [vmem:[%s2529_s16 + $0x30] sm:$0xff] %v405_v6  ;;  %v421_v14 = vld [vmem:[%s2524_s15 + $0xe0] sm:$0xff]  ;;  %v423_v15 = vld [vmem:[%s2524_s15 + $0xf0] sm:$0xff] }
  0x1e   : > { %408 = vst [vmem:[%s2529_s16 + $0x38] sm:$0xff] %v407_v7  ;;  %v425_v16 = vld [vmem:[%s2524_s15 + $0x100] sm:$0xff]  ;;  %v427_v17 = vld [vmem:[%s2524_s15 + $0x110] sm:$0xff] }
  0x1f   : > { %410 = vst [vmem:[%s2529_s16 + $0x40] sm:$0xff] %v409_v8  ;;  %v429_v18 = vld [vmem:[%s2524_s15 + $0x120] sm:$0xff]  ;;  %v431_v19 = vld [vmem:[%s2524_s15 + $0x130] sm:$0xff] }
  0x20   : > { %412 = vst [vmem:[%s2529_s16 + $0x48] sm:$0xff] %v411_v9  ;;  %v433_v20 = vld [vmem:[%s2524_s15 + $0x140] sm:$0xff]  ;;  %v435_v21 = vld [vmem:[%s2524_s15 + $0x150] sm:$0xff] }
  0x21   : > { %414 = vst [vmem:[%s2529_s16 + $0x50] sm:$0xff] %v413_v10  ;;  %v437_v22 = vld [vmem:[%s2524_s15 + $0x160] sm:$0xff]  ;;  %v439_v23 = vld [vmem:[%s2524_s15 + $0x170] sm:$0xff] }
  0x22   : > { %416 = vst [vmem:[%s2529_s16 + $0x58] sm:$0xff] %v415_v11  ;;  %v441_v24 = vld [vmem:[%s2524_s15 + $0x180] sm:$0xff]  ;;  %v443_v25 = vld [vmem:[%s2524_s15 + $0x190] sm:$0xff] }
  0x23   : > { %418 = vst [vmem:[%s2529_s16 + $0x60] sm:$0xff] %v417_v12  ;;  %v445_v26 = vld [vmem:[%s2524_s15 + $0x1a0] sm:$0xff]  ;;  %v447_v27 = vld [vmem:[%s2524_s15 + $0x1b0] sm:$0xff] }
  0x24   : > { %420 = vst [vmem:[%s2529_s16 + $0x68] sm:$0xff] %v419_v13  ;;  %v449_v28 = vld [vmem:[%s2524_s15 + $0x1c0] sm:$0xff]  ;;  %v451_v29 = vld [vmem:[%s2524_s15 + $0x1d0] sm:$0xff] }
  0x25   : > { %422 = vst [vmem:[%s2529_s16 + $0x70] sm:$0xff] %v421_v14  ;;  %v453_v30 = vld [vmem:[%s2524_s15 + $0x1e0] sm:$0xff]  ;;  %v455_v31 = vld [vmem:[%s2524_s15 + $0x1f0] sm:$0xff] }
  0x26   : > { %424 = vst [vmem:[%s2529_s16 + $0x78] sm:$0xff] %v423_v15  ;;  %v457_v32 = vld [vmem:[%s2524_s15 + $0x200] sm:$0xff]  ;;  %v459_v33 = vld [vmem:[%s2524_s15 + $0x210] sm:$0xff] }
  0x27   : > { %426 = vst [vmem:[%s2529_s16 + $0x80] sm:$0xff] %v425_v16  ;;  %v461_v34 = vld [vmem:[%s2524_s15 + $0x220] sm:$0xff]  ;;  %v463_v35 = vld [vmem:[%s2524_s15 + $0x230] sm:$0xff] }
  0x28   : > { %428 = vst [vmem:[%s2529_s16 + $0x88] sm:$0xff] %v427_v17  ;;  %v465_v36 = vld [vmem:[%s2524_s15 + $0x240] sm:$0xff]  ;;  %v467_v37 = vld [vmem:[%s2524_s15 + $0x250] sm:$0xff] }
  0x29   : > { %430 = vst [vmem:[%s2529_s16 + $0x90] sm:$0xff] %v429_v18  ;;  %v469_v38 = vld [vmem:[%s2524_s15 + $0x260] sm:$0xff]  ;;  %v471_v39 = vld [vmem:[%s2524_s15 + $0x270] sm:$0xff] }
  0x2a   : > { %432 = vst [vmem:[%s2529_s16 + $0x98] sm:$0xff] %v431_v19  ;;  %v473_v40 = vld [vmem:[%s2524_s15 + $0x280] sm:$0xff]  ;;  %v475_v41 = vld [vmem:[%s2524_s15 + $0x290] sm:$0xff] }
  0x2b   : > { %434 = vst [vmem:[%s2529_s16 + $0xa0] sm:$0xff] %v433_v20  ;;  %v477_v42 = vld [vmem:[%s2524_s15 + $0x2a0] sm:$0xff]  ;;  %v479_v43 = vld [vmem:[%s2524_s15 + $0x2b0] sm:$0xff] }
  0x2c   : > { %436 = vst [vmem:[%s2529_s16 + $0xa8] sm:$0xff] %v435_v21  ;;  %v481_v44 = vld [vmem:[%s2524_s15 + $0x2c0] sm:$0xff]  ;;  %v483_v45 = vld [vmem:[%s2524_s15 + $0x2d0] sm:$0xff] }
  0x2d   : > { %438 = vst [vmem:[%s2529_s16 + $0xb0] sm:$0xff] %v437_v22  ;;  %v485_v46 = vld [vmem:[%s2524_s15 + $0x2e0] sm:$0xff]  ;;  %v487_v47 = vld [vmem:[%s2524_s15 + $0x2f0] sm:$0xff] }
  0x2e   : > { %440 = vst [vmem:[%s2529_s16 + $0xb8] sm:$0xff] %v439_v23  ;;  %v489_v48 = vld [vmem:[%s2524_s15 + $0x300] sm:$0xff]  ;;  %v491_v49 = vld [vmem:[%s2524_s15 + $0x310] sm:$0xff] }
  0x2f   : > { %442 = vst [vmem:[%s2529_s16 + $0xc0] sm:$0xff] %v441_v24  ;;  %v493_v50 = vld [vmem:[%s2524_s15 + $0x320] sm:$0xff]  ;;  %v495_v51 = vld [vmem:[%s2524_s15 + $0x330] sm:$0xff] }
  0x30   : > { %444 = vst [vmem:[%s2529_s16 + $0xc8] sm:$0xff] %v443_v25  ;;  %v497_v52 = vld [vmem:[%s2524_s15 + $0x340] sm:$0xff]  ;;  %v499_v53 = vld [vmem:[%s2524_s15 + $0x350] sm:$0xff] }
  0x31   : > { %446 = vst [vmem:[%s2529_s16 + $0xd0] sm:$0xff] %v445_v26  ;;  %v501_v54 = vld [vmem:[%s2524_s15 + $0x360] sm:$0xff]  ;;  %v503_v55 = vld [vmem:[%s2524_s15 + $0x370] sm:$0xff] }
  0x32   : > { %448 = vst [vmem:[%s2529_s16 + $0xd8] sm:$0xff] %v447_v27  ;;  %v505_v56 = vld [vmem:[%s2524_s15 + $0x380] sm:$0xff]  ;;  %v507_v57 = vld [vmem:[%s2524_s15 + $0x390] sm:$0xff] }
  0x33   : > { %450 = vst [vmem:[%s2529_s16 + $0xe0] sm:$0xff] %v449_v28  ;;  %v509_v58 = vld [vmem:[%s2524_s15 + $0x3a0] sm:$0xff]  ;;  %v511_v59 = vld [vmem:[%s2524_s15 + $0x3b0] sm:$0xff] }
  0x34   : > { %452 = vst [vmem:[%s2529_s16 + $0xe8] sm:$0xff] %v451_v29  ;;  %v513_v60 = vld [vmem:[%s2524_s15 + $0x3c0] sm:$0xff]  ;;  %v515_v61 = vld [vmem:[%s2524_s15 + $0x3d0] sm:$0xff] }
  0x35   : > { %454 = vst [vmem:[%s2529_s16 + $0xf0] sm:$0xff] %v453_v30  ;;  %v517_v62 = vld [vmem:[%s2524_s15 + $0x3e0] sm:$0xff]  ;;  %v519_v63 = vld [vmem:[%s2524_s15 + $0x3f0] sm:$0xff] }
  0x36   : > { %456 = vst [vmem:[%s2529_s16 + $0xf8] sm:$0xff] %v455_v31  ;;  %v521_v0 = vld [vmem:[%s2524_s15 + $0x400] sm:$0xff]  ;;  %v523_v1 = vld [vmem:[%s2524_s15 + $0x410] sm:$0xff] }
  0x37   : > { %458 = vst [vmem:[%s2529_s16 + $0x100] sm:$0xff] %v457_v32  ;;  %v525_v2 = vld [vmem:[%s2524_s15 + $0x420] sm:$0xff]  ;;  %v527_v3 = vld [vmem:[%s2524_s15 + $0x430] sm:$0xff] }
  0x38   : > { %460 = vst [vmem:[%s2529_s16 + $0x108] sm:$0xff] %v459_v33  ;;  %v529_v4 = vld [vmem:[%s2524_s15 + $0x440] sm:$0xff]  ;;  %v531_v5 = vld [vmem:[%s2524_s15 + $0x450] sm:$0xff] }
  0x39   : > { %462 = vst [vmem:[%s2529_s16 + $0x110] sm:$0xff] %v461_v34  ;;  %v533_v6 = vld [vmem:[%s2524_s15 + $0x460] sm:$0xff]  ;;  %v535_v7 = vld [vmem:[%s2524_s15 + $0x470] sm:$0xff] }
  0x3a   : > { %464 = vst [vmem:[%s2529_s16 + $0x118] sm:$0xff] %v463_v35 }
  0x3b   : > { %466 = vst [vmem:[%s2529_s16 + $0x120] sm:$0xff] %v465_v36 }
  0x3c   : > { %468 = vst [vmem:[%s2529_s16 + $0x128] sm:$0xff] %v467_v37 }
  0x3d   : > { %470 = vst [vmem:[%s2529_s16 + $0x130] sm:$0xff] %v469_v38 }
  0x3e   : > { %472 = vst [vmem:[%s2529_s16 + $0x138] sm:$0xff] %v471_v39 }
  0x3f   : > { %474 = vst [vmem:[%s2529_s16 + $0x140] sm:$0xff] %v473_v40 }
  0x40   : > { %476 = vst [vmem:[%s2529_s16 + $0x148] sm:$0xff] %v475_v41 }
  0x41   : > { %478 = vst [vmem:[%s2529_s16 + $0x150] sm:$0xff] %v477_v42 }
  0x42   : > { %480 = vst [vmem:[%s2529_s16 + $0x158] sm:$0xff] %v479_v43 }
  0x43   : > { %482 = vst [vmem:[%s2529_s16 + $0x160] sm:$0xff] %v481_v44 }
  0x44   : > { %484 = vst [vmem:[%s2529_s16 + $0x168] sm:$0xff] %v483_v45 }
  0x45   : > { %486 = vst [vmem:[%s2529_s16 + $0x170] sm:$0xff] %v485_v46 }
  0x46   : > { %488 = vst [vmem:[%s2529_s16 + $0x178] sm:$0xff] %v487_v47 }
  0x47   : > { %490 = vst [vmem:[%s2529_s16 + $0x180] sm:$0xff] %v489_v48 }
  0x48   : > { %492 = vst [vmem:[%s2529_s16 + $0x188] sm:$0xff] %v491_v49 }
  0x49   : > { %494 = vst [vmem:[%s2529_s16 + $0x190] sm:$0xff] %v493_v50 }
  0x4a   : > { %496 = vst [vmem:[%s2529_s16 + $0x198] sm:$0xff] %v495_v51 }
  0x4b   : > { %498 = vst [vmem:[%s2529_s16 + $0x1a0] sm:$0xff] %v497_v52 }
  0x4c   : > { %500 = vst [vmem:[%s2529_s16 + $0x1a8] sm:$0xff] %v499_v53 }
  0x4d   : > { %502 = vst [vmem:[%s2529_s16 + $0x1b0] sm:$0xff] %v501_v54 }
  0x4e   : > { %504 = vst [vmem:[%s2529_s16 + $0x1b8] sm:$0xff] %v503_v55 }
  0x4f   : > { %506 = vst [vmem:[%s2529_s16 + $0x1c0] sm:$0xff] %v505_v56 }
  0x50   : > { %508 = vst [vmem:[%s2529_s16 + $0x1c8] sm:$0xff] %v507_v57 }
  0x51   : > { %510 = vst [vmem:[%s2529_s16 + $0x1d0] sm:$0xff] %v509_v58 }
  0x52   : > { %512 = vst [vmem:[%s2529_s16 + $0x1d8] sm:$0xff] %v511_v59 }
  0x53   : > { %514 = vst [vmem:[%s2529_s16 + $0x1e0] sm:$0xff] %v513_v60 }
  0x54   : > { %516 = vst [vmem:[%s2529_s16 + $0x1e8] sm:$0xff] %v515_v61 }
  0x55   : > { %518 = vst [vmem:[%s2529_s16 + $0x1f0] sm:$0xff] %v517_v62 }
  0x56   : > { %520 = vst [vmem:[%s2529_s16 + $0x1f8] sm:$0xff] %v519_v63 }
  0x57   : > { %522 = vst [vmem:[%s2529_s16 + $0x200] sm:$0xff] %v521_v0 }
  0x58   : > { %524 = vst [vmem:[%s2529_s16 + $0x208] sm:$0xff] %v523_v1 }
  0x59   : > { %526 = vst [vmem:[%s2529_s16 + $0x210] sm:$0xff] %v525_v2 }
  0x5a   : > { %528 = vst [vmem:[%s2529_s16 + $0x218] sm:$0xff] %v527_v3 }
  0x5b   : > { %530 = vst [vmem:[%s2529_s16 + $0x220] sm:$0xff] %v529_v4 }
  0x5c   : > { %532 = vst [vmem:[%s2529_s16 + $0x228] sm:$0xff] %v531_v5 }
  0x5d   : > { %534 = vst [vmem:[%s2529_s16 + $0x230] sm:$0xff] %v533_v6 }
  0x5e   : > { %536 = vst [vmem:[%s2529_s16 + $0x238] sm:$0xff] %v535_v7 }
  0x5f PF: > { %542 = sbr.rel (!%p2502_p5) target bundleno = 107 (0x6b), region = 66  ;;  %s544_s17 = sand.u32 (%p2502_p5), 1, %s2419_s23  }
  0x60   : > { %s2184_s18 = sshll.u32 (%p2502_p5), %s2423_s24, 4  ;;  %s1824_s19 = sshll.u32 (%p2502_p5), %s544_s17, 6 }
  0x61   : > { %s549_s28 = scalar_lea.vmem (%p2502_p5), %s3175_s3, %s2184_s18  ;;  %s546_s29 = scalar_lea.vmem (%p2502_p5), [#allocation3], %s1824_s19 }
  0x62   : > { %v562_v8 = vld [vmem:[%s549_s28] sm:$0xff] (%p2502_p5)  ;;  %v564_v9 = vld [vmem:[%s549_s28 + $0x8] sm:$0xff] (%p2502_p5) }
  0x63   : > { %v566_v10 = vld [vmem:[%s549_s28 + $0x20] sm:$0xff] (%p2502_p5)  ;;  %563 = vst [vmem:[%s546_s29] sm:$0xff] (%p2502_p5), %v562_v8  ;;  %v568_v11 = vld [vmem:[%s549_s28 + $0x28] sm:$0xff] (%p2502_p5) }
  0x64   : > { %565 = vst [vmem:[%s546_s29 + $0x8] sm:$0xff] %v564_v9  ;;  %v570_v12 = vld [vmem:[%s549_s28 + $0x40] sm:$0xff]  ;;  %v572_v13 = vld [vmem:[%s549_s28 + $0x48] sm:$0xff] }
  0x65   : > { %567 = vst [vmem:[%s546_s29 + $0x10] sm:$0xff] %v566_v10  ;;  %v574_v14 = vld [vmem:[%s549_s28 + $0x60] sm:$0xff]  ;;  %v576_v15 = vld [vmem:[%s549_s28 + $0x68] sm:$0xff] }
  0x66   : > { %569 = vst [vmem:[%s546_s29 + $0x18] sm:$0xff] %v568_v11 }
  0x67   : > { %571 = vst [vmem:[%s546_s29 + $0x20] sm:$0xff] %v570_v12 }
  0x68   : > { %573 = vst [vmem:[%s546_s29 + $0x28] sm:$0xff] %v572_v13 }
  0x69   : > { %575 = vst [vmem:[%s546_s29 + $0x30] sm:$0xff] %v574_v14 }
  0x6a   : > { %577 = vst [vmem:[%s546_s29 + $0x38] sm:$0xff] %v576_v15 }
  0x6b PF: > { %583 = sbr.rel (!%p2502_p5) target bundleno = 119 (0x77), region = 89  ;;  %s585_s10 = sand.u32 (%p2502_p5), 1, %s2419_s23  }
  0x6c   : > { %s2185_s11 = sshll.u32 (%p2502_p5), %s2423_s24, 4  ;;  %s1827_s12 = sshll.u32 (%p2502_p5), %s585_s10, 6 }
  0x6d   : > { %s590_s15 = scalar_lea.vmem (%p2502_p5), %s3176_s4, %s2185_s11  ;;  %s587_s16 = scalar_lea.vmem (%p2502_p5), [#allocation4], %s1827_s12 }
  0x6e   : > { %v603_v16 = vld [vmem:[%s590_s15] sm:$0xff] (%p2502_p5)  ;;  %v605_v17 = vld [vmem:[%s590_s15 + $0x8] sm:$0xff] (%p2502_p5) }
  0x6f   : > { %v607_v18 = vld [vmem:[%s590_s15 + $0x20] sm:$0xff] (%p2502_p5)  ;;  %604 = vst [vmem:[%s587_s16] sm:$0xff] (%p2502_p5), %v603_v16  ;;  %v609_v19 = vld [vmem:[%s590_s15 + $0x28] sm:$0xff] (%p2502_p5) }
  0x70   : > { %606 = vst [vmem:[%s587_s16 + $0x8] sm:$0xff] %v605_v17  ;;  %v611_v20 = vld [vmem:[%s590_s15 + $0x40] sm:$0xff]  ;;  %v613_v21 = vld [vmem:[%s590_s15 + $0x48] sm:$0xff] }
  0x71   : > { %608 = vst [vmem:[%s587_s16 + $0x10] sm:$0xff] %v607_v18  ;;  %v615_v22 = vld [vmem:[%s590_s15 + $0x60] sm:$0xff]  ;;  %v617_v23 = vld [vmem:[%s590_s15 + $0x68] sm:$0xff] }
  0x72   : > { %610 = vst [vmem:[%s587_s16 + $0x18] sm:$0xff] %v609_v19 }
  0x73   : > { %612 = vst [vmem:[%s587_s16 + $0x20] sm:$0xff] %v611_v20 }
  0x74   : > { %614 = vst [vmem:[%s587_s16 + $0x28] sm:$0xff] %v613_v21 }
  0x75   : > { %616 = vst [vmem:[%s587_s16 + $0x30] sm:$0xff] %v615_v22 }
  0x76   : > { %618 = vst [vmem:[%s587_s16 + $0x38] sm:$0xff] %v617_v23 }
  0x77 PF: > { %p1830_p10 = scmp.ge.s32.totalorder %s2423_s24, 1  ;;  %p623_p11 = scmp.lt.s32.totalorder %s2423_s24, 3 }
  0x79   : > { %p624_p12 = pnand %p1830_p10, %p623_p11 }
  0x7a   : > { %s2689_s7 = sand.u32 (!%p624_p12), 1, %s2415_s22   ;;  %s3183_s0 = sld [smem:[#allocation9_spill]] (!%p624_p12) }
  0x7b   : > { %627 = sbr.rel (%p624_p12) target bundleno = 420 (0x1a4), region = 112  ;;  %s3050_s19 = sshll.u32 (!%p624_p12), %s1818_s25, 4 }
  0x7c   : > { %s2283_s17 = smul.u32 (!%p624_p12), 576, %s2689_s7  ;;  %s1646_s26 = scalar_lea.hbm (!%p624_p12), %s3177_s5, %s3050_s19 }
  0x7d   : > { %s3072_s29 = sshll.u32 (!%p624_p12), %s1646_s26, 4  ;;  %s1631_s10 = scalar_lea.sflag (!%p624_p12), [#allocation6], %s2689_s7  ;;  %s1650_s29 = int_to_ptr.hbm [resolvable:$true] %s3072_s29 }
  0x7e   : > { %s2692_s18 = scalar_lea.vmem (!%p624_p12), [#allocation2], %s2283_s17  ;;  %s2375_s11 = sshra.s32 (!%p624_p12), %s1650_s29, 4  ;;  %s2376_s11 = int_to_ptr.hbm [resolvable:$true] %s2375_s11 }
  0x7f   : > { %s2377_s12 = scalar_lea.hbm (!%p624_p12), %s2376_s11, 64  ;;  %s2381_s25 = scalar_lea.hbm (!%p624_p12), %s3177_s5, 128 }
  0x80   : > { %v1933_v24 = vld [vmem:[%s2692_s18 + $0x70] sm:$0xf]  ;;  %v2211_v25 = vld [vmem:[%s2692_s18 + $0x74] sm:$0xf0]  ;;  %v1925_v35 = vld [vmem:[%s2692_s18 + $0x60] sm:$0xf]  ;;  %p2378_p13 = scmp.ne.s32.totalorder %s2376_s11, %s2377_s12  ;;  %p2382_p2 = scmp.lt.s32.totalorder %s2376_s11, %s3177_s5 }
  0x81   : > { %v1997_v26 = vld [vmem:[%s2692_s18 + $0xf0] sm:$0xf]  ;;  %v1934_v27 = vor.u32 %v2211_v25, %v1933_v24  ;;  %v2227_v28 = vld [vmem:[%s2692_s18 + $0xf4] sm:$0xf0]  ;;  %v2209_v37 = vld [vmem:[%s2692_s18 + $0x64] sm:$0xf0]  ;;  %p2383_p3 = scmp.lt.s32.totalorder %s2381_s25, %s2377_s12 }
  0x82   : > { %v2061_v29 = vld [vmem:[%s2692_s18 + $0x170] sm:$0xf]  ;;  %v2243_v30 = vld [vmem:[%s2692_s18 + $0x174] sm:$0xf0]  ;;  %v1998_v31 = vor.u32 %v2227_v28, %v1997_v26  ;;  %v1989_v38 = vld [vmem:[%s2692_s18 + $0xe0] sm:$0xf]  ;;  %v1926_v40 = vor.u32 %v2209_v37, %v1925_v35  ;;  %p2379_p0 = pnand %p2378_p13, %p2506_p6 }
  0x83   : > { %v2062_v32 = vor.u32 %v2243_v30, %v2061_v29  ;;  %v2125_v33 = vld [vmem:[%s2692_s18 + $0x1f0] sm:$0xf]  ;;  %v2259_v34 = vld [vmem:[%s2692_s18 + $0x1f4] sm:$0xf0]  ;;  %1216 = vmatpush.bf16.msra.mxu0 %v1934_v27  ;;  %v2225_v39 = vld [vmem:[%s2692_s18 + $0xe4] sm:$0xf0]  ;;  %p2384_p4 = por %p2383_p3, %p2382_p2 }
  0x84   : > { %v2126_v36 = vor.u32 %v2259_v34, %v2125_v33  ;;  %1235 = vmatpush.bf16.msra.mxu1 %v1998_v31  ;;  %v1990_v41 = vor.u32 %v2225_v39, %v1989_v38  ;;  %v2053_v42 = vld [vmem:[%s2692_s18 + $0x160] sm:$0xf]  ;;  %v2241_v43 = vld [vmem:[%s2692_s18 + $0x164] sm:$0xf0]  ;;  %v1917_v47 = vld [vmem:[%s2692_s18 + $0x50] sm:$0xf]  ;;  %p2380_p1 = pneg %p2379_p0 }
  0x85   : > { %1254 = vmatpush.bf16.msra.mxu2 %v2062_v32  ;;  %v2117_v44 = vld [vmem:[%s2692_s18 + $0x1e0] sm:$0xf]  ;;  %v2054_v45 = vor.u32 %v2241_v43, %v2053_v42  ;;  %v2257_v46 = vld [vmem:[%s2692_s18 + $0x1e4] sm:$0xf0]  ;;  %v2207_v48 = vld [vmem:[%s2692_s18 + $0x54] sm:$0xf0] }
  0x86   : > { %1273 = vmatpush.bf16.msra.mxu3 %v2126_v36  ;;  %v2118_v49 = vor.u32 %v2257_v46, %v2117_v44  ;;  %v1981_v50 = vld [vmem:[%s2692_s18 + $0xd0] sm:$0xf]  ;;  %v2223_v51 = vld [vmem:[%s2692_s18 + $0xd4] sm:$0xf0]  ;;  %v1918_v53 = vor.u32 %v2207_v48, %v1917_v47  ;;  %v1909_v59 = vld [vmem:[%s2692_s18 + $0x40] sm:$0xf]  ;;  %p2385_p5 = pnand %p2384_p4, %p2380_p1 }
  0x87   : > { %v2045_v52 = vld [vmem:[%s2692_s18 + $0x150] sm:$0xf]  ;;  %1217 = vmatpush.bf16.msra.mxu0 %v1926_v40  ;;  %v2239_v54 = vld [vmem:[%s2692_s18 + $0x154] sm:$0xf0]  ;;  %v1982_v57 = vor.u32 %v2223_v51, %v1981_v50  ;;  %v2205_v60 = vld [vmem:[%s2692_s18 + $0x44] sm:$0xf0] }
  0x88   : > { %v2109_v55 = vld [vmem:[%s2692_s18 + $0x1d0] sm:$0xf]  ;;  %v2255_v56 = vld [vmem:[%s2692_s18 + $0x1d4] sm:$0xf0]  ;;  %1236 = vmatpush.bf16.msra.mxu1 %v1990_v41  ;;  %v2046_v58 = vor.u32 %v2239_v54, %v2045_v52  ;;  %v1973_v61 = vld [vmem:[%s2692_s18 + $0xc0] sm:$0xf]  ;;  %v1910_v4 = vor.u32 %v2205_v60, %v1909_v59 }
  0x89   : > { %1255 = vmatpush.bf16.msra.mxu2 %v2054_v45  ;;  %v2110_v62 = vor.u32 %v2255_v56, %v2109_v55  ;;  %v2221_v63 = vld [vmem:[%s2692_s18 + $0xc4] sm:$0xf0]  ;;  %v2037_v0 = vld [vmem:[%s2692_s18 + $0x140] sm:$0xf]  ;;  %v1901_v7 = vld [vmem:[%s2692_s18 + $0x30] sm:$0xf] }
  0x8a   : > { %1274 = vmatpush.bf16.msra.mxu3 %v2118_v49  ;;  %v2237_v1 = vld [vmem:[%s2692_s18 + $0x144] sm:$0xf0]  ;;  %v2101_v2 = vld [vmem:[%s2692_s18 + $0x1c0] sm:$0xf]  ;;  %v1974_v5 = vor.u32 %v2221_v63, %v1973_v61  ;;  %v2203_v8 = vld [vmem:[%s2692_s18 + $0x34] sm:$0xf0] }
  0x8b   : > { %v2253_v3 = vld [vmem:[%s2692_s18 + $0x1c4] sm:$0xf0]  ;;  %1218 = vmatpush.bf16.msra.mxu0 %v1918_v53  ;;  %v2038_v6 = vor.u32 %v2237_v1, %v2037_v0  ;;  %v1965_v9 = vld [vmem:[%s2692_s18 + $0xb0] sm:$0xf]  ;;  %v2219_v11 = vld [vmem:[%s2692_s18 + $0xb4] sm:$0xf0]  ;;  %v1902_v16 = vor.u32 %v2203_v8, %v1901_v7 }
  0x8c   : > { %1237 = vmatpush.bf16.msra.mxu1 %v1982_v57  ;;  %v2102_v10 = vor.u32 %v2253_v3, %v2101_v2  ;;  %v2029_v12 = vld [vmem:[%s2692_s18 + $0x130] sm:$0xf]  ;;  %v2235_v13 = vld [vmem:[%s2692_s18 + $0x134] sm:$0xf0]  ;;  %v1966_v17 = vor.u32 %v2219_v11, %v1965_v9  ;;  %v1893_v19 = vld [vmem:[%s2692_s18 + $0x20] sm:$0xf] }
  0x8d   : > { %1256 = vmatpush.bf16.msra.mxu2 %v2046_v58  ;;  %v2093_v14 = vld [vmem:[%s2692_s18 + $0x1b0] sm:$0xf]  ;;  %v2251_v15 = vld [vmem:[%s2692_s18 + $0x1b4] sm:$0xf0]  ;;  %v2030_v18 = vor.u32 %v2235_v13, %v2029_v12  ;;  %v2201_v20 = vld [vmem:[%s2692_s18 + $0x24] sm:$0xf0] }
  0x8e   : > { %1275 = vmatpush.bf16.msra.mxu3 %v2110_v62  ;;  %v1957_v21 = vld [vmem:[%s2692_s18 + $0xa0] sm:$0xf]  ;;  %v2094_v22 = vor.u32 %v2251_v15, %v2093_v14  ;;  %v2217_v23 = vld [vmem:[%s2692_s18 + $0xa4] sm:$0xf0]  ;;  %v1894_v28 = vor.u32 %v2201_v20, %v1893_v19  ;;  %v1885_v31 = vld [vmem:[%s2692_s18 + $0x10] sm:$0xf] }
  0x8f   : > { %1219 = vmatpush.bf16.msra.mxu0 %v1910_v4  ;;  %v2021_v24 = vld [vmem:[%s2692_s18 + $0x120] sm:$0xf]  ;;  %v2233_v25 = vld [vmem:[%s2692_s18 + $0x124] sm:$0xf0]  ;;  %v1958_v29 = vor.u32 %v2217_v23, %v1957_v21  ;;  %v2199_v32 = vld [vmem:[%s2692_s18 + $0x14] sm:$0xf0] }
  0x90   : > { %1238 = vmatpush.bf16.msra.mxu1 %v1974_v5  ;;  %v2085_v26 = vld [vmem:[%s2692_s18 + $0x1a0] sm:$0xf]  ;;  %v2249_v27 = vld [vmem:[%s2692_s18 + $0x1a4] sm:$0xf0]  ;;  %v2022_v30 = vor.u32 %v2233_v25, %v2021_v24  ;;  %v1949_v33 = vld [vmem:[%s2692_s18 + $0x90] sm:$0xf]  ;;  %v1886_v41 = vor.u32 %v2199_v32, %v1885_v31 }
  0x91   : > { %1257 = vmatpush.bf16.msra.mxu2 %v2038_v6  ;;  %v2086_v34 = vor.u32 %v2249_v27, %v2085_v26  ;;  %v2215_v35 = vld [vmem:[%s2692_s18 + $0x94] sm:$0xf0]  ;;  %v2013_v36 = vld [vmem:[%s2692_s18 + $0x110] sm:$0xf]  ;;  %v1877_v40 = vld [vmem:[%s2692_s18] sm:$0xf] }
  0x92   : > { %1276 = vmatpush.bf16.msra.mxu3 %v2102_v10  ;;  %v2231_v37 = vld [vmem:[%s2692_s18 + $0x114] sm:$0xf0]  ;;  %v2077_v38 = vld [vmem:[%s2692_s18 + $0x190] sm:$0xf]  ;;  %v2197_v42 = vld [vmem:[%s2692_s18 + $0x4] sm:$0xf0]  ;;  %v1950_v45 = vor.u32 %v2215_v35, %v1949_v33 }
  0x93   : > { %1220 = vmatpush.bf16.msra.mxu0 %v1902_v16  ;;  %v2247_v39 = vld [vmem:[%s2692_s18 + $0x194] sm:$0xf0]  ;;  %v1941_v43 = vld [vmem:[%s2692_s18 + $0x80] sm:$0xf]  ;;  %v2213_v44 = vld [vmem:[%s2692_s18 + $0x84] sm:$0xf0]  ;;  %v2014_v46 = vor.u32 %v2231_v37, %v2013_v36  ;;  %v1878_v59 = vor.u32 %v2197_v42, %v1877_v40 }
  0x94   : > { %1239 = vmatpush.bf16.msra.mxu1 %v1966_v17  ;;  %v2005_v47 = vld [vmem:[%s2692_s18 + $0x100] sm:$0xf]  ;;  %v2229_v48 = vld [vmem:[%s2692_s18 + $0x104] sm:$0xf0]  ;;  %v2078_v50 = vor.u32 %v2247_v39, %v2077_v38  ;;  %v2188_v53 = vld [vmem:[%s3183_s0 + $0x10] sm:$0xf0]  ;;  %v1942_v63 = vor.u32 %v2213_v44, %v1941_v43 }
  0x95   : > { %1258 = vmatpush.bf16.msra.mxu2 %v2030_v18  ;;  %v2069_v49 = vld [vmem:[%s2692_s18 + $0x180] sm:$0xf]  ;;  %v2245_v51 = vld [vmem:[%s2692_s18 + $0x184] sm:$0xf0]  ;;  %v2186_v54 = vld [vmem:[%s3183_s0 + $0x4] sm:$0xf]  ;;  %v2006_v0 = vor.u32 %v2229_v48, %v2005_v47 }
  0x96   : > { %1277 = vmatpush.bf16.msra.mxu3 %v2094_v22  ;;  %v1837_v52 = vld [vmem:[%s3183_s0] sm:$0xf]  ;;  %v1839_v55 = vld [vmem:[%s3183_s0 + $0x14] sm:$0xf0]  ;;  %v1845_v56 = vld [vmem:[%s3183_s0 + $0x8] sm:$0xf]  ;;  %v2070_v4 = vor.u32 %v2245_v51, %v2069_v49 }
  0x97   : > { %1221 = vmatpush.bf16.msra.mxu0 %v1894_v28  ;;  %v2226_v57 = vld [vmem:[%s2692_s18 + $0xf4] sm:$0xf]  ;;  %v1999_v58 = vld [vmem:[%s2692_s18 + $0xf8] sm:$0xf0]  ;;  %v2187_v1 = vld [vmem:[%s3183_s0 + $0xc] sm:$0xf]  ;;  %v2790_v9 = vor.u32 %v2188_v53, %v1837_v52  ;;  %v2794_v13 = vor.u32 %v2186_v54, %v1839_v55 }
  0x98   : > { %1240 = vmatpush.bf16.msra.mxu1 %v1958_v29  ;;  %v2189_v60 = vld [vmem:[%s3183_s0 + $0x18] sm:$0xf0]  ;;  %v2210_v61 = vld [vmem:[%s2692_s18 + $0x74] sm:$0xf]  ;;  %v1847_v2 = vld [vmem:[%s3183_s0 + $0x1c] sm:$0xf0]  ;;  %v2002_v5 = vor.u32 %v2226_v57, %v1999_v58 }
  0x99   : > { %1259 = vmatpush.bf16.msra.mxu2 %v2022_v30  ;;  %v1935_v62 = vld [vmem:[%s2692_s18 + $0x78] sm:$0xf0]  ;;  %v2242_v3 = vld [vmem:[%s2692_s18 + $0x174] sm:$0xf]  ;;  %v2157_v7 = vld [vmem:[%s2692_s18 + $0x230] sm:$0xf]  ;;  %v2796_v14 = vor.u32 %v2189_v60, %v1845_v56  ;;  %v2800_v18 = vor.u32 %v2187_v1, %v1847_v2 }
  0x9a   : > { %1278 = vmatpush.bf16.msra.mxu3 %v2086_v34  ;;  %v2063_v6 = vld [vmem:[%s2692_s18 + $0x178] sm:$0xf0]  ;;  %v2267_v8 = vld [vmem:[%s2692_s18 + $0x234] sm:$0xf0]  ;;  %v1938_v10 = vor.u32 %v2210_v61, %v1935_v62  ;;  %v2224_v11 = vld [vmem:[%s2692_s18 + $0xe4] sm:$0xf] }
  0x9b   : > { %1222 = vmatpush.bf16.msra.mxu0 %v1886_v41  ;;  %v1991_v12 = vld [vmem:[%s2692_s18 + $0xe8] sm:$0xf0]  ;;  %v2208_v15 = vld [vmem:[%s2692_s18 + $0x64] sm:$0xf]  ;;  %v2425_v17 = vmov 0   ;;  %v2158_v19 = vor.u32 %v2267_v8, %v2157_v7  ;;  %v2066_v20 = vor.u32 %v2242_v3, %v2063_v6  ;;  %v777_v61 = vld [vmem:[%s3174_s2 + $0x10] sm:$0xff] }
  0x9c   : > { %1241 = vmatpush.bf16.msra.mxu1 %v1950_v45  ;;  %v1927_v16 = vld [vmem:[%s2692_s18 + $0x68] sm:$0xf0]  ;;  %2327 = vset.pattern.permute.xlu0 %v2425_v17  ;;  %v1994_v21 = vor.u32 %v2224_v11, %v1991_v12  ;;  %v2240_v22 = vld [vmem:[%s2692_s18 + $0x164] sm:$0xf]  ;;  %v2149_v23 = vld [vmem:[%s2692_s18 + $0x220] sm:$0xf] }
  0x9d   : > { %1260 = vmatpush.bf16.msra.mxu2 %v2014_v46  ;;  %v2265_v24 = vld [vmem:[%s2692_s18 + $0x224] sm:$0xf0]  ;;  %v1930_v25 = vor.u32 %v2208_v15, %v1927_v16  ;;  %v2055_v26 = vld [vmem:[%s2692_s18 + $0x168] sm:$0xf0]  ;;  %v2222_v27 = vld [vmem:[%s2692_s18 + $0xd4] sm:$0xf]  ;;  %2328 = vset.pattern.permute.xlu1 %v2425_v17 }
  0x9e   : > { %1279 = vmatpush.bf16.msra.mxu3 %v2078_v50  ;;  %v1983_v28 = vld [vmem:[%s2692_s18 + $0xd8] sm:$0xf0]  ;;  %v2206_v29 = vld [vmem:[%s2692_s18 + $0x54] sm:$0xf]  ;;  %v775_v31 = vld [vmem:[%s3174_s2] sm:$0xff]  ;;  %v2150_v32 = vor.u32 %v2265_v24, %v2149_v23  ;;  %v2058_v33 = vor.u32 %v2240_v22, %v2055_v26  ;;  %791 = vperm.xlu1 %2328, %v777_v61   ;;  %vm1209_vm0 = vcmask 523264  }
  0x9f   : > { %1223 = vmatpush.bf16.msra.mxu0 %v1878_v59  ;;  %v1919_v30 = vld [vmem:[%s2692_s18 + $0x58] sm:$0xf0]  ;;  %v1986_v34 = vor.u32 %v2222_v27, %v1983_v28  ;;  %v2238_v35 = vld [vmem:[%s2692_s18 + $0x154] sm:$0xf]  ;;  %781 = vperm.xlu0 %2327, %v775_v31   ;;  %v2220_v38 = vld [vmem:[%s2692_s18 + $0xc4] sm:$0xf] }
  0xa0   : > { %1242 = vmatpush.bf16.msra.mxu1 %v1942_v63  ;;  %v1922_v36 = vor.u32 %v2206_v29, %v1919_v30  ;;  %v2047_v37 = vld [vmem:[%s2692_s18 + $0x158] sm:$0xf0]  ;;  %v1975_v39 = vld [vmem:[%s2692_s18 + $0xc8] sm:$0xf0]  ;;  %v2204_v40 = vld [vmem:[%s2692_s18 + $0x44] sm:$0xf] }
  0xa1   : > { %1261 = vmatpush.bf16.msra.mxu2 %v2006_v0  ;;  %v1911_v41 = vld [vmem:[%s2692_s18 + $0x48] sm:$0xf0]  ;;  %v2236_v42 = vld [vmem:[%s2692_s18 + $0x144] sm:$0xf]  ;;  %v2141_v44 = vld [vmem:[%s2692_s18 + $0x210] sm:$0xf]  ;;  %v2050_v45 = vor.u32 %v2238_v35, %v2047_v37  ;;  %v1978_v46 = vor.u32 %v2220_v38, %v1975_v39 }
  0xa2   : > { %1280 = vmatpush.bf16.msra.mxu3 %v2070_v4  ;;  %1224 = vmatmul.bf16.vlgmr.msra.gmra.mxu0 %v2790_v9  ;;  %v2039_v43 = vld [vmem:[%s2692_s18 + $0x148] sm:$0xf0]  ;;  %v1857_v47 = vld [vmem:[%s3183_s0 + $0x28] sm:$0xf]  ;;  %v2193_v48 = vld [vmem:[%s3183_s0 + $0x38] sm:$0xf0]  ;;  %v1914_v50 = vor.u32 %v2204_v40, %v1911_v41 }
  0xa3   : > { %1243 = vmatmul.bf16.vlgmr.msra.gmra.mxu1 %v2794_v13  ;;  %1296 = vmatpush.bf16.msrb.mxu0 %v2158_v19  ;;  %v2263_v49 = vld [vmem:[%s2692_s18 + $0x214] sm:$0xf0]  ;;  %v2191_v51 = vld [vmem:[%s3183_s0 + $0x2c] sm:$0xf]  ;;  %v1859_v52 = vld [vmem:[%s3183_s0 + $0x3c] sm:$0xf0]  ;;  %v2042_v1 = vor.u32 %v2236_v42, %v2039_v43  ;;  %v2865_v7 = vor.u32 %v2193_v48, %v1857_v47 }
  0xa4   : > { %1311 = vmatpush.bf16.msrb.mxu1 %v1938_v10  ;;  %1262 = vmatmul.bf16.vlgmr.msra.gmra.mxu2 %v2796_v14  ;;  %v1865_v53 = vld [vmem:[%s3183_s0 + $0x30] sm:$0xf]  ;;  %v2194_v54 = vld [vmem:[%s3183_s0 + $0x40] sm:$0xf0]  ;;  %v2218_v55 = vld [vmem:[%s2692_s18 + $0xb4] sm:$0xf]  ;;  %v2142_v58 = vor.u32 %v2263_v49, %v2141_v44  ;;  %v2870_v15 = vor.u32 %v2191_v51, %v1859_v52 }
  0xa5   : > { %1330 = vmatpush.bf16.msrb.mxu2 %v2002_v5  ;;  %1281 = vmatmul.bf16.vlgmr.msra.gmra.mxu3 %v2800_v18  ;;  %v1967_v56 = vld [vmem:[%s2692_s18 + $0xb8] sm:$0xf0]  ;;  %v2202_v57 = vld [vmem:[%s2692_s18 + $0x34] sm:$0xf]  ;;  %v776_v60 = vld [vmem:[%s3174_s2 + $0x8] sm:$0xff]  ;;  %v2872_v16 = vor.u32 %v2194_v54, %v1865_v53 }
  0xa6   : > { %1349 = vmatpush.bf16.msrb.mxu3 %v2066_v20  ;;  %v1903_v59 = vld [vmem:[%s2692_s18 + $0x38] sm:$0xf0]  ;;  %v2192_v62 = vld [vmem:[%s3183_s0 + $0x34] sm:$0xf]  ;;  %v2133_v63 = vld [vmem:[%s2692_s18 + $0x200] sm:$0xf]  ;;  %v1970_v3 = vor.u32 %v2218_v55, %v1967_v56 }
  0xa7   : > { %1297 = vmatpush.bf16.msrb.mxu0 %v2150_v32  ;;  %v2261_v0 = vld [vmem:[%s2692_s18 + $0x204] sm:$0xf0]  ;;  %v2234_v4 = vld [vmem:[%s2692_s18 + $0x134] sm:$0xf]  ;;  %v2031_v5 = vld [vmem:[%s2692_s18 + $0x138] sm:$0xf0]  ;;  %v1906_v8 = vor.u32 %v2202_v57, %v1903_v59  ;;  %786 = vperm.xlu0 %2327, %v776_v60  }
  0xa8   : > { %1312 = vmatpush.bf16.msrb.mxu1 %v1930_v25  ;;  %v1867_v2 = vld [vmem:[%s3183_s0 + $0x44] sm:$0xf0]  ;;  %v2134_v6 = vor.u32 %v2261_v0, %v2133_v63  ;;  %v2216_v10 = vld [vmem:[%s2692_s18 + $0xa4] sm:$0xf]  ;;  %v1959_v11 = vld [vmem:[%s2692_s18 + $0xa8] sm:$0xf0]  ;;  %v2034_v23 = vor.u32 %v2234_v4, %v2031_v5 }
  0xa9   : > { %1331 = vmatpush.bf16.msrb.mxu2 %v1994_v21  ;;  %v2200_v12 = vld [vmem:[%s2692_s18 + $0x24] sm:$0xf]  ;;  %v1895_v17 = vld [vmem:[%s2692_s18 + $0x28] sm:$0xf0]  ;;  %v2258_v19 = vld [vmem:[%s2692_s18 + $0x1f4] sm:$0xf]  ;;  %v2877_v21 = vor.u32 %v2192_v62, %v1867_v2  ;;  %v1962_v24 = vor.u32 %v2216_v10, %v1959_v11 }
  0xaa   : > { %1350 = vmatpush.bf16.msrb.mxu3 %v2058_v33  ;;  %v2127_v20 = vld [vmem:[%s2692_s18 + $0x1f8] sm:$0xf0]  ;;  %v2232_v25 = vld [vmem:[%s2692_s18 + $0x124] sm:$0xf]  ;;  %v2119_v27 = vld [vmem:[%s2692_s18 + $0x1e8] sm:$0xf0]  ;;  %v1898_v28 = vor.u32 %v2200_v12, %v1895_v17 }
  0xab   : > { %1298 = vmatpush.bf16.msrb.mxu0 %v2142_v58  ;;  %v2130_v22 = vor.u32 %v2258_v19, %v2127_v20  ;;  %v2256_v26 = vld [vmem:[%s2692_s18 + $0x1e4] sm:$0xf]  ;;  %v2023_v29 = vld [vmem:[%s2692_s18 + $0x128] sm:$0xf0]  ;;  %v2214_v30 = vld [vmem:[%s2692_s18 + $0x94] sm:$0xf] }
  0xac   : > { %1313 = vmatpush.bf16.msrb.mxu1 %v1922_v36  ;;  %v1951_v31 = vld [vmem:[%s2692_s18 + $0x98] sm:$0xf0]  ;;  %v2198_v32 = vld [vmem:[%s2692_s18 + $0x14] sm:$0xf]  ;;  %v2122_v35 = vor.u32 %v2256_v26, %v2119_v27  ;;  %v2026_v36 = vor.u32 %v2232_v25, %v2023_v29  ;;  %v2212_v43 = vld [vmem:[%s2692_s18 + $0x84] sm:$0xf] }
  0xad   : > { %1332 = vmatpush.bf16.msrb.mxu2 %v1986_v34  ;;  %v1887_v33 = vld [vmem:[%s2692_s18 + $0x18] sm:$0xf0]  ;;  %v1954_v37 = vor.u32 %v2214_v30, %v1951_v31  ;;  %v2230_v38 = vld [vmem:[%s2692_s18 + $0x114] sm:$0xf]  ;;  %v1943_v44 = vld [vmem:[%s2692_s18 + $0x88] sm:$0xf0] }
  0xae   : > { %1351 = vmatpush.bf16.msrb.mxu3 %v2050_v45  ;;  %v778_v34 = vld [vmem:[%s3174_s2 + $0x18] sm:$0xff]  ;;  %v2254_v39 = vld [vmem:[%s2692_s18 + $0x1d4] sm:$0xf]  ;;  %v1890_v41 = vor.u32 %v2198_v32, %v1887_v33  ;;  %v2196_v45 = vld [vmem:[%s2692_s18 + $0x4] sm:$0xf]  ;;  %v1946_v51 = vor.u32 %v2212_v43, %v1943_v44 }
  0xaf   : > { %1299 = vmatpush.bf16.msrb.mxu0 %v2134_v6  ;;  %v2111_v40 = vld [vmem:[%s2692_s18 + $0x1d8] sm:$0xf0]  ;;  %796 = vperm.xlu1 %2328, %v778_v34   ;;  %v2266_v47 = vld [vmem:[%s2692_s18 + $0x234] sm:$0xf]  ;;  %v2252_v52 = vld [vmem:[%s2692_s18 + $0x1c4] sm:$0xf] }
  0xb0   : > { %1314 = vmatpush.bf16.msrb.mxu1 %v1914_v50  ;;  %v2015_v42 = vld [vmem:[%s2692_s18 + $0x118] sm:$0xf0]  ;;  %v2114_v49 = vor.u32 %v2254_v39, %v2111_v40  ;;  %v2103_v53 = vld [vmem:[%s2692_s18 + $0x1c8] sm:$0xf0]  ;;  %v2228_v55 = vld [vmem:[%s2692_s18 + $0x104] sm:$0xf] }
  0xb1   : > { %1333 = vmatpush.bf16.msrb.mxu2 %v1978_v46  ;;  %v1879_v46 = vld [vmem:[%s2692_s18 + $0x8] sm:$0xf0]  ;;  %v2159_v48 = vld [vmem:[%s2692_s18 + $0x238] sm:$0xf0]  ;;  %v2018_v50 = vor.u32 %v2230_v38, %v2015_v42  ;;  %v1853_v57 = vld [vmem:[%s3183_s0 + $0x10] sm:$0xf]  ;;  %v2106_v60 = vor.u32 %v2252_v52, %v2103_v53 }
  0xb2   : > { %1352 = vmatpush.bf16.msrb.mxu3 %v2042_v1  ;;  %1229 = vmatmul.bf16.gmra.mxu0 %v2865_v7  ;;  %v1882_v54 = vor.u32 %v2196_v45, %v1879_v46  ;;  %v2007_v56 = vld [vmem:[%s2692_s18 + $0x108] sm:$0xf0]  ;;  %v2190_v58 = vld [vmem:[%s3183_s0 + $0x20] sm:$0xf0]  ;;  %v2162_v59 = vor.u32 %v2266_v47, %v2159_v48  ;;  %v2250_v1 = vld [vmem:[%s2692_s18 + $0x1b4] sm:$0xf] }
  0xb3   : > { %1248 = vmatmul.bf16.gmra.mxu1 %v2870_v15  ;;  %1368 = vmatpush.bf16.msra.mxu0 %v2130_v22  ;;  %v2010_v61 = vor.u32 %v2228_v55, %v2007_v56  ;;  %v2264_v62 = vld [vmem:[%s2692_s18 + $0x224] sm:$0xf]  ;;  %v1854_v63 = vor.u32 %v2190_v58, %v1853_v57  ;;  %v2151_v0 = vld [vmem:[%s2692_s18 + $0x228] sm:$0xf0]  ;;  %v2095_v2 = vld [vmem:[%s2692_s18 + $0x1b8] sm:$0xf0] }
  0xb4   : > { %1315 = vmatpush.bf16.msrb.mxu1 %v1906_v8  ;;  %1267 = vmatmul.bf16.gmra.mxu2 %v2872_v16  ;;  %v2098_v4 = vor.u32 %v2250_v1, %v2095_v2  ;;  %v2262_v5 = vld [vmem:[%s2692_s18 + $0x214] sm:$0xf]  ;;  %v2143_v6 = vld [vmem:[%s2692_s18 + $0x218] sm:$0xf0]  ;;  %v2248_v8 = vld [vmem:[%s2692_s18 + $0x1a4] sm:$0xf] }
  0xb5   : > { %1334 = vmatpush.bf16.msrb.mxu2 %v1970_v3  ;;  %1286 = vmatmul.bf16.gmra.mxu3 %v2877_v21  ;;  %v2154_v3 = vor.u32 %v2264_v62, %v2151_v0  ;;  %v2087_v10 = vld [vmem:[%s2692_s18 + $0x1a8] sm:$0xf0]  ;;  %v2146_v11 = vor.u32 %v2262_v5, %v2143_v6  ;;  %v2246_v17 = vld [vmem:[%s2692_s18 + $0x194] sm:$0xf]  ;;  %v2079_v19 = vld [vmem:[%s2692_s18 + $0x198] sm:$0xf0] }
  0xb6   : > { %1353 = vmatpush.bf16.msrb.mxu3 %v2034_v23  ;;  %v2090_v12 = vor.u32 %v2248_v8, %v2087_v10  ;;  %v2260_v20 = vld [vmem:[%s2692_s18 + $0x204] sm:$0xf]  ;;  %v2082_v23 = vor.u32 %v2246_v17, %v2079_v19  ;;  %v2195_v25 = vld [vmem:[%s3183_s0 + $0x48] sm:$0xf0] }
  0xb7   : > { %1369 = vmatpush.bf16.msra.mxu0 %v2122_v35 }
  0xb8   : > { %1316 = vmatpush.bf16.msrb.mxu1 %v1898_v28 }
  0xb9   : > { %1335 = vmatpush.bf16.msrb.mxu2 %v1962_v24  ;;  %v1873_v24 = vld [vmem:[%s3183_s0 + $0x38] sm:$0xf] }
  0xba   : > { %1354 = vmatpush.bf16.msrb.mxu3 %v2026_v36  ;;  %v1874_v27 = vor.u32 %v2195_v25, %v1873_v24 }
  0xbb   : > { %1370 = vmatpush.bf16.msra.mxu0 %v2114_v49 }
  0xbc   : > { %1317 = vmatpush.bf16.msrb.mxu1 %v1890_v41 }
  0xbd   : > { %1336 = vmatpush.bf16.msrb.mxu2 %v1954_v37 }
  0xbe   : > { %1355 = vmatpush.bf16.msrb.mxu3 %v2018_v50 }
  0xbf   : > { %1371 = vmatpush.bf16.msra.mxu0 %v2106_v60 }
  0xc0   : > { %1318 = vmatpush.bf16.msrb.mxu1 %v1882_v54 }
  0xc1   : > { %1337 = vmatpush.bf16.msrb.mxu2 %v1946_v51 }
  0xc2   : > { %1356 = vmatpush.bf16.msrb.mxu3 %v2010_v61  ;;  %2163 = vmatmul.msk.bf16.vlgmr.msrb.gmra.mxu0 %vm1209_vm0, %v1854_v63 }
  0xc3   : > { %1319 = vmatmul.bf16.vlgmr.msrb.gmra.mxu1 %v2790_v9  ;;  %1372 = vmatpush.bf16.msra.mxu0 %v2098_v4 }
  0xc4   : > { %1391 = vmatpush.bf16.msra.mxu1 %v2162_v59  ;;  %1338 = vmatmul.bf16.vlgmr.msrb.gmra.mxu2 %v2794_v13  ;;  %v2244_v13 = vld [vmem:[%s2692_s18 + $0x184] sm:$0xf] }
  0xc5   : > { %2270 = vmatpush.bf16.msra.mxu2 %v2130_v22  ;;  %1357 = vmatmul.bf16.vlgmr.msrb.gmra.mxu3 %v2796_v14  ;;  %v2135_v22 = vld [vmem:[%s2692_s18 + $0x208] sm:$0xf0] }
  0xc6   : > { %2278 = vmatpush.bf16.msra.mxu3 %v2162_v59  ;;  %v2138_v9 = vor.u32 %v2260_v20, %v2135_v22  ;;  %v2071_v14 = vld [vmem:[%s2692_s18 + $0x188] sm:$0xf0]  ;;  %s2955_s18 = sshll.u32 %s2689_s7, 6 }
  0xc7   : > { %1373 = vmatpush.bf16.msra.mxu0 %v2090_v12  ;;  %v2074_v26 = vor.u32 %v2244_v13, %v2071_v14  ;;  %s2959_s14 = scalar_lea.vmem [#allocation5], %s2955_s18  ;;  %s2986_s15 = scalar_lea.vmem [#allocation4], %s2955_s18 }
  0xc8   : > { %1392 = vmatpush.bf16.msra.mxu1 %v2154_v3  ;;  %v1422_v24 = vld [vmem:[%s2986_s15] sm:$0xff]  ;;  %s2996_s16 = scalar_lea.vmem [#allocation3], %s2955_s18  ;;  %s3023_s17 = scalar_lea.vmem [#allocation7], %s2955_s18 }
  0xc9   : > { %2271 = vmatpush.bf16.msra.mxu2 %v2122_v35  ;;  %s1647_s28 = sshll.u32 %s2959_s14, 4  ;;  %s3077_s28 = int_to_ptr.vmem [resolvable:$true] %s1647_s28 }
  0xca   : > { %2279 = vmatpush.bf16.msra.mxu3 %v2154_v3 }
  0xcb   : > { %1374 = vmatpush.bf16.msra.mxu0 %v2082_v23 }
  0xcc   : > { %1393 = vmatpush.bf16.msra.mxu1 %v2146_v11 }
  0xcd   : > { %2272 = vmatpush.bf16.msra.mxu2 %v2114_v49 }
  0xce   : > { %2280 = vmatpush.bf16.msra.mxu3 %v2146_v11 }
  0xcf   : > { %1375 = vmatpush.bf16.msra.mxu0 %v2074_v26 }
  0xd0   : > { %1394 = vmatpush.bf16.msra.mxu1 %v2138_v9 }
  0xd1   : > { %2273 = vmatpush.bf16.msra.mxu2 %v2106_v60 }
  0xd2   : > { %2281 = vmatpush.bf16.msra.mxu3 %v2138_v9  ;;  %2164 = vmatmul.msk.bf16.gmra.mxu0 %vm1209_vm0, %v1874_v27 }
  0xd3   : > { %1324 = vmatmul.bf16.gmra.mxu1 %v2865_v7 }
  0xd4   : > { %1343 = vmatmul.bf16.gmra.mxu2 %v2870_v15 }
  0xd5   : > { %2274 = vmatpush.bf16.msra.mxu2 %v2098_v4  ;;  %1362 = vmatmul.bf16.gmra.mxu3 %v2872_v16 }
  0xd9   : > { %2275 = vmatpush.bf16.msra.mxu2 %v2090_v12 }
  0xdd   : > { %2276 = vmatpush.bf16.msra.mxu2 %v2082_v23 }
  0xe1   : > { %2277 = vmatpush.bf16.msra.mxu2 %v2074_v26 }
  0xe2   : > { %1376 = vmatmul.bf16.vlgmr.msra.gmra.mxu0 %v2800_v18 }
  0xe3   : > { %2165 = vmatmul.msk.bf16.vlgmr.msra.gmra.mxu1 %vm1209_vm0, %v1854_v63 }
  0xe4   : > { %1381 = vmatmul.bf16.vlgmr.msra.gmra.mxu2 %v2877_v21 }
  0xe5   : > { %2166 = vmatmul.msk.bf16.vlgmr.msra.gmra.mxu3 %vm1209_vm0, %v1874_v27 }
 0x110   : > { %v2952_v44 = vpop.permute.xlu1 %791 }
 0x111   : > { %v2946_v15 = vpop.permute.xlu0 %781 }
 0x119   : > { %v2949_v40 = vpop.permute.xlu0 %786 }
 0x11f   : > { %v1225_v28 = vpop.f32.mrf.mxu0 }
 0x120   : > { %v1244_v29 = vpop.f32.mrf.mxu1  ;;  %v1226_v18 = vadd.f32 %v1225_v28, %v2946_v15 }
 0x121   : > { %v2966_v62 = vpop.permute.xlu1 %796 }
 0x122   : > { %v1245_v21 = vadd.f32 %v1244_v29, %v1226_v18 }
 0x127   : > { %v1263_v30 = vpop.f32.mrf.mxu2  ;;  %v1227_v7 = vpop.f32.mrf.mxu0 }
 0x128   : > { %v1282_v31 = vpop.f32.mrf.mxu3  ;;  %v1246_v32 = vpop.f32.mrf.mxu1  ;;  %v1264_v41 = vadd.f32 %v1263_v30, %v1245_v21  ;;  %v1228_v42 = vadd.f32 %v1227_v7, %v2949_v40 }
 0x12a   : > { %v1283_v43 = vadd.f32 %v1282_v31, %v1264_v41  ;;  %v1247_v48 = vadd.f32 %v1246_v32, %v1228_v42  ;;  %v1424_v42 = vld [vmem:[%s2986_s15 + $0x10] sm:$0xff] }
 0x12f   : > { %v1265_v16 = vpop.f32.mrf.mxu2  ;;  %v1230_v34 = vpop.f32.mrf.mxu0 }
 0x130   : > { %v1284_v33 = vpop.f32.mrf.mxu3  ;;  %v1249_v35 = vpop.f32.mrf.mxu1  ;;  %v1266_v51 = vadd.f32 %v1265_v16, %v1247_v48  ;;  %v1231_v52 = vadd.f32 %v1230_v34, %v2952_v44 }
 0x132   : > { %v1285_v55 = vadd.f32 %v1284_v33, %v1266_v51  ;;  %v1250_v56 = vadd.f32 %v1249_v35, %v1231_v52  ;;  %v1438_v33 = vld [vmem:[%s2996_s16] sm:$0xff] }
 0x137   : > { %v1268_v36 = vpop.f32.mrf.mxu2  ;;  %v1232_v38 = vpop.f32.mrf.mxu0 }
 0x138   : > { %v1287_v37 = vpop.f32.mrf.mxu3  ;;  %v1251_v39 = vpop.f32.mrf.mxu1  ;;  %v1269_v63 = vadd.f32 %v1268_v36, %v1250_v56  ;;  %v1233_v2 = vadd.f32 %v1232_v38, %v2966_v62 }
 0x13a   : > { %v1288_v5 = vadd.f32 %v1287_v37, %v1269_v63  ;;  %v1252_v11 = vadd.f32 %v1251_v39, %v1233_v2 }
 0x13f   : > { %v1270_v45 = vpop.f32.mrf.mxu2  ;;  %v1301_v47 = vpop.f32.mrf.mxu0 }
 0x140   : > { %v1289_v46 = vpop.f32.mrf.mxu3  ;;  %v1302_v49 = vadd.f32 %v1301_v47, %v1283_v43  ;;  %v1320_v50 = vpop.f32.mrf.mxu1  ;;  %v1271_v19 = vadd.f32 %v1270_v45, %v1252_v11 }
 0x141   : > { %v1321_v27 = vadd.f32 %v1320_v50, %v2946_v15 }
 0x142   : > { %v1406_v53 = vmax.f32 %v1302_v49, 0.0  ;;  %v1290_v14 = vadd.f32 %v1289_v46, %v1271_v19 }
 0x144   : > { %1414 = vst [vmem:[%s2959_s14] sm:$0xff] %v1406_v53  ;;  %v2167_v54 = vmul.f32 -1.442695, %v1406_v53  ;;  %v1430_v32 = vadd.f32 %v1422_v24, %v1406_v53 }
 0x146   : > { %2329 = vpow2.f32 %v2167_v54  ;;  %v1446_v39 = vmul.f32 %v1438_v33, %v1430_v32 }
 0x147   : > { %v1339_v57 = vpop.f32.mrf.mxu2  ;;  %v1303_v59 = vpop.f32.mrf.mxu0 }
 0x148   : > { %v2962_v58 = vpop.f32.mrf.mxu3  ;;  %v1304_v60 = vadd.f32 %v1303_v59, %v1285_v55  ;;  %v2964_v61 = vpop.f32.mrf.mxu1  ;;  %v1340_v18 = vadd.f32 %v1339_v57, %v1321_v27 }
 0x149   : > { %v1323_v51 = vadd.f32 %v2964_v61, %v2949_v40  ;;  %v1440_v61 = vld [vmem:[%s2996_s16 + $0x10] sm:$0xff] }
 0x14a   : > { %v2968_v0 = vmax.f32 %v1304_v60, 0.0  ;;  %v1359_v50 = vadd.f32 %v2962_v58, %v1340_v18 }
 0x14c   : > { %v2330_v1 = vpop.eup %2329  ;;  %1416 = vst [vmem:[%s2959_s14 + $0x10] sm:$0xff] %v2968_v0  ;;  %v2169_v3 = vmul.f32 -1.442695, %v2968_v0  ;;  %v1432_v55 = vadd.f32 %v1424_v42, %v2968_v0 }
 0x14d   : > { %v1478_v4 = vadd.f32 1.0, %v2330_v1 }
 0x14e   : > { %2331 = vpow2.f32 %v2169_v3  ;;  %v1426_v3 = vld [vmem:[%s2986_s15 + $0x20] sm:$0xff] }
 0x14f   : > { %v2974_v6 = vpop.f32.mrf.mxu2  ;;  %2333 = vrcp.f32 %v1478_v4  ;;  %v1306_v10 = vpop.f32.mrf.mxu0  ;;  %v1497_v16 = vand.u32 2147483648, %v1478_v4  ;;  %v1495_v15 = vand.u32 2147483647, %v1478_v4  ;;  %vm1491_vm2 = vweird.f32 %v1478_v4 }
 0x150   : > { %v2976_v8 = vpop.f32.mrf.mxu3  ;;  %v1307_v12 = vadd.f32 %v1306_v10, %v1288_v5  ;;  %v1325_v17 = vpop.f32.mrf.mxu1  ;;  %v1342_v59 = vadd.f32 %v2974_v6, %v1323_v51  ;;  %v1448_v5 = vmul.f32 %v1440_v61, %v1432_v55 }
 0x151   : > { %v1498_v41 = vor.u32 1.1754944e-38, %v1497_v16  ;;  %vm1496_vm4 = vcmp.eq.f32.partialorder %v1495_v15, 8.507059e+37  ;;  %v1326_v47 = vadd.f32 %v1325_v17, %v2952_v44 }
 0x152   : > { %v2978_v20 = vmax.f32 %v1307_v12, 0.0  ;;  %v1361_v10 = vadd.f32 %v2976_v8, %v1342_v59 }
 0x154   : > { %v2332_v22 = vpop.eup %2331  ;;  %1418 = vst [vmem:[%s2959_s14 + $0x20] sm:$0xff] %v2978_v20  ;;  %v2171_v23 = vmul.f32 -1.442695, %v2978_v20 }
 0x155   : > { %v2334_v9 = vpop.eup %2333  ;;  %v2983_v13 = vadd.f32 1.0, %v2332_v22 }
 0x156   : > { %v1487_v25 = vmul.f32 %v2334_v9, %v1478_v4  ;;  %2335 = vpow2.f32 %v2171_v23  ;;  %vm1492_vm1 = vweird.f32 %v2334_v9 }
 0x157   : > { %v1344_v26 = vpop.f32.mrf.mxu2  ;;  %2337 = vrcp.f32 %v2983_v13  ;;  %v1308_v29 = vpop.f32.mrf.mxu0  ;;  %vm1493_vm3 = vmor %vm1491_vm2, %vm1492_vm1  ;;  %v1525_v57 = vand.u32 2147483647, %v2983_v13  ;;  %v1527_v58 = vand.u32 2147483648, %v2983_v13  ;;  %vm1521_vm6 = vweird.f32 %v2983_v13 }
 0x158   : > { %v2991_v28 = vpop.f32.mrf.mxu3  ;;  %v1488_v30 = vsub.f32 1.0, %v1487_v25  ;;  %v1309_v31 = vadd.f32 %v1308_v29, %v1290_v14  ;;  %v2993_v7 = vpop.f32.mrf.mxu1  ;;  %v1345_v1 = vadd.f32 %v1344_v26, %v1326_v47 }
 0x159   : > { %v1528_v6 = vor.u32 1.1754944e-38, %v1527_v58  ;;  %vm1526_vm8 = vcmp.eq.f32.partialorder %v1525_v57, 8.507059e+37 }
 0x15a   : > { %v1489_v34 = vmul.f32 %v2334_v9, %v1488_v30  ;;  %v2999_v35 = vmax.f32 %v1309_v31, 0.0  ;;  %v1364_v22 = vadd.f32 %v2991_v28, %v1345_v1 }
 0x15c   : > { %v2336_v21 = vpop.eup %2335  ;;  %v1490_v36 = vadd.f32 %v2334_v9, %v1489_v34  ;;  %1420 = vst [vmem:[%s2959_s14 + $0x30] sm:$0xff] %v2999_v35  ;;  %v2173_v37 = vmul.f32 -1.442695, %v2999_v35  ;;  %v1442_v34 = vld [vmem:[%s2996_s16 + $0x20] sm:$0xff] }
 0x15d   : > { %v2338_v38 = vpop.eup %2337  ;;  %v3005_v43 = vadd.f32 1.0, %v2336_v21 }
 0x15e   : > { %v1494_v45 = vsel %vm1493_vm3, %v2334_v9, %v1490_v36  ;;  %v1517_v46 = vmul.f32 %v2338_v38, %v2983_v13  ;;  %vm1522_vm5 = vweird.f32 %v2338_v38  ;;  %v1434_v13 = vadd.f32 %v1426_v3, %v2978_v20 }
 0x15f   : > { %v3009_v48 = vpop.f32.mrf.mxu2  ;;  %v1499_v49 = vsel %vm1496_vm4, %v1498_v41, %v1494_v45  ;;  %2339 = vrcp.f32 %v3005_v43  ;;  %v1377_v53 = vpop.f32.mrf.mxu0  ;;  %vm1523_vm7 = vmor %vm1521_vm6, %vm1522_vm5  ;;  %v1555_v30 = vand.u32 2147483647, %v3005_v43  ;;  %v1557_v28 = vand.u32 2147483648, %v3005_v43 }
 0x160   : > { %v3015_v52 = vpop.f32.mrf.mxu3  ;;  %v1606_v54 = vmul.f32 %v1499_v49, %v1446_v39  ;;  %v1518_v56 = vsub.f32 1.0, %v1517_v46  ;;  %2341 = vpow2.f32 %v2173_v37  ;;  %v1396_v44 = vpop.f32.mrf.mxu1  ;;  %v1378_v40 = vadd.f32 %v1377_v53, %v1359_v50 }
 0x161   : > { %v1328_v20 = vadd.f32 %v2993_v7, %v2966_v62  ;;  %vm1551_vm10 = vweird.f32 %v3005_v43  ;;  %v1558_v62 = vor.u32 1.1754944e-38, %v1557_v28  ;;  %vm1556_vm12 = vcmp.eq.f32.partialorder %v1555_v30, 8.507059e+37 }
 0x162   : > { %v1614_v60 = vmax.f32 %v1606_v54, 0.0  ;;  %v1519_v63 = vmul.f32 %v2338_v38, %v1518_v56  ;;  %v1397_v2 = vadd.f32 %v1396_v44, %v1378_v40 }
 0x163   : > { %v1347_v36 = vadd.f32 %v3009_v48, %v1328_v20  ;;  %v1428_v48 = vld [vmem:[%s2986_s15 + $0x30] sm:$0xff] }
 0x164   : > { %1622 = vst [vmem:[%s3023_s17] sm:$0xff] %v1614_v60  ;;  %v1520_v0 = vadd.f32 %v2338_v38, %v1519_v63  ;;  %v3029_v11 = vmax.f32 %v1397_v2, 0.0  ;;  %v1436_v44 = vadd.f32 %v1428_v48, %v2999_v35  ;;  %v1444_v60 = vld [vmem:[%s2996_s16 + $0x30] sm:$0xff] }
 0x165   : > { %v2340_v4 = vpop.eup %2339  ;;  %v1366_v50 = vadd.f32 %v3015_v52, %v1347_v36 }
 0x166   : > { %v2342_v12 = vpop.eup %2341  ;;  %v1524_v17 = vsel %vm1523_vm7, %v2338_v38, %v1520_v0  ;;  %v1547_v19 = vmul.f32 %v2340_v4, %v3005_v43  ;;  %1415 = vst [vmem:[%s2959_s14 + $0x8] sm:$0xff] %v3029_v11  ;;  %v2168_v24 = vmul.f32 -1.442695, %v3029_v11  ;;  %vm1552_vm9 = vweird.f32 %v2340_v4 }
 0x167   : > { %v1382_v23 = vpop.f32.mrf.mxu2  ;;  %v1529_v9 = vsel %vm1526_vm8, %v1528_v6, %v1524_v17  ;;  %v3034_v14 = vadd.f32 1.0, %v2342_v12  ;;  %v1379_v8 = vpop.f32.mrf.mxu0  ;;  %vm1553_vm11 = vmor %vm1551_vm10, %vm1552_vm9  ;;  %v1450_v38 = vmul.f32 %v1442_v34, %v1434_v13  ;;  %v1452_v0 = vmul.f32 %v1444_v60, %v1436_v44 }
 0x168   : > { %v1608_v25 = vmul.f32 %v1529_v9, %v1448_v5  ;;  %v1548_v26 = vsub.f32 1.0, %v1547_v19  ;;  %v1383_v27 = vadd.f32 %v1382_v23, %v1364_v22  ;;  %v1380_v29 = vadd.f32 %v1379_v8, %v1361_v10  ;;  %v1401_v31 = vpop.f32.mrf.mxu3  ;;  %v1398_v33 = vpop.f32.mrf.mxu1 }
 0x169   : > { %2343 = vrcp.f32 %v3034_v14  ;;  %v1587_v52 = vand.u32 2147483648, %v3034_v14  ;;  %v1585_v59 = vand.u32 2147483647, %v3034_v14  ;;  %vm1581_vm14 = vweird.f32 %v3034_v14 }
 0x16a   : > { %v1616_v32 = vmax.f32 %v1608_v25, 0.0  ;;  %v1549_v16 = vmul.f32 %v2340_v4, %v1548_v26  ;;  %2345 = vpow2.f32 %v2168_v24  ;;  %v1402_v15 = vadd.f32 %v1401_v31, %v1383_v27 }
 0x16b   : > { %v1399_v18 = vadd.f32 %v1398_v33, %v1380_v29  ;;  %v1588_v1 = vor.u32 1.1754944e-38, %v1587_v52  ;;  %vm1586_vm0 = vcmp.eq.f32.partialorder %v1585_v59, 8.507059e+37 }
 0x16c   : > { %1624 = vst [vmem:[%s3023_s17 + $0x10] sm:$0xff] %v1616_v32  ;;  %v1550_v21 = vadd.f32 %v2340_v4, %v1549_v16  ;;  %v3052_v7 = vmax.f32 %v1402_v15, 0.0 }
 0x16d   : > { %v3054_v37 = vmax.f32 %v1399_v18, 0.0 }
 0x16e   : > { %v1554_v39 = vsel %vm1553_vm11, %v2340_v4, %v1550_v21  ;;  %1419 = vst [vmem:[%s2959_s14 + $0x28] sm:$0xff] %v3052_v7  ;;  %v2172_v43 = vmul.f32 -1.442695, %v3052_v7 }
 0x16f   : > { %v2344_v41 = vpop.eup %2343  ;;  %v1559_v42 = vsel %vm1556_vm12, %v1558_v62, %v1554_v39  ;;  %v1384_v45 = vpop.f32.mrf.mxu2  ;;  %1417 = vst [vmem:[%s2959_s14 + $0x18] sm:$0xff] %v3054_v37  ;;  %v2170_v51 = vmul.f32 -1.442695, %v3054_v37 }
 0x170   : > { %v2346_v46 = vpop.eup %2345  ;;  %v1610_v47 = vmul.f32 %v1559_v42, %v1450_v38  ;;  %v1577_v49 = vmul.f32 %v2344_v41, %v3034_v14  ;;  %2347 = vpow2.f32 %v2172_v43  ;;  %v1385_v56 = vadd.f32 %v1384_v45, %v1366_v50  ;;  %v1403_v57 = vpop.f32.mrf.mxu3 }
 0x171   : > { %v3070_v53 = vadd.f32 1.0, %v2346_v46  ;;  %2349 = vpow2.f32 %v2170_v51  ;;  %vm1582_vm13 = vweird.f32 %v2344_v41 }
 0x172   : > { %v1618_v54 = vmax.f32 %v1610_v47, 0.0  ;;  %v1578_v55 = vsub.f32 1.0, %v1577_v49  ;;  %v1404_v40 = vadd.f32 %v1403_v57, %v1385_v56  ;;  %vm1583_vm15 = vmor %vm1581_vm14, %vm1582_vm13 }
 0x173   : > { %2351 = vrcp.f32 %v3070_v53 }
 0x174   : > { %1626 = vst [vmem:[%s3023_s17 + $0x20] sm:$0xff] %v1618_v54  ;;  %v1579_v58 = vmul.f32 %v2344_v41, %v1578_v55  ;;  %v3084_v35 = vmax.f32 %v1404_v40, 0.0 }
 0x176   : > { %v1580_v61 = vadd.f32 %v2344_v41, %v1579_v58  ;;  %v2348_v63 = vpop.eup %2347  ;;  %1421 = vst [vmem:[%s2959_s14 + $0x38] sm:$0xff] %v3084_v35 }
 0x177   : > { %v2350_v2 = vpop.eup %2349  ;;  %v3086_v4 = vadd.f32 1.0, %v2348_v63 }
 0x178   : > { %v1584_v3 = vsel %vm1583_vm15, %v2344_v41, %v1580_v61  ;;  %v3090_v10 = vadd.f32 1.0, %v2350_v2 }
 0x179   : > { %v2352_v5 = vpop.eup %2351  ;;  %v1589_v6 = vsel %vm1586_vm0, %v1588_v1, %v1584_v3 }
 0x17a   : > { %2388 = shalt.err (!%p2385_p5)
}
 0x17b   : > { %s2426_s7 = smov 256   ;;  %s2427_s14 = smov 512   ;;  %v1612_v12 = vmul.f32 %v1589_v6, %v1452_v0  ;;  %v1423_v17 = vld [vmem:[%s2986_s15 + $0x8] sm:$0xff]  ;;  %v1502_v19 = vmul.f32 %v2352_v5, %v3070_v53  ;;  %2353 = vrcp.f32 %v3086_v4  ;;  %v2174_v22 = vmul.f32 -1.442695, %v3084_v35  ;;  %v1425_v30 = vld [vmem:[%s2986_s15 + $0x18] sm:$0xff] }
 0x17c   : > { %s2428_s0 = smov 16   ;;  %2355 = vrcp.f32 %v3090_v10  ;;  %v1431_v13 = vadd.f32 %v1423_v17, %v3029_v11  ;;  %v1512_v14 = vand.u32 2147483648, %v3070_v53  ;;  %vm1507_vm1 = vweird.f32 %v2352_v5  ;;  %v1439_v25 = vld [vmem:[%s2996_s16 + $0x8] sm:$0xff]  ;;  %v1441_v48 = vld [vmem:[%s2996_s16 + $0x18] sm:$0xff] }
 0x17d   : > { %2284 = dma.vmem_to_hbm [thread:$0]  (%p2506_p6), %s3077_s28, 1024, %s1650_s29, %s1631_s10, %s2426_s7, %s2427_s14, %s2428_s0   ;;  %v1620_v23 = vmax.f32 %v1612_v12, 0.0  ;;  %v1503_v9 = vsub.f32 1.0, %v1502_v19  ;;  %v1510_v8 = vand.u32 2147483647, %v3070_v53  ;;  %2357 = vpow2.f32 %v2174_v22 }
 0x17e   : > { %vm1506_vm2 = vweird.f32 %v3070_v53  ;;  %v1427_v29 = vld [vmem:[%s2986_s15 + $0x28] sm:$0xff]  ;;  %v1513_v20 = vor.u32 1.1754944e-38, %v1512_v14  ;;  %v1447_v31 = vmul.f32 %v1439_v25, %v1431_v13  ;;  %v1433_v18 = vadd.f32 %v1425_v30, %v3054_v37  ;;  %v1429_v63 = vld [vmem:[%s2986_s15 + $0x38] sm:$0xff]  ;;  %v1678_v13 = vld [vmem:[%s3023_s17 + $0x10] sm:$0xff] (%p2506_p6) }
 0x17f   : > { %1628 = vst [vmem:[%s3023_s17 + $0x30] sm:$0xff] %v1620_v23  ;;  %v1504_v24 = vmul.f32 %v2352_v5, %v1503_v9  ;;  %vm1508_vm3 = vmor %vm1506_vm2, %vm1507_vm1  ;;  %vm1511_vm4 = vcmp.eq.f32.partialorder %v1510_v8, 8.507059e+37  ;;  %v1435_v34 = vadd.f32 %v1427_v29, %v3052_v7  ;;  %v1570_v62 = vand.u32 2147483647, %v3086_v4  ;;  %v1443_v46 = vld [vmem:[%s2996_s16 + $0x28] sm:$0xff] }
 0x180   : > { %v1572_v38 = vand.u32 2147483648, %v3086_v4  ;;  %v1542_v42 = vand.u32 2147483648, %v3090_v10  ;;  %v1540_v37 = vand.u32 2147483647, %v3090_v10  ;;  %vm1566_vm7 = vweird.f32 %v3086_v4 }
 0x181   : > { %v2354_v26 = vpop.eup %2353  ;;  %v1505_v27 = vadd.f32 %v2352_v5, %v1504_v24  ;;  %vm1536_vm9 = vweird.f32 %v3090_v10  ;;  %v1451_v51 = vmul.f32 %v1443_v46, %v1435_v34  ;;  %vm1571_vm10 = vcmp.eq.f32.partialorder %v1570_v62, 8.507059e+37  ;;  %v1682_v24 = vld [vmem:[%s3023_s17 + $0x20] sm:$0xff] (%p2506_p6) }
 0x182   : > { %v2356_v28 = vpop.eup %2355  ;;  %v1562_v11 = vmul.f32 %v2354_v26, %v3086_v4  ;;  %vm1567_vm5 = vweird.f32 %v2354_v26  ;;  %v1573_v49 = vor.u32 1.1754944e-38, %v1572_v38  ;;  %v1543_v54 = vor.u32 1.1754944e-38, %v1542_v42 }
 0x183   : > { %v1509_v32 = vsel %vm1508_vm3, %v2352_v5, %v1505_v27  ;;  %v1532_v16 = vmul.f32 %v2356_v28, %v3090_v10  ;;  %v2358_v21 = vpop.eup %2357  ;;  %vm1537_vm6 = vweird.f32 %v2356_v28  ;;  %vm1568_vm8 = vmor %vm1566_vm7, %vm1567_vm5  ;;  %v1449_v56 = vmul.f32 %v1441_v48, %v1433_v18  ;;  %v1445_v5 = vld [vmem:[%s2996_s16 + $0x38] sm:$0xff]  ;;  %s1661_s16 = scalar_lea.vmem (%p2506_p6), %s3178_s6, %s3050_s19 }
 0x184   : > { %v1514_v33 = vsel %vm1511_vm4, %v1513_v20, %v1509_v32  ;;  %v1563_v15 = vsub.f32 1.0, %v1562_v11  ;;  %v1485_v43 = vadd.f32 1.0, %v2358_v21  ;;  %vm1538_vm11 = vmor %vm1536_vm9, %vm1537_vm6  ;;  %vm1541_vm12 = vcmp.eq.f32.partialorder %v1540_v37, 8.507059e+37  ;;  %1679 = vst [vmem:[%s1661_s16 + $0x20] sm:$0xff] (%p2506_p6), %v1678_v13 }
 0x185   : > { %v1607_v36 = vmul.f32 %v1514_v33, %v1447_v31  ;;  %v1533_v39 = vsub.f32 1.0, %v1532_v16  ;;  %v1437_v0 = vadd.f32 %v1429_v63, %v3084_v35  ;;  %v1674_v35 = vld [vmem:[%s3023_s17] sm:$0xff] (%p2506_p6)  ;;  %1683 = vst [vmem:[%s1661_s16 + $0x40] sm:$0xff] (%p2506_p6), %v1682_v24 }
 0x186   : > { %v1564_v41 = vmul.f32 %v2354_v26, %v1563_v15  ;;  %2359 = vrcp.f32 %v1485_v43  ;;  %v1602_v2 = vand.u32 2147483648, %v1485_v43  ;;  %v1600_v4 = vand.u32 2147483647, %v1485_v43  ;;  %1675 = vst [vmem:[%s1661_s16] sm:$0xff] (%p2506_p6), %v1674_v35  ;;  %v1686_v25 = vld [vmem:[%s3023_s17 + $0x30] sm:$0xff] (%p2506_p6) }
 0x187   : > { %v1615_v45 = vmax.f32 %v1607_v36, 0.0  ;;  %v1534_v7 = vmul.f32 %v2356_v28, %v1533_v39  ;;  %vm1596_vm14 = vweird.f32 %v1485_v43  ;;  %v1453_v12 = vmul.f32 %v1445_v5, %v1437_v0  ;;  %1687 = vst [vmem:[%s1661_s16 + $0x60] sm:$0xff] (%p2506_p6), %v1686_v25 }
 0x188   : > { %v1565_v47 = vadd.f32 %v2354_v26, %v1564_v41  ;;  %v1603_v10 = vor.u32 1.1754944e-38, %v1602_v2  ;;  %vm1601_vm0 = vcmp.eq.f32.partialorder %v1600_v4, 8.507059e+37 }
 0x189   : > { %1623 = vst [vmem:[%s3023_s17 + $0x8] sm:$0xff] %v1615_v45  ;;  %v1535_v50 = vadd.f32 %v2356_v28, %v1534_v7 }
 0x18a   : > { %v1569_v53 = vsel %vm1568_vm8, %v2354_v26, %v1565_v47 }
 0x18b   : > { %v1574_v55 = vsel %vm1571_vm10, %v1573_v49, %v1569_v53  ;;  %v1539_v44 = vsel %vm1538_vm11, %v2356_v28, %v1535_v50 }
 0x18c   : > { %v1611_v52 = vmul.f32 %v1574_v55, %v1451_v51  ;;  %v1544_v57 = vsel %vm1541_vm12, %v1543_v54, %v1539_v44  ;;  %v2360_v59 = vpop.eup %2359 }
 0x18d   : > { %v1609_v58 = vmul.f32 %v1544_v57, %v1449_v56  ;;  %v1592_v61 = vmul.f32 %v2360_v59, %v1485_v43  ;;  %vm1597_vm13 = vweird.f32 %v2360_v59 }
 0x18e   : > { %v1619_v40 = vmax.f32 %v1611_v52, 0.0  ;;  %vm1598_vm15 = vmor %vm1596_vm14, %vm1597_vm13 }
 0x18f   : > { %v1617_v60 = vmax.f32 %v1609_v58, 0.0  ;;  %v1593_v1 = vsub.f32 1.0, %v1592_v61 }
 0x190   : > { %1627 = vst [vmem:[%s3023_s17 + $0x28] sm:$0xff] %v1619_v40  ;;  %v1676_v9 = vld [vmem:[%s3023_s17 + $0x8] sm:$0xff] (%p2506_p6) }
 0x191   : > { %1625 = vst [vmem:[%s3023_s17 + $0x18] sm:$0xff] %v1617_v60  ;;  %v1594_v3 = vmul.f32 %v2360_v59, %v1593_v1 }
 0x192   : > { %1677 = vst [vmem:[%s1661_s16 + $0x8] sm:$0xff] (%p2506_p6), %v1676_v9 }
 0x193   : > { %v1595_v6 = vadd.f32 %v2360_v59, %v1594_v3 }
 0x195   : > { %v1599_v17 = vsel %vm1598_vm15, %v2360_v59, %v1595_v6 }
 0x196   : > { %v1604_v19 = vsel %vm1601_vm0, %v1603_v10, %v1599_v17 }
 0x197   : > { %v1613_v22 = vmul.f32 %v1604_v19, %v1453_v12  ;;  %1658 = sbr.rel (!%p2506_p6) target bundleno = 420 (0x1a4), region = 132  ;;  %v1684_v8 = vld [vmem:[%s3023_s17 + $0x28] sm:$0xff] (%p2506_p6) }
 0x198   : > { %v1680_v14 = vld [vmem:[%s3023_s17 + $0x18] sm:$0xff] (%p2506_p6)  ;;  %1685 = vst [vmem:[%s1661_s16 + $0x48] sm:$0xff] (%p2506_p6), %v1684_v8 }
 0x199   : > { %v1621_v23 = vmax.f32 %v1613_v22, 0.0  ;;  %1681 = vst [vmem:[%s1661_s16 + $0x28] sm:$0xff] (%p2506_p6), %v1680_v14 }
 0x19b   : > { %1629 = vst [vmem:[%s3023_s17 + $0x38] sm:$0xff] %v1621_v23 }
 0x1a2   : > { %v1688_v26 = vld [vmem:[%s3023_s17 + $0x38] sm:$0xff] }
 0x1a3   : > { %1689 = vst [vmem:[%s1661_s16 + $0x68] sm:$0xff] %v1688_v26 }
 0x1a4 PF: > { %s1701_s8 = sand.u32 1, %s2411_s21   ;;  %p2287_p6 = pnand %p1821_p9, %p2510_p8 }
 0x1a5   : > { %s1702_s19 = scalar_lea.sflag [#allocation6], %s1701_s8 }
 0x1a6   : > { %p2288_p7 = pneg %p2287_p6 }
 0x1a8   : > { %2406 = dma.done.wait (%p2288_p7), %s1702_s19, 1024  }
 0x1a9   : > { %2408 = vsyncadd (%p2288_p7), %s1702_s19, 4294966272  ;;  %p17_p10 = scmp.ge.s32.totalorder %s2487_s27, 4   ;;  %s3184_s21 = smov %s2415_s22 }
 0x1aa   : > { %s3185_s22 = smov %s2419_s23  ;;  %s3186_s23 = smov %s2500_s30 }
 0x1ab   : > { %s3187_s24 = smov %s2487_s27  ;;  %19 = sbr.rel (!%p17_p10) target bundleno = 5 (0x5), region = 215 }
 0x1b0   :  { %1715 = vsyncpa [#allocation6], 1 }
 0x1b1   :  { %1717 = vsyncpa [#allocation6 + $0x1], 1 }

// kernel: fl2d_forward.58
= control target key start
LH: loop header
LB: loop body
LE: loop exit
PB: predicated region body
PF: predicated region fallthrough
CT: control target
= control target key end

     0   :  { %s683_s12 = smov 0   ;;  %s685_s13 = smov 0   ;;  %s784_s0 = inlined_call_operand.vmem [shape: bf16[2,1,64], index: 0, kind: input, shape index: {}]   ;;  %s785_s1 = inlined_call_operand.vmem [shape: bf16[2,64,512], index: 1, kind: input, shape index: {}]   ;;  %s786_s2 = inlined_call_operand.vmem [shape: f32[2,1,1], index: 2, kind: input, shape index: {}]   ;;  %s787_s3 = inlined_call_operand.vmem [shape: f32[2,1,512], index: 3, kind: output, shape index: {}]  }
   0x1   :  { %s687_s14 = smov 0   ;;  %s689_s15 = smov 0  }
   0x2   :  { %s691_s16 = smov 0   ;;  %s693_s17 = smov 0  }
   0x3   :  { %s695_s18 = smov 0  }
   0x4 LB: > { %s22_s19 = sadd.s32 1, %s652_s16  ;;  %s25_s20 = sadd.s32 1, %s656_s17  ;;  %s660_s18 = sphi %s695_s18, %s13_s18   ;;  %s656_s17 = sphi %s693_s17, %s793_s17   ;;  %s652_s16 = sphi %s691_s16, %s792_s16   ;;  %s648_s15 = sphi %s689_s15, %s791_s15   ;;  %s644_s14 = sphi %s687_s14, %s790_s14   ;;  %s640_s13 = sphi %s685_s13, %s789_s13   ;;  %s636_s12 = sphi %s683_s12, %s788_s12  }
   0x5   : > { %p23_p0 = scmp.ge.s32.totalorder %s22_s19, 2  ;;  %p67_p1 = scmp.ne.s32.totalorder %s640_s13, %s636_s12 }
   0x6   : > { %p68_p2 = scmp.eq.s32.totalorder %s660_s18, 0  ;;  %s60_s24 = sadd.s32 1, %s640_s13 }
   0x7   : > { %s795_s19 = smov (%p23_p0, %s22_s19), 0  ;;  %s797_s20 = smov (!%p23_p0, %s25_s20), %s656_s17 }
   0x8   : > { %p69_p3 = por %p68_p2, %p67_p1  ;;  %p27_p4 = scmp.ge.s32.totalorder %s797_s20, 2 }
   0x9   : > { %s56_s21 = ssub.s32 %s652_s16, %s795_s19  ;;  %p495_p6 = scmp.ge.s32.totalorder %s660_s18, 4 }
   0xa   : > { %s799_s20 = smov (%p27_p4, %s797_s20), 0 }
   0xb   : > { %s55_s22 = ssub.s32 %s656_s17, %s799_s20  ;;  %147 = sbr.rel (%p495_p6) target bundleno = 31 (0x1f), region = 16 }
   0xc   : > { %s57_s23 = sor.u32 %s56_s21, %s55_s22 }
   0xd   : > { %p58_p5 = scmp.eq.s32.totalorder %s57_s23, 0 }
   0xf   : > { %s734_s25 = scalar_select %p58_p5, %s640_s13, %s60_s24  }
  0x10   : > { %156 = sbr.rel (!%p69_p3) target bundleno = 31 (0x1f), region = 24  ;;  %s158_s26 = sand.u32 (%p69_p3), 1, %s640_s13  }
  0x11   : > { %s497_s27 = sshll.u32 (%p69_p3), %s652_s16, 1  ;;  %s496_s28 = sshll.u32 (%p69_p3), %s158_s26, 6 }
  0x12   : > { %s498_s29 = sshll.u32 (%p69_p3), %s656_s17, 5  ;;  %s160_s8 = scalar_lea.vmem (%p69_p3), [#allocation2], %s496_s28 }
  0x13   : > { %s163_s30 = sadd.s32 (%p69_p3), %s498_s29, %s497_s27 }
  0x14   : > { %s499_s4 = sshll.u32 (%p69_p3), %s163_s30, 2 }
  0x15   : > { %s165_s7 = scalar_lea.vmem %s785_s1, %s499_s4 }
  0x16   : > { %v208_v0 = vld [vmem:[%s165_s7] sm:$0xff]  ;;  %v210_v1 = vld [vmem:[%s165_s7 + $0x10] sm:$0xff] }
  0x17   : > { %v212_v2 = vld [vmem:[%s165_s7 + $0x20] sm:$0xff]  ;;  %209 = vst [vmem:[%s160_s8] sm:$0xff] %v208_v0  ;;  %v214_v3 = vld [vmem:[%s165_s7 + $0x30] sm:$0xff] }
  0x18   : > { %211 = vst [vmem:[%s160_s8 + $0x8] sm:$0xff] %v210_v1  ;;  %v216_v4 = vld [vmem:[%s165_s7 + $0x40] sm:$0xff]  ;;  %v218_v5 = vld [vmem:[%s165_s7 + $0x50] sm:$0xff] }
  0x19   : > { %213 = vst [vmem:[%s160_s8 + $0x10] sm:$0xff] %v212_v2  ;;  %v220_v6 = vld [vmem:[%s165_s7 + $0x60] sm:$0xff]  ;;  %v222_v7 = vld [vmem:[%s165_s7 + $0x70] sm:$0xff] }
  0x1a   : > { %215 = vst [vmem:[%s160_s8 + $0x18] sm:$0xff] %v214_v3 }
  0x1b   : > { %217 = vst [vmem:[%s160_s8 + $0x20] sm:$0xff] %v216_v4 }
  0x1c   : > { %219 = vst [vmem:[%s160_s8 + $0x28] sm:$0xff] %v218_v5 }
  0x1d   : > { %221 = vst [vmem:[%s160_s8 + $0x30] sm:$0xff] %v220_v6 }
  0x1e   : > { %223 = vst [vmem:[%s160_s8 + $0x38] sm:$0xff] %v222_v7 }
  0x1f PF: > { %p500_p7 = scmp.ge.s32.totalorder %s660_s18, 1  ;;  %p234_p8 = scmp.lt.s32.totalorder %s660_s18, 5 }
  0x21   : > { %p235_p9 = pnand %p500_p7, %p234_p8 }
  0x22   : > { %s241_s9 = sand.u32 (!%p235_p9), 1, %s636_s12   ;;  %p273_p10 = scmp.lt.s32.totalorder (!%p235_p9), %s648_s15, 1 }
  0x23   : > { %238 = sbr.rel (%p235_p9) target bundleno = 193 (0xc1), region = 66  ;;  %s501_s10 = sshll.u32 (!%p235_p9), %s241_s9, 6 }
  0x24   : > { %s243_s11 = scalar_lea.vmem (!%p235_p9), [#allocation2], %s501_s10  ;;  %s502_s27 = sshll.u32 (!%p235_p9), %s644_s14, 1 }
  0x25   : > { %p283_p11 = scmp.lt.s32.totalorder (!%p235_p9), %s502_s27, 3 }
  0x28   : > { %v662_v8 = vmov 0   ;;  %v530_v9 = vld [vmem:[%s243_s11 + $0x30] sm:$0xf]  ;;  %v547_v10 = vld [vmem:[%s243_s11 + $0x34] sm:$0xf0]  ;;  %s801_s15 = smov (!%p273_p10, %s648_s15), 1  ;;  %v382_v38 = vlaneseq }
  0x29   : > { %605 = vset.pattern.permute.xlu0 %v662_v8  ;;  %v546_v11 = vld [vmem:[%s243_s11 + $0x34] sm:$0xf]  ;;  %v531_v12 = vor.u32 %v547_v10, %v530_v9  ;;  %v532_v13 = vld [vmem:[%s243_s11 + $0x38] sm:$0xf0]  ;;  %v522_v14 = vld [vmem:[%s243_s11 + $0x20] sm:$0xf]  ;;  %s279_s22 = scalar_lea.vmem %s786_s2, %s801_s15  ;;  %s275_s26 = scalar_lea.vmem %s784_s0, %s801_s15 }
  0x2a   : > { %v545_v15 = vld [vmem:[%s243_s11 + $0x24] sm:$0xf0]  ;;  %v535_v16 = vor.u32 %v546_v11, %v532_v13  ;;  %v544_v17 = vld [vmem:[%s243_s11 + $0x24] sm:$0xf]  ;;  %v524_v18 = vld [vmem:[%s243_s11 + $0x28] sm:$0xf0] }
  0x2b   : > { %354 = vmatpush.bf16.msra.mxu0 %v531_v12  ;;  %v523_v19 = vor.u32 %v545_v15, %v522_v14  ;;  %v527_v20 = vor.u32 %v544_v17, %v524_v18  ;;  %v514_v21 = vld [vmem:[%s243_s11 + $0x10] sm:$0xf]  ;;  %v543_v22 = vld [vmem:[%s243_s11 + $0x14] sm:$0xf0]  ;;  %v542_v23 = vld [vmem:[%s243_s11 + $0x14] sm:$0xf] }
  0x2c   : > { %367 = vmatpush.bf16.msra.mxu1 %v535_v16  ;;  %v516_v24 = vld [vmem:[%s243_s11 + $0x18] sm:$0xf0]  ;;  %v515_v25 = vor.u32 %v543_v22, %v514_v21  ;;  %v506_v27 = vld [vmem:[%s243_s11] sm:$0xf]  ;;  %v541_v28 = vld [vmem:[%s243_s11 + $0x4] sm:$0xf0] }
  0x2d   : > { %v519_v26 = vor.u32 %v542_v23, %v516_v24  ;;  %v540_v29 = vld [vmem:[%s243_s11 + $0x4] sm:$0xf]  ;;  %v508_v30 = vld [vmem:[%s243_s11 + $0x8] sm:$0xf0]  ;;  %v299_v31 = vld [vmem:[%s279_s22] sm:$0x1]  ;;  %v507_v32 = vor.u32 %v541_v28, %v506_v27 }
  0x2e   : > { %302 = vperm.xlu0 %605, %v299_v31   ;;  %v511_v33 = vor.u32 %v540_v29, %v508_v30  ;;  %v290_v34 = vld [vmem:[%s275_s26] sm:$0x1]  ;;  %vm346_vm0 = vcmask 523264   ;;  %s803_s27 = smov (!%p283_p11, %s502_s27), 3  ;;  %s503_s28 = sshll.u32 %s801_s15, 2  ;;  %vm379_vm1 = vcmask 1040384  }
  0x2f   : > { %355 = vmatpush.bf16.msra.mxu0 %v523_v19  ;;  %s286_s29 = sadd.s32 %s503_s28, %s803_s27  ;;  %vm384_vm2 = vcmp.lt.s32.totalorder %v382_v38, 256 }
  0x30   : > { %368 = vmatpush.bf16.msra.mxu1 %v527_v20  ;;  %s287_s5 = scalar_lea.vmem %s787_s3, %s286_s29 }
  0x33   : > { %356 = vmatpush.bf16.msra.mxu0 %v515_v25 }
  0x34   : > { %369 = vmatpush.bf16.msra.mxu1 %v519_v26 }
  0x37   : > { %357 = vmatpush.bf16.msra.mxu0 %v507_v32 }
  0x38   : > { %370 = vmatpush.bf16.msra.mxu1 %v511_v33 }
  0x3a   : > { %536 = vmatmul.msk.bf16.vlgmr.msra.gmra.mxu0 %vm346_vm0, %v290_v34 }
  0x3b   : > { %537 = vmatmul.msk.bf16.vlgmr.msra.gmra.mxu1 %vm346_vm0, %v290_v34 }
  0xa0   : > { %v303_v35 = vpop.permute.xlu0 %302 }
  0xa1   : > { %v305_v36 = vperm.slane %v303_v35, 0 }
  0xb7   : > { %v359_v37 = vpop.f32.mrf.mxu0 }
  0xb8   : > { %v372_v39 = vpop.f32.mrf.mxu1  ;;  %v360_v41 = vadd.f32 %v359_v37, %v305_v36 }
  0xb9   : > { %v373_v40 = vadd.f32 %v372_v39, %v305_v36 }
  0xbb   : > { %v378_v42 = vrot.slane %v373_v40, 7 }
  0xbd   : > { %v380_v43 = vsel %vm379_vm1, %v360_v41, %v378_v42 }
  0xbe   : > { %386 = vst.msk [vmem:[%s287_s5] sm:$0x3] %vm384_vm2, %v380_v43 }
  0xbf   : > { %v361_v44 = vpop.f32.mrf.mxu0 }
  0xc0   : > { %v374_v45 = vpop.f32.mrf.mxu1 }
  0xc1 PF: > { %s13_s18 = sadd.s32 1, %s660_s18   ;;  %s788_s12 = smov %s640_s13 }
  0xc2   : > { %p10_p12 = scmp.ge.s32.totalorder %s13_s18, 6   ;;  %s789_s13 = smov %s734_s25 }
  0xc3   : > { %s790_s14 = smov %s652_s16  ;;  %s791_s15 = smov %s656_s17 }
  0xc4   : > { %s792_s16 = smov %s795_s19  ;;  %s793_s17 = smov %s799_s20 }
  0xc5   :  { %12 = sbr.rel (!%p10_p12) target bundleno = 4 (0x4), region = 111 }

// kernel: fl2d_forward.36
= control target key start
LH: loop header
LB: loop body
LE: loop exit
PB: predicated region body
PF: predicated region fallthrough
CT: control target
= control target key end

     0   :  { %s2413_s21 = smov 0   ;;  %s2415_s22 = smov 0   ;;  %s3077_s0 = inlined_call_operand.vmem [shape: bf16[32,576], index: 0, kind: input, shape index: {}]   ;;  %s3078_s1 = inlined_call_operand.vmem [shape: bf16[576,512], index: 1, kind: input, shape index: {}]   ;;  %s3079_s2 = inlined_call_operand.vmem [shape: f32[32,1], index: 2, kind: input, shape index: {}]   ;;  %s3080_s3 = inlined_call_operand.vmem [shape: f32[32,512], index: 3, kind: input, shape index: {}]   ;;  %s3081_s4 = inlined_call_operand.vmem [shape: f32[32,512], index: 4, kind: input, shape index: {}]   ;;  %s3082_s5 = inlined_call_operand.vmem [shape: f32[32,512], index: 5, kind: output, shape index: {0}]   ;;  %s3083_s6 = inlined_call_operand.vmem [shape: f32[32,512], index: 6, kind: output, shape index: {1}]  }
   0x1   :  { %s2417_s23 = smov 0  }
   0x2 LB: > { %s2429_s24 = sadd.s32 4294967295, %s2375_s23   ;;  %s2432_s25 = sadd.s32 1, %s2375_s23   ;;  %s2375_s23 = sphi %s2417_s23, %s3088_s23   ;;  %s2371_s22 = sphi %s2415_s22, %s3087_s22   ;;  %s2367_s21 = sphi %s2413_s21, %s3086_s21  }
   0x3   : > { %s42_s26 = ssub.s32 %s2375_s23, %s2432_s25  ;;  %s45_s27 = sadd.s32 1, %s2371_s22 }
   0x4   : > { %p43_p0 = scmp.eq.s32.totalorder %s42_s26, 0  ;;  %p52_p1 = scmp.ne.s32.totalorder %s2371_s22, %s2367_s21 }
   0x5   : > { %p53_p2 = scmp.eq.s32.totalorder %s2375_s23, 0  ;;  %p155_p3 = scmp.eq.s32.totalorder %s2429_s24, 1 }
   0x6   : > { %s2442_s28 = scalar_select %p43_p0, %s2371_s22, %s45_s27  }
   0x7   : > { %p2444_p4 = por %p53_p2, %p52_p1  ;;  %p2448_p5 = por %p155_p3, %p52_p1 }
   0x8   : > { %p1831_p6 = scmp.ge.s32.totalorder %s2375_s23, 2 }
   0xa   : > { %209 = sbr.rel (%p1831_p6) target bundleno = 115 (0x73), region = 24 }
   0xf   : > { %212 = sbr.rel (!%p2444_p4) target bundleno = 91 (0x5b), region = 28  ;;  %s214_s7 = sand.u32 (%p2444_p4), 1, %s2371_s22  }
  0x10   : > { %s2193_s8 = sshll.u32 (%p2444_p4), %s2375_s23, 3  ;;  %s2292_s9 = smul.u32 (%p2444_p4), 576, %s214_s7 }
  0x11   : > { %s2460_s12 = scalar_lea.vmem (%p2444_p4), %s3078_s1, %s2193_s8 }
  0x12   : > { %v390_v0 = vld [vmem:[%s2460_s12] sm:$0xff] (%p2444_p4)  ;;  %v392_v1 = vld [vmem:[%s2460_s12 + $0x10] sm:$0xff] (%p2444_p4)  ;;  %s2465_s13 = scalar_lea.vmem (%p2444_p4), [#allocation2], %s2292_s9 }
  0x13   : > { %v394_v2 = vld [vmem:[%s2460_s12 + $0x20] sm:$0xff] (%p2444_p4)  ;;  %391 = vst [vmem:[%s2465_s13] sm:$0xff] (%p2444_p4), %v390_v0  ;;  %v396_v3 = vld [vmem:[%s2460_s12 + $0x30] sm:$0xff] (%p2444_p4) }
  0x14   : > { %393 = vst [vmem:[%s2465_s13 + $0x8] sm:$0xff] %v392_v1  ;;  %v398_v4 = vld [vmem:[%s2460_s12 + $0x40] sm:$0xff]  ;;  %v400_v5 = vld [vmem:[%s2460_s12 + $0x50] sm:$0xff] }
  0x15   : > { %395 = vst [vmem:[%s2465_s13 + $0x10] sm:$0xff] %v394_v2  ;;  %v402_v6 = vld [vmem:[%s2460_s12 + $0x60] sm:$0xff]  ;;  %v404_v7 = vld [vmem:[%s2460_s12 + $0x70] sm:$0xff] }
  0x16   : > { %397 = vst [vmem:[%s2465_s13 + $0x18] sm:$0xff] %v396_v3  ;;  %v406_v8 = vld [vmem:[%s2460_s12 + $0x80] sm:$0xff]  ;;  %v408_v9 = vld [vmem:[%s2460_s12 + $0x90] sm:$0xff] }
  0x17   : > { %399 = vst [vmem:[%s2465_s13 + $0x20] sm:$0xff] %v398_v4  ;;  %v410_v10 = vld [vmem:[%s2460_s12 + $0xa0] sm:$0xff]  ;;  %v412_v11 = vld [vmem:[%s2460_s12 + $0xb0] sm:$0xff] }
  0x18   : > { %401 = vst [vmem:[%s2465_s13 + $0x28] sm:$0xff] %v400_v5  ;;  %v414_v12 = vld [vmem:[%s2460_s12 + $0xc0] sm:$0xff]  ;;  %v416_v13 = vld [vmem:[%s2460_s12 + $0xd0] sm:$0xff] }
  0x19   : > { %403 = vst [vmem:[%s2465_s13 + $0x30] sm:$0xff] %v402_v6  ;;  %v418_v14 = vld [vmem:[%s2460_s12 + $0xe0] sm:$0xff]  ;;  %v420_v15 = vld [vmem:[%s2460_s12 + $0xf0] sm:$0xff] }
  0x1a   : > { %405 = vst [vmem:[%s2465_s13 + $0x38] sm:$0xff] %v404_v7  ;;  %v422_v16 = vld [vmem:[%s2460_s12 + $0x100] sm:$0xff]  ;;  %v424_v17 = vld [vmem:[%s2460_s12 + $0x110] sm:$0xff] }
  0x1b   : > { %407 = vst [vmem:[%s2465_s13 + $0x40] sm:$0xff] %v406_v8  ;;  %v426_v18 = vld [vmem:[%s2460_s12 + $0x120] sm:$0xff]  ;;  %v428_v19 = vld [vmem:[%s2460_s12 + $0x130] sm:$0xff] }
  0x1c   : > { %409 = vst [vmem:[%s2465_s13 + $0x48] sm:$0xff] %v408_v9  ;;  %v430_v20 = vld [vmem:[%s2460_s12 + $0x140] sm:$0xff]  ;;  %v432_v21 = vld [vmem:[%s2460_s12 + $0x150] sm:$0xff] }
  0x1d   : > { %411 = vst [vmem:[%s2465_s13 + $0x50] sm:$0xff] %v410_v10  ;;  %v434_v22 = vld [vmem:[%s2460_s12 + $0x160] sm:$0xff]  ;;  %v436_v23 = vld [vmem:[%s2460_s12 + $0x170] sm:$0xff] }
  0x1e   : > { %413 = vst [vmem:[%s2465_s13 + $0x58] sm:$0xff] %v412_v11  ;;  %v438_v24 = vld [vmem:[%s2460_s12 + $0x180] sm:$0xff]  ;;  %v440_v25 = vld [vmem:[%s2460_s12 + $0x190] sm:$0xff] }
  0x1f   : > { %415 = vst [vmem:[%s2465_s13 + $0x60] sm:$0xff] %v414_v12  ;;  %v442_v26 = vld [vmem:[%s2460_s12 + $0x1a0] sm:$0xff]  ;;  %v444_v27 = vld [vmem:[%s2460_s12 + $0x1b0] sm:$0xff] }
  0x20   : > { %417 = vst [vmem:[%s2465_s13 + $0x68] sm:$0xff] %v416_v13  ;;  %v446_v28 = vld [vmem:[%s2460_s12 + $0x1c0] sm:$0xff]  ;;  %v448_v29 = vld [vmem:[%s2460_s12 + $0x1d0] sm:$0xff] }
  0x21   : > { %419 = vst [vmem:[%s2465_s13 + $0x70] sm:$0xff] %v418_v14  ;;  %v450_v30 = vld [vmem:[%s2460_s12 + $0x1e0] sm:$0xff]  ;;  %v452_v31 = vld [vmem:[%s2460_s12 + $0x1f0] sm:$0xff] }
  0x22   : > { %421 = vst [vmem:[%s2465_s13 + $0x78] sm:$0xff] %v420_v15  ;;  %v454_v32 = vld [vmem:[%s2460_s12 + $0x200] sm:$0xff]  ;;  %v456_v33 = vld [vmem:[%s2460_s12 + $0x210] sm:$0xff] }
  0x23   : > { %423 = vst [vmem:[%s2465_s13 + $0x80] sm:$0xff] %v422_v16  ;;  %v458_v34 = vld [vmem:[%s2460_s12 + $0x220] sm:$0xff]  ;;  %v460_v35 = vld [vmem:[%s2460_s12 + $0x230] sm:$0xff] }
  0x24   : > { %425 = vst [vmem:[%s2465_s13 + $0x88] sm:$0xff] %v424_v17  ;;  %v462_v36 = vld [vmem:[%s2460_s12 + $0x240] sm:$0xff]  ;;  %v464_v37 = vld [vmem:[%s2460_s12 + $0x250] sm:$0xff] }
  0x25   : > { %427 = vst [vmem:[%s2465_s13 + $0x90] sm:$0xff] %v426_v18  ;;  %v466_v38 = vld [vmem:[%s2460_s12 + $0x260] sm:$0xff]  ;;  %v468_v39 = vld [vmem:[%s2460_s12 + $0x270] sm:$0xff] }
  0x26   : > { %429 = vst [vmem:[%s2465_s13 + $0x98] sm:$0xff] %v428_v19  ;;  %v470_v40 = vld [vmem:[%s2460_s12 + $0x280] sm:$0xff]  ;;  %v472_v41 = vld [vmem:[%s2460_s12 + $0x290] sm:$0xff] }
  0x27   : > { %431 = vst [vmem:[%s2465_s13 + $0xa0] sm:$0xff] %v430_v20  ;;  %v474_v42 = vld [vmem:[%s2460_s12 + $0x2a0] sm:$0xff]  ;;  %v476_v43 = vld [vmem:[%s2460_s12 + $0x2b0] sm:$0xff] }
  0x28   : > { %433 = vst [vmem:[%s2465_s13 + $0xa8] sm:$0xff] %v432_v21  ;;  %v478_v44 = vld [vmem:[%s2460_s12 + $0x2c0] sm:$0xff]  ;;  %v480_v45 = vld [vmem:[%s2460_s12 + $0x2d0] sm:$0xff] }
  0x29   : > { %435 = vst [vmem:[%s2465_s13 + $0xb0] sm:$0xff] %v434_v22  ;;  %v482_v46 = vld [vmem:[%s2460_s12 + $0x2e0] sm:$0xff]  ;;  %v484_v47 = vld [vmem:[%s2460_s12 + $0x2f0] sm:$0xff] }
  0x2a   : > { %437 = vst [vmem:[%s2465_s13 + $0xb8] sm:$0xff] %v436_v23  ;;  %v486_v48 = vld [vmem:[%s2460_s12 + $0x300] sm:$0xff]  ;;  %v488_v49 = vld [vmem:[%s2460_s12 + $0x310] sm:$0xff] }
  0x2b   : > { %439 = vst [vmem:[%s2465_s13 + $0xc0] sm:$0xff] %v438_v24  ;;  %v490_v50 = vld [vmem:[%s2460_s12 + $0x320] sm:$0xff]  ;;  %v492_v51 = vld [vmem:[%s2460_s12 + $0x330] sm:$0xff] }
  0x2c   : > { %441 = vst [vmem:[%s2465_s13 + $0xc8] sm:$0xff] %v440_v25  ;;  %v494_v52 = vld [vmem:[%s2460_s12 + $0x340] sm:$0xff]  ;;  %v496_v53 = vld [vmem:[%s2460_s12 + $0x350] sm:$0xff] }
  0x2d   : > { %443 = vst [vmem:[%s2465_s13 + $0xd0] sm:$0xff] %v442_v26  ;;  %v498_v54 = vld [vmem:[%s2460_s12 + $0x360] sm:$0xff]  ;;  %v500_v55 = vld [vmem:[%s2460_s12 + $0x370] sm:$0xff] }
  0x2e   : > { %445 = vst [vmem:[%s2465_s13 + $0xd8] sm:$0xff] %v444_v27  ;;  %v502_v56 = vld [vmem:[%s2460_s12 + $0x380] sm:$0xff]  ;;  %v504_v57 = vld [vmem:[%s2460_s12 + $0x390] sm:$0xff] }
  0x2f   : > { %447 = vst [vmem:[%s2465_s13 + $0xe0] sm:$0xff] %v446_v28  ;;  %v506_v58 = vld [vmem:[%s2460_s12 + $0x3a0] sm:$0xff]  ;;  %v508_v59 = vld [vmem:[%s2460_s12 + $0x3b0] sm:$0xff] }
  0x30   : > { %449 = vst [vmem:[%s2465_s13 + $0xe8] sm:$0xff] %v448_v29  ;;  %v510_v60 = vld [vmem:[%s2460_s12 + $0x3c0] sm:$0xff]  ;;  %v512_v61 = vld [vmem:[%s2460_s12 + $0x3d0] sm:$0xff] }
  0x31   : > { %451 = vst [vmem:[%s2465_s13 + $0xf0] sm:$0xff] %v450_v30  ;;  %v514_v62 = vld [vmem:[%s2460_s12 + $0x3e0] sm:$0xff]  ;;  %v516_v63 = vld [vmem:[%s2460_s12 + $0x3f0] sm:$0xff] }
  0x32   : > { %453 = vst [vmem:[%s2465_s13 + $0xf8] sm:$0xff] %v452_v31  ;;  %v518_v0 = vld [vmem:[%s2460_s12 + $0x400] sm:$0xff]  ;;  %v520_v1 = vld [vmem:[%s2460_s12 + $0x410] sm:$0xff] }
  0x33   : > { %455 = vst [vmem:[%s2465_s13 + $0x100] sm:$0xff] %v454_v32  ;;  %v522_v2 = vld [vmem:[%s2460_s12 + $0x420] sm:$0xff]  ;;  %v524_v3 = vld [vmem:[%s2460_s12 + $0x430] sm:$0xff] }
  0x34   : > { %457 = vst [vmem:[%s2465_s13 + $0x108] sm:$0xff] %v456_v33  ;;  %v526_v4 = vld [vmem:[%s2460_s12 + $0x440] sm:$0xff]  ;;  %v528_v5 = vld [vmem:[%s2460_s12 + $0x450] sm:$0xff] }
  0x35   : > { %459 = vst [vmem:[%s2465_s13 + $0x110] sm:$0xff] %v458_v34  ;;  %v530_v6 = vld [vmem:[%s2460_s12 + $0x460] sm:$0xff]  ;;  %v532_v7 = vld [vmem:[%s2460_s12 + $0x470] sm:$0xff] }
  0x36   : > { %461 = vst [vmem:[%s2465_s13 + $0x118] sm:$0xff] %v460_v35 }
  0x37   : > { %463 = vst [vmem:[%s2465_s13 + $0x120] sm:$0xff] %v462_v36 }
  0x38   : > { %465 = vst [vmem:[%s2465_s13 + $0x128] sm:$0xff] %v464_v37 }
  0x39   : > { %467 = vst [vmem:[%s2465_s13 + $0x130] sm:$0xff] %v466_v38 }
  0x3a   : > { %469 = vst [vmem:[%s2465_s13 + $0x138] sm:$0xff] %v468_v39 }
  0x3b   : > { %471 = vst [vmem:[%s2465_s13 + $0x140] sm:$0xff] %v470_v40 }
  0x3c   : > { %473 = vst [vmem:[%s2465_s13 + $0x148] sm:$0xff] %v472_v41 }
  0x3d   : > { %475 = vst [vmem:[%s2465_s13 + $0x150] sm:$0xff] %v474_v42 }
  0x3e   : > { %477 = vst [vmem:[%s2465_s13 + $0x158] sm:$0xff] %v476_v43 }
  0x3f   : > { %479 = vst [vmem:[%s2465_s13 + $0x160] sm:$0xff] %v478_v44 }
  0x40   : > { %481 = vst [vmem:[%s2465_s13 + $0x168] sm:$0xff] %v480_v45 }
  0x41   : > { %483 = vst [vmem:[%s2465_s13 + $0x170] sm:$0xff] %v482_v46 }
  0x42   : > { %485 = vst [vmem:[%s2465_s13 + $0x178] sm:$0xff] %v484_v47 }
  0x43   : > { %487 = vst [vmem:[%s2465_s13 + $0x180] sm:$0xff] %v486_v48 }
  0x44   : > { %489 = vst [vmem:[%s2465_s13 + $0x188] sm:$0xff] %v488_v49 }
  0x45   : > { %491 = vst [vmem:[%s2465_s13 + $0x190] sm:$0xff] %v490_v50 }
  0x46   : > { %493 = vst [vmem:[%s2465_s13 + $0x198] sm:$0xff] %v492_v51 }
  0x47   : > { %495 = vst [vmem:[%s2465_s13 + $0x1a0] sm:$0xff] %v494_v52 }
  0x48   : > { %497 = vst [vmem:[%s2465_s13 + $0x1a8] sm:$0xff] %v496_v53 }
  0x49   : > { %499 = vst [vmem:[%s2465_s13 + $0x1b0] sm:$0xff] %v498_v54 }
  0x4a   : > { %501 = vst [vmem:[%s2465_s13 + $0x1b8] sm:$0xff] %v500_v55 }
  0x4b   : > { %503 = vst [vmem:[%s2465_s13 + $0x1c0] sm:$0xff] %v502_v56 }
  0x4c   : > { %505 = vst [vmem:[%s2465_s13 + $0x1c8] sm:$0xff] %v504_v57 }
  0x4d   : > { %507 = vst [vmem:[%s2465_s13 + $0x1d0] sm:$0xff] %v506_v58 }
  0x4e   : > { %509 = vst [vmem:[%s2465_s13 + $0x1d8] sm:$0xff] %v508_v59 }
  0x4f   : > { %511 = vst [vmem:[%s2465_s13 + $0x1e0] sm:$0xff] %v510_v60 }
  0x50   : > { %513 = vst [vmem:[%s2465_s13 + $0x1e8] sm:$0xff] %v512_v61 }
  0x51   : > { %515 = vst [vmem:[%s2465_s13 + $0x1f0] sm:$0xff] %v514_v62 }
  0x52   : > { %517 = vst [vmem:[%s2465_s13 + $0x1f8] sm:$0xff] %v516_v63 }
  0x53   : > { %519 = vst [vmem:[%s2465_s13 + $0x200] sm:$0xff] %v518_v0 }
  0x54   : > { %521 = vst [vmem:[%s2465_s13 + $0x208] sm:$0xff] %v520_v1 }
  0x55   : > { %523 = vst [vmem:[%s2465_s13 + $0x210] sm:$0xff] %v522_v2 }
  0x56   : > { %525 = vst [vmem:[%s2465_s13 + $0x218] sm:$0xff] %v524_v3 }
  0x57   : > { %527 = vst [vmem:[%s2465_s13 + $0x220] sm:$0xff] %v526_v4 }
  0x58   : > { %529 = vst [vmem:[%s2465_s13 + $0x228] sm:$0xff] %v528_v5 }
  0x59   : > { %531 = vst [vmem:[%s2465_s13 + $0x230] sm:$0xff] %v530_v6 }
  0x5a   : > { %533 = vst [vmem:[%s2465_s13 + $0x238] sm:$0xff] %v532_v7 }
  0x5b PF: > { %539 = sbr.rel (!%p2444_p4) target bundleno = 103 (0x67), region = 66  ;;  %s541_s14 = sand.u32 (%p2444_p4), 1, %s2371_s22  }
  0x5c   : > { %s2194_s15 = sshll.u32 (%p2444_p4), %s2375_s23, 4  ;;  %s1834_s16 = sshll.u32 (%p2444_p4), %s541_s14, 6 }
  0x5d   : > { %s546_s19 = scalar_lea.vmem (%p2444_p4), %s3080_s3, %s2194_s15  ;;  %s543_s20 = scalar_lea.vmem (%p2444_p4), [#allocation3], %s1834_s16 }
  0x5e   : > { %v559_v8 = vld [vmem:[%s546_s19] sm:$0xff] (%p2444_p4)  ;;  %v561_v9 = vld [vmem:[%s546_s19 + $0x8] sm:$0xff] (%p2444_p4) }
  0x5f   : > { %v563_v10 = vld [vmem:[%s546_s19 + $0x20] sm:$0xff] (%p2444_p4)  ;;  %560 = vst [vmem:[%s543_s20] sm:$0xff] (%p2444_p4), %v559_v8  ;;  %v565_v11 = vld [vmem:[%s546_s19 + $0x28] sm:$0xff] (%p2444_p4) }
  0x60   : > { %562 = vst [vmem:[%s543_s20 + $0x8] sm:$0xff] %v561_v9  ;;  %v567_v12 = vld [vmem:[%s546_s19 + $0x40] sm:$0xff]  ;;  %v569_v13 = vld [vmem:[%s546_s19 + $0x48] sm:$0xff] }
  0x61   : > { %564 = vst [vmem:[%s543_s20 + $0x10] sm:$0xff] %v563_v10  ;;  %v571_v14 = vld [vmem:[%s546_s19 + $0x60] sm:$0xff]  ;;  %v573_v15 = vld [vmem:[%s546_s19 + $0x68] sm:$0xff] }
  0x62   : > { %566 = vst [vmem:[%s543_s20 + $0x18] sm:$0xff] %v565_v11 }
  0x63   : > { %568 = vst [vmem:[%s543_s20 + $0x20] sm:$0xff] %v567_v12 }
  0x64   : > { %570 = vst [vmem:[%s543_s20 + $0x28] sm:$0xff] %v569_v13 }
  0x65   : > { %572 = vst [vmem:[%s543_s20 + $0x30] sm:$0xff] %v571_v14 }
  0x66   : > { %574 = vst [vmem:[%s543_s20 + $0x38] sm:$0xff] %v573_v15 }
  0x67 PF: > { %580 = sbr.rel (!%p2444_p4) target bundleno = 115 (0x73), region = 89  ;;  %s582_s26 = sand.u32 (%p2444_p4), 1, %s2371_s22  }
  0x68   : > { %s2195_s27 = sshll.u32 (%p2444_p4), %s2375_s23, 4  ;;  %s1837_s7 = sshll.u32 (%p2444_p4), %s582_s26, 6 }
  0x69   : > { %s587_s10 = scalar_lea.vmem (%p2444_p4), %s3081_s4, %s2195_s27  ;;  %s584_s11 = scalar_lea.vmem (%p2444_p4), [#allocation4], %s1837_s7 }
  0x6a   : > { %v600_v16 = vld [vmem:[%s587_s10] sm:$0xff] (%p2444_p4)  ;;  %v602_v17 = vld [vmem:[%s587_s10 + $0x8] sm:$0xff] (%p2444_p4) }
  0x6b   : > { %v604_v18 = vld [vmem:[%s587_s10 + $0x20] sm:$0xff] (%p2444_p4)  ;;  %601 = vst [vmem:[%s584_s11] sm:$0xff] (%p2444_p4), %v600_v16  ;;  %v606_v19 = vld [vmem:[%s587_s10 + $0x28] sm:$0xff] (%p2444_p4) }
  0x6c   : > { %603 = vst [vmem:[%s584_s11 + $0x8] sm:$0xff] %v602_v17  ;;  %v608_v20 = vld [vmem:[%s587_s10 + $0x40] sm:$0xff]  ;;  %v610_v21 = vld [vmem:[%s587_s10 + $0x48] sm:$0xff] }
  0x6d   : > { %605 = vst [vmem:[%s584_s11 + $0x10] sm:$0xff] %v604_v18  ;;  %v612_v22 = vld [vmem:[%s587_s10 + $0x60] sm:$0xff]  ;;  %v614_v23 = vld [vmem:[%s587_s10 + $0x68] sm:$0xff] }
  0x6e   : > { %607 = vst [vmem:[%s584_s11 + $0x18] sm:$0xff] %v606_v19 }
  0x6f   : > { %609 = vst [vmem:[%s584_s11 + $0x20] sm:$0xff] %v608_v20 }
  0x70   : > { %611 = vst [vmem:[%s584_s11 + $0x28] sm:$0xff] %v610_v21 }
  0x71   : > { %613 = vst [vmem:[%s584_s11 + $0x30] sm:$0xff] %v612_v22 }
  0x72   : > { %615 = vst [vmem:[%s584_s11 + $0x38] sm:$0xff] %v614_v23 }
  0x73 PF: > { %p1840_p7 = scmp.ge.s32.totalorder %s2375_s23, 1  ;;  %p620_p8 = scmp.lt.s32.totalorder %s2375_s23, 3 }
  0x75   : > { %p621_p9 = pnand %p1840_p7, %p620_p8 }
  0x76   : > { %s627_s29 = sand.u32 (!%p621_p9), 1, %s2367_s21  }
  0x77   : > { %624 = sbr.rel (%p621_p9) target bundleno = 416 (0x1a0), region = 112 }
  0x78   : > { %s2293_s12 = smul.u32 (!%p621_p9), 576, %s627_s29 }
  0x7a   : > { %s2627_s13 = scalar_lea.vmem (!%p621_p9), [#allocation2], %s2293_s12 }
  0x7c   : > { %v1943_v24 = vld [vmem:[%s2627_s13 + $0x70] sm:$0xf]  ;;  %v2221_v25 = vld [vmem:[%s2627_s13 + $0x74] sm:$0xf0]  ;;  %v1935_v35 = vld [vmem:[%s2627_s13 + $0x60] sm:$0xf] }
  0x7d   : > { %v2007_v26 = vld [vmem:[%s2627_s13 + $0xf0] sm:$0xf]  ;;  %v1944_v27 = vor.u32 %v2221_v25, %v1943_v24  ;;  %v2237_v28 = vld [vmem:[%s2627_s13 + $0xf4] sm:$0xf0]  ;;  %v2219_v37 = vld [vmem:[%s2627_s13 + $0x64] sm:$0xf0] }
  0x7e   : > { %v2071_v29 = vld [vmem:[%s2627_s13 + $0x170] sm:$0xf]  ;;  %v2253_v30 = vld [vmem:[%s2627_s13 + $0x174] sm:$0xf0]  ;;  %v2008_v31 = vor.u32 %v2237_v28, %v2007_v26  ;;  %v1999_v38 = vld [vmem:[%s2627_s13 + $0xe0] sm:$0xf]  ;;  %v1936_v40 = vor.u32 %v2219_v37, %v1935_v35 }
  0x7f   : > { %v2072_v32 = vor.u32 %v2253_v30, %v2071_v29  ;;  %v2135_v33 = vld [vmem:[%s2627_s13 + $0x1f0] sm:$0xf]  ;;  %v2269_v34 = vld [vmem:[%s2627_s13 + $0x1f4] sm:$0xf0]  ;;  %1212 = vmatpush.bf16.msra.mxu0 %v1944_v27  ;;  %v2235_v39 = vld [vmem:[%s2627_s13 + $0xe4] sm:$0xf0] }
  0x80   : > { %v2136_v36 = vor.u32 %v2269_v34, %v2135_v33  ;;  %1231 = vmatpush.bf16.msra.mxu1 %v2008_v31  ;;  %v2000_v41 = vor.u32 %v2235_v39, %v1999_v38  ;;  %v2063_v42 = vld [vmem:[%s2627_s13 + $0x160] sm:$0xf]  ;;  %v2251_v43 = vld [vmem:[%s2627_s13 + $0x164] sm:$0xf0]  ;;  %v1927_v47 = vld [vmem:[%s2627_s13 + $0x50] sm:$0xf] }
  0x81   : > { %1250 = vmatpush.bf16.msra.mxu2 %v2072_v32  ;;  %v2127_v44 = vld [vmem:[%s2627_s13 + $0x1e0] sm:$0xf]  ;;  %v2064_v45 = vor.u32 %v2251_v43, %v2063_v42  ;;  %v2267_v46 = vld [vmem:[%s2627_s13 + $0x1e4] sm:$0xf0]  ;;  %v2217_v48 = vld [vmem:[%s2627_s13 + $0x54] sm:$0xf0] }
  0x82   : > { %1269 = vmatpush.bf16.msra.mxu3 %v2136_v36  ;;  %v2128_v49 = vor.u32 %v2267_v46, %v2127_v44  ;;  %v1991_v50 = vld [vmem:[%s2627_s13 + $0xd0] sm:$0xf]  ;;  %v2233_v51 = vld [vmem:[%s2627_s13 + $0xd4] sm:$0xf0]  ;;  %v1928_v53 = vor.u32 %v2217_v48, %v1927_v47  ;;  %v1919_v59 = vld [vmem:[%s2627_s13 + $0x40] sm:$0xf] }
  0x83   : > { %v2055_v52 = vld [vmem:[%s2627_s13 + $0x150] sm:$0xf]  ;;  %1213 = vmatpush.bf16.msra.mxu0 %v1936_v40  ;;  %v2249_v54 = vld [vmem:[%s2627_s13 + $0x154] sm:$0xf0]  ;;  %v1992_v57 = vor.u32 %v2233_v51, %v1991_v50  ;;  %v2215_v60 = vld [vmem:[%s2627_s13 + $0x44] sm:$0xf0] }
  0x84   : > { %v2119_v55 = vld [vmem:[%s2627_s13 + $0x1d0] sm:$0xf]  ;;  %v2265_v56 = vld [vmem:[%s2627_s13 + $0x1d4] sm:$0xf0]  ;;  %1232 = vmatpush.bf16.msra.mxu1 %v2000_v41  ;;  %v2056_v58 = vor.u32 %v2249_v54, %v2055_v52  ;;  %v1983_v61 = vld [vmem:[%s2627_s13 + $0xc0] sm:$0xf]  ;;  %v1920_v4 = vor.u32 %v2215_v60, %v1919_v59 }
  0x85   : > { %1251 = vmatpush.bf16.msra.mxu2 %v2064_v45  ;;  %v2120_v62 = vor.u32 %v2265_v56, %v2119_v55  ;;  %v2231_v63 = vld [vmem:[%s2627_s13 + $0xc4] sm:$0xf0]  ;;  %v2047_v0 = vld [vmem:[%s2627_s13 + $0x140] sm:$0xf]  ;;  %v1911_v7 = vld [vmem:[%s2627_s13 + $0x30] sm:$0xf] }
  0x86   : > { %1270 = vmatpush.bf16.msra.mxu3 %v2128_v49  ;;  %v2247_v1 = vld [vmem:[%s2627_s13 + $0x144] sm:$0xf0]  ;;  %v2111_v2 = vld [vmem:[%s2627_s13 + $0x1c0] sm:$0xf]  ;;  %v1984_v5 = vor.u32 %v2231_v63, %v1983_v61  ;;  %v2213_v8 = vld [vmem:[%s2627_s13 + $0x34] sm:$0xf0] }
  0x87   : > { %v2263_v3 = vld [vmem:[%s2627_s13 + $0x1c4] sm:$0xf0]  ;;  %1214 = vmatpush.bf16.msra.mxu0 %v1928_v53  ;;  %v2048_v6 = vor.u32 %v2247_v1, %v2047_v0  ;;  %v1975_v9 = vld [vmem:[%s2627_s13 + $0xb0] sm:$0xf]  ;;  %v2229_v11 = vld [vmem:[%s2627_s13 + $0xb4] sm:$0xf0]  ;;  %v1912_v16 = vor.u32 %v2213_v8, %v1911_v7 }
  0x88   : > { %1233 = vmatpush.bf16.msra.mxu1 %v1992_v57  ;;  %v2112_v10 = vor.u32 %v2263_v3, %v2111_v2  ;;  %v2039_v12 = vld [vmem:[%s2627_s13 + $0x130] sm:$0xf]  ;;  %v2245_v13 = vld [vmem:[%s2627_s13 + $0x134] sm:$0xf0]  ;;  %v1976_v17 = vor.u32 %v2229_v11, %v1975_v9  ;;  %v1903_v19 = vld [vmem:[%s2627_s13 + $0x20] sm:$0xf] }
  0x89   : > { %1252 = vmatpush.bf16.msra.mxu2 %v2056_v58  ;;  %v2103_v14 = vld [vmem:[%s2627_s13 + $0x1b0] sm:$0xf]  ;;  %v2261_v15 = vld [vmem:[%s2627_s13 + $0x1b4] sm:$0xf0]  ;;  %v2040_v18 = vor.u32 %v2245_v13, %v2039_v12  ;;  %v2211_v20 = vld [vmem:[%s2627_s13 + $0x24] sm:$0xf0] }
  0x8a   : > { %1271 = vmatpush.bf16.msra.mxu3 %v2120_v62  ;;  %v1967_v21 = vld [vmem:[%s2627_s13 + $0xa0] sm:$0xf]  ;;  %v2104_v22 = vor.u32 %v2261_v15, %v2103_v14  ;;  %v2227_v23 = vld [vmem:[%s2627_s13 + $0xa4] sm:$0xf0]  ;;  %v1904_v28 = vor.u32 %v2211_v20, %v1903_v19  ;;  %v1895_v31 = vld [vmem:[%s2627_s13 + $0x10] sm:$0xf] }
  0x8b   : > { %1215 = vmatpush.bf16.msra.mxu0 %v1920_v4  ;;  %v2031_v24 = vld [vmem:[%s2627_s13 + $0x120] sm:$0xf]  ;;  %v2243_v25 = vld [vmem:[%s2627_s13 + $0x124] sm:$0xf0]  ;;  %v1968_v29 = vor.u32 %v2227_v23, %v1967_v21  ;;  %v2209_v32 = vld [vmem:[%s2627_s13 + $0x14] sm:$0xf0] }
  0x8c   : > { %1234 = vmatpush.bf16.msra.mxu1 %v1984_v5  ;;  %v2095_v26 = vld [vmem:[%s2627_s13 + $0x1a0] sm:$0xf]  ;;  %v2259_v27 = vld [vmem:[%s2627_s13 + $0x1a4] sm:$0xf0]  ;;  %v2032_v30 = vor.u32 %v2243_v25, %v2031_v24  ;;  %v1959_v33 = vld [vmem:[%s2627_s13 + $0x90] sm:$0xf]  ;;  %v1896_v41 = vor.u32 %v2209_v32, %v1895_v31 }
  0x8d   : > { %1253 = vmatpush.bf16.msra.mxu2 %v2048_v6  ;;  %v2096_v34 = vor.u32 %v2259_v27, %v2095_v26  ;;  %v2225_v35 = vld [vmem:[%s2627_s13 + $0x94] sm:$0xf0]  ;;  %v2023_v36 = vld [vmem:[%s2627_s13 + $0x110] sm:$0xf]  ;;  %v1887_v40 = vld [vmem:[%s2627_s13] sm:$0xf] }
  0x8e   : > { %1272 = vmatpush.bf16.msra.mxu3 %v2112_v10  ;;  %v2241_v37 = vld [vmem:[%s2627_s13 + $0x114] sm:$0xf0]  ;;  %v2087_v38 = vld [vmem:[%s2627_s13 + $0x190] sm:$0xf]  ;;  %v2207_v42 = vld [vmem:[%s2627_s13 + $0x4] sm:$0xf0]  ;;  %v1960_v45 = vor.u32 %v2225_v35, %v1959_v33 }
  0x8f   : > { %1216 = vmatpush.bf16.msra.mxu0 %v1912_v16  ;;  %v2257_v39 = vld [vmem:[%s2627_s13 + $0x194] sm:$0xf0]  ;;  %v1951_v43 = vld [vmem:[%s2627_s13 + $0x80] sm:$0xf]  ;;  %v2223_v44 = vld [vmem:[%s2627_s13 + $0x84] sm:$0xf0]  ;;  %v2024_v46 = vor.u32 %v2241_v37, %v2023_v36  ;;  %v1888_v59 = vor.u32 %v2207_v42, %v1887_v40 }
  0x90   : > { %1235 = vmatpush.bf16.msra.mxu1 %v1976_v17  ;;  %v2015_v47 = vld [vmem:[%s2627_s13 + $0x100] sm:$0xf]  ;;  %v2239_v48 = vld [vmem:[%s2627_s13 + $0x104] sm:$0xf0]  ;;  %v2088_v50 = vor.u32 %v2257_v39, %v2087_v38  ;;  %v2198_v53 = vld [vmem:[%s3077_s0 + $0x10] sm:$0xf0]  ;;  %v1952_v63 = vor.u32 %v2223_v44, %v1951_v43 }
  0x91   : > { %1254 = vmatpush.bf16.msra.mxu2 %v2040_v18  ;;  %v2079_v49 = vld [vmem:[%s2627_s13 + $0x180] sm:$0xf]  ;;  %v2255_v51 = vld [vmem:[%s2627_s13 + $0x184] sm:$0xf0]  ;;  %v2196_v54 = vld [vmem:[%s3077_s0 + $0x4] sm:$0xf]  ;;  %v2016_v0 = vor.u32 %v2239_v48, %v2015_v47 }
  0x92   : > { %1273 = vmatpush.bf16.msra.mxu3 %v2104_v22  ;;  %v1847_v52 = vld [vmem:[%s3077_s0] sm:$0xf]  ;;  %v1849_v55 = vld [vmem:[%s3077_s0 + $0x14] sm:$0xf0]  ;;  %v1855_v56 = vld [vmem:[%s3077_s0 + $0x8] sm:$0xf]  ;;  %v2080_v4 = vor.u32 %v2255_v51, %v2079_v49 }
  0x93   : > { %1217 = vmatpush.bf16.msra.mxu0 %v1904_v28  ;;  %v2236_v57 = vld [vmem:[%s2627_s13 + $0xf4] sm:$0xf]  ;;  %v2009_v58 = vld [vmem:[%s2627_s13 + $0xf8] sm:$0xf0]  ;;  %v2197_v1 = vld [vmem:[%s3077_s0 + $0xc] sm:$0xf]  ;;  %v2725_v9 = vor.u32 %v2198_v53, %v1847_v52  ;;  %v2729_v13 = vor.u32 %v2196_v54, %v1849_v55 }
  0x94   : > { %1236 = vmatpush.bf16.msra.mxu1 %v1968_v29  ;;  %v2199_v60 = vld [vmem:[%s3077_s0 + $0x18] sm:$0xf0]  ;;  %v2220_v61 = vld [vmem:[%s2627_s13 + $0x74] sm:$0xf]  ;;  %v1857_v2 = vld [vmem:[%s3077_s0 + $0x1c] sm:$0xf0]  ;;  %v2012_v5 = vor.u32 %v2236_v57, %v2009_v58 }
  0x95   : > { %1255 = vmatpush.bf16.msra.mxu2 %v2032_v30  ;;  %v1945_v62 = vld [vmem:[%s2627_s13 + $0x78] sm:$0xf0]  ;;  %v2252_v3 = vld [vmem:[%s2627_s13 + $0x174] sm:$0xf]  ;;  %v2167_v7 = vld [vmem:[%s2627_s13 + $0x230] sm:$0xf]  ;;  %v2731_v14 = vor.u32 %v2199_v60, %v1855_v56  ;;  %v2735_v18 = vor.u32 %v2197_v1, %v1857_v2 }
  0x96   : > { %1274 = vmatpush.bf16.msra.mxu3 %v2096_v34  ;;  %v2073_v6 = vld [vmem:[%s2627_s13 + $0x178] sm:$0xf0]  ;;  %v2277_v8 = vld [vmem:[%s2627_s13 + $0x234] sm:$0xf0]  ;;  %v1948_v10 = vor.u32 %v2220_v61, %v1945_v62  ;;  %v2234_v11 = vld [vmem:[%s2627_s13 + $0xe4] sm:$0xf] }
  0x97   : > { %1218 = vmatpush.bf16.msra.mxu0 %v1896_v41  ;;  %v2001_v12 = vld [vmem:[%s2627_s13 + $0xe8] sm:$0xf0]  ;;  %v2218_v15 = vld [vmem:[%s2627_s13 + $0x64] sm:$0xf]  ;;  %v2377_v17 = vmov 0   ;;  %v2168_v19 = vor.u32 %v2277_v8, %v2167_v7  ;;  %v2076_v20 = vor.u32 %v2252_v3, %v2073_v6  ;;  %v773_v61 = vld [vmem:[%s3079_s2 + $0x10] sm:$0xff] }
  0x98   : > { %1237 = vmatpush.bf16.msra.mxu1 %v1960_v45  ;;  %v1937_v16 = vld [vmem:[%s2627_s13 + $0x68] sm:$0xf0]  ;;  %2319 = vset.pattern.permute.xlu0 %v2377_v17  ;;  %v2004_v21 = vor.u32 %v2234_v11, %v2001_v12  ;;  %v2250_v22 = vld [vmem:[%s2627_s13 + $0x164] sm:$0xf]  ;;  %v2159_v23 = vld [vmem:[%s2627_s13 + $0x220] sm:$0xf] }
  0x99   : > { %1256 = vmatpush.bf16.msra.mxu2 %v2024_v46  ;;  %v2275_v24 = vld [vmem:[%s2627_s13 + $0x224] sm:$0xf0]  ;;  %v1940_v25 = vor.u32 %v2218_v15, %v1937_v16  ;;  %v2065_v26 = vld [vmem:[%s2627_s13 + $0x168] sm:$0xf0]  ;;  %v2232_v27 = vld [vmem:[%s2627_s13 + $0xd4] sm:$0xf]  ;;  %2320 = vset.pattern.permute.xlu1 %v2377_v17 }
  0x9a   : > { %1275 = vmatpush.bf16.msra.mxu3 %v2088_v50  ;;  %v1993_v28 = vld [vmem:[%s2627_s13 + $0xd8] sm:$0xf0]  ;;  %v2216_v29 = vld [vmem:[%s2627_s13 + $0x54] sm:$0xf]  ;;  %v771_v31 = vld [vmem:[%s3079_s2] sm:$0xff]  ;;  %v2160_v32 = vor.u32 %v2275_v24, %v2159_v23  ;;  %v2068_v33 = vor.u32 %v2250_v22, %v2065_v26  ;;  %787 = vperm.xlu1 %2320, %v773_v61   ;;  %vm1205_vm0 = vcmask 523264  }
  0x9b   : > { %1219 = vmatpush.bf16.msra.mxu0 %v1888_v59  ;;  %v1929_v30 = vld [vmem:[%s2627_s13 + $0x58] sm:$0xf0]  ;;  %v1996_v34 = vor.u32 %v2232_v27, %v1993_v28  ;;  %v2248_v35 = vld [vmem:[%s2627_s13 + $0x154] sm:$0xf]  ;;  %777 = vperm.xlu0 %2319, %v771_v31   ;;  %v2230_v38 = vld [vmem:[%s2627_s13 + $0xc4] sm:$0xf] }
  0x9c   : > { %1238 = vmatpush.bf16.msra.mxu1 %v1952_v63  ;;  %v1932_v36 = vor.u32 %v2216_v29, %v1929_v30  ;;  %v2057_v37 = vld [vmem:[%s2627_s13 + $0x158] sm:$0xf0]  ;;  %v1985_v39 = vld [vmem:[%s2627_s13 + $0xc8] sm:$0xf0]  ;;  %v2214_v40 = vld [vmem:[%s2627_s13 + $0x44] sm:$0xf] }
  0x9d   : > { %1257 = vmatpush.bf16.msra.mxu2 %v2016_v0  ;;  %v1921_v41 = vld [vmem:[%s2627_s13 + $0x48] sm:$0xf0]  ;;  %v2246_v42 = vld [vmem:[%s2627_s13 + $0x144] sm:$0xf]  ;;  %v2151_v44 = vld [vmem:[%s2627_s13 + $0x210] sm:$0xf]  ;;  %v2060_v45 = vor.u32 %v2248_v35, %v2057_v37  ;;  %v1988_v46 = vor.u32 %v2230_v38, %v1985_v39 }
  0x9e   : > { %1276 = vmatpush.bf16.msra.mxu3 %v2080_v4  ;;  %1220 = vmatmul.bf16.vlgmr.msra.gmra.mxu0 %v2725_v9  ;;  %v2049_v43 = vld [vmem:[%s2627_s13 + $0x148] sm:$0xf0]  ;;  %v1867_v47 = vld [vmem:[%s3077_s0 + $0x28] sm:$0xf]  ;;  %v2203_v48 = vld [vmem:[%s3077_s0 + $0x38] sm:$0xf0]  ;;  %v1924_v50 = vor.u32 %v2214_v40, %v1921_v41 }
  0x9f   : > { %1239 = vmatmul.bf16.vlgmr.msra.gmra.mxu1 %v2729_v13  ;;  %1292 = vmatpush.bf16.msrb.mxu0 %v2168_v19  ;;  %v2273_v49 = vld [vmem:[%s2627_s13 + $0x214] sm:$0xf0]  ;;  %v2201_v51 = vld [vmem:[%s3077_s0 + $0x2c] sm:$0xf]  ;;  %v1869_v52 = vld [vmem:[%s3077_s0 + $0x3c] sm:$0xf0]  ;;  %v2052_v1 = vor.u32 %v2246_v42, %v2049_v43  ;;  %v2800_v7 = vor.u32 %v2203_v48, %v1867_v47 }
  0xa0   : > { %1307 = vmatpush.bf16.msrb.mxu1 %v1948_v10  ;;  %1258 = vmatmul.bf16.vlgmr.msra.gmra.mxu2 %v2731_v14  ;;  %v1875_v53 = vld [vmem:[%s3077_s0 + $0x30] sm:$0xf]  ;;  %v2204_v54 = vld [vmem:[%s3077_s0 + $0x40] sm:$0xf0]  ;;  %v2228_v55 = vld [vmem:[%s2627_s13 + $0xb4] sm:$0xf]  ;;  %v2152_v58 = vor.u32 %v2273_v49, %v2151_v44  ;;  %v2805_v15 = vor.u32 %v2201_v51, %v1869_v52 }
  0xa1   : > { %1326 = vmatpush.bf16.msrb.mxu2 %v2012_v5  ;;  %1277 = vmatmul.bf16.vlgmr.msra.gmra.mxu3 %v2735_v18  ;;  %v1977_v56 = vld [vmem:[%s2627_s13 + $0xb8] sm:$0xf0]  ;;  %v2212_v57 = vld [vmem:[%s2627_s13 + $0x34] sm:$0xf]  ;;  %v772_v60 = vld [vmem:[%s3079_s2 + $0x8] sm:$0xff]  ;;  %v2807_v16 = vor.u32 %v2204_v54, %v1875_v53  ;;  %s2278_s15 = sshll.u32 (%p2448_p5), %s2429_s24, 4 }
  0xa2   : > { %1345 = vmatpush.bf16.msrb.mxu3 %v2076_v20  ;;  %v1913_v59 = vld [vmem:[%s2627_s13 + $0x38] sm:$0xf0]  ;;  %v2202_v62 = vld [vmem:[%s3077_s0 + $0x34] sm:$0xf]  ;;  %v2143_v63 = vld [vmem:[%s2627_s13 + $0x200] sm:$0xf]  ;;  %v1980_v3 = vor.u32 %v2228_v55, %v1977_v56  ;;  %s1639_s18 = scalar_lea.vmem (%p2448_p5), %s3082_s5, %s2278_s15 }
  0xa3   : > { %1293 = vmatpush.bf16.msrb.mxu0 %v2160_v32  ;;  %v2271_v0 = vld [vmem:[%s2627_s13 + $0x204] sm:$0xf0]  ;;  %v2244_v4 = vld [vmem:[%s2627_s13 + $0x134] sm:$0xf]  ;;  %v2041_v5 = vld [vmem:[%s2627_s13 + $0x138] sm:$0xf0]  ;;  %v1916_v8 = vor.u32 %v2212_v57, %v1913_v59  ;;  %782 = vperm.xlu0 %2319, %v772_v60  }
  0xa4   : > { %1308 = vmatpush.bf16.msrb.mxu1 %v1940_v25  ;;  %v1877_v2 = vld [vmem:[%s3077_s0 + $0x44] sm:$0xf0]  ;;  %v2144_v6 = vor.u32 %v2271_v0, %v2143_v63  ;;  %v2226_v10 = vld [vmem:[%s2627_s13 + $0xa4] sm:$0xf]  ;;  %v1969_v11 = vld [vmem:[%s2627_s13 + $0xa8] sm:$0xf0]  ;;  %v2044_v23 = vor.u32 %v2244_v4, %v2041_v5 }
  0xa5   : > { %1327 = vmatpush.bf16.msrb.mxu2 %v2004_v21  ;;  %v2210_v12 = vld [vmem:[%s2627_s13 + $0x24] sm:$0xf]  ;;  %v1905_v17 = vld [vmem:[%s2627_s13 + $0x28] sm:$0xf0]  ;;  %v2268_v19 = vld [vmem:[%s2627_s13 + $0x1f4] sm:$0xf]  ;;  %v2812_v21 = vor.u32 %v2202_v62, %v1877_v2  ;;  %v1972_v24 = vor.u32 %v2226_v10, %v1969_v11 }
  0xa6   : > { %1346 = vmatpush.bf16.msrb.mxu3 %v2068_v33  ;;  %v2137_v20 = vld [vmem:[%s2627_s13 + $0x1f8] sm:$0xf0]  ;;  %v2242_v25 = vld [vmem:[%s2627_s13 + $0x124] sm:$0xf]  ;;  %v2129_v27 = vld [vmem:[%s2627_s13 + $0x1e8] sm:$0xf0]  ;;  %v1908_v28 = vor.u32 %v2210_v12, %v1905_v17 }
  0xa7   : > { %1294 = vmatpush.bf16.msrb.mxu0 %v2152_v58  ;;  %v2140_v22 = vor.u32 %v2268_v19, %v2137_v20  ;;  %v2266_v26 = vld [vmem:[%s2627_s13 + $0x1e4] sm:$0xf]  ;;  %v2033_v29 = vld [vmem:[%s2627_s13 + $0x128] sm:$0xf0]  ;;  %v2224_v30 = vld [vmem:[%s2627_s13 + $0x94] sm:$0xf] }
  0xa8   : > { %1309 = vmatpush.bf16.msrb.mxu1 %v1932_v36  ;;  %v1961_v31 = vld [vmem:[%s2627_s13 + $0x98] sm:$0xf0]  ;;  %v2208_v32 = vld [vmem:[%s2627_s13 + $0x14] sm:$0xf]  ;;  %v2132_v35 = vor.u32 %v2266_v26, %v2129_v27  ;;  %v2036_v36 = vor.u32 %v2242_v25, %v2033_v29  ;;  %v2222_v43 = vld [vmem:[%s2627_s13 + $0x84] sm:$0xf] }
  0xa9   : > { %1328 = vmatpush.bf16.msrb.mxu2 %v1996_v34  ;;  %v1897_v33 = vld [vmem:[%s2627_s13 + $0x18] sm:$0xf0]  ;;  %v1964_v37 = vor.u32 %v2224_v30, %v1961_v31  ;;  %v2240_v38 = vld [vmem:[%s2627_s13 + $0x114] sm:$0xf]  ;;  %v1953_v44 = vld [vmem:[%s2627_s13 + $0x88] sm:$0xf0] }
  0xaa   : > { %1347 = vmatpush.bf16.msrb.mxu3 %v2060_v45  ;;  %v774_v34 = vld [vmem:[%s3079_s2 + $0x18] sm:$0xff]  ;;  %v2264_v39 = vld [vmem:[%s2627_s13 + $0x1d4] sm:$0xf]  ;;  %v1900_v41 = vor.u32 %v2208_v32, %v1897_v33  ;;  %v2206_v45 = vld [vmem:[%s2627_s13 + $0x4] sm:$0xf]  ;;  %v1956_v51 = vor.u32 %v2222_v43, %v1953_v44 }
  0xab   : > { %1295 = vmatpush.bf16.msrb.mxu0 %v2144_v6  ;;  %v2121_v40 = vld [vmem:[%s2627_s13 + $0x1d8] sm:$0xf0]  ;;  %792 = vperm.xlu1 %2320, %v774_v34   ;;  %v2276_v47 = vld [vmem:[%s2627_s13 + $0x234] sm:$0xf]  ;;  %v2262_v52 = vld [vmem:[%s2627_s13 + $0x1c4] sm:$0xf] }
  0xac   : > { %1310 = vmatpush.bf16.msrb.mxu1 %v1924_v50  ;;  %v2025_v42 = vld [vmem:[%s2627_s13 + $0x118] sm:$0xf0]  ;;  %v2124_v49 = vor.u32 %v2264_v39, %v2121_v40  ;;  %v2113_v53 = vld [vmem:[%s2627_s13 + $0x1c8] sm:$0xf0]  ;;  %v2238_v55 = vld [vmem:[%s2627_s13 + $0x104] sm:$0xf] }
  0xad   : > { %1329 = vmatpush.bf16.msrb.mxu2 %v1988_v46  ;;  %v1889_v46 = vld [vmem:[%s2627_s13 + $0x8] sm:$0xf0]  ;;  %v2169_v48 = vld [vmem:[%s2627_s13 + $0x238] sm:$0xf0]  ;;  %v2028_v50 = vor.u32 %v2240_v38, %v2025_v42  ;;  %v1863_v57 = vld [vmem:[%s3077_s0 + $0x10] sm:$0xf]  ;;  %v2116_v60 = vor.u32 %v2262_v52, %v2113_v53 }
  0xae   : > { %1348 = vmatpush.bf16.msrb.mxu3 %v2052_v1  ;;  %1225 = vmatmul.bf16.gmra.mxu0 %v2800_v7  ;;  %v1892_v54 = vor.u32 %v2206_v45, %v1889_v46  ;;  %v2017_v56 = vld [vmem:[%s2627_s13 + $0x108] sm:$0xf0]  ;;  %v2200_v58 = vld [vmem:[%s3077_s0 + $0x20] sm:$0xf0]  ;;  %v2172_v59 = vor.u32 %v2276_v47, %v2169_v48  ;;  %v2260_v1 = vld [vmem:[%s2627_s13 + $0x1b4] sm:$0xf] }
  0xaf   : > { %1244 = vmatmul.bf16.gmra.mxu1 %v2805_v15  ;;  %1364 = vmatpush.bf16.msra.mxu0 %v2140_v22  ;;  %v2020_v61 = vor.u32 %v2238_v55, %v2017_v56  ;;  %v2274_v62 = vld [vmem:[%s2627_s13 + $0x224] sm:$0xf]  ;;  %v1864_v63 = vor.u32 %v2200_v58, %v1863_v57  ;;  %v2161_v0 = vld [vmem:[%s2627_s13 + $0x228] sm:$0xf0]  ;;  %v2105_v2 = vld [vmem:[%s2627_s13 + $0x1b8] sm:$0xf0] }
  0xb0   : > { %1311 = vmatpush.bf16.msrb.mxu1 %v1916_v8  ;;  %1263 = vmatmul.bf16.gmra.mxu2 %v2807_v16  ;;  %v2108_v4 = vor.u32 %v2260_v1, %v2105_v2  ;;  %v2272_v5 = vld [vmem:[%s2627_s13 + $0x214] sm:$0xf]  ;;  %v2153_v6 = vld [vmem:[%s2627_s13 + $0x218] sm:$0xf0]  ;;  %v2258_v8 = vld [vmem:[%s2627_s13 + $0x1a4] sm:$0xf] }
  0xb1   : > { %1330 = vmatpush.bf16.msrb.mxu2 %v1980_v3  ;;  %1282 = vmatmul.bf16.gmra.mxu3 %v2812_v21  ;;  %v2164_v3 = vor.u32 %v2274_v62, %v2161_v0  ;;  %v2097_v10 = vld [vmem:[%s2627_s13 + $0x1a8] sm:$0xf0]  ;;  %v2156_v11 = vor.u32 %v2272_v5, %v2153_v6  ;;  %v2256_v17 = vld [vmem:[%s2627_s13 + $0x194] sm:$0xf]  ;;  %v2089_v19 = vld [vmem:[%s2627_s13 + $0x198] sm:$0xf0] }
  0xb2   : > { %1349 = vmatpush.bf16.msrb.mxu3 %v2044_v23  ;;  %v2100_v12 = vor.u32 %v2258_v8, %v2097_v10  ;;  %v2270_v20 = vld [vmem:[%s2627_s13 + $0x204] sm:$0xf]  ;;  %v2092_v23 = vor.u32 %v2256_v17, %v2089_v19  ;;  %v2205_v25 = vld [vmem:[%s3077_s0 + $0x48] sm:$0xf0] }
  0xb3   : > { %1365 = vmatpush.bf16.msra.mxu0 %v2132_v35 }
  0xb4   : > { %1312 = vmatpush.bf16.msrb.mxu1 %v1908_v28 }
  0xb5   : > { %1331 = vmatpush.bf16.msrb.mxu2 %v1972_v24  ;;  %v1883_v24 = vld [vmem:[%s3077_s0 + $0x38] sm:$0xf] }
  0xb6   : > { %1350 = vmatpush.bf16.msrb.mxu3 %v2036_v36  ;;  %v1884_v27 = vor.u32 %v2205_v25, %v1883_v24 }
  0xb7   : > { %1366 = vmatpush.bf16.msra.mxu0 %v2124_v49 }
  0xb8   : > { %1313 = vmatpush.bf16.msrb.mxu1 %v1900_v41 }
  0xb9   : > { %1332 = vmatpush.bf16.msrb.mxu2 %v1964_v37 }
  0xba   : > { %1351 = vmatpush.bf16.msrb.mxu3 %v2028_v50 }
  0xbb   : > { %1367 = vmatpush.bf16.msra.mxu0 %v2116_v60 }
  0xbc   : > { %1314 = vmatpush.bf16.msrb.mxu1 %v1892_v54 }
  0xbd   : > { %1333 = vmatpush.bf16.msrb.mxu2 %v1956_v51 }
  0xbe   : > { %1352 = vmatpush.bf16.msrb.mxu3 %v2020_v61  ;;  %2173 = vmatmul.msk.bf16.vlgmr.msrb.gmra.mxu0 %vm1205_vm0, %v1864_v63 }
  0xbf   : > { %1315 = vmatmul.bf16.vlgmr.msrb.gmra.mxu1 %v2725_v9  ;;  %1368 = vmatpush.bf16.msra.mxu0 %v2108_v4 }
  0xc0   : > { %1387 = vmatpush.bf16.msra.mxu1 %v2172_v59  ;;  %1334 = vmatmul.bf16.vlgmr.msrb.gmra.mxu2 %v2729_v13  ;;  %v2254_v13 = vld [vmem:[%s2627_s13 + $0x184] sm:$0xf] }
  0xc1   : > { %2280 = vmatpush.bf16.msra.mxu2 %v2140_v22  ;;  %1353 = vmatmul.bf16.vlgmr.msrb.gmra.mxu3 %v2731_v14  ;;  %v2145_v22 = vld [vmem:[%s2627_s13 + $0x208] sm:$0xf0] }
  0xc2   : > { %2288 = vmatpush.bf16.msra.mxu3 %v2172_v59  ;;  %v2148_v9 = vor.u32 %v2270_v20, %v2145_v22  ;;  %v2081_v14 = vld [vmem:[%s2627_s13 + $0x188] sm:$0xf0]  ;;  %s2891_s13 = sshll.u32 %s627_s29, 6 }
  0xc3   : > { %1369 = vmatpush.bf16.msra.mxu0 %v2100_v12  ;;  %v2084_v26 = vor.u32 %v2254_v13, %v2081_v14  ;;  %s2895_s23 = scalar_lea.vmem [#allocation5], %s2891_s13  ;;  %s2922_s21 = scalar_lea.vmem [#allocation4], %s2891_s13 }
  0xc4   : > { %1388 = vmatpush.bf16.msra.mxu1 %v2164_v3  ;;  %v1418_v24 = vld [vmem:[%s2922_s21] sm:$0xff]  ;;  %s2932_s29 = scalar_lea.vmem [#allocation3], %s2891_s13  ;;  %s2959_s14 = scalar_lea.vmem [#allocation6], %s2891_s13 }
  0xc5   : > { %2281 = vmatpush.bf16.msra.mxu2 %v2132_v35 }
  0xc6   : > { %2289 = vmatpush.bf16.msra.mxu3 %v2164_v3 }
  0xc7   : > { %1370 = vmatpush.bf16.msra.mxu0 %v2092_v23 }
  0xc8   : > { %1389 = vmatpush.bf16.msra.mxu1 %v2156_v11 }
  0xc9   : > { %2282 = vmatpush.bf16.msra.mxu2 %v2124_v49 }
  0xca   : > { %2290 = vmatpush.bf16.msra.mxu3 %v2156_v11 }
  0xcb   : > { %1371 = vmatpush.bf16.msra.mxu0 %v2084_v26 }
  0xcc   : > { %1390 = vmatpush.bf16.msra.mxu1 %v2148_v9 }
  0xcd   : > { %2283 = vmatpush.bf16.msra.mxu2 %v2116_v60 }
  0xce   : > { %2291 = vmatpush.bf16.msra.mxu3 %v2148_v9  ;;  %2174 = vmatmul.msk.bf16.gmra.mxu0 %vm1205_vm0, %v1884_v27 }
  0xcf   : > { %1320 = vmatmul.bf16.gmra.mxu1 %v2800_v7 }
  0xd0   : > { %1339 = vmatmul.bf16.gmra.mxu2 %v2805_v15 }
  0xd1   : > { %2284 = vmatpush.bf16.msra.mxu2 %v2108_v4  ;;  %1358 = vmatmul.bf16.gmra.mxu3 %v2807_v16 }
  0xd5   : > { %2285 = vmatpush.bf16.msra.mxu2 %v2100_v12 }
  0xd9   : > { %2286 = vmatpush.bf16.msra.mxu2 %v2092_v23 }
  0xdd   : > { %2287 = vmatpush.bf16.msra.mxu2 %v2084_v26 }
  0xde   : > { %1372 = vmatmul.bf16.vlgmr.msra.gmra.mxu0 %v2735_v18 }
  0xdf   : > { %2175 = vmatmul.msk.bf16.vlgmr.msra.gmra.mxu1 %vm1205_vm0, %v1864_v63 }
  0xe0   : > { %1377 = vmatmul.bf16.vlgmr.msra.gmra.mxu2 %v2812_v21 }
  0xe1   : > { %2176 = vmatmul.msk.bf16.vlgmr.msra.gmra.mxu3 %vm1205_vm0, %v1884_v27 }
 0x10c   : > { %v2887_v44 = vpop.permute.xlu1 %787 }
 0x10d   : > { %v2881_v15 = vpop.permute.xlu0 %777 }
 0x115   : > { %v2884_v40 = vpop.permute.xlu0 %782 }
 0x11b   : > { %v1221_v28 = vpop.f32.mrf.mxu0 }
 0x11c   : > { %v1240_v29 = vpop.f32.mrf.mxu1  ;;  %v1222_v18 = vadd.f32 %v1221_v28, %v2881_v15 }
 0x11d   : > { %v2902_v62 = vpop.permute.xlu1 %792 }
 0x11e   : > { %v1241_v21 = vadd.f32 %v1240_v29, %v1222_v18 }
 0x123   : > { %v1259_v30 = vpop.f32.mrf.mxu2  ;;  %v1223_v7 = vpop.f32.mrf.mxu0 }
 0x124   : > { %v1278_v31 = vpop.f32.mrf.mxu3  ;;  %v1242_v32 = vpop.f32.mrf.mxu1  ;;  %v1260_v41 = vadd.f32 %v1259_v30, %v1241_v21  ;;  %v1224_v42 = vadd.f32 %v1223_v7, %v2884_v40 }
 0x126   : > { %v1279_v43 = vadd.f32 %v1278_v31, %v1260_v41  ;;  %v1243_v48 = vadd.f32 %v1242_v32, %v1224_v42  ;;  %v1420_v42 = vld [vmem:[%s2922_s21 + $0x10] sm:$0xff] }
 0x12b   : > { %v1261_v16 = vpop.f32.mrf.mxu2  ;;  %v1226_v34 = vpop.f32.mrf.mxu0 }
 0x12c   : > { %v1280_v33 = vpop.f32.mrf.mxu3  ;;  %v1245_v35 = vpop.f32.mrf.mxu1  ;;  %v1262_v51 = vadd.f32 %v1261_v16, %v1243_v48  ;;  %v1227_v52 = vadd.f32 %v1226_v34, %v2887_v44 }
 0x12e   : > { %v1281_v55 = vadd.f32 %v1280_v33, %v1262_v51  ;;  %v1246_v56 = vadd.f32 %v1245_v35, %v1227_v52  ;;  %v1434_v33 = vld [vmem:[%s2932_s29] sm:$0xff] }
 0x133   : > { %v1264_v36 = vpop.f32.mrf.mxu2  ;;  %v1228_v38 = vpop.f32.mrf.mxu0 }
 0x134   : > { %v1283_v37 = vpop.f32.mrf.mxu3  ;;  %v1247_v39 = vpop.f32.mrf.mxu1  ;;  %v1265_v63 = vadd.f32 %v1264_v36, %v1246_v56  ;;  %v1229_v2 = vadd.f32 %v1228_v38, %v2902_v62 }
 0x136   : > { %v1284_v5 = vadd.f32 %v1283_v37, %v1265_v63  ;;  %v1248_v11 = vadd.f32 %v1247_v39, %v1229_v2 }
 0x13b   : > { %v1266_v45 = vpop.f32.mrf.mxu2  ;;  %v1297_v47 = vpop.f32.mrf.mxu0 }
 0x13c   : > { %v1285_v46 = vpop.f32.mrf.mxu3  ;;  %v1298_v49 = vadd.f32 %v1297_v47, %v1279_v43  ;;  %v1316_v50 = vpop.f32.mrf.mxu1  ;;  %v1267_v19 = vadd.f32 %v1266_v45, %v1248_v11 }
 0x13d   : > { %v1317_v27 = vadd.f32 %v1316_v50, %v2881_v15 }
 0x13e   : > { %v1402_v53 = vmax.f32 %v1298_v49, 0.0  ;;  %v1286_v14 = vadd.f32 %v1285_v46, %v1267_v19 }
 0x140   : > { %1410 = vst [vmem:[%s2895_s23] sm:$0xff] %v1402_v53  ;;  %v2177_v54 = vmul.f32 -1.442695, %v1402_v53  ;;  %v1426_v32 = vadd.f32 %v1418_v24, %v1402_v53 }
 0x142   : > { %2321 = vpow2.f32 %v2177_v54  ;;  %v1442_v39 = vmul.f32 %v1434_v33, %v1426_v32 }
 0x143   : > { %v1335_v57 = vpop.f32.mrf.mxu2  ;;  %v1299_v59 = vpop.f32.mrf.mxu0 }
 0x144   : > { %v2898_v58 = vpop.f32.mrf.mxu3  ;;  %v1300_v60 = vadd.f32 %v1299_v59, %v1281_v55  ;;  %v2900_v61 = vpop.f32.mrf.mxu1  ;;  %v1336_v18 = vadd.f32 %v1335_v57, %v1317_v27 }
 0x145   : > { %v1319_v51 = vadd.f32 %v2900_v61, %v2884_v40  ;;  %v1436_v61 = vld [vmem:[%s2932_s29 + $0x10] sm:$0xff] }
 0x146   : > { %v2904_v0 = vmax.f32 %v1300_v60, 0.0  ;;  %v1355_v50 = vadd.f32 %v2898_v58, %v1336_v18 }
 0x148   : > { %v2322_v1 = vpop.eup %2321  ;;  %1412 = vst [vmem:[%s2895_s23 + $0x10] sm:$0xff] %v2904_v0  ;;  %v2179_v3 = vmul.f32 -1.442695, %v2904_v0  ;;  %v1428_v55 = vadd.f32 %v1420_v42, %v2904_v0 }
 0x149   : > { %v1474_v4 = vadd.f32 1.0, %v2322_v1 }
 0x14a   : > { %2323 = vpow2.f32 %v2179_v3  ;;  %v1422_v3 = vld [vmem:[%s2922_s21 + $0x20] sm:$0xff] }
 0x14b   : > { %v2910_v6 = vpop.f32.mrf.mxu2  ;;  %2325 = vrcp.f32 %v1474_v4  ;;  %v1302_v10 = vpop.f32.mrf.mxu0  ;;  %v1493_v16 = vand.u32 2147483648, %v1474_v4  ;;  %v1491_v15 = vand.u32 2147483647, %v1474_v4  ;;  %vm1487_vm2 = vweird.f32 %v1474_v4 }
 0x14c   : > { %v2912_v8 = vpop.f32.mrf.mxu3  ;;  %v1303_v12 = vadd.f32 %v1302_v10, %v1284_v5  ;;  %v1321_v17 = vpop.f32.mrf.mxu1  ;;  %v1338_v59 = vadd.f32 %v2910_v6, %v1319_v51  ;;  %v1444_v5 = vmul.f32 %v1436_v61, %v1428_v55 }
 0x14d   : > { %v1494_v41 = vor.u32 1.1754944e-38, %v1493_v16  ;;  %vm1492_vm4 = vcmp.eq.f32.partialorder %v1491_v15, 8.507059e+37  ;;  %v1322_v47 = vadd.f32 %v1321_v17, %v2887_v44 }
 0x14e   : > { %v2914_v20 = vmax.f32 %v1303_v12, 0.0  ;;  %v1357_v10 = vadd.f32 %v2912_v8, %v1338_v59 }
 0x150   : > { %v2324_v22 = vpop.eup %2323  ;;  %1414 = vst [vmem:[%s2895_s23 + $0x20] sm:$0xff] %v2914_v20  ;;  %v2181_v23 = vmul.f32 -1.442695, %v2914_v20 }
 0x151   : > { %v2326_v9 = vpop.eup %2325  ;;  %v2919_v13 = vadd.f32 1.0, %v2324_v22 }
 0x152   : > { %v1483_v25 = vmul.f32 %v2326_v9, %v1474_v4  ;;  %2327 = vpow2.f32 %v2181_v23  ;;  %vm1488_vm1 = vweird.f32 %v2326_v9 }
 0x153   : > { %v1340_v26 = vpop.f32.mrf.mxu2  ;;  %2329 = vrcp.f32 %v2919_v13  ;;  %v1304_v29 = vpop.f32.mrf.mxu0  ;;  %vm1489_vm3 = vmor %vm1487_vm2, %vm1488_vm1  ;;  %v1521_v57 = vand.u32 2147483647, %v2919_v13  ;;  %v1523_v58 = vand.u32 2147483648, %v2919_v13  ;;  %vm1517_vm6 = vweird.f32 %v2919_v13 }
 0x154   : > { %v2927_v28 = vpop.f32.mrf.mxu3  ;;  %v1484_v30 = vsub.f32 1.0, %v1483_v25  ;;  %v1305_v31 = vadd.f32 %v1304_v29, %v1286_v14  ;;  %v2929_v7 = vpop.f32.mrf.mxu1  ;;  %v1341_v1 = vadd.f32 %v1340_v26, %v1322_v47 }
 0x155   : > { %v1524_v6 = vor.u32 1.1754944e-38, %v1523_v58  ;;  %vm1522_vm8 = vcmp.eq.f32.partialorder %v1521_v57, 8.507059e+37 }
 0x156   : > { %v1485_v34 = vmul.f32 %v2326_v9, %v1484_v30  ;;  %v2935_v35 = vmax.f32 %v1305_v31, 0.0  ;;  %v1360_v22 = vadd.f32 %v2927_v28, %v1341_v1 }
 0x158   : > { %v2328_v21 = vpop.eup %2327  ;;  %v1486_v36 = vadd.f32 %v2326_v9, %v1485_v34  ;;  %1416 = vst [vmem:[%s2895_s23 + $0x30] sm:$0xff] %v2935_v35  ;;  %v2183_v37 = vmul.f32 -1.442695, %v2935_v35  ;;  %v1438_v34 = vld [vmem:[%s2932_s29 + $0x20] sm:$0xff] }
 0x159   : > { %v2330_v38 = vpop.eup %2329  ;;  %v2941_v43 = vadd.f32 1.0, %v2328_v21 }
 0x15a   : > { %v1490_v45 = vsel %vm1489_vm3, %v2326_v9, %v1486_v36  ;;  %v1513_v46 = vmul.f32 %v2330_v38, %v2919_v13  ;;  %vm1518_vm5 = vweird.f32 %v2330_v38  ;;  %v1430_v13 = vadd.f32 %v1422_v3, %v2914_v20 }
 0x15b   : > { %v2945_v48 = vpop.f32.mrf.mxu2  ;;  %v1495_v49 = vsel %vm1492_vm4, %v1494_v41, %v1490_v45  ;;  %2331 = vrcp.f32 %v2941_v43  ;;  %v1373_v53 = vpop.f32.mrf.mxu0  ;;  %vm1519_vm7 = vmor %vm1517_vm6, %vm1518_vm5  ;;  %v1551_v30 = vand.u32 2147483647, %v2941_v43  ;;  %v1553_v28 = vand.u32 2147483648, %v2941_v43 }
 0x15c   : > { %v2951_v52 = vpop.f32.mrf.mxu3  ;;  %v1602_v54 = vmul.f32 %v1495_v49, %v1442_v39  ;;  %v1514_v56 = vsub.f32 1.0, %v1513_v46  ;;  %2333 = vpow2.f32 %v2183_v37  ;;  %v1392_v44 = vpop.f32.mrf.mxu1  ;;  %v1374_v40 = vadd.f32 %v1373_v53, %v1355_v50 }
 0x15d   : > { %v1324_v20 = vadd.f32 %v2929_v7, %v2902_v62  ;;  %vm1547_vm10 = vweird.f32 %v2941_v43  ;;  %v1554_v37 = vor.u32 1.1754944e-38, %v1553_v28  ;;  %vm1552_vm12 = vcmp.eq.f32.partialorder %v1551_v30, 8.507059e+37  ;;  %v1421_v30 = vld [vmem:[%s2922_s21 + $0x18] sm:$0xff] }
 0x15e   : > { %v1610_v60 = vmax.f32 %v1602_v54, 0.0  ;;  %v1515_v63 = vmul.f32 %v2330_v38, %v1514_v56  ;;  %v1393_v2 = vadd.f32 %v1392_v44, %v1374_v40 }
 0x15f   : > { %v1343_v36 = vadd.f32 %v2945_v48, %v1324_v20  ;;  %v1424_v48 = vld [vmem:[%s2922_s21 + $0x30] sm:$0xff] }
 0x160   : > { %1618 = vst [vmem:[%s2959_s14] sm:$0xff] %v1610_v60  ;;  %v1516_v0 = vadd.f32 %v2330_v38, %v1515_v63  ;;  %v2965_v11 = vmax.f32 %v1393_v2, 0.0  ;;  %v1432_v44 = vadd.f32 %v1424_v48, %v2935_v35  ;;  %v1440_v60 = vld [vmem:[%s2932_s29 + $0x30] sm:$0xff]  ;;  %v1437_v48 = vld [vmem:[%s2932_s29 + $0x18] sm:$0xff] }
 0x161   : > { %v2332_v4 = vpop.eup %2331  ;;  %v1362_v50 = vadd.f32 %v2951_v52, %v1343_v36 }
 0x162   : > { %v2334_v12 = vpop.eup %2333  ;;  %v1520_v17 = vsel %vm1519_vm7, %v2330_v38, %v1516_v0  ;;  %v1543_v19 = vmul.f32 %v2332_v4, %v2941_v43  ;;  %1411 = vst [vmem:[%s2895_s23 + $0x8] sm:$0xff] %v2965_v11  ;;  %v2178_v24 = vmul.f32 -1.442695, %v2965_v11  ;;  %vm1548_vm9 = vweird.f32 %v2332_v4 }
 0x163   : > { %v1378_v23 = vpop.f32.mrf.mxu2  ;;  %v1525_v9 = vsel %vm1522_vm8, %v1524_v6, %v1520_v17  ;;  %v2970_v14 = vadd.f32 1.0, %v2334_v12  ;;  %v1375_v8 = vpop.f32.mrf.mxu0  ;;  %vm1549_vm11 = vmor %vm1547_vm10, %vm1548_vm9  ;;  %v1446_v38 = vmul.f32 %v1438_v34, %v1430_v13  ;;  %v1448_v0 = vmul.f32 %v1440_v60, %v1432_v44  ;;  %v1419_v17 = vld [vmem:[%s2922_s21 + $0x8] sm:$0xff] }
 0x164   : > { %v1604_v25 = vmul.f32 %v1525_v9, %v1444_v5  ;;  %v1544_v26 = vsub.f32 1.0, %v1543_v19  ;;  %v1379_v27 = vadd.f32 %v1378_v23, %v1360_v22  ;;  %v1376_v29 = vadd.f32 %v1375_v8, %v1357_v10  ;;  %v1397_v31 = vpop.f32.mrf.mxu3  ;;  %v1394_v33 = vpop.f32.mrf.mxu1 }
 0x165   : > { %2335 = vrcp.f32 %v2970_v14  ;;  %v1583_v57 = vand.u32 2147483648, %v2970_v14  ;;  %v1581_v52 = vand.u32 2147483647, %v2970_v14  ;;  %vm1577_vm14 = vweird.f32 %v2970_v14 }
 0x166   : > { %v1612_v32 = vmax.f32 %v1604_v25, 0.0  ;;  %v1545_v16 = vmul.f32 %v2332_v4, %v1544_v26  ;;  %2337 = vpow2.f32 %v2178_v24  ;;  %v1398_v15 = vadd.f32 %v1397_v31, %v1379_v27  ;;  %v1435_v25 = vld [vmem:[%s2932_s29 + $0x8] sm:$0xff] }
 0x167   : > { %v1395_v18 = vadd.f32 %v1394_v33, %v1376_v29  ;;  %v1584_v35 = vor.u32 1.1754944e-38, %v1583_v57  ;;  %vm1582_vm0 = vcmp.eq.f32.partialorder %v1581_v52, 8.507059e+37  ;;  %v1427_v13 = vadd.f32 %v1419_v17, %v2965_v11  ;;  %v1423_v29 = vld [vmem:[%s2922_s21 + $0x28] sm:$0xff] }
 0x168   : > { %1620 = vst [vmem:[%s2959_s14 + $0x10] sm:$0xff] %v1612_v32  ;;  %v1546_v21 = vadd.f32 %v2332_v4, %v1545_v16  ;;  %v2984_v62 = vmax.f32 %v1398_v15, 0.0 }
 0x169   : > { %v2986_v7 = vmax.f32 %v1395_v18, 0.0  ;;  %v1443_v32 = vmul.f32 %v1435_v25, %v1427_v13  ;;  %v1656_v13 = vld [vmem:[%s2895_s23 + $0x10] sm:$0xff] (%p2448_p5) }
 0x16a   : > { %v1550_v39 = vsel %vm1549_vm11, %v2332_v4, %v1546_v21  ;;  %1415 = vst [vmem:[%s2895_s23 + $0x28] sm:$0xff] %v2984_v62  ;;  %v2182_v45 = vmul.f32 -1.442695, %v2984_v62  ;;  %v1431_v34 = vadd.f32 %v1423_v29, %v2984_v62  ;;  %v1664_v25 = vld [vmem:[%s2895_s23 + $0x30] sm:$0xff] (%p2448_p5) }
 0x16b   : > { %v2336_v41 = vpop.eup %2335  ;;  %v1555_v42 = vsel %vm1552_vm12, %v1554_v37, %v1550_v39  ;;  %v1380_v43 = vpop.f32.mrf.mxu2  ;;  %1413 = vst [vmem:[%s2895_s23 + $0x18] sm:$0xff] %v2986_v7  ;;  %v2180_v51 = vmul.f32 -1.442695, %v2986_v7  ;;  %v1429_v18 = vadd.f32 %v1421_v30, %v2986_v7 }
 0x16c   : > { %v2338_v46 = vpop.eup %2337  ;;  %v1606_v47 = vmul.f32 %v1555_v42, %v1446_v38  ;;  %v1573_v49 = vmul.f32 %v2336_v41, %v2970_v14  ;;  %2339 = vpow2.f32 %v2182_v45  ;;  %v1381_v56 = vadd.f32 %v1380_v43, %v1362_v50  ;;  %v1399_v58 = vpop.f32.mrf.mxu3  ;;  %1657 = vst [vmem:[%s1639_s18 + $0x20] sm:$0xff] (%p2448_p5), %v1656_v13 }
 0x16d   : > { %v1475_v53 = vadd.f32 1.0, %v2338_v46  ;;  %2341 = vpow2.f32 %v2180_v51  ;;  %vm1578_vm13 = vweird.f32 %v2336_v41  ;;  %v1439_v46 = vld [vmem:[%s2932_s29 + $0x28] sm:$0xff]  ;;  %1665 = vst [vmem:[%s1639_s18 + $0x60] sm:$0xff] (%p2448_p5), %v1664_v25 }
 0x16e   : > { %v1614_v54 = vmax.f32 %v1606_v47, 0.0  ;;  %v1574_v55 = vsub.f32 1.0, %v1573_v49  ;;  %v1400_v40 = vadd.f32 %v1399_v58, %v1381_v56  ;;  %vm1579_vm15 = vmor %vm1577_vm14, %vm1578_vm13  ;;  %v1447_v51 = vmul.f32 %v1439_v46, %v1431_v34 }
 0x16f   : > { %2343 = vrcp.f32 %v1475_v53  ;;  %v1508_v14 = vand.u32 2147483648, %v1475_v53  ;;  %v1506_v8 = vand.u32 2147483647, %v1475_v53  ;;  %vm1502_vm2 = vweird.f32 %v1475_v53 }
 0x170   : > { %1622 = vst [vmem:[%s2959_s14 + $0x20] sm:$0xff] %v1614_v54  ;;  %v1575_v59 = vmul.f32 %v2336_v41, %v1574_v55  ;;  %v3003_v63 = vmax.f32 %v1400_v40, 0.0  ;;  %v1445_v56 = vmul.f32 %v1437_v48, %v1429_v18 }
 0x171   : > { %v1509_v20 = vor.u32 1.1754944e-38, %v1508_v14  ;;  %vm1507_vm4 = vcmp.eq.f32.partialorder %v1506_v8, 8.507059e+37  ;;  %v1662_v8 = vld [vmem:[%s2895_s23 + $0x28] sm:$0xff] (%p2448_p5) }
 0x172   : > { %v1576_v61 = vadd.f32 %v2336_v41, %v1575_v59  ;;  %v2340_v1 = vpop.eup %2339  ;;  %1417 = vst [vmem:[%s2895_s23 + $0x38] sm:$0xff] %v3003_v63  ;;  %v2184_v22 = vmul.f32 -1.442695, %v3003_v63  ;;  %v1658_v14 = vld [vmem:[%s2895_s23 + $0x18] sm:$0xff] (%p2448_p5) }
 0x173   : > { %v2342_v2 = vpop.eup %2341  ;;  %v3005_v4 = vadd.f32 1.0, %v2340_v1  ;;  %v1425_v1 = vld [vmem:[%s2922_s21 + $0x38] sm:$0xff]  ;;  %1659 = vst [vmem:[%s1639_s18 + $0x28] sm:$0xff] (%p2448_p5), %v1658_v14 }
 0x174   : > { %v1580_v3 = vsel %vm1579_vm15, %v2336_v41, %v1576_v61  ;;  %v3009_v10 = vadd.f32 1.0, %v2342_v2  ;;  %1663 = vst [vmem:[%s1639_s18 + $0x48] sm:$0xff] (%p2448_p5), %v1662_v8 }
 0x175   : > { %v2344_v5 = vpop.eup %2343  ;;  %v1585_v6 = vsel %vm1582_vm0, %v1584_v35, %v1580_v3  ;;  %2345 = vrcp.f32 %v3005_v4  ;;  %v1566_v37 = vand.u32 2147483647, %v3005_v4  ;;  %v1568_v38 = vand.u32 2147483648, %v3005_v4 }
 0x176   : > { %v1608_v12 = vmul.f32 %v1585_v6, %v1448_v0  ;;  %v1498_v19 = vmul.f32 %v2344_v5, %v1475_v53  ;;  %2347 = vrcp.f32 %v3009_v10  ;;  %vm1503_vm1 = vweird.f32 %v2344_v5 }
 0x177   : > { %2349 = vpow2.f32 %v2184_v22  ;;  %vm1504_vm3 = vmor %vm1502_vm2, %vm1503_vm1  ;;  %v1538_v42 = vand.u32 2147483648, %v3009_v10  ;;  %v1536_v7 = vand.u32 2147483647, %v3009_v10  ;;  %vm1562_vm7 = vweird.f32 %v3005_v4 }
 0x178   : > { %v1616_v23 = vmax.f32 %v1608_v12, 0.0  ;;  %v1499_v9 = vsub.f32 1.0, %v1498_v19  ;;  %v1569_v49 = vor.u32 1.1754944e-38, %v1568_v38  ;;  %vm1532_vm9 = vweird.f32 %v3009_v10 }
 0x179   : > { %vm1567_vm10 = vcmp.eq.f32.partialorder %v1566_v37, 8.507059e+37  ;;  %v1539_v54 = vor.u32 1.1754944e-38, %v1538_v42  ;;  %vm1537_vm12 = vcmp.eq.f32.partialorder %v1536_v7, 8.507059e+37  ;;  %v1433_v0 = vadd.f32 %v1425_v1, %v3003_v63  ;;  %v1652_v63 = vld [vmem:[%s2895_s23] sm:$0xff] (%p2448_p5) }
 0x17a   : > { %1624 = vst [vmem:[%s2959_s14 + $0x30] sm:$0xff] %v1616_v23  ;;  %v1500_v24 = vmul.f32 %v2344_v5, %v1499_v9  ;;  %v1654_v9 = vld [vmem:[%s2895_s23 + $0x8] sm:$0xff] (%p2448_p5) }
 0x17b   : > { %v2346_v26 = vpop.eup %2345  ;;  %1653 = vst [vmem:[%s1639_s18] sm:$0xff] (%p2448_p5), %v1652_v63 }
 0x17c   : > { %v1501_v27 = vadd.f32 %v2344_v5, %v1500_v24  ;;  %v2348_v28 = vpop.eup %2347  ;;  %v1558_v31 = vmul.f32 %v2346_v26, %v3005_v4  ;;  %vm1563_vm5 = vweird.f32 %v2346_v26  ;;  %1655 = vst [vmem:[%s1639_s18 + $0x8] sm:$0xff] (%p2448_p5), %v1654_v9  ;;  %v1660_v24 = vld [vmem:[%s2895_s23 + $0x20] sm:$0xff] (%p2448_p5) }
 0x17d   : > { %v1528_v11 = vmul.f32 %v2348_v28, %v3009_v10  ;;  %v2350_v21 = vpop.eup %2349  ;;  %vm1533_vm6 = vweird.f32 %v2348_v28  ;;  %vm1564_vm8 = vmor %vm1562_vm7, %vm1563_vm5  ;;  %1661 = vst [vmem:[%s1639_s18 + $0x40] sm:$0xff] (%p2448_p5), %v1660_v24 }
 0x17e   : > { %v1505_v16 = vsel %vm1504_vm3, %v2344_v5, %v1501_v27  ;;  %v1559_v15 = vsub.f32 1.0, %v1558_v31  ;;  %v1481_v45 = vadd.f32 1.0, %v2350_v21  ;;  %vm1534_vm11 = vmor %vm1532_vm9, %vm1533_vm6  ;;  %v1441_v5 = vld [vmem:[%s2932_s29 + $0x38] sm:$0xff] }
 0x17f   : > { %v1510_v33 = vsel %vm1507_vm4, %v1509_v20, %v1505_v16  ;;  %v1529_v39 = vsub.f32 1.0, %v1528_v11  ;;  %v1449_v12 = vmul.f32 %v1441_v5, %v1433_v0 }
 0x180   : > { %v1603_v36 = vmul.f32 %v1510_v33, %v1443_v32  ;;  %v1560_v41 = vmul.f32 %v2346_v26, %v1559_v15  ;;  %2351 = vrcp.f32 %v1481_v45  ;;  %v1598_v2 = vand.u32 2147483648, %v1481_v45 }
 0x181   : > { %v1530_v62 = vmul.f32 %v2348_v28, %v1529_v39  ;;  %v1596_v4 = vand.u32 2147483647, %v1481_v45  ;;  %vm1592_vm14 = vweird.f32 %v1481_v45 }
 0x182   : > { %v1611_v43 = vmax.f32 %v1603_v36, 0.0  ;;  %v1561_v47 = vadd.f32 %v2346_v26, %v1560_v41  ;;  %v1599_v10 = vor.u32 1.1754944e-38, %v1598_v2 }
 0x183   : > { %v1531_v50 = vadd.f32 %v2348_v28, %v1530_v62  ;;  %vm1597_vm0 = vcmp.eq.f32.partialorder %v1596_v4, 8.507059e+37 }
 0x184   : > { %1619 = vst [vmem:[%s2959_s14 + $0x8] sm:$0xff] %v1611_v43  ;;  %v1565_v53 = vsel %vm1564_vm8, %v2346_v26, %v1561_v47  ;;  %v1666_v26 = vld [vmem:[%s2895_s23 + $0x38] sm:$0xff] (%p2448_p5) }
 0x185   : > { %v1570_v55 = vsel %vm1567_vm10, %v1569_v49, %v1565_v53  ;;  %v1535_v44 = vsel %vm1534_vm11, %v2348_v28, %v1531_v50  ;;  %1667 = vst [vmem:[%s1639_s18 + $0x68] sm:$0xff] (%p2448_p5), %v1666_v26 }
 0x186   : > { %v1607_v57 = vmul.f32 %v1570_v55, %v1447_v51  ;;  %v1540_v58 = vsel %vm1537_vm12, %v1539_v54, %v1535_v44  ;;  %v2352_v52 = vpop.eup %2351 }
 0x187   : > { %v1605_v59 = vmul.f32 %v1540_v58, %v1445_v56  ;;  %v1588_v61 = vmul.f32 %v2352_v52, %v1481_v45  ;;  %vm1593_vm13 = vweird.f32 %v2352_v52 }
 0x188   : > { %v1615_v40 = vmax.f32 %v1607_v57, 0.0  ;;  %vm1594_vm15 = vmor %vm1592_vm14, %vm1593_vm13 }
 0x189   : > { %v1613_v60 = vmax.f32 %v1605_v59, 0.0  ;;  %v1589_v35 = vsub.f32 1.0, %v1588_v61 }
 0x18a   : > { %1623 = vst [vmem:[%s2959_s14 + $0x28] sm:$0xff] %v1615_v40 }
 0x18b   : > { %1621 = vst [vmem:[%s2959_s14 + $0x18] sm:$0xff] %v1613_v60  ;;  %v1590_v3 = vmul.f32 %v2352_v52, %v1589_v35 }
 0x18d   : > { %v1591_v6 = vadd.f32 %v2352_v52, %v1590_v3 }
 0x18f   : > { %v1595_v17 = vsel %vm1594_vm15, %v2352_v52, %v1591_v6 }
 0x190   : > { %v1600_v19 = vsel %vm1597_vm0, %v1599_v10, %v1595_v17 }
 0x191   : > { %v1609_v22 = vmul.f32 %v1600_v19, %v1449_v12  ;;  %1636 = sbr.rel (!%p2448_p5) target bundleno = 406 (0x196), region = 128 }
 0x193   : > { %v1617_v23 = vmax.f32 %v1609_v22, 0.0 }
 0x195   : > { %1625 = vst [vmem:[%s2959_s14 + $0x38] sm:$0xff] %v1617_v23 }
 0x196 PF: > { %1673 = sbr.rel (!%p2448_p5) target bundleno = 416 (0x1a0), region = 151  ;;  %s2279_s19 = sshll.u32 (%p2448_p5), %s2429_s24, 4  ;;  %v1689_v27 = vld [vmem:[%s2959_s14] sm:$0xff] (%p2448_p5)  ;;  %v1691_v29 = vld [vmem:[%s2959_s14 + $0x8] sm:$0xff] (%p2448_p5)  ;;  %v1693_v30 = vld [vmem:[%s2959_s14 + $0x10] sm:$0xff] (%p2448_p5) }
 0x197   : > { %s1676_s27 = scalar_lea.vmem (%p2448_p5), %s3083_s6, %s2279_s19  ;;  %v1695_v28 = vld [vmem:[%s2959_s14 + $0x18] sm:$0xff] (%p2448_p5)  ;;  %v1697_v20 = vld [vmem:[%s2959_s14 + $0x20] sm:$0xff] (%p2448_p5)  ;;  %v1699_v31 = vld [vmem:[%s2959_s14 + $0x28] sm:$0xff] (%p2448_p5) }
 0x198   : > { %1690 = vst [vmem:[%s1676_s27] sm:$0xff] (%p2448_p5), %v1689_v27  ;;  %v1701_v32 = vld [vmem:[%s2959_s14 + $0x30] sm:$0xff] (%p2448_p5) }
 0x199   : > { %1692 = vst [vmem:[%s1676_s27 + $0x8] sm:$0xff] (%p2448_p5), %v1691_v29 }
 0x19a   : > { %1694 = vst [vmem:[%s1676_s27 + $0x20] sm:$0xff] (%p2448_p5), %v1693_v30 }
 0x19b   : > { %1696 = vst [vmem:[%s1676_s27 + $0x28] sm:$0xff] %v1695_v28 }
 0x19c   : > { %1698 = vst [vmem:[%s1676_s27 + $0x40] sm:$0xff] %v1697_v20  ;;  %v1703_v16 = vld [vmem:[%s2959_s14 + $0x38] sm:$0xff] }
 0x19d   : > { %1700 = vst [vmem:[%s1676_s27 + $0x48] sm:$0xff] %v1699_v31 }
 0x19e   : > { %1702 = vst [vmem:[%s1676_s27 + $0x60] sm:$0xff] %v1701_v32 }
 0x19f   : > { %1704 = vst [vmem:[%s1676_s27 + $0x68] sm:$0xff] %v1703_v16 }
 0x1a0 PF: > { %p14_p10 = scmp.ge.s32.totalorder %s2432_s25, 4   ;;  %s3086_s21 = smov %s2371_s22 }
 0x1a1   : > { %s3087_s22 = smov %s2442_s28  ;;  %s3088_s23 = smov %s2432_s25 }
 0x1a2   :  { %16 = sbr.rel (!%p14_p10) target bundleno = 2 (0x2), region = 233 }

// kernel: fl2d_forward.59
= control target key start
LH: loop header
LB: loop body
LE: loop exit
PB: predicated region body
PF: predicated region fallthrough
CT: control target
= control target key end

     0   :  { %s202_s12 = smov 127   ;;  %s344_s0 = inlined_call_operand.vmem [shape: f32[2,33,65], index: 0, kind: input, shape index: {}]   ;;  %s345_s1 = inlined_call_operand.hbm [shape: f32[2,32,64], index: 1, kind: output, shape index: {}]  }
   0x1   :  { %v219_v0 = vld [vmem:[%s344_s0 + $0x10] sm:$0xff]  ;;  %v9_v1 = vld [vmem:[%s344_s0] sm:$0xff]  ;;  %v227_v2 = vld [vmem:[%s344_s0 + $0x28] sm:$0xff] }
   0x2   :  { %37 = vrot.lane.b32.xlu1 %v219_v0, %s202_s12  ;;  %33 = vrot.lane.b32.xlu0 %v9_v1, %s202_s12 }
   0x3   :  { %41 = vrot.lane.b32.xlu2 %v227_v2, %s202_s12 }
   0x4   :  { %6 = vsyncpa [#allocation3], 0  ;;  %v12_v3 = vld [vmem:[%s344_s0 + $0x18] sm:$0xff]  ;;  %v240_v4 = vld [vmem:[%s344_s0 + $0x8] sm:$0xff]  ;;  %vm145_vm0 = vcmask 523264   ;;  %s160_s13 = sshll.u32 %s345_s1, 4  ;;  %s161_s13 = int_to_ptr.hbm [resolvable:$true] %s160_s13 }
   0x5   :  { %v245_v5 = vld [vmem:[%s344_s0 + $0x30] sm:$0xff]  ;;  %v255_v6 = vld [vmem:[%s344_s0 + $0x40] sm:$0xff]  ;;  %v15_v7 = vld [vmem:[%s344_s0 + $0x38] sm:$0xff]  ;;  %s204_s14 = smov 128   ;;  %s205_s15 = smov 8  }
   0x6   :  { %v17_v8 = vld [vmem:[%s344_s0 + $0x1] sm:$0xff]  ;;  %v19_v9 = vld [vmem:[%s344_s0 + $0x11] sm:$0xff]  ;;  %v273_v10 = vld [vmem:[%s344_s0 + $0x9] sm:$0xff] }
   0x7   :  { %v20_v11 = vld [vmem:[%s344_s0 + $0x19] sm:$0xff]  ;;  %v285_v12 = vld [vmem:[%s344_s0 + $0x31] sm:$0xff]  ;;  %v290_v13 = vld [vmem:[%s344_s0 + $0x29] sm:$0xff] }
   0x8   :  { %v23_v14 = vld [vmem:[%s344_s0 + $0x39] sm:$0xff]  ;;  %v303_v15 = vld [vmem:[%s344_s0 + $0x41] sm:$0xff]  ;;  %s203_s0 = smov [#allocation2]  }
   0x9   :  { %s158_s10 = sshll.u32 %s203_s0, 4  ;;  %s159_s10 = int_to_ptr.vmem [resolvable:$true] %s158_s10 }
   0xa   :  { %39 = vrot.lane.b32.xlu1 %v12_v3, %s202_s12  ;;  %35 = vrot.lane.b32.xlu0 %v240_v4, %s202_s12 }
   0xb   :  { %43 = vrot.lane.b32.xlu2 %v245_v5, %s202_s12 }
  0x12   :  { %47 = vrot.lane.b32.xlu1 %v255_v6, %s202_s12  ;;  %45 = vrot.lane.b32.xlu0 %v15_v7, %s202_s12 }
  0x13   :  { %73 = vrot.lane.b32.xlu2 %v17_v8, %s202_s12 }
  0x1a   :  { %77 = vrot.lane.b32.xlu1 %v19_v9, %s202_s12  ;;  %75 = vrot.lane.b32.xlu0 %v273_v10, %s202_s12 }
  0x1b   :  { %79 = vrot.lane.b32.xlu2 %v20_v11, %s202_s12 }
  0x22   :  { %83 = vrot.lane.b32.xlu1 %v285_v12, %s202_s12  ;;  %81 = vrot.lane.b32.xlu0 %v290_v13, %s202_s12 }
  0x23   :  { %85 = vrot.lane.b32.xlu2 %v23_v14, %s202_s12 }
  0x2a   :  { %87 = vrot.lane.b32.xlu0 %v303_v15, %s202_s12 }
  0x5d   :  { %v307_v16 = vpop.permute.xlu2 %41 }
  0x65   :  { %v309_v17 = vpop.permute.xlu2 %43 }
  0x6d   :  { %v74_v18 = vpop.permute.xlu2 %73 }
  0x6e   :  { %v97_v19 = vmax.f32 %v17_v8, %v74_v18  ;;  %v121_v20 = vmin.f32 %v17_v8, %v74_v18 }
  0x74   :  { %v38_v21 = vpop.permute.xlu1 %37  ;;  %v34_v22 = vpop.permute.xlu0 %33 }
  0x75   :  { %v57_v23 = vmax.f32 %v9_v1, %v34_v22  ;;  %v113_v24 = vmin.f32 %v9_v1, %v34_v22  ;;  %v80_v25 = vpop.permute.xlu2 %79  ;;  %v59_v48 = vmax.f32 %v219_v0, %v38_v21  ;;  %v115_v49 = vmin.f32 %v219_v0, %v38_v21 }
  0x76   :  { %v100_v29 = vmax.f32 %v20_v11, %v80_v25  ;;  %v124_v30 = vmin.f32 %v20_v11, %v80_v25  ;;  %v61_v0 = vmax.f32 %v227_v2, %v307_v16  ;;  %v117_v1 = vmin.f32 %v227_v2, %v307_v16 }
  0x77   :  { %v105_v26 = vmax.f32 %v57_v23, %v97_v19  ;;  %v129_v27 = vmin.f32 %v113_v24, %v121_v20 }
  0x79   :  { %v137_v28 = vsub.f32 %v105_v26, %v129_v27 }
  0x7b   :  { %146 = vst.msk [vmem:[#allocation2] sm:$0xff] %vm145_vm0, %v137_v28 }
  0x7c   :  { %v40_v31 = vpop.permute.xlu1 %39  ;;  %v36_v32 = vpop.permute.xlu0 %35 }
  0x7d   :  { %v60_v33 = vmax.f32 %v12_v3, %v40_v31  ;;  %v116_v34 = vmin.f32 %v12_v3, %v40_v31  ;;  %v86_v37 = vpop.permute.xlu2 %85  ;;  %v58_v50 = vmax.f32 %v240_v4, %v36_v32  ;;  %v114_v51 = vmin.f32 %v240_v4, %v36_v32 }
  0x7e   :  { %v103_v39 = vmax.f32 %v23_v14, %v86_v37  ;;  %v127_v40 = vmin.f32 %v23_v14, %v86_v37  ;;  %v62_v3 = vmax.f32 %v245_v5, %v309_v17  ;;  %v118_v4 = vmin.f32 %v245_v5, %v309_v17 }
  0x7f   :  { %v108_v35 = vmax.f32 %v60_v33, %v100_v29  ;;  %v132_v36 = vmin.f32 %v116_v34, %v124_v30 }
  0x81   :  { %v140_v38 = vsub.f32 %v108_v35, %v132_v36 }
  0x83   :  { %149 = vst.msk [vmem:[#allocation2 + $0x18] sm:$0xff] %vm145_vm0, %v140_v38 }
  0x84   :  { %v48_v41 = vpop.permute.xlu1 %47  ;;  %v46_v42 = vpop.permute.xlu0 %45 }
  0x85   :  { %v63_v43 = vmax.f32 %v15_v7, %v46_v42  ;;  %v119_v44 = vmin.f32 %v15_v7, %v46_v42  ;;  %v64_v17 = vmax.f32 %v255_v6, %v48_v41  ;;  %v120_v22 = vmin.f32 %v255_v6, %v48_v41 }
  0x87   :  { %v111_v45 = vmax.f32 %v63_v43, %v103_v39  ;;  %v135_v46 = vmin.f32 %v119_v44, %v127_v40 }
  0x89   :  { %v143_v47 = vsub.f32 %v111_v45, %v135_v46 }
  0x8b   :  { %152 = vst.msk [vmem:[#allocation2 + $0x30] sm:$0xff] %vm145_vm0, %v143_v47 }
  0x8c   :  { %v78_v52 = vpop.permute.xlu1 %77  ;;  %v76_v53 = vpop.permute.xlu0 %75 }
  0x8d   :  { %v99_v54 = vmax.f32 %v19_v9, %v78_v52  ;;  %v123_v55 = vmin.f32 %v19_v9, %v78_v52  ;;  %v98_v56 = vmax.f32 %v273_v10, %v76_v53  ;;  %v122_v57 = vmin.f32 %v273_v10, %v76_v53 }
  0x8f   :  { %v107_v58 = vmax.f32 %v59_v48, %v99_v54  ;;  %v131_v59 = vmin.f32 %v115_v49, %v123_v55  ;;  %v106_v60 = vmax.f32 %v58_v50, %v98_v56  ;;  %v130_v61 = vmin.f32 %v114_v51, %v122_v57 }
  0x91   :  { %v139_v62 = vsub.f32 %v107_v58, %v131_v59  ;;  %v138_v63 = vsub.f32 %v106_v60, %v130_v61 }
  0x93   :  { %148 = vst.msk [vmem:[#allocation2 + $0x10] sm:$0xff] %vm145_vm0, %v139_v62 }
  0x94   :  { %147 = vst.msk [vmem:[#allocation2 + $0x8] sm:$0xff] %vm145_vm0, %v138_v63  ;;  %v84_v7 = vpop.permute.xlu1 %83  ;;  %v82_v8 = vpop.permute.xlu0 %81 }
  0x95   :  { %v102_v9 = vmax.f32 %v285_v12, %v84_v7  ;;  %v126_v10 = vmin.f32 %v285_v12, %v84_v7  ;;  %v101_v11 = vmax.f32 %v290_v13, %v82_v8  ;;  %v125_v14 = vmin.f32 %v290_v13, %v82_v8 }
  0x97   :  { %v110_v18 = vmax.f32 %v62_v3, %v102_v9  ;;  %v134_v2 = vmin.f32 %v118_v4, %v126_v10  ;;  %v109_v16 = vmax.f32 %v61_v0, %v101_v11  ;;  %v133_v19 = vmin.f32 %v117_v1, %v125_v14 }
  0x99   :  { %v142_v20 = vsub.f32 %v110_v18, %v134_v2  ;;  %v141_v21 = vsub.f32 %v109_v16, %v133_v19 }
  0x9b   :  { %151 = vst.msk [vmem:[#allocation2 + $0x28] sm:$0xff] %vm145_vm0, %v142_v20 }
  0x9c   :  { %150 = vst.msk [vmem:[#allocation2 + $0x20] sm:$0xff] %vm145_vm0, %v141_v21  ;;  %v88_v5 = vpop.permute.xlu0 %87 }
  0x9d   :  { %v104_v12 = vmax.f32 %v303_v15, %v88_v5  ;;  %v128_v23 = vmin.f32 %v303_v15, %v88_v5 }
  0x9f   :  { %v112_v13 = vmax.f32 %v64_v17, %v104_v12  ;;  %v136_v24 = vmin.f32 %v120_v22, %v128_v23 }
  0xa1   :  { %v144_v25 = vsub.f32 %v112_v13, %v136_v24 }
  0xa3   :  { %153 = vst.msk [vmem:[#allocation2 + $0x38] sm:$0xff] %vm145_vm0, %v144_v25 }
  0xa4   :  { %166 = dma.vmem_to_hbm [thread:$0]  %s159_s10, 1024, %s161_s13, [#allocation3], %s204_s14, %s204_s14, %s205_s15  }
  0xa5   :  { %200 = dma.done.wait [#allocation3], 1024  }
  0xa6   :  { %201 = vsyncadd [#allocation3], 4294966272 }
  0xa7   :  { %171 = vsyncpa [#allocation3], 1 }

</bundles_post_ra>
